<compile_context>
chip_gen: v7x
topology: tpu7x:2x2x1
jax: 0.10.0
libtpu: 0.0.40
codegen_flags: <defaults>
</compile_context>

<pallas_src>
import functools

import jax
import jax.numpy as jnp
from jax import lax
from jax.experimental import pallas as pl
from jax.experimental.pallas import tpu as pltpu

EPS = 1e-5  # BatchNorm3d default eps


# ----------------------------- Pallas kernels -----------------------------

def gemm_stats_kernel(w_ref, p_ref, y_ref, sum_ref, sq_ref):
    """Transposed GEMM (bf16 in, f32 acc) + fused per-block channel sum / sumsq.
    y is stored bf16; statistics are reduced from the f32 accumulator."""
    y = jnp.dot(w_ref[...], p_ref[...], preferred_element_type=jnp.float32)
    y_ref[...] = y.astype(y_ref.dtype)                        # (Cout, tile_m) lane-dense bf16
    cout = y.shape[0]
    sum_ref[...] = jnp.sum(y, axis=1, keepdims=True).reshape(1, cout, 1)
    sq_ref[...] = jnp.sum(y * y, axis=1, keepdims=True).reshape(1, cout, 1)


def gemm_kernel(w_ref, p_ref, y_ref):
    """Plain transposed GEMM (final `prob` conv: no BN, no ReLU, no bias) -> f32."""
    y_ref[...] = jnp.dot(w_ref[...], p_ref[...], preferred_element_type=jnp.float32)


def bn_relu_kernel(y_ref, scale_ref, shift_ref, o_ref):
    """BatchNorm (precomputed f32 scale/shift) + ReLU; bf16 in, bf16 out."""
    y = y_ref[...].astype(jnp.float32)
    o_ref[...] = jnp.maximum(y * scale_ref[...] + shift_ref[...], 0.0).astype(o_ref.dtype)


def bn_relu_add_kernel(y_ref, scale_ref, shift_ref, r_ref, o_ref):
    """BatchNorm + ReLU fused with the U-Net skip addition; bf16 in, bf16 out."""
    y = y_ref[...].astype(jnp.float32)
    act = jnp.maximum(y * scale_ref[...] + shift_ref[...], 0.0)
    o_ref[...] = (r_ref[...].astype(jnp.float32) + act).astype(o_ref.dtype)


# ----------------------------- glue helpers -----------------------------

def _round_up(x, m):
    return (x + m - 1) // m * m


def _pick_tile(mp, target):
    """mp is a multiple of 128; return the largest 128-multiple <= target dividing mp."""
    q = mp // 128
    kmax = max(1, min(q, target // 128))
    for k in range(kmax, 0, -1):
        if q % k == 0:
            return 128 * k
    return 128


def _im2col_k3(ap, od, oh, ow, stride):
    """ap: pre-padded [C, N, Dp, Hp, Wp] (bf16). Returns patches [C*27, N*od*oh*ow]."""
    c, n = ap.shape[0], ap.shape[1]
    taps = []
    for kd in range(3):
        for kh in range(3):
            for kw in range(3):
                taps.append(
                    ap[:, :,
                       kd:kd + (od - 1) * stride + 1:stride,
                       kh:kh + (oh - 1) * stride + 1:stride,
                       kw:kw + (ow - 1) * stride + 1:stride])
    p = jnp.stack(taps, axis=1)                               # [C, 27, N, od, oh, ow]
    return p.reshape(c * 27, n * od * oh * ow)


def _gemm(w_mat, patches, tile_m, with_stats):
    cout, k = w_mat.shape
    mp = patches.shape[1]
    grid_m = mp // tile_m
    parallel = pltpu.CompilerParams(dimension_semantics=("parallel",))
    w_spec = pl.BlockSpec((cout, k), lambda i: (0, 0))
    p_spec = pl.BlockSpec((k, tile_m), lambda i: (0, i))
    y_spec = pl.BlockSpec((cout, tile_m), lambda i: (0, i))
    if with_stats:
        return pl.pallas_call(
            gemm_stats_kernel,
            out_shape=(jax.ShapeDtypeStruct((cout, mp), jnp.bfloat16),
                       jax.ShapeDtypeStruct((grid_m, cout, 1), jnp.float32),
                       jax.ShapeDtypeStruct((grid_m, cout, 1), jnp.float32)),
            grid=(grid_m,),
            in_specs=[w_spec, p_spec],
            out_specs=(y_spec,
                       pl.BlockSpec((1, cout, 1), lambda i: (i, 0, 0)),
                       pl.BlockSpec((1, cout, 1), lambda i: (i, 0, 0))),
            compiler_params=parallel,
        )(w_mat, patches)
    return pl.pallas_call(
        gemm_kernel,
        out_shape=jax.ShapeDtypeStruct((cout, mp), jnp.float32),
        grid=(grid_m,),
        in_specs=[w_spec, p_spec],
        out_specs=y_spec,
        compiler_params=parallel,
    )(w_mat, patches)


def _bn_relu(y, scale, shift, residual, tile_m):
    cout, mp = y.shape
    grid_m = mp // tile_m
    parallel = pltpu.CompilerParams(dimension_semantics=("parallel",))
    chan_spec = pl.BlockSpec((cout, 1), lambda i: (0, 0))
    tile_spec = pl.BlockSpec((cout, tile_m), lambda i: (0, i))
    out_shape = jax.ShapeDtypeStruct((cout, mp), jnp.bfloat16)
    if residual is None:
        return pl.pallas_call(
            bn_relu_kernel, out_shape=out_shape, grid=(grid_m,),
            in_specs=[tile_spec, chan_spec, chan_spec], out_specs=tile_spec,
            compiler_params=parallel,
        )(y, scale, shift)
    return pl.pallas_call(
        bn_relu_add_kernel, out_shape=out_shape, grid=(grid_m,),
        in_specs=[tile_spec, chan_spec, chan_spec, tile_spec], out_specs=tile_spec,
        compiler_params=parallel,
    )(y, scale, shift, residual)


def _scale_shift(ssum, ssq, m, gamma, beta):
    """Training-mode BN: fold batch mean/var into a per-channel FMA."""
    mean = ssum / m
    var = jnp.maximum(ssq / m - mean * mean, 0.0)   # clamp against f32 cancellation
    inv = lax.rsqrt(var + EPS)
    scale = (gamma * inv).reshape(-1, 1)
    shift = (beta - mean * gamma * inv).reshape(-1, 1)
    return scale, shift


# ----------------------------- layer implementations -----------------------------

def conv3d_bn_relu(a, w, gamma, beta, *, stride, tile_m):
    """Conv3d(k=3, pad=1, stride in {1,2}, bias=False) + BatchNorm3d(train) + ReLU.
    a: [Cin, N, D, H, W] bf16 (channel-major), w: [Cout, Cin, 3, 3, 3] f32. Returns bf16."""
    _, n, d, h, wd = a.shape
    cout = w.shape[0]
    od, oh, ow = [(sz + 2 - 3) // stride + 1 for sz in (d, h, wd)]
    m = n * od * oh * ow

    ap = jnp.pad(a, ((0, 0), (0, 0), (1, 1), (1, 1), (1, 1)))
    patches = _im2col_k3(ap, od, oh, ow, stride)
    w_mat = w.reshape(cout, -1).astype(jnp.bfloat16)

    mp = _round_up(m, 128)
    tm = _pick_tile(mp, tile_m)
    if mp != m:
        patches = jnp.pad(patches, ((0, 0), (0, mp - m)))     # zero cols: stats-neutral

    y, psum, psq = _gemm(w_mat, patches, tm, with_stats=True)
    scale, shift = _scale_shift(jnp.sum(psum[:, :, 0], axis=0),
                                jnp.sum(psq[:, :, 0], axis=0), m, gamma, beta)
    out = _bn_relu(y, scale, shift, None, tm)
    return out[:, :m].reshape(cout, n, od, oh, ow)


def _deconv_axis_taps(parity):
    # ConvTranspose (k=3, s=2, p=1, op=1):  even output o=2m -> w[1]*x[m]
    #                                       odd  output o=2m+1 -> w[0]*x[m+1] + w[2]*x[m]
    # Each tap = (input_offset, kernel_index).
    return ((0, 1),) if parity == 0 else ((1, 0), (0, 2))


def deconv3d_bn_relu(a, w, gamma, beta, *, tile_m, residual):
    """ConvTranspose3d(k=3, s=2, p=1, output_pad=1, bias=False) + BN(train) + ReLU + skip add,
    via the stride-2 sub-pixel phase decomposition (no zero-dilated input is materialized).
    a: [Cin, N, D, H, W] bf16, w: [Cin, Cout, 3, 3, 3] f32 (PyTorch layout), residual bf16."""
    c, n, d, h, wd = a.shape
    cout = w.shape[1]
    od, oh, ow = 2 * d, 2 * h, 2 * wd
    m_phase = n * d * h * wd
    m_out = n * od * oh * ow

    # odd phases read x[m+1] -> pad one zero at the far end of each spatial axis
    ap = jnp.pad(a, ((0, 0), (0, 0), (0, 1), (0, 1), (0, 1)))

    phase_vols = []
    ssum = jnp.zeros((cout,), jnp.float32)
    ssq = jnp.zeros((cout,), jnp.float32)
    for pd in (0, 1):
        for ph in (0, 1):
            for pw in (0, 1):
                combos = [(td, th, tw)
                          for td in _deconv_axis_taps(pd)
                          for th in _deconv_axis_taps(ph)
                          for tw in _deconv_axis_taps(pw)]
                ntap = len(combos)
                patches = jnp.stack(
                    [ap[:, :, td[0]:td[0] + d, th[0]:th[0] + h, tw[0]:tw[0] + wd]
                     for (td, th, tw) in combos], axis=1).reshape(c * ntap, m_phase)
                w_mat = jnp.stack(
                    [w[:, :, td[1], th[1], tw[1]] for (td, th, tw) in combos],
                    axis=-1).transpose(1, 0, 2).reshape(cout, c * ntap).astype(jnp.bfloat16)

                mp = _round_up(m_phase, 128)
                tm = _pick_tile(mp, tile_m)
                if mp != m_phase:
                    patches = jnp.pad(patches, ((0, 0), (0, mp - m_phase)))
                y, psum, psq = _gemm(w_mat, patches, tm, with_stats=True)
                ssum = ssum + jnp.sum(psum[:, :, 0], axis=0)
                ssq = ssq + jnp.sum(psq[:, :, 0], axis=0)
                phase_vols.append(y[:, :m_phase].reshape(cout, n, d, h, wd))

    # interleave the 8 phase outputs with a single stack+transpose (no strided scatters)
    yv = jnp.stack(phase_vols, axis=0).reshape(2, 2, 2, cout, n, d, h, wd)
    yv = yv.transpose(3, 4, 5, 0, 6, 1, 7, 2).reshape(cout, n, od, oh, ow)

    scale, shift = _scale_shift(ssum, ssq, m_out, gamma, beta)

    mp = _round_up(m_out, 128)
    tm = _pick_tile(mp, tile_m)
    yf = yv.reshape(cout, m_out)
    rf = residual.reshape(cout, m_out)
    if mp != m_out:
        yf = jnp.pad(yf, ((0, 0), (0, mp - m_out)))
        rf = jnp.pad(rf, ((0, 0), (0, mp - m_out)))
    out = _bn_relu(yf, scale, shift, rf, tm)
    return out[:, :m_out].reshape(cout, n, od, oh, ow)


def conv3d_plain(a, w, *, tile_m):
    """Final `prob` layer: Conv3d(k=3, s=1, pad=1, bias=False), no BN, no ReLU -> f32."""
    _, n, d, h, wd = a.shape
    cout = w.shape[0]
    m = n * d * h * wd
    ap = jnp.pad(a, ((0, 0), (0, 0), (1, 1), (1, 1), (1, 1)))
    patches = _im2col_k3(ap, d, h, wd, 1)
    cpad = _round_up(cout, 8)                                 # keep f32 output sublane-aligned
    w_mat = jnp.pad(w.reshape(cout, -1), ((0, cpad - cout), (0, 0))).astype(jnp.bfloat16)
    mp = _round_up(m, 128)
    tm = _pick_tile(mp, tile_m)
    if mp != m:
        patches = jnp.pad(patches, ((0, 0), (0, mp - m)))
    y = _gemm(w_mat, patches, tm, with_stats=False)
    return y[:cout, :m].reshape(cout, n, d, h, wd)


# ----------------------------- full network forward -----------------------------

@functools.partial(jax.jit, static_argnames=("tile_m",))
def costregnet_small_forward(x, params, tile_m=2048):
    """x: [N, Cin, D, H, W] (NCDHW, PyTorch layout). Returns [N, 1, D, H, W] f32."""
    a = jnp.transpose(x, (1, 0, 2, 3, 4)).astype(jnp.bfloat16)   # channel-major bf16

    c0 = conv3d_bn_relu(a, params["w0"], params["g0"], params["b0"], stride=1, tile_m=tile_m)
    c1 = conv3d_bn_relu(c0, params["w1"], params["g1"], params["b1"], stride=1, tile_m=tile_m)
    c2 = conv3d_bn_relu(c1, params["w2"], params["g2"], params["b2"], stride=2, tile_m=tile_m)
    c3 = conv3d_bn_relu(c2, params["w3"], params["g3"], params["b3"], stride=1, tile_m=tile_m)
    c4 = conv3d_bn_relu(c3, params["w4"], params["g4"], params["b4"], stride=2, tile_m=tile_m)
    c5 = conv3d_bn_relu(c4, params["w5"], params["g5"], params["b5"], stride=1, tile_m=tile_m)
    d6 = deconv3d_bn_relu(c5, params["w6"], params["g6"], params["b6"],
                          tile_m=tile_m, residual=c3)             # conv3 + conv6(x)
    d7 = deconv3d_bn_relu(d6, params["w7"], params["g7"], params["b7"],
                          tile_m=tile_m, residual=c1)             # conv1 + conv7(x)
    pr = conv3d_plain(d7, params["w_prob"], tile_m=tile_m)        # [1, N, D, H, W] f32
    return jnp.transpose(pr, (1, 0, 2, 3, 4))                     # NCDHW


# ----------------------------- pure-JAX reference (f32 math, bf16 rounding points) -----------

def _q(x):
    """Round through bf16 (matches the kernel's quantization points) but stay f32."""
    return x.astype(jnp.bfloat16).astype(jnp.float32)


def _ref_conv(x, w, stride):
    return lax.conv_general_dilated(
        _q(x), _q(w), window_strides=(stride,) * 3, padding=[(1, 1)] * 3,
        dimension_numbers=("NCDHW", "OIDHW", "NCDHW"))


def _ref_bn_relu(y, gamma, beta, residual=None):
    mean = y.mean(axis=(0, 2, 3, 4), keepdims=True)
    var = y.var(axis=(0, 2, 3, 4), keepdims=True)                 # biased, like PyTorch BN
    inv = lax.rsqrt(var + EPS)
    g = gamma.reshape(1, -1, 1, 1, 1)
    b = beta.reshape(1, -1, 1, 1, 1)
    out = jnp.maximum(_q(y) * (g * inv) + (b - mean * g * inv), 0.0)
    if residual is not None:
        out = out + residual
    return _q(out)


def _ref_deconv(x, w):
    """Scatter formulation of ConvTranspose3d(k=3, s=2, p=1, op=1), f32 math."""
    n, ci, d, h, wd = x.shape
    co = w.shape[1]
    xq, wq = _q(x), _q(w)
    y = jnp.zeros((n, co, 2 * d + 1, 2 * h + 1, 2 * wd + 1), jnp.float32)
    for kd in range(3):
        for kh in range(3):
            for kw in range(3):
                contrib = jnp.einsum("ncdhw,co->nodhw", xq, wq[:, :, kd, kh, kw])
                y = y.at[:, :,
                         kd:kd + 2 * d - 1:2,
                         kh:kh + 2 * h - 1:2,
                         kw:kw + 2 * wd - 1:2].add(contrib)
    return y[:, :, 1:1 + 2 * d, 1:1 + 2 * h, 1:1 + 2 * wd]


def reference_forward(x, p):
    c0 = _ref_bn_relu(_ref_conv(x, p["w0"], 1), p["g0"], p["b0"])
    c1 = _ref_bn_relu(_ref_conv(c0, p["w1"], 1), p["g1"], p["b1"])
    c2 = _ref_bn_relu(_ref_conv(c1, p["w2"], 2), p["g2"], p["b2"])
    c3 = _ref_bn_relu(_ref_conv(c2, p["w3"], 1), p["g3"], p["b3"])
    c4 = _ref_bn_relu(_ref_conv(c3, p["w4"], 2), p["g4"], p["b4"])
    c5 = _ref_bn_relu(_ref_conv(c4, p["w5"], 1), p["g5"], p["b5"])
    d6 = _ref_bn_relu(_ref_deconv(c5, p["w6"]), p["g6"], p["b6"], residual=c3)
    d7 = _ref_bn_relu(_ref_deconv(d6, p["w7"]), p["g7"], p["b7"], residual=c1)
    return _ref_conv(d7, p["w_prob"], 1)


# ----------------------------- deterministic parameters & test -----------------------------

def _init_params(key, cin, base):
    def conv_w(k, co, ci):
        bound = (6.0 / ((ci + co) * 27.0)) ** 0.5
        return jax.random.uniform(k, (co, ci, 3, 3, 3), jnp.float32, -bound, bound)

    def deconv_w(k, ci, co):
        bound = (6.0 / ((ci + co) * 27.0)) ** 0.5
        return jax.random.uniform(k, (ci, co, 3, 3, 3), jnp.float32, -bound, bound)

    def bn(k, c):
        kg, kb = jax.random.split(k)
        return (1.0 + 0.1 * jax.random.normal(kg, (c,), jnp.float32),
                0.1 * jax.random.normal(kb, (c,), jnp.float32))

    keys = jax.random.split(key, 20)
    b, b2, b4 = base, 2 * base, 4 * base
    p = {}
    p["w0"] = conv_w(keys[0], b, cin);    p["g0"], p["b0"] = bn(keys[1], b)
    p["w1"] = conv_w(keys[2], b, b);      p["g1"], p["b1"] = bn(keys[3], b)
    p["w2"] = conv_w(keys[4], b2, b);     p["g2"], p["b2"] = bn(keys[5], b2)
    p["w3"] = conv_w(keys[6], b2, b2);    p["g3"], p["b3"] = bn(keys[7], b2)
    p["w4"] = conv_w(keys[8], b4, b2);    p["g4"], p["b4"] = bn(keys[9], b4)
    p["w5"] = conv_w(keys[10], b4, b4);   p["g5"], p["b5"] = bn(keys[11], b4)
    p["w6"] = deconv_w(keys[12], b4, b2); p["g6"], p["b6"] = bn(keys[13], b2)
    p["w7"] = deconv_w(keys[14], b2, b);  p["g7"], p["b7"] = bn(keys[15], b)
    p["w_prob"] = conv_w(keys[16], 1, b)
    return p


if __name__ == "__main__":
    # Small cost volume: CostRegNet_small(in_channels=4, base_channels=8)
    N, Cin, D, H, W = 2, 4, 8, 16, 16
    base = 8

    key = jax.random.PRNGKey(0)
    kx, kp = jax.random.split(key)
    x = jax.random.normal(kx, (N, Cin, D, H, W), jnp.float32)
    params = _init_params(kp, Cin, base)

    out = jax.block_until_ready(costregnet_small_forward(x, params))
    assert out.shape == (N, 1, D, H, W), out.shape

    ref = jax.block_until_ready(jax.jit(reference_forward)(x, params))
    err = float(jnp.max(jnp.abs(out - ref)))
    assert jnp.allclose(out, ref, atol=2e-2, rtol=2e-2), f"max abs err {err}"

    print("KERNEL_OK")
</pallas_src>

<mosaic_0001>
module attributes {stable_mosaic.version = 11 : i64} {
  func.func @gemm_stats_kernel(%arg0: i32, %arg1: memref<8x108xbf16, #tpu.memory_space<vmem>>, %arg2: memref<108x2048xbf16, #tpu.memory_space<vmem>>, %arg3: memref<8x2048xbf16, #tpu.memory_space<vmem>>, %arg4: memref<1x8x1xf32, #tpu.memory_space<vmem>>, %arg5: memref<1x8x1xf32, #tpu.memory_space<vmem>>) attributes {dimension_semantics = [#tpu.dimension_semantics<parallel>], iteration_bounds = array<i64: 2>, scalar_prefetch = 0 : i64, scratch_operands = 0 : i64, tpu.core_type = #tpu.core_type<tc>, window_params = [{pipeline_mode = #tpu.pipeline_mode<synchronous>, transform_indices = @transform_0, window_bounds = array<i64: 8, 108>}, {transform_indices = @transform_1, window_bounds = array<i64: 108, 2048>}, {transform_indices = @transform_2, window_bounds = array<i64: 8, 2048>}, {transform_indices = @transform_3, window_bounds = array<i64: 1, 8, 1>}, {transform_indices = @transform_4, window_bounds = array<i64: 1, 8, 1>}]} {
    %c0 = arith.constant 0 : index
    %c0_0 = arith.constant 0 : index
    %0 = vector.load %arg1[%c0, %c0_0] : memref<8x108xbf16, #tpu.memory_space<vmem>>, vector<8x108xbf16>
    %c0_1 = arith.constant 0 : index
    %c0_2 = arith.constant 0 : index
    %1 = vector.load %arg2[%c0_1, %c0_2] : memref<108x2048xbf16, #tpu.memory_space<vmem>>, vector<108x2048xbf16>
    %cst = arith.constant dense<0.000000e+00> : vector<8x2048xf32>
    %2 = tpu.matmul %0, %1, %cst {dimension_numbers = #tpu.dot_dimension_numbers<[1], [0], [0], [1], [0, 0, 1, 1], [], []>} : vector<8x108xbf16>, vector<108x2048xbf16>, vector<8x2048xf32> -> vector<8x2048xf32>
    %3 = arith.truncf %2 : vector<8x2048xf32> to vector<8x2048xbf16>
    %c0_3 = arith.constant 0 : index
    %c0_4 = arith.constant 0 : index
    %4 = vector.load %arg3[%c0_3, %c0_4] : memref<8x2048xbf16, #tpu.memory_space<vmem>>, vector<8x2048xbf16>
    tpu.vector_store %arg3[%c0_3, %c0_4], %3 {strides = array<i32>} : memref<8x2048xbf16, #tpu.memory_space<vmem>>, vector<8x2048xbf16>,
    %cst_5 = arith.constant dense<0.000000e+00> : vector<8xf32>
    %5 = vector.multi_reduction <add>, %2, %cst_5 [1] : vector<8x2048xf32> to vector<8xf32>
    %6 = vector.shape_cast %5 : vector<8xf32> to vector<8x1xf32>
    %7 = vector.shape_cast %6 : vector<8x1xf32> to vector<1x8x1xf32>
    %c0_6 = arith.constant 0 : index
    %c0_7 = arith.constant 0 : index
    %c0_8 = arith.constant 0 : index
    %8 = vector.load %arg4[%c0_6, %c0_7, %c0_8] : memref<1x8x1xf32, #tpu.memory_space<vmem>>, vector<1x8x1xf32>
    tpu.vector_store %arg4[%c0_6, %c0_7, %c0_8], %7 {strides = array<i32>} : memref<1x8x1xf32, #tpu.memory_space<vmem>>, vector<1x8x1xf32>,
    %9 = arith.mulf %2, %2 : vector<8x2048xf32>
    %cst_9 = arith.constant dense<0.000000e+00> : vector<8xf32>
    %10 = vector.multi_reduction <add>, %9, %cst_9 [1] : vector<8x2048xf32> to vector<8xf32>
    %11 = vector.shape_cast %10 : vector<8xf32> to vector<8x1xf32>
    %12 = vector.shape_cast %11 : vector<8x1xf32> to vector<1x8x1xf32>
    %c0_10 = arith.constant 0 : index
    %c0_11 = arith.constant 0 : index
    %c0_12 = arith.constant 0 : index
    %13 = vector.load %arg5[%c0_10, %c0_11, %c0_12] : memref<1x8x1xf32, #tpu.memory_space<vmem>>, vector<1x8x1xf32>
    tpu.vector_store %arg5[%c0_10, %c0_11, %c0_12], %12 {strides = array<i32>} : memref<1x8x1xf32, #tpu.memory_space<vmem>>, vector<1x8x1xf32>,
    return
  }
  func.func @transform_0(%arg0: i32) -> (i32, i32) {
    %c0_i32 = arith.constant 0 : i32
    %c0_i32_0 = arith.constant 0 : i32
    %c0_i32_1 = arith.constant 0 : i32
    return %c0_i32, %c0_i32_0 : i32, i32
  }
  func.func @transform_1(%arg0: i32) -> (i32, i32) {
    %c0_i32 = arith.constant 0 : i32
    %c0_i32_0 = arith.constant 0 : i32
    return %c0_i32, %arg0 : i32, i32
  }
  func.func @transform_2(%arg0: i32) -> (i32, i32) {
    %c0_i32 = arith.constant 0 : i32
    %c0_i32_0 = arith.constant 0 : i32
    return %c0_i32, %arg0 : i32, i32
  }
  func.func @transform_3(%arg0: i32) -> (i32, i32, i32) {
    %c0_i32 = arith.constant 0 : i32
    %c0_i32_0 = arith.constant 0 : i32
    %c0_i32_1 = arith.constant 0 : i32
    return %arg0, %c0_i32, %c0_i32_0 : i32, i32, i32
  }
  func.func @transform_4(%arg0: i32) -> (i32, i32, i32) {
    %c0_i32 = arith.constant 0 : i32
    %c0_i32_0 = arith.constant 0 : i32
    %c0_i32_1 = arith.constant 0 : i32
    return %arg0, %c0_i32, %c0_i32_0 : i32, i32, i32
  }
}

module attributes {stable_mosaic.version = 11 : i64} {
  func.func @bn_relu_kernel(%arg0: i32, %arg1: memref<8x2048xbf16, #tpu.memory_space<vmem>>, %arg2: memref<8x1xf32, #tpu.memory_space<vmem>>, %arg3: memref<8x1xf32, #tpu.memory_space<vmem>>, %arg4: memref<8x2048xbf16, #tpu.memory_space<vmem>>) attributes {dimension_semantics = [#tpu.dimension_semantics<parallel>], iteration_bounds = array<i64: 2>, scalar_prefetch = 0 : i64, scratch_operands = 0 : i64, tpu.core_type = #tpu.core_type<tc>, window_params = [{transform_indices = @transform_0, window_bounds = array<i64: 8, 2048>}, {pipeline_mode = #tpu.pipeline_mode<synchronous>, transform_indices = @transform_1, window_bounds = array<i64: 8, 1>}, {pipeline_mode = #tpu.pipeline_mode<synchronous>, transform_indices = @transform_2, window_bounds = array<i64: 8, 1>}, {transform_indices = @transform_3, window_bounds = array<i64: 8, 2048>}]} {
    %c0 = arith.constant 0 : index
    %c0_0 = arith.constant 0 : index
    %0 = vector.load %arg1[%c0, %c0_0] : memref<8x2048xbf16, #tpu.memory_space<vmem>>, vector<8x2048xbf16>
    %1 = arith.extf %0 : vector<8x2048xbf16> to vector<8x2048xf32>
    %c0_1 = arith.constant 0 : index
    %c0_2 = arith.constant 0 : index
    %2 = vector.load %arg2[%c0_1, %c0_2] : memref<8x1xf32, #tpu.memory_space<vmem>>, vector<8x1xf32>
    %3 = vector.broadcast %2 : vector<8x1xf32> to vector<8x2048xf32>
    %4 = arith.mulf %1, %3 : vector<8x2048xf32>
    %c0_3 = arith.constant 0 : index
    %c0_4 = arith.constant 0 : index
    %5 = vector.load %arg3[%c0_3, %c0_4] : memref<8x1xf32, #tpu.memory_space<vmem>>, vector<8x1xf32>
    %6 = vector.broadcast %5 : vector<8x1xf32> to vector<8x2048xf32>
    %7 = arith.addf %4, %6 : vector<8x2048xf32>
    %cst = arith.constant 0.000000e+00 : f32
    %8 = vector.broadcast %cst : f32 to vector<8x2048xf32>
    %9 = arith.maximumf %7, %8 : vector<8x2048xf32>
    %10 = arith.truncf %9 : vector<8x2048xf32> to vector<8x2048xbf16>
    %c0_5 = arith.constant 0 : index
    %c0_6 = arith.constant 0 : index
    %11 = vector.load %arg4[%c0_5, %c0_6] : memref<8x2048xbf16, #tpu.memory_space<vmem>>, vector<8x2048xbf16>
    tpu.vector_store %arg4[%c0_5, %c0_6], %10 {strides = array<i32>} : memref<8x2048xbf16, #tpu.memory_space<vmem>>, vector<8x2048xbf16>,
    return
  }
  func.func @transform_0(%arg0: i32) -> (i32, i32) {
    %c0_i32 = arith.constant 0 : i32
    %c0_i32_0 = arith.constant 0 : i32
    return %c0_i32, %arg0 : i32, i32
  }
  func.func @transform_1(%arg0: i32) -> (i32, i32) {
    %c0_i32 = arith.constant 0 : i32
    %c0_i32_0 = arith.constant 0 : i32
    %c0_i32_1 = arith.constant 0 : i32
    return %c0_i32, %c0_i32_0 : i32, i32
  }
  func.func @transform_2(%arg0: i32) -> (i32, i32) {
    %c0_i32 = arith.constant 0 : i32
    %c0_i32_0 = arith.constant 0 : i32
    %c0_i32_1 = arith.constant 0 : i32
    return %c0_i32, %c0_i32_0 : i32, i32
  }
  func.func @transform_3(%arg0: i32) -> (i32, i32) {
    %c0_i32 = arith.constant 0 : i32
    %c0_i32_0 = arith.constant 0 : i32
    return %c0_i32, %arg0 : i32, i32
  }
}

module attributes {stable_mosaic.version = 11 : i64} {
  func.func @gemm_stats_kernel(%arg0: i32, %arg1: memref<8x216xbf16, #tpu.memory_space<vmem>>, %arg2: memref<216x2048xbf16, #tpu.memory_space<vmem>>, %arg3: memref<8x2048xbf16, #tpu.memory_space<vmem>>, %arg4: memref<1x8x1xf32, #tpu.memory_space<vmem>>, %arg5: memref<1x8x1xf32, #tpu.memory_space<vmem>>) attributes {dimension_semantics = [#tpu.dimension_semantics<parallel>], iteration_bounds = array<i64: 2>, scalar_prefetch = 0 : i64, scratch_operands = 0 : i64, tpu.core_type = #tpu.core_type<tc>, window_params = [{pipeline_mode = #tpu.pipeline_mode<synchronous>, transform_indices = @transform_0, window_bounds = array<i64: 8, 216>}, {transform_indices = @transform_1, window_bounds = array<i64: 216, 2048>}, {transform_indices = @transform_2, window_bounds = array<i64: 8, 2048>}, {transform_indices = @transform_3, window_bounds = array<i64: 1, 8, 1>}, {transform_indices = @transform_4, window_bounds = array<i64: 1, 8, 1>}]} {
    %c0 = arith.constant 0 : index
    %c0_0 = arith.constant 0 : index
    %0 = vector.load %arg1[%c0, %c0_0] : memref<8x216xbf16, #tpu.memory_space<vmem>>, vector<8x216xbf16>
    %c0_1 = arith.constant 0 : index
    %c0_2 = arith.constant 0 : index
    %1 = vector.load %arg2[%c0_1, %c0_2] : memref<216x2048xbf16, #tpu.memory_space<vmem>>, vector<216x2048xbf16>
    %cst = arith.constant dense<0.000000e+00> : vector<8x2048xf32>
    %2 = tpu.matmul %0, %1, %cst {dimension_numbers = #tpu.dot_dimension_numbers<[1], [0], [0], [1], [0, 0, 1, 1], [], []>} : vector<8x216xbf16>, vector<216x2048xbf16>, vector<8x2048xf32> -> vector<8x2048xf32>
    %3 = arith.truncf %2 : vector<8x2048xf32> to vector<8x2048xbf16>
    %c0_3 = arith.constant 0 : index
    %c0_4 = arith.constant 0 : index
    %4 = vector.load %arg3[%c0_3, %c0_4] : memref<8x2048xbf16, #tpu.memory_space<vmem>>, vector<8x2048xbf16>
    tpu.vector_store %arg3[%c0_3, %c0_4], %3 {strides = array<i32>} : memref<8x2048xbf16, #tpu.memory_space<vmem>>, vector<8x2048xbf16>,
    %cst_5 = arith.constant dense<0.000000e+00> : vector<8xf32>
    %5 = vector.multi_reduction <add>, %2, %cst_5 [1] : vector<8x2048xf32> to vector<8xf32>
    %6 = vector.shape_cast %5 : vector<8xf32> to vector<8x1xf32>
    %7 = vector.shape_cast %6 : vector<8x1xf32> to vector<1x8x1xf32>
    %c0_6 = arith.constant 0 : index
    %c0_7 = arith.constant 0 : index
    %c0_8 = arith.constant 0 : index
    %8 = vector.load %arg4[%c0_6, %c0_7, %c0_8] : memref<1x8x1xf32, #tpu.memory_space<vmem>>, vector<1x8x1xf32>
    tpu.vector_store %arg4[%c0_6, %c0_7, %c0_8], %7 {strides = array<i32>} : memref<1x8x1xf32, #tpu.memory_space<vmem>>, vector<1x8x1xf32>,
    %9 = arith.mulf %2, %2 : vector<8x2048xf32>
    %cst_9 = arith.constant dense<0.000000e+00> : vector<8xf32>
    %10 = vector.multi_reduction <add>, %9, %cst_9 [1] : vector<8x2048xf32> to vector<8xf32>
    %11 = vector.shape_cast %10 : vector<8xf32> to vector<8x1xf32>
    %12 = vector.shape_cast %11 : vector<8x1xf32> to vector<1x8x1xf32>
    %c0_10 = arith.constant 0 : index
    %c0_11 = arith.constant 0 : index
    %c0_12 = arith.constant 0 : index
    %13 = vector.load %arg5[%c0_10, %c0_11, %c0_12] : memref<1x8x1xf32, #tpu.memory_space<vmem>>, vector<1x8x1xf32>
    tpu.vector_store %arg5[%c0_10, %c0_11, %c0_12], %12 {strides = array<i32>} : memref<1x8x1xf32, #tpu.memory_space<vmem>>, vector<1x8x1xf32>,
    return
  }
  func.func @transform_0(%arg0: i32) -> (i32, i32) {
    %c0_i32 = arith.constant 0 : i32
    %c0_i32_0 = arith.constant 0 : i32
    %c0_i32_1 = arith.constant 0 : i32
    return %c0_i32, %c0_i32_0 : i32, i32
  }
  func.func @transform_1(%arg0: i32) -> (i32, i32) {
    %c0_i32 = arith.constant 0 : i32
    %c0_i32_0 = arith.constant 0 : i32
    return %c0_i32, %arg0 : i32, i32
  }
  func.func @transform_2(%arg0: i32) -> (i32, i32) {
    %c0_i32 = arith.constant 0 : i32
    %c0_i32_0 = arith.constant 0 : i32
    return %c0_i32, %arg0 : i32, i32
  }
  func.func @transform_3(%arg0: i32) -> (i32, i32, i32) {
    %c0_i32 = arith.constant 0 : i32
    %c0_i32_0 = arith.constant 0 : i32
    %c0_i32_1 = arith.constant 0 : i32
    return %arg0, %c0_i32, %c0_i32_0 : i32, i32, i32
  }
  func.func @transform_4(%arg0: i32) -> (i32, i32, i32) {
    %c0_i32 = arith.constant 0 : i32
    %c0_i32_0 = arith.constant 0 : i32
    %c0_i32_1 = arith.constant 0 : i32
    return %arg0, %c0_i32, %c0_i32_0 : i32, i32, i32
  }
}

module attributes {stable_mosaic.version = 11 : i64} {
  func.func @gemm_stats_kernel(%arg0: i32, %arg1: memref<16x216xbf16, #tpu.memory_space<vmem>>, %arg2: memref<216x512xbf16, #tpu.memory_space<vmem>>, %arg3: memref<16x512xbf16, #tpu.memory_space<vmem>>, %arg4: memref<1x16x1xf32, #tpu.memory_space<vmem>>, %arg5: memref<1x16x1xf32, #tpu.memory_space<vmem>>) attributes {dimension_semantics = [#tpu.dimension_semantics<parallel>], iteration_bounds = array<i64: 1>, scalar_prefetch = 0 : i64, scratch_operands = 0 : i64, tpu.core_type = #tpu.core_type<tc>, window_params = [{pipeline_mode = #tpu.pipeline_mode<synchronous>, transform_indices = @transform_0, window_bounds = array<i64: 16, 216>}, {transform_indices = @transform_1, window_bounds = array<i64: 216, 512>}, {transform_indices = @transform_2, window_bounds = array<i64: 16, 512>}, {transform_indices = @transform_3, window_bounds = array<i64: 1, 16, 1>}, {transform_indices = @transform_4, window_bounds = array<i64: 1, 16, 1>}]} {
    %c0 = arith.constant 0 : index
    %c0_0 = arith.constant 0 : index
    %0 = vector.load %arg1[%c0, %c0_0] : memref<16x216xbf16, #tpu.memory_space<vmem>>, vector<16x216xbf16>
    %c0_1 = arith.constant 0 : index
    %c0_2 = arith.constant 0 : index
    %1 = vector.load %arg2[%c0_1, %c0_2] : memref<216x512xbf16, #tpu.memory_space<vmem>>, vector<216x512xbf16>
    %cst = arith.constant dense<0.000000e+00> : vector<16x512xf32>
    %2 = tpu.matmul %0, %1, %cst {dimension_numbers = #tpu.dot_dimension_numbers<[1], [0], [0], [1], [0, 0, 1, 1], [], []>} : vector<16x216xbf16>, vector<216x512xbf16>, vector<16x512xf32> -> vector<16x512xf32>
    %3 = arith.truncf %2 : vector<16x512xf32> to vector<16x512xbf16>
    %c0_3 = arith.constant 0 : index
    %c0_4 = arith.constant 0 : index
    %4 = vector.load %arg3[%c0_3, %c0_4] : memref<16x512xbf16, #tpu.memory_space<vmem>>, vector<16x512xbf16>
    tpu.vector_store %arg3[%c0_3, %c0_4], %3 {strides = array<i32>} : memref<16x512xbf16, #tpu.memory_space<vmem>>, vector<16x512xbf16>,
    %cst_5 = arith.constant dense<0.000000e+00> : vector<16xf32>
    %5 = vector.multi_reduction <add>, %2, %cst_5 [1] : vector<16x512xf32> to vector<16xf32>
    %6 = vector.shape_cast %5 : vector<16xf32> to vector<16x1xf32>
    %7 = vector.shape_cast %6 : vector<16x1xf32> to vector<1x16x1xf32>
    %c0_6 = arith.constant 0 : index
    %c0_7 = arith.constant 0 : index
    %c0_8 = arith.constant 0 : index
    %8 = vector.load %arg4[%c0_6, %c0_7, %c0_8] : memref<1x16x1xf32, #tpu.memory_space<vmem>>, vector<1x16x1xf32>
    tpu.vector_store %arg4[%c0_6, %c0_7, %c0_8], %7 {strides = array<i32>} : memref<1x16x1xf32, #tpu.memory_space<vmem>>, vector<1x16x1xf32>,
    %9 = arith.mulf %2, %2 : vector<16x512xf32>
    %cst_9 = arith.constant dense<0.000000e+00> : vector<16xf32>
    %10 = vector.multi_reduction <add>, %9, %cst_9 [1] : vector<16x512xf32> to vector<16xf32>
    %11 = vector.shape_cast %10 : vector<16xf32> to vector<16x1xf32>
    %12 = vector.shape_cast %11 : vector<16x1xf32> to vector<1x16x1xf32>
    %c0_10 = arith.constant 0 : index
    %c0_11 = arith.constant 0 : index
    %c0_12 = arith.constant 0 : index
    %13 = vector.load %arg5[%c0_10, %c0_11, %c0_12] : memref<1x16x1xf32, #tpu.memory_space<vmem>>, vector<1x16x1xf32>
    tpu.vector_store %arg5[%c0_10, %c0_11, %c0_12], %12 {strides = array<i32>} : memref<1x16x1xf32, #tpu.memory_space<vmem>>, vector<1x16x1xf32>,
    return
  }
  func.func @transform_0(%arg0: i32) -> (i32, i32) {
    %c0_i32 = arith.constant 0 : i32
    %c0_i32_0 = arith.constant 0 : i32
    %c0_i32_1 = arith.constant 0 : i32
    return %c0_i32, %c0_i32_0 : i32, i32
  }
  func.func @transform_1(%arg0: i32) -> (i32, i32) {
    %c0_i32 = arith.constant 0 : i32
    %c0_i32_0 = arith.constant 0 : i32
    return %c0_i32, %arg0 : i32, i32
  }
  func.func @transform_2(%arg0: i32) -> (i32, i32) {
    %c0_i32 = arith.constant 0 : i32
    %c0_i32_0 = arith.constant 0 : i32
    return %c0_i32, %arg0 : i32, i32
  }
  func.func @transform_3(%arg0: i32) -> (i32, i32, i32) {
    %c0_i32 = arith.constant 0 : i32
    %c0_i32_0 = arith.constant 0 : i32
    %c0_i32_1 = arith.constant 0 : i32
    return %arg0, %c0_i32, %c0_i32_0 : i32, i32, i32
  }
  func.func @transform_4(%arg0: i32) -> (i32, i32, i32) {
    %c0_i32 = arith.constant 0 : i32
    %c0_i32_0 = arith.constant 0 : i32
    %c0_i32_1 = arith.constant 0 : i32
    return %arg0, %c0_i32, %c0_i32_0 : i32, i32, i32
  }
}

module attributes {stable_mosaic.version = 11 : i64} {
  func.func @bn_relu_kernel(%arg0: i32, %arg1: memref<16x512xbf16, #tpu.memory_space<vmem>>, %arg2: memref<16x1xf32, #tpu.memory_space<vmem>>, %arg3: memref<16x1xf32, #tpu.memory_space<vmem>>, %arg4: memref<16x512xbf16, #tpu.memory_space<vmem>>) attributes {dimension_semantics = [#tpu.dimension_semantics<parallel>], iteration_bounds = array<i64: 1>, scalar_prefetch = 0 : i64, scratch_operands = 0 : i64, tpu.core_type = #tpu.core_type<tc>, window_params = [{transform_indices = @transform_0, window_bounds = array<i64: 16, 512>}, {pipeline_mode = #tpu.pipeline_mode<synchronous>, transform_indices = @transform_1, window_bounds = array<i64: 16, 1>}, {pipeline_mode = #tpu.pipeline_mode<synchronous>, transform_indices = @transform_2, window_bounds = array<i64: 16, 1>}, {transform_indices = @transform_3, window_bounds = array<i64: 16, 512>}]} {
    %c0 = arith.constant 0 : index
    %c0_0 = arith.constant 0 : index
    %0 = vector.load %arg1[%c0, %c0_0] : memref<16x512xbf16, #tpu.memory_space<vmem>>, vector<16x512xbf16>
    %1 = arith.extf %0 : vector<16x512xbf16> to vector<16x512xf32>
    %c0_1 = arith.constant 0 : index
    %c0_2 = arith.constant 0 : index
    %2 = vector.load %arg2[%c0_1, %c0_2] : memref<16x1xf32, #tpu.memory_space<vmem>>, vector<16x1xf32>
    %3 = vector.broadcast %2 : vector<16x1xf32> to vector<16x512xf32>
    %4 = arith.mulf %1, %3 : vector<16x512xf32>
    %c0_3 = arith.constant 0 : index
    %c0_4 = arith.constant 0 : index
    %5 = vector.load %arg3[%c0_3, %c0_4] : memref<16x1xf32, #tpu.memory_space<vmem>>, vector<16x1xf32>
    %6 = vector.broadcast %5 : vector<16x1xf32> to vector<16x512xf32>
    %7 = arith.addf %4, %6 : vector<16x512xf32>
    %cst = arith.constant 0.000000e+00 : f32
    %8 = vector.broadcast %cst : f32 to vector<16x512xf32>
    %9 = arith.maximumf %7, %8 : vector<16x512xf32>
    %10 = arith.truncf %9 : vector<16x512xf32> to vector<16x512xbf16>
    %c0_5 = arith.constant 0 : index
    %c0_6 = arith.constant 0 : index
    %11 = vector.load %arg4[%c0_5, %c0_6] : memref<16x512xbf16, #tpu.memory_space<vmem>>, vector<16x512xbf16>
    tpu.vector_store %arg4[%c0_5, %c0_6], %10 {strides = array<i32>} : memref<16x512xbf16, #tpu.memory_space<vmem>>, vector<16x512xbf16>,
    return
  }
  func.func @transform_0(%arg0: i32) -> (i32, i32) {
    %c0_i32 = arith.constant 0 : i32
    %c0_i32_0 = arith.constant 0 : i32
    return %c0_i32, %arg0 : i32, i32
  }
  func.func @transform_1(%arg0: i32) -> (i32, i32) {
    %c0_i32 = arith.constant 0 : i32
    %c0_i32_0 = arith.constant 0 : i32
    %c0_i32_1 = arith.constant 0 : i32
    return %c0_i32, %c0_i32_0 : i32, i32
  }
  func.func @transform_2(%arg0: i32) -> (i32, i32) {
    %c0_i32 = arith.constant 0 : i32
    %c0_i32_0 = arith.constant 0 : i32
    %c0_i32_1 = arith.constant 0 : i32
    return %c0_i32, %c0_i32_0 : i32, i32
  }
  func.func @transform_3(%arg0: i32) -> (i32, i32) {
    %c0_i32 = arith.constant 0 : i32
    %c0_i32_0 = arith.constant 0 : i32
    return %c0_i32, %arg0 : i32, i32
  }
}

module attributes {stable_mosaic.version = 11 : i64} {
  func.func @gemm_stats_kernel(%arg0: i32, %arg1: memref<16x432xbf16, #tpu.memory_space<vmem>>, %arg2: memref<432x512xbf16, #tpu.memory_space<vmem>>, %arg3: memref<16x512xbf16, #tpu.memory_space<vmem>>, %arg4: memref<1x16x1xf32, #tpu.memory_space<vmem>>, %arg5: memref<1x16x1xf32, #tpu.memory_space<vmem>>) attributes {dimension_semantics = [#tpu.dimension_semantics<parallel>], iteration_bounds = array<i64: 1>, scalar_prefetch = 0 : i64, scratch_operands = 0 : i64, tpu.core_type = #tpu.core_type<tc>, window_params = [{pipeline_mode = #tpu.pipeline_mode<synchronous>, transform_indices = @transform_0, window_bounds = array<i64: 16, 432>}, {transform_indices = @transform_1, window_bounds = array<i64: 432, 512>}, {transform_indices = @transform_2, window_bounds = array<i64: 16, 512>}, {transform_indices = @transform_3, window_bounds = array<i64: 1, 16, 1>}, {transform_indices = @transform_4, window_bounds = array<i64: 1, 16, 1>}]} {
    %c0 = arith.constant 0 : index
    %c0_0 = arith.constant 0 : index
    %0 = vector.load %arg1[%c0, %c0_0] : memref<16x432xbf16, #tpu.memory_space<vmem>>, vector<16x432xbf16>
    %c0_1 = arith.constant 0 : index
    %c0_2 = arith.constant 0 : index
    %1 = vector.load %arg2[%c0_1, %c0_2] : memref<432x512xbf16, #tpu.memory_space<vmem>>, vector<432x512xbf16>
    %cst = arith.constant dense<0.000000e+00> : vector<16x512xf32>
    %2 = tpu.matmul %0, %1, %cst {dimension_numbers = #tpu.dot_dimension_numbers<[1], [0], [0], [1], [0, 0, 1, 1], [], []>} : vector<16x432xbf16>, vector<432x512xbf16>, vector<16x512xf32> -> vector<16x512xf32>
    %3 = arith.truncf %2 : vector<16x512xf32> to vector<16x512xbf16>
    %c0_3 = arith.constant 0 : index
    %c0_4 = arith.constant 0 : index
    %4 = vector.load %arg3[%c0_3, %c0_4] : memref<16x512xbf16, #tpu.memory_space<vmem>>, vector<16x512xbf16>
    tpu.vector_store %arg3[%c0_3, %c0_4], %3 {strides = array<i32>} : memref<16x512xbf16, #tpu.memory_space<vmem>>, vector<16x512xbf16>,
    %cst_5 = arith.constant dense<0.000000e+00> : vector<16xf32>
    %5 = vector.multi_reduction <add>, %2, %cst_5 [1] : vector<16x512xf32> to vector<16xf32>
    %6 = vector.shape_cast %5 : vector<16xf32> to vector<16x1xf32>
    %7 = vector.shape_cast %6 : vector<16x1xf32> to vector<1x16x1xf32>
    %c0_6 = arith.constant 0 : index
    %c0_7 = arith.constant 0 : index
    %c0_8 = arith.constant 0 : index
    %8 = vector.load %arg4[%c0_6, %c0_7, %c0_8] : memref<1x16x1xf32, #tpu.memory_space<vmem>>, vector<1x16x1xf32>
    tpu.vector_store %arg4[%c0_6, %c0_7, %c0_8], %7 {strides = array<i32>} : memref<1x16x1xf32, #tpu.memory_space<vmem>>, vector<1x16x1xf32>,
    %9 = arith.mulf %2, %2 : vector<16x512xf32>
    %cst_9 = arith.constant dense<0.000000e+00> : vector<16xf32>
    %10 = vector.multi_reduction <add>, %9, %cst_9 [1] : vector<16x512xf32> to vector<16xf32>
    %11 = vector.shape_cast %10 : vector<16xf32> to vector<16x1xf32>
    %12 = vector.shape_cast %11 : vector<16x1xf32> to vector<1x16x1xf32>
    %c0_10 = arith.constant 0 : index
    %c0_11 = arith.constant 0 : index
    %c0_12 = arith.constant 0 : index
    %13 = vector.load %arg5[%c0_10, %c0_11, %c0_12] : memref<1x16x1xf32, #tpu.memory_space<vmem>>, vector<1x16x1xf32>
    tpu.vector_store %arg5[%c0_10, %c0_11, %c0_12], %12 {strides = array<i32>} : memref<1x16x1xf32, #tpu.memory_space<vmem>>, vector<1x16x1xf32>,
    return
  }
  func.func @transform_0(%arg0: i32) -> (i32, i32) {
    %c0_i32 = arith.constant 0 : i32
    %c0_i32_0 = arith.constant 0 : i32
    %c0_i32_1 = arith.constant 0 : i32
    return %c0_i32, %c0_i32_0 : i32, i32
  }
  func.func @transform_1(%arg0: i32) -> (i32, i32) {
    %c0_i32 = arith.constant 0 : i32
    %c0_i32_0 = arith.constant 0 : i32
    return %c0_i32, %arg0 : i32, i32
  }
  func.func @transform_2(%arg0: i32) -> (i32, i32) {
    %c0_i32 = arith.constant 0 : i32
    %c0_i32_0 = arith.constant 0 : i32
    return %c0_i32, %arg0 : i32, i32
  }
  func.func @transform_3(%arg0: i32) -> (i32, i32, i32) {
    %c0_i32 = arith.constant 0 : i32
    %c0_i32_0 = arith.constant 0 : i32
    %c0_i32_1 = arith.constant 0 : i32
    return %arg0, %c0_i32, %c0_i32_0 : i32, i32, i32
  }
  func.func @transform_4(%arg0: i32) -> (i32, i32, i32) {
    %c0_i32 = arith.constant 0 : i32
    %c0_i32_0 = arith.constant 0 : i32
    %c0_i32_1 = arith.constant 0 : i32
    return %arg0, %c0_i32, %c0_i32_0 : i32, i32, i32
  }
}

module attributes {stable_mosaic.version = 11 : i64} {
  func.func @gemm_stats_kernel(%arg0: i32, %arg1: memref<32x432xbf16, #tpu.memory_space<vmem>>, %arg2: memref<432x128xbf16, #tpu.memory_space<vmem>>, %arg3: memref<32x128xbf16, #tpu.memory_space<vmem>>, %arg4: memref<1x32x1xf32, #tpu.memory_space<vmem>>, %arg5: memref<1x32x1xf32, #tpu.memory_space<vmem>>) attributes {dimension_semantics = [#tpu.dimension_semantics<parallel>], iteration_bounds = array<i64: 1>, scalar_prefetch = 0 : i64, scratch_operands = 0 : i64, tpu.core_type = #tpu.core_type<tc>, window_params = [{pipeline_mode = #tpu.pipeline_mode<synchronous>, transform_indices = @transform_0, window_bounds = array<i64: 32, 432>}, {transform_indices = @transform_1, window_bounds = array<i64: 432, 128>}, {transform_indices = @transform_2, window_bounds = array<i64: 32, 128>}, {transform_indices = @transform_3, window_bounds = array<i64: 1, 32, 1>}, {transform_indices = @transform_4, window_bounds = array<i64: 1, 32, 1>}]} {
    %c0 = arith.constant 0 : index
    %c0_0 = arith.constant 0 : index
    %0 = vector.load %arg1[%c0, %c0_0] : memref<32x432xbf16, #tpu.memory_space<vmem>>, vector<32x432xbf16>
    %c0_1 = arith.constant 0 : index
    %c0_2 = arith.constant 0 : index
    %1 = vector.load %arg2[%c0_1, %c0_2] : memref<432x128xbf16, #tpu.memory_space<vmem>>, vector<432x128xbf16>
    %cst = arith.constant dense<0.000000e+00> : vector<32x128xf32>
    %2 = tpu.matmul %0, %1, %cst {dimension_numbers = #tpu.dot_dimension_numbers<[1], [0], [0], [1], [0, 0, 1, 1], [], []>} : vector<32x432xbf16>, vector<432x128xbf16>, vector<32x128xf32> -> vector<32x128xf32>
    %3 = arith.truncf %2 : vector<32x128xf32> to vector<32x128xbf16>
    %c0_3 = arith.constant 0 : index
    %c0_4 = arith.constant 0 : index
    %4 = vector.load %arg3[%c0_3, %c0_4] : memref<32x128xbf16, #tpu.memory_space<vmem>>, vector<32x128xbf16>
    tpu.vector_store %arg3[%c0_3, %c0_4], %3 {strides = array<i32>} : memref<32x128xbf16, #tpu.memory_space<vmem>>, vector<32x128xbf16>,
    %cst_5 = arith.constant dense<0.000000e+00> : vector<32xf32>
    %5 = vector.multi_reduction <add>, %2, %cst_5 [1] : vector<32x128xf32> to vector<32xf32>
    %6 = vector.shape_cast %5 : vector<32xf32> to vector<32x1xf32>
    %7 = vector.shape_cast %6 : vector<32x1xf32> to vector<1x32x1xf32>
    %c0_6 = arith.constant 0 : index
    %c0_7 = arith.constant 0 : index
    %c0_8 = arith.constant 0 : index
    %8 = vector.load %arg4[%c0_6, %c0_7, %c0_8] : memref<1x32x1xf32, #tpu.memory_space<vmem>>, vector<1x32x1xf32>
    tpu.vector_store %arg4[%c0_6, %c0_7, %c0_8], %7 {strides = array<i32>} : memref<1x32x1xf32, #tpu.memory_space<vmem>>, vector<1x32x1xf32>,
    %9 = arith.mulf %2, %2 : vector<32x128xf32>
    %cst_9 = arith.constant dense<0.000000e+00> : vector<32xf32>
    %10 = vector.multi_reduction <add>, %9, %cst_9 [1] : vector<32x128xf32> to vector<32xf32>
    %11 = vector.shape_cast %10 : vector<32xf32> to vector<32x1xf32>
    %12 = vector.shape_cast %11 : vector<32x1xf32> to vector<1x32x1xf32>
    %c0_10 = arith.constant 0 : index
    %c0_11 = arith.constant 0 : index
    %c0_12 = arith.constant 0 : index
    %13 = vector.load %arg5[%c0_10, %c0_11, %c0_12] : memref<1x32x1xf32, #tpu.memory_space<vmem>>, vector<1x32x1xf32>
    tpu.vector_store %arg5[%c0_10, %c0_11, %c0_12], %12 {strides = array<i32>} : memref<1x32x1xf32, #tpu.memory_space<vmem>>, vector<1x32x1xf32>,
    return
  }
  func.func @transform_0(%arg0: i32) -> (i32, i32) {
    %c0_i32 = arith.constant 0 : i32
    %c0_i32_0 = arith.constant 0 : i32
    %c0_i32_1 = arith.constant 0 : i32
    return %c0_i32, %c0_i32_0 : i32, i32
  }
  func.func @transform_1(%arg0: i32) -> (i32, i32) {
    %c0_i32 = arith.constant 0 : i32
    %c0_i32_0 = arith.constant 0 : i32
    return %c0_i32, %arg0 : i32, i32
  }
  func.func @transform_2(%arg0: i32) -> (i32, i32) {
    %c0_i32 = arith.constant 0 : i32
    %c0_i32_0 = arith.constant 0 : i32
    return %c0_i32, %arg0 : i32, i32
  }
  func.func @transform_3(%arg0: i32) -> (i32, i32, i32) {
    %c0_i32 = arith.constant 0 : i32
    %c0_i32_0 = arith.constant 0 : i32
    %c0_i32_1 = arith.constant 0 : i32
    return %arg0, %c0_i32, %c0_i32_0 : i32, i32, i32
  }
  func.func @transform_4(%arg0: i32) -> (i32, i32, i32) {
    %c0_i32 = arith.constant 0 : i32
    %c0_i32_0 = arith.constant 0 : i32
    %c0_i32_1 = arith.constant 0 : i32
    return %arg0, %c0_i32, %c0_i32_0 : i32, i32, i32
  }
}

module attributes {stable_mosaic.version = 11 : i64} {
  func.func @bn_relu_kernel(%arg0: i32, %arg1: memref<32x128xbf16, #tpu.memory_space<vmem>>, %arg2: memref<32x1xf32, #tpu.memory_space<vmem>>, %arg3: memref<32x1xf32, #tpu.memory_space<vmem>>, %arg4: memref<32x128xbf16, #tpu.memory_space<vmem>>) attributes {dimension_semantics = [#tpu.dimension_semantics<parallel>], iteration_bounds = array<i64: 1>, scalar_prefetch = 0 : i64, scratch_operands = 0 : i64, tpu.core_type = #tpu.core_type<tc>, window_params = [{transform_indices = @transform_0, window_bounds = array<i64: 32, 128>}, {pipeline_mode = #tpu.pipeline_mode<synchronous>, transform_indices = @transform_1, window_bounds = array<i64: 32, 1>}, {pipeline_mode = #tpu.pipeline_mode<synchronous>, transform_indices = @transform_2, window_bounds = array<i64: 32, 1>}, {transform_indices = @transform_3, window_bounds = array<i64: 32, 128>}]} {
    %c0 = arith.constant 0 : index
    %c0_0 = arith.constant 0 : index
    %0 = vector.load %arg1[%c0, %c0_0] : memref<32x128xbf16, #tpu.memory_space<vmem>>, vector<32x128xbf16>
    %1 = arith.extf %0 : vector<32x128xbf16> to vector<32x128xf32>
    %c0_1 = arith.constant 0 : index
    %c0_2 = arith.constant 0 : index
    %2 = vector.load %arg2[%c0_1, %c0_2] : memref<32x1xf32, #tpu.memory_space<vmem>>, vector<32x1xf32>
    %3 = vector.broadcast %2 : vector<32x1xf32> to vector<32x128xf32>
    %4 = arith.mulf %1, %3 : vector<32x128xf32>
    %c0_3 = arith.constant 0 : index
    %c0_4 = arith.constant 0 : index
    %5 = vector.load %arg3[%c0_3, %c0_4] : memref<32x1xf32, #tpu.memory_space<vmem>>, vector<32x1xf32>
    %6 = vector.broadcast %5 : vector<32x1xf32> to vector<32x128xf32>
    %7 = arith.addf %4, %6 : vector<32x128xf32>
    %cst = arith.constant 0.000000e+00 : f32
    %8 = vector.broadcast %cst : f32 to vector<32x128xf32>
    %9 = arith.maximumf %7, %8 : vector<32x128xf32>
    %10 = arith.truncf %9 : vector<32x128xf32> to vector<32x128xbf16>
    %c0_5 = arith.constant 0 : index
    %c0_6 = arith.constant 0 : index
    %11 = vector.load %arg4[%c0_5, %c0_6] : memref<32x128xbf16, #tpu.memory_space<vmem>>, vector<32x128xbf16>
    tpu.vector_store %arg4[%c0_5, %c0_6], %10 {strides = array<i32>} : memref<32x128xbf16, #tpu.memory_space<vmem>>, vector<32x128xbf16>,
    return
  }
  func.func @transform_0(%arg0: i32) -> (i32, i32) {
    %c0_i32 = arith.constant 0 : i32
    %c0_i32_0 = arith.constant 0 : i32
    return %c0_i32, %arg0 : i32, i32
  }
  func.func @transform_1(%arg0: i32) -> (i32, i32) {
    %c0_i32 = arith.constant 0 : i32
    %c0_i32_0 = arith.constant 0 : i32
    %c0_i32_1 = arith.constant 0 : i32
    return %c0_i32, %c0_i32_0 : i32, i32
  }
  func.func @transform_2(%arg0: i32) -> (i32, i32) {
    %c0_i32 = arith.constant 0 : i32
    %c0_i32_0 = arith.constant 0 : i32
    %c0_i32_1 = arith.constant 0 : i32
    return %c0_i32, %c0_i32_0 : i32, i32
  }
  func.func @transform_3(%arg0: i32) -> (i32, i32) {
    %c0_i32 = arith.constant 0 : i32
    %c0_i32_0 = arith.constant 0 : i32
    return %c0_i32, %arg0 : i32, i32
  }
}

module attributes {stable_mosaic.version = 11 : i64} {
  func.func @gemm_stats_kernel(%arg0: i32, %arg1: memref<32x864xbf16, #tpu.memory_space<vmem>>, %arg2: memref<864x128xbf16, #tpu.memory_space<vmem>>, %arg3: memref<32x128xbf16, #tpu.memory_space<vmem>>, %arg4: memref<1x32x1xf32, #tpu.memory_space<vmem>>, %arg5: memref<1x32x1xf32, #tpu.memory_space<vmem>>) attributes {dimension_semantics = [#tpu.dimension_semantics<parallel>], iteration_bounds = array<i64: 1>, scalar_prefetch = 0 : i64, scratch_operands = 0 : i64, tpu.core_type = #tpu.core_type<tc>, window_params = [{pipeline_mode = #tpu.pipeline_mode<synchronous>, transform_indices = @transform_0, window_bounds = array<i64: 32, 864>}, {transform_indices = @transform_1, window_bounds = array<i64: 864, 128>}, {transform_indices = @transform_2, window_bounds = array<i64: 32, 128>}, {transform_indices = @transform_3, window_bounds = array<i64: 1, 32, 1>}, {transform_indices = @transform_4, window_bounds = array<i64: 1, 32, 1>}]} {
    %c0 = arith.constant 0 : index
    %c0_0 = arith.constant 0 : index
    %0 = vector.load %arg1[%c0, %c0_0] : memref<32x864xbf16, #tpu.memory_space<vmem>>, vector<32x864xbf16>
    %c0_1 = arith.constant 0 : index
    %c0_2 = arith.constant 0 : index
    %1 = vector.load %arg2[%c0_1, %c0_2] : memref<864x128xbf16, #tpu.memory_space<vmem>>, vector<864x128xbf16>
    %cst = arith.constant dense<0.000000e+00> : vector<32x128xf32>
    %2 = tpu.matmul %0, %1, %cst {dimension_numbers = #tpu.dot_dimension_numbers<[1], [0], [0], [1], [0, 0, 1, 1], [], []>} : vector<32x864xbf16>, vector<864x128xbf16>, vector<32x128xf32> -> vector<32x128xf32>
    %3 = arith.truncf %2 : vector<32x128xf32> to vector<32x128xbf16>
    %c0_3 = arith.constant 0 : index
    %c0_4 = arith.constant 0 : index
    %4 = vector.load %arg3[%c0_3, %c0_4] : memref<32x128xbf16, #tpu.memory_space<vmem>>, vector<32x128xbf16>
    tpu.vector_store %arg3[%c0_3, %c0_4], %3 {strides = array<i32>} : memref<32x128xbf16, #tpu.memory_space<vmem>>, vector<32x128xbf16>,
    %cst_5 = arith.constant dense<0.000000e+00> : vector<32xf32>
    %5 = vector.multi_reduction <add>, %2, %cst_5 [1] : vector<32x128xf32> to vector<32xf32>
    %6 = vector.shape_cast %5 : vector<32xf32> to vector<32x1xf32>
    %7 = vector.shape_cast %6 : vector<32x1xf32> to vector<1x32x1xf32>
    %c0_6 = arith.constant 0 : index
    %c0_7 = arith.constant 0 : index
    %c0_8 = arith.constant 0 : index
    %8 = vector.load %arg4[%c0_6, %c0_7, %c0_8] : memref<1x32x1xf32, #tpu.memory_space<vmem>>, vector<1x32x1xf32>
    tpu.vector_store %arg4[%c0_6, %c0_7, %c0_8], %7 {strides = array<i32>} : memref<1x32x1xf32, #tpu.memory_space<vmem>>, vector<1x32x1xf32>,
    %9 = arith.mulf %2, %2 : vector<32x128xf32>
    %cst_9 = arith.constant dense<0.000000e+00> : vector<32xf32>
    %10 = vector.multi_reduction <add>, %9, %cst_9 [1] : vector<32x128xf32> to vector<32xf32>
    %11 = vector.shape_cast %10 : vector<32xf32> to vector<32x1xf32>
    %12 = vector.shape_cast %11 : vector<32x1xf32> to vector<1x32x1xf32>
    %c0_10 = arith.constant 0 : index
    %c0_11 = arith.constant 0 : index
    %c0_12 = arith.constant 0 : index
    %13 = vector.load %arg5[%c0_10, %c0_11, %c0_12] : memref<1x32x1xf32, #tpu.memory_space<vmem>>, vector<1x32x1xf32>
    tpu.vector_store %arg5[%c0_10, %c0_11, %c0_12], %12 {strides = array<i32>} : memref<1x32x1xf32, #tpu.memory_space<vmem>>, vector<1x32x1xf32>,
    return
  }
  func.func @transform_0(%arg0: i32) -> (i32, i32) {
    %c0_i32 = arith.constant 0 : i32
    %c0_i32_0 = arith.constant 0 : i32
    %c0_i32_1 = arith.constant 0 : i32
    return %c0_i32, %c0_i32_0 : i32, i32
  }
  func.func @transform_1(%arg0: i32) -> (i32, i32) {
    %c0_i32 = arith.constant 0 : i32
    %c0_i32_0 = arith.constant 0 : i32
    return %c0_i32, %arg0 : i32, i32
  }
  func.func @transform_2(%arg0: i32) -> (i32, i32) {
    %c0_i32 = arith.constant 0 : i32
    %c0_i32_0 = arith.constant 0 : i32
    return %c0_i32, %arg0 : i32, i32
  }
  func.func @transform_3(%arg0: i32) -> (i32, i32, i32) {
    %c0_i32 = arith.constant 0 : i32
    %c0_i32_0 = arith.constant 0 : i32
    %c0_i32_1 = arith.constant 0 : i32
    return %arg0, %c0_i32, %c0_i32_0 : i32, i32, i32
  }
  func.func @transform_4(%arg0: i32) -> (i32, i32, i32) {
    %c0_i32 = arith.constant 0 : i32
    %c0_i32_0 = arith.constant 0 : i32
    %c0_i32_1 = arith.constant 0 : i32
    return %arg0, %c0_i32, %c0_i32_0 : i32, i32, i32
  }
}

module attributes {stable_mosaic.version = 11 : i64} {
  func.func @gemm_stats_kernel(%arg0: i32, %arg1: memref<16x256xbf16, #tpu.memory_space<vmem>>, %arg2: memref<256x128xbf16, #tpu.memory_space<vmem>>, %arg3: memref<16x128xbf16, #tpu.memory_space<vmem>>, %arg4: memref<1x16x1xf32, #tpu.memory_space<vmem>>, %arg5: memref<1x16x1xf32, #tpu.memory_space<vmem>>) attributes {dimension_semantics = [#tpu.dimension_semantics<parallel>], iteration_bounds = array<i64: 1>, scalar_prefetch = 0 : i64, scratch_operands = 0 : i64, tpu.core_type = #tpu.core_type<tc>, window_params = [{pipeline_mode = #tpu.pipeline_mode<synchronous>, transform_indices = @transform_0, window_bounds = array<i64: 16, 256>}, {transform_indices = @transform_1, window_bounds = array<i64: 256, 128>}, {transform_indices = @transform_2, window_bounds = array<i64: 16, 128>}, {transform_indices = @transform_3, window_bounds = array<i64: 1, 16, 1>}, {transform_indices = @transform_4, window_bounds = array<i64: 1, 16, 1>}]} {
    %c0 = arith.constant 0 : index
    %c0_0 = arith.constant 0 : index
    %0 = vector.load %arg1[%c0, %c0_0] : memref<16x256xbf16, #tpu.memory_space<vmem>>, vector<16x256xbf16>
    %c0_1 = arith.constant 0 : index
    %c0_2 = arith.constant 0 : index
    %1 = vector.load %arg2[%c0_1, %c0_2] : memref<256x128xbf16, #tpu.memory_space<vmem>>, vector<256x128xbf16>
    %cst = arith.constant dense<0.000000e+00> : vector<16x128xf32>
    %2 = tpu.matmul %0, %1, %cst {dimension_numbers = #tpu.dot_dimension_numbers<[1], [0], [0], [1], [0, 0, 1, 1], [], []>} : vector<16x256xbf16>, vector<256x128xbf16>, vector<16x128xf32> -> vector<16x128xf32>
    %3 = arith.truncf %2 : vector<16x128xf32> to vector<16x128xbf16>
    %c0_3 = arith.constant 0 : index
    %c0_4 = arith.constant 0 : index
    %4 = vector.load %arg3[%c0_3, %c0_4] : memref<16x128xbf16, #tpu.memory_space<vmem>>, vector<16x128xbf16>
    tpu.vector_store %arg3[%c0_3, %c0_4], %3 {strides = array<i32>} : memref<16x128xbf16, #tpu.memory_space<vmem>>, vector<16x128xbf16>,
    %cst_5 = arith.constant dense<0.000000e+00> : vector<16xf32>
    %5 = vector.multi_reduction <add>, %2, %cst_5 [1] : vector<16x128xf32> to vector<16xf32>
    %6 = vector.shape_cast %5 : vector<16xf32> to vector<16x1xf32>
    %7 = vector.shape_cast %6 : vector<16x1xf32> to vector<1x16x1xf32>
    %c0_6 = arith.constant 0 : index
    %c0_7 = arith.constant 0 : index
    %c0_8 = arith.constant 0 : index
    %8 = vector.load %arg4[%c0_6, %c0_7, %c0_8] : memref<1x16x1xf32, #tpu.memory_space<vmem>>, vector<1x16x1xf32>
    tpu.vector_store %arg4[%c0_6, %c0_7, %c0_8], %7 {strides = array<i32>} : memref<1x16x1xf32, #tpu.memory_space<vmem>>, vector<1x16x1xf32>,
    %9 = arith.mulf %2, %2 : vector<16x128xf32>
    %cst_9 = arith.constant dense<0.000000e+00> : vector<16xf32>
    %10 = vector.multi_reduction <add>, %9, %cst_9 [1] : vector<16x128xf32> to vector<16xf32>
    %11 = vector.shape_cast %10 : vector<16xf32> to vector<16x1xf32>
    %12 = vector.shape_cast %11 : vector<16x1xf32> to vector<1x16x1xf32>
    %c0_10 = arith.constant 0 : index
    %c0_11 = arith.constant 0 : index
    %c0_12 = arith.constant 0 : index
    %13 = vector.load %arg5[%c0_10, %c0_11, %c0_12] : memref<1x16x1xf32, #tpu.memory_space<vmem>>, vector<1x16x1xf32>
    tpu.vector_store %arg5[%c0_10, %c0_11, %c0_12], %12 {strides = array<i32>} : memref<1x16x1xf32, #tpu.memory_space<vmem>>, vector<1x16x1xf32>,
    return
  }
  func.func @transform_0(%arg0: i32) -> (i32, i32) {
    %c0_i32 = arith.constant 0 : i32
    %c0_i32_0 = arith.constant 0 : i32
    %c0_i32_1 = arith.constant 0 : i32
    return %c0_i32, %c0_i32_0 : i32, i32
  }
  func.func @transform_1(%arg0: i32) -> (i32, i32) {
    %c0_i32 = arith.constant 0 : i32
    %c0_i32_0 = arith.constant 0 : i32
    return %c0_i32, %arg0 : i32, i32
  }
  func.func @transform_2(%arg0: i32) -> (i32, i32) {
    %c0_i32 = arith.constant 0 : i32
    %c0_i32_0 = arith.constant 0 : i32
    return %c0_i32, %arg0 : i32, i32
  }
  func.func @transform_3(%arg0: i32) -> (i32, i32, i32) {
    %c0_i32 = arith.constant 0 : i32
    %c0_i32_0 = arith.constant 0 : i32
    %c0_i32_1 = arith.constant 0 : i32
    return %arg0, %c0_i32, %c0_i32_0 : i32, i32, i32
  }
  func.func @transform_4(%arg0: i32) -> (i32, i32, i32) {
    %c0_i32 = arith.constant 0 : i32
    %c0_i32_0 = arith.constant 0 : i32
    %c0_i32_1 = arith.constant 0 : i32
    return %arg0, %c0_i32, %c0_i32_0 : i32, i32, i32
  }
}

module attributes {stable_mosaic.version = 11 : i64} {
  func.func @gemm_stats_kernel(%arg0: i32, %arg1: memref<16x128xbf16, #tpu.memory_space<vmem>>, %arg2: memref<128x128xbf16, #tpu.memory_space<vmem>>, %arg3: memref<16x128xbf16, #tpu.memory_space<vmem>>, %arg4: memref<1x16x1xf32, #tpu.memory_space<vmem>>, %arg5: memref<1x16x1xf32, #tpu.memory_space<vmem>>) attributes {dimension_semantics = [#tpu.dimension_semantics<parallel>], iteration_bounds = array<i64: 1>, scalar_prefetch = 0 : i64, scratch_operands = 0 : i64, tpu.core_type = #tpu.core_type<tc>, window_params = [{pipeline_mode = #tpu.pipeline_mode<synchronous>, transform_indices = @transform_0, window_bounds = array<i64: 16, 128>}, {transform_indices = @transform_1, window_bounds = array<i64: 128, 128>}, {transform_indices = @transform_2, window_bounds = array<i64: 16, 128>}, {transform_indices = @transform_3, window_bounds = array<i64: 1, 16, 1>}, {transform_indices = @transform_4, window_bounds = array<i64: 1, 16, 1>}]} {
    %c0 = arith.constant 0 : index
    %c0_0 = arith.constant 0 : index
    %0 = vector.load %arg1[%c0, %c0_0] : memref<16x128xbf16, #tpu.memory_space<vmem>>, vector<16x128xbf16>
    %c0_1 = arith.constant 0 : index
    %c0_2 = arith.constant 0 : index
    %1 = vector.load %arg2[%c0_1, %c0_2] : memref<128x128xbf16, #tpu.memory_space<vmem>>, vector<128x128xbf16>
    %cst = arith.constant dense<0.000000e+00> : vector<16x128xf32>
    %2 = tpu.matmul %0, %1, %cst {dimension_numbers = #tpu.dot_dimension_numbers<[1], [0], [0], [1], [0, 0, 1, 1], [], []>} : vector<16x128xbf16>, vector<128x128xbf16>, vector<16x128xf32> -> vector<16x128xf32>
    %3 = arith.truncf %2 : vector<16x128xf32> to vector<16x128xbf16>
    %c0_3 = arith.constant 0 : index
    %c0_4 = arith.constant 0 : index
    %4 = vector.load %arg3[%c0_3, %c0_4] : memref<16x128xbf16, #tpu.memory_space<vmem>>, vector<16x128xbf16>
    tpu.vector_store %arg3[%c0_3, %c0_4], %3 {strides = array<i32>} : memref<16x128xbf16, #tpu.memory_space<vmem>>, vector<16x128xbf16>,
    %cst_5 = arith.constant dense<0.000000e+00> : vector<16xf32>
    %5 = vector.multi_reduction <add>, %2, %cst_5 [1] : vector<16x128xf32> to vector<16xf32>
    %6 = vector.shape_cast %5 : vector<16xf32> to vector<16x1xf32>
    %7 = vector.shape_cast %6 : vector<16x1xf32> to vector<1x16x1xf32>
    %c0_6 = arith.constant 0 : index
    %c0_7 = arith.constant 0 : index
    %c0_8 = arith.constant 0 : index
    %8 = vector.load %arg4[%c0_6, %c0_7, %c0_8] : memref<1x16x1xf32, #tpu.memory_space<vmem>>, vector<1x16x1xf32>
    tpu.vector_store %arg4[%c0_6, %c0_7, %c0_8], %7 {strides = array<i32>} : memref<1x16x1xf32, #tpu.memory_space<vmem>>, vector<1x16x1xf32>,
    %9 = arith.mulf %2, %2 : vector<16x128xf32>
    %cst_9 = arith.constant dense<0.000000e+00> : vector<16xf32>
    %10 = vector.multi_reduction <add>, %9, %cst_9 [1] : vector<16x128xf32> to vector<16xf32>
    %11 = vector.shape_cast %10 : vector<16xf32> to vector<16x1xf32>
    %12 = vector.shape_cast %11 : vector<16x1xf32> to vector<1x16x1xf32>
    %c0_10 = arith.constant 0 : index
    %c0_11 = arith.constant 0 : index
    %c0_12 = arith.constant 0 : index
    %13 = vector.load %arg5[%c0_10, %c0_11, %c0_12] : memref<1x16x1xf32, #tpu.memory_space<vmem>>, vector<1x16x1xf32>
    tpu.vector_store %arg5[%c0_10, %c0_11, %c0_12], %12 {strides = array<i32>} : memref<1x16x1xf32, #tpu.memory_space<vmem>>, vector<1x16x1xf32>,
    return
  }
  func.func @transform_0(%arg0: i32) -> (i32, i32) {
    %c0_i32 = arith.constant 0 : i32
    %c0_i32_0 = arith.constant 0 : i32
    %c0_i32_1 = arith.constant 0 : i32
    return %c0_i32, %c0_i32_0 : i32, i32
  }
  func.func @transform_1(%arg0: i32) -> (i32, i32) {
    %c0_i32 = arith.constant 0 : i32
    %c0_i32_0 = arith.constant 0 : i32
    return %c0_i32, %arg0 : i32, i32
  }
  func.func @transform_2(%arg0: i32) -> (i32, i32) {
    %c0_i32 = arith.constant 0 : i32
    %c0_i32_0 = arith.constant 0 : i32
    return %c0_i32, %arg0 : i32, i32
  }
  func.func @transform_3(%arg0: i32) -> (i32, i32, i32) {
    %c0_i32 = arith.constant 0 : i32
    %c0_i32_0 = arith.constant 0 : i32
    %c0_i32_1 = arith.constant 0 : i32
    return %arg0, %c0_i32, %c0_i32_0 : i32, i32, i32
  }
  func.func @transform_4(%arg0: i32) -> (i32, i32, i32) {
    %c0_i32 = arith.constant 0 : i32
    %c0_i32_0 = arith.constant 0 : i32
    %c0_i32_1 = arith.constant 0 : i32
    return %arg0, %c0_i32, %c0_i32_0 : i32, i32, i32
  }
}

module attributes {stable_mosaic.version = 11 : i64} {
  func.func @gemm_stats_kernel(%arg0: i32, %arg1: memref<16x64xbf16, #tpu.memory_space<vmem>>, %arg2: memref<64x128xbf16, #tpu.memory_space<vmem>>, %arg3: memref<16x128xbf16, #tpu.memory_space<vmem>>, %arg4: memref<1x16x1xf32, #tpu.memory_space<vmem>>, %arg5: memref<1x16x1xf32, #tpu.memory_space<vmem>>) attributes {dimension_semantics = [#tpu.dimension_semantics<parallel>], iteration_bounds = array<i64: 1>, scalar_prefetch = 0 : i64, scratch_operands = 0 : i64, tpu.core_type = #tpu.core_type<tc>, window_params = [{pipeline_mode = #tpu.pipeline_mode<synchronous>, transform_indices = @transform_0, window_bounds = array<i64: 16, 64>}, {transform_indices = @transform_1, window_bounds = array<i64: 64, 128>}, {transform_indices = @transform_2, window_bounds = array<i64: 16, 128>}, {transform_indices = @transform_3, window_bounds = array<i64: 1, 16, 1>}, {transform_indices = @transform_4, window_bounds = array<i64: 1, 16, 1>}]} {
    %c0 = arith.constant 0 : index
    %c0_0 = arith.constant 0 : index
    %0 = vector.load %arg1[%c0, %c0_0] : memref<16x64xbf16, #tpu.memory_space<vmem>>, vector<16x64xbf16>
    %c0_1 = arith.constant 0 : index
    %c0_2 = arith.constant 0 : index
    %1 = vector.load %arg2[%c0_1, %c0_2] : memref<64x128xbf16, #tpu.memory_space<vmem>>, vector<64x128xbf16>
    %cst = arith.constant dense<0.000000e+00> : vector<16x128xf32>
    %2 = tpu.matmul %0, %1, %cst {dimension_numbers = #tpu.dot_dimension_numbers<[1], [0], [0], [1], [0, 0, 1, 1], [], []>} : vector<16x64xbf16>, vector<64x128xbf16>, vector<16x128xf32> -> vector<16x128xf32>
    %3 = arith.truncf %2 : vector<16x128xf32> to vector<16x128xbf16>
    %c0_3 = arith.constant 0 : index
    %c0_4 = arith.constant 0 : index
    %4 = vector.load %arg3[%c0_3, %c0_4] : memref<16x128xbf16, #tpu.memory_space<vmem>>, vector<16x128xbf16>
    tpu.vector_store %arg3[%c0_3, %c0_4], %3 {strides = array<i32>} : memref<16x128xbf16, #tpu.memory_space<vmem>>, vector<16x128xbf16>,
    %cst_5 = arith.constant dense<0.000000e+00> : vector<16xf32>
    %5 = vector.multi_reduction <add>, %2, %cst_5 [1] : vector<16x128xf32> to vector<16xf32>
    %6 = vector.shape_cast %5 : vector<16xf32> to vector<16x1xf32>
    %7 = vector.shape_cast %6 : vector<16x1xf32> to vector<1x16x1xf32>
    %c0_6 = arith.constant 0 : index
    %c0_7 = arith.constant 0 : index
    %c0_8 = arith.constant 0 : index
    %8 = vector.load %arg4[%c0_6, %c0_7, %c0_8] : memref<1x16x1xf32, #tpu.memory_space<vmem>>, vector<1x16x1xf32>
    tpu.vector_store %arg4[%c0_6, %c0_7, %c0_8], %7 {strides = array<i32>} : memref<1x16x1xf32, #tpu.memory_space<vmem>>, vector<1x16x1xf32>,
    %9 = arith.mulf %2, %2 : vector<16x128xf32>
    %cst_9 = arith.constant dense<0.000000e+00> : vector<16xf32>
    %10 = vector.multi_reduction <add>, %9, %cst_9 [1] : vector<16x128xf32> to vector<16xf32>
    %11 = vector.shape_cast %10 : vector<16xf32> to vector<16x1xf32>
    %12 = vector.shape_cast %11 : vector<16x1xf32> to vector<1x16x1xf32>
    %c0_10 = arith.constant 0 : index
    %c0_11 = arith.constant 0 : index
    %c0_12 = arith.constant 0 : index
    %13 = vector.load %arg5[%c0_10, %c0_11, %c0_12] : memref<1x16x1xf32, #tpu.memory_space<vmem>>, vector<1x16x1xf32>
    tpu.vector_store %arg5[%c0_10, %c0_11, %c0_12], %12 {strides = array<i32>} : memref<1x16x1xf32, #tpu.memory_space<vmem>>, vector<1x16x1xf32>,
    return
  }
  func.func @transform_0(%arg0: i32) -> (i32, i32) {
    %c0_i32 = arith.constant 0 : i32
    %c0_i32_0 = arith.constant 0 : i32
    %c0_i32_1 = arith.constant 0 : i32
    return %c0_i32, %c0_i32_0 : i32, i32
  }
  func.func @transform_1(%arg0: i32) -> (i32, i32) {
    %c0_i32 = arith.constant 0 : i32
    %c0_i32_0 = arith.constant 0 : i32
    return %c0_i32, %arg0 : i32, i32
  }
  func.func @transform_2(%arg0: i32) -> (i32, i32) {
    %c0_i32 = arith.constant 0 : i32
    %c0_i32_0 = arith.constant 0 : i32
    return %c0_i32, %arg0 : i32, i32
  }
  func.func @transform_3(%arg0: i32) -> (i32, i32, i32) {
    %c0_i32 = arith.constant 0 : i32
    %c0_i32_0 = arith.constant 0 : i32
    %c0_i32_1 = arith.constant 0 : i32
    return %arg0, %c0_i32, %c0_i32_0 : i32, i32, i32
  }
  func.func @transform_4(%arg0: i32) -> (i32, i32, i32) {
    %c0_i32 = arith.constant 0 : i32
    %c0_i32_0 = arith.constant 0 : i32
    %c0_i32_1 = arith.constant 0 : i32
    return %arg0, %c0_i32, %c0_i32_0 : i32, i32, i32
  }
}

module attributes {stable_mosaic.version = 11 : i64} {
  func.func @gemm_stats_kernel(%arg0: i32, %arg1: memref<16x32xbf16, #tpu.memory_space<vmem>>, %arg2: memref<32x128xbf16, #tpu.memory_space<vmem>>, %arg3: memref<16x128xbf16, #tpu.memory_space<vmem>>, %arg4: memref<1x16x1xf32, #tpu.memory_space<vmem>>, %arg5: memref<1x16x1xf32, #tpu.memory_space<vmem>>) attributes {dimension_semantics = [#tpu.dimension_semantics<parallel>], iteration_bounds = array<i64: 1>, scalar_prefetch = 0 : i64, scratch_operands = 0 : i64, tpu.core_type = #tpu.core_type<tc>, window_params = [{pipeline_mode = #tpu.pipeline_mode<synchronous>, transform_indices = @transform_0, window_bounds = array<i64: 16, 32>}, {transform_indices = @transform_1, window_bounds = array<i64: 32, 128>}, {transform_indices = @transform_2, window_bounds = array<i64: 16, 128>}, {transform_indices = @transform_3, window_bounds = array<i64: 1, 16, 1>}, {transform_indices = @transform_4, window_bounds = array<i64: 1, 16, 1>}]} {
    %c0 = arith.constant 0 : index
    %c0_0 = arith.constant 0 : index
    %0 = vector.load %arg1[%c0, %c0_0] : memref<16x32xbf16, #tpu.memory_space<vmem>>, vector<16x32xbf16>
    %c0_1 = arith.constant 0 : index
    %c0_2 = arith.constant 0 : index
    %1 = vector.load %arg2[%c0_1, %c0_2] : memref<32x128xbf16, #tpu.memory_space<vmem>>, vector<32x128xbf16>
    %cst = arith.constant dense<0.000000e+00> : vector<16x128xf32>
    %2 = tpu.matmul %0, %1, %cst {dimension_numbers = #tpu.dot_dimension_numbers<[1], [0], [0], [1], [0, 0, 1, 1], [], []>} : vector<16x32xbf16>, vector<32x128xbf16>, vector<16x128xf32> -> vector<16x128xf32>
    %3 = arith.truncf %2 : vector<16x128xf32> to vector<16x128xbf16>
    %c0_3 = arith.constant 0 : index
    %c0_4 = arith.constant 0 : index
    %4 = vector.load %arg3[%c0_3, %c0_4] : memref<16x128xbf16, #tpu.memory_space<vmem>>, vector<16x128xbf16>
    tpu.vector_store %arg3[%c0_3, %c0_4], %3 {strides = array<i32>} : memref<16x128xbf16, #tpu.memory_space<vmem>>, vector<16x128xbf16>,
    %cst_5 = arith.constant dense<0.000000e+00> : vector<16xf32>
    %5 = vector.multi_reduction <add>, %2, %cst_5 [1] : vector<16x128xf32> to vector<16xf32>
    %6 = vector.shape_cast %5 : vector<16xf32> to vector<16x1xf32>
    %7 = vector.shape_cast %6 : vector<16x1xf32> to vector<1x16x1xf32>
    %c0_6 = arith.constant 0 : index
    %c0_7 = arith.constant 0 : index
    %c0_8 = arith.constant 0 : index
    %8 = vector.load %arg4[%c0_6, %c0_7, %c0_8] : memref<1x16x1xf32, #tpu.memory_space<vmem>>, vector<1x16x1xf32>
    tpu.vector_store %arg4[%c0_6, %c0_7, %c0_8], %7 {strides = array<i32>} : memref<1x16x1xf32, #tpu.memory_space<vmem>>, vector<1x16x1xf32>,
    %9 = arith.mulf %2, %2 : vector<16x128xf32>
    %cst_9 = arith.constant dense<0.000000e+00> : vector<16xf32>
    %10 = vector.multi_reduction <add>, %9, %cst_9 [1] : vector<16x128xf32> to vector<16xf32>
    %11 = vector.shape_cast %10 : vector<16xf32> to vector<16x1xf32>
    %12 = vector.shape_cast %11 : vector<16x1xf32> to vector<1x16x1xf32>
    %c0_10 = arith.constant 0 : index
    %c0_11 = arith.constant 0 : index
    %c0_12 = arith.constant 0 : index
    %13 = vector.load %arg5[%c0_10, %c0_11, %c0_12] : memref<1x16x1xf32, #tpu.memory_space<vmem>>, vector<1x16x1xf32>
    tpu.vector_store %arg5[%c0_10, %c0_11, %c0_12], %12 {strides = array<i32>} : memref<1x16x1xf32, #tpu.memory_space<vmem>>, vector<1x16x1xf32>,
    return
  }
  func.func @transform_0(%arg0: i32) -> (i32, i32) {
    %c0_i32 = arith.constant 0 : i32
    %c0_i32_0 = arith.constant 0 : i32
    %c0_i32_1 = arith.constant 0 : i32
    return %c0_i32, %c0_i32_0 : i32, i32
  }
  func.func @transform_1(%arg0: i32) -> (i32, i32) {
    %c0_i32 = arith.constant 0 : i32
    %c0_i32_0 = arith.constant 0 : i32
    return %c0_i32, %arg0 : i32, i32
  }
  func.func @transform_2(%arg0: i32) -> (i32, i32) {
    %c0_i32 = arith.constant 0 : i32
    %c0_i32_0 = arith.constant 0 : i32
    return %c0_i32, %arg0 : i32, i32
  }
  func.func @transform_3(%arg0: i32) -> (i32, i32, i32) {
    %c0_i32 = arith.constant 0 : i32
    %c0_i32_0 = arith.constant 0 : i32
    %c0_i32_1 = arith.constant 0 : i32
    return %arg0, %c0_i32, %c0_i32_0 : i32, i32, i32
  }
  func.func @transform_4(%arg0: i32) -> (i32, i32, i32) {
    %c0_i32 = arith.constant 0 : i32
    %c0_i32_0 = arith.constant 0 : i32
    %c0_i32_1 = arith.constant 0 : i32
    return %arg0, %c0_i32, %c0_i32_0 : i32, i32, i32
  }
}

module attributes {stable_mosaic.version = 11 : i64} {
  func.func @bn_relu_add_kernel(%arg0: i32, %arg1: memref<16x512xbf16, #tpu.memory_space<vmem>>, %arg2: memref<16x1xf32, #tpu.memory_space<vmem>>, %arg3: memref<16x1xf32, #tpu.memory_space<vmem>>, %arg4: memref<16x512xbf16, #tpu.memory_space<vmem>>, %arg5: memref<16x512xbf16, #tpu.memory_space<vmem>>) attributes {dimension_semantics = [#tpu.dimension_semantics<parallel>], iteration_bounds = array<i64: 1>, scalar_prefetch = 0 : i64, scratch_operands = 0 : i64, tpu.core_type = #tpu.core_type<tc>, window_params = [{transform_indices = @transform_0, window_bounds = array<i64: 16, 512>}, {pipeline_mode = #tpu.pipeline_mode<synchronous>, transform_indices = @transform_1, window_bounds = array<i64: 16, 1>}, {pipeline_mode = #tpu.pipeline_mode<synchronous>, transform_indices = @transform_2, window_bounds = array<i64: 16, 1>}, {transform_indices = @transform_3, window_bounds = array<i64: 16, 512>}, {transform_indices = @transform_4, window_bounds = array<i64: 16, 512>}]} {
    %c0 = arith.constant 0 : index
    %c0_0 = arith.constant 0 : index
    %0 = vector.load %arg1[%c0, %c0_0] : memref<16x512xbf16, #tpu.memory_space<vmem>>, vector<16x512xbf16>
    %1 = arith.extf %0 : vector<16x512xbf16> to vector<16x512xf32>
    %c0_1 = arith.constant 0 : index
    %c0_2 = arith.constant 0 : index
    %2 = vector.load %arg2[%c0_1, %c0_2] : memref<16x1xf32, #tpu.memory_space<vmem>>, vector<16x1xf32>
    %3 = vector.broadcast %2 : vector<16x1xf32> to vector<16x512xf32>
    %4 = arith.mulf %1, %3 : vector<16x512xf32>
    %c0_3 = arith.constant 0 : index
    %c0_4 = arith.constant 0 : index
    %5 = vector.load %arg3[%c0_3, %c0_4] : memref<16x1xf32, #tpu.memory_space<vmem>>, vector<16x1xf32>
    %6 = vector.broadcast %5 : vector<16x1xf32> to vector<16x512xf32>
    %7 = arith.addf %4, %6 : vector<16x512xf32>
    %cst = arith.constant 0.000000e+00 : f32
    %8 = vector.broadcast %cst : f32 to vector<16x512xf32>
    %9 = arith.maximumf %7, %8 : vector<16x512xf32>
    %c0_5 = arith.constant 0 : index
    %c0_6 = arith.constant 0 : index
    %10 = vector.load %arg4[%c0_5, %c0_6] : memref<16x512xbf16, #tpu.memory_space<vmem>>, vector<16x512xbf16>
    %11 = arith.extf %10 : vector<16x512xbf16> to vector<16x512xf32>
    %12 = arith.addf %11, %9 : vector<16x512xf32>
    %13 = arith.truncf %12 : vector<16x512xf32> to vector<16x512xbf16>
    %c0_7 = arith.constant 0 : index
    %c0_8 = arith.constant 0 : index
    %14 = vector.load %arg5[%c0_7, %c0_8] : memref<16x512xbf16, #tpu.memory_space<vmem>>, vector<16x512xbf16>
    tpu.vector_store %arg5[%c0_7, %c0_8], %13 {strides = array<i32>} : memref<16x512xbf16, #tpu.memory_space<vmem>>, vector<16x512xbf16>,
    return
  }
  func.func @transform_0(%arg0: i32) -> (i32, i32) {
    %c0_i32 = arith.constant 0 : i32
    %c0_i32_0 = arith.constant 0 : i32
    return %c0_i32, %arg0 : i32, i32
  }
  func.func @transform_1(%arg0: i32) -> (i32, i32) {
    %c0_i32 = arith.constant 0 : i32
    %c0_i32_0 = arith.constant 0 : i32
    %c0_i32_1 = arith.constant 0 : i32
    return %c0_i32, %c0_i32_0 : i32, i32
  }
  func.func @transform_2(%arg0: i32) -> (i32, i32) {
    %c0_i32 = arith.constant 0 : i32
    %c0_i32_0 = arith.constant 0 : i32
    %c0_i32_1 = arith.constant 0 : i32
    return %c0_i32, %c0_i32_0 : i32, i32
  }
  func.func @transform_3(%arg0: i32) -> (i32, i32) {
    %c0_i32 = arith.constant 0 : i32
    %c0_i32_0 = arith.constant 0 : i32
    return %c0_i32, %arg0 : i32, i32
  }
  func.func @transform_4(%arg0: i32) -> (i32, i32) {
    %c0_i32 = arith.constant 0 : i32
    %c0_i32_0 = arith.constant 0 : i32
    return %c0_i32, %arg0 : i32, i32
  }
}

module attributes {stable_mosaic.version = 11 : i64} {
  func.func @gemm_stats_kernel(%arg0: i32, %arg1: memref<8x128xbf16, #tpu.memory_space<vmem>>, %arg2: memref<128x512xbf16, #tpu.memory_space<vmem>>, %arg3: memref<8x512xbf16, #tpu.memory_space<vmem>>, %arg4: memref<1x8x1xf32, #tpu.memory_space<vmem>>, %arg5: memref<1x8x1xf32, #tpu.memory_space<vmem>>) attributes {dimension_semantics = [#tpu.dimension_semantics<parallel>], iteration_bounds = array<i64: 1>, scalar_prefetch = 0 : i64, scratch_operands = 0 : i64, tpu.core_type = #tpu.core_type<tc>, window_params = [{pipeline_mode = #tpu.pipeline_mode<synchronous>, transform_indices = @transform_0, window_bounds = array<i64: 8, 128>}, {transform_indices = @transform_1, window_bounds = array<i64: 128, 512>}, {transform_indices = @transform_2, window_bounds = array<i64: 8, 512>}, {transform_indices = @transform_3, window_bounds = array<i64: 1, 8, 1>}, {transform_indices = @transform_4, window_bounds = array<i64: 1, 8, 1>}]} {
    %c0 = arith.constant 0 : index
    %c0_0 = arith.constant 0 : index
    %0 = vector.load %arg1[%c0, %c0_0] : memref<8x128xbf16, #tpu.memory_space<vmem>>, vector<8x128xbf16>
    %c0_1 = arith.constant 0 : index
    %c0_2 = arith.constant 0 : index
    %1 = vector.load %arg2[%c0_1, %c0_2] : memref<128x512xbf16, #tpu.memory_space<vmem>>, vector<128x512xbf16>
    %cst = arith.constant dense<0.000000e+00> : vector<8x512xf32>
    %2 = tpu.matmul %0, %1, %cst {dimension_numbers = #tpu.dot_dimension_numbers<[1], [0], [0], [1], [0, 0, 1, 1], [], []>} : vector<8x128xbf16>, vector<128x512xbf16>, vector<8x512xf32> -> vector<8x512xf32>
    %3 = arith.truncf %2 : vector<8x512xf32> to vector<8x512xbf16>
    %c0_3 = arith.constant 0 : index
    %c0_4 = arith.constant 0 : index
    %4 = vector.load %arg3[%c0_3, %c0_4] : memref<8x512xbf16, #tpu.memory_space<vmem>>, vector<8x512xbf16>
    tpu.vector_store %arg3[%c0_3, %c0_4], %3 {strides = array<i32>} : memref<8x512xbf16, #tpu.memory_space<vmem>>, vector<8x512xbf16>,
    %cst_5 = arith.constant dense<0.000000e+00> : vector<8xf32>
    %5 = vector.multi_reduction <add>, %2, %cst_5 [1] : vector<8x512xf32> to vector<8xf32>
    %6 = vector.shape_cast %5 : vector<8xf32> to vector<8x1xf32>
    %7 = vector.shape_cast %6 : vector<8x1xf32> to vector<1x8x1xf32>
    %c0_6 = arith.constant 0 : index
    %c0_7 = arith.constant 0 : index
    %c0_8 = arith.constant 0 : index
    %8 = vector.load %arg4[%c0_6, %c0_7, %c0_8] : memref<1x8x1xf32, #tpu.memory_space<vmem>>, vector<1x8x1xf32>
    tpu.vector_store %arg4[%c0_6, %c0_7, %c0_8], %7 {strides = array<i32>} : memref<1x8x1xf32, #tpu.memory_space<vmem>>, vector<1x8x1xf32>,
    %9 = arith.mulf %2, %2 : vector<8x512xf32>
    %cst_9 = arith.constant dense<0.000000e+00> : vector<8xf32>
    %10 = vector.multi_reduction <add>, %9, %cst_9 [1] : vector<8x512xf32> to vector<8xf32>
    %11 = vector.shape_cast %10 : vector<8xf32> to vector<8x1xf32>
    %12 = vector.shape_cast %11 : vector<8x1xf32> to vector<1x8x1xf32>
    %c0_10 = arith.constant 0 : index
    %c0_11 = arith.constant 0 : index
    %c0_12 = arith.constant 0 : index
    %13 = vector.load %arg5[%c0_10, %c0_11, %c0_12] : memref<1x8x1xf32, #tpu.memory_space<vmem>>, vector<1x8x1xf32>
    tpu.vector_store %arg5[%c0_10, %c0_11, %c0_12], %12 {strides = array<i32>} : memref<1x8x1xf32, #tpu.memory_space<vmem>>, vector<1x8x1xf32>,
    return
  }
  func.func @transform_0(%arg0: i32) -> (i32, i32) {
    %c0_i32 = arith.constant 0 : i32
    %c0_i32_0 = arith.constant 0 : i32
    %c0_i32_1 = arith.constant 0 : i32
    return %c0_i32, %c0_i32_0 : i32, i32
  }
  func.func @transform_1(%arg0: i32) -> (i32, i32) {
    %c0_i32 = arith.constant 0 : i32
    %c0_i32_0 = arith.constant 0 : i32
    return %c0_i32, %arg0 : i32, i32
  }
  func.func @transform_2(%arg0: i32) -> (i32, i32) {
    %c0_i32 = arith.constant 0 : i32
    %c0_i32_0 = arith.constant 0 : i32
    return %c0_i32, %arg0 : i32, i32
  }
  func.func @transform_3(%arg0: i32) -> (i32, i32, i32) {
    %c0_i32 = arith.constant 0 : i32
    %c0_i32_0 = arith.constant 0 : i32
    %c0_i32_1 = arith.constant 0 : i32
    return %arg0, %c0_i32, %c0_i32_0 : i32, i32, i32
  }
  func.func @transform_4(%arg0: i32) -> (i32, i32, i32) {
    %c0_i32 = arith.constant 0 : i32
    %c0_i32_0 = arith.constant 0 : i32
    %c0_i32_1 = arith.constant 0 : i32
    return %arg0, %c0_i32, %c0_i32_0 : i32, i32, i32
  }
}

module attributes {stable_mosaic.version = 11 : i64} {
  func.func @gemm_stats_kernel(%arg0: i32, %arg1: memref<8x64xbf16, #tpu.memory_space<vmem>>, %arg2: memref<64x512xbf16, #tpu.memory_space<vmem>>, %arg3: memref<8x512xbf16, #tpu.memory_space<vmem>>, %arg4: memref<1x8x1xf32, #tpu.memory_space<vmem>>, %arg5: memref<1x8x1xf32, #tpu.memory_space<vmem>>) attributes {dimension_semantics = [#tpu.dimension_semantics<parallel>], iteration_bounds = array<i64: 1>, scalar_prefetch = 0 : i64, scratch_operands = 0 : i64, tpu.core_type = #tpu.core_type<tc>, window_params = [{pipeline_mode = #tpu.pipeline_mode<synchronous>, transform_indices = @transform_0, window_bounds = array<i64: 8, 64>}, {transform_indices = @transform_1, window_bounds = array<i64: 64, 512>}, {transform_indices = @transform_2, window_bounds = array<i64: 8, 512>}, {transform_indices = @transform_3, window_bounds = array<i64: 1, 8, 1>}, {transform_indices = @transform_4, window_bounds = array<i64: 1, 8, 1>}]} {
    %c0 = arith.constant 0 : index
    %c0_0 = arith.constant 0 : index
    %0 = vector.load %arg1[%c0, %c0_0] : memref<8x64xbf16, #tpu.memory_space<vmem>>, vector<8x64xbf16>
    %c0_1 = arith.constant 0 : index
    %c0_2 = arith.constant 0 : index
    %1 = vector.load %arg2[%c0_1, %c0_2] : memref<64x512xbf16, #tpu.memory_space<vmem>>, vector<64x512xbf16>
    %cst = arith.constant dense<0.000000e+00> : vector<8x512xf32>
    %2 = tpu.matmul %0, %1, %cst {dimension_numbers = #tpu.dot_dimension_numbers<[1], [0], [0], [1], [0, 0, 1, 1], [], []>} : vector<8x64xbf16>, vector<64x512xbf16>, vector<8x512xf32> -> vector<8x512xf32>
    %3 = arith.truncf %2 : vector<8x512xf32> to vector<8x512xbf16>
    %c0_3 = arith.constant 0 : index
    %c0_4 = arith.constant 0 : index
    %4 = vector.load %arg3[%c0_3, %c0_4] : memref<8x512xbf16, #tpu.memory_space<vmem>>, vector<8x512xbf16>
    tpu.vector_store %arg3[%c0_3, %c0_4], %3 {strides = array<i32>} : memref<8x512xbf16, #tpu.memory_space<vmem>>, vector<8x512xbf16>,
    %cst_5 = arith.constant dense<0.000000e+00> : vector<8xf32>
    %5 = vector.multi_reduction <add>, %2, %cst_5 [1] : vector<8x512xf32> to vector<8xf32>
    %6 = vector.shape_cast %5 : vector<8xf32> to vector<8x1xf32>
    %7 = vector.shape_cast %6 : vector<8x1xf32> to vector<1x8x1xf32>
    %c0_6 = arith.constant 0 : index
    %c0_7 = arith.constant 0 : index
    %c0_8 = arith.constant 0 : index
    %8 = vector.load %arg4[%c0_6, %c0_7, %c0_8] : memref<1x8x1xf32, #tpu.memory_space<vmem>>, vector<1x8x1xf32>
    tpu.vector_store %arg4[%c0_6, %c0_7, %c0_8], %7 {strides = array<i32>} : memref<1x8x1xf32, #tpu.memory_space<vmem>>, vector<1x8x1xf32>,
    %9 = arith.mulf %2, %2 : vector<8x512xf32>
    %cst_9 = arith.constant dense<0.000000e+00> : vector<8xf32>
    %10 = vector.multi_reduction <add>, %9, %cst_9 [1] : vector<8x512xf32> to vector<8xf32>
    %11 = vector.shape_cast %10 : vector<8xf32> to vector<8x1xf32>
    %12 = vector.shape_cast %11 : vector<8x1xf32> to vector<1x8x1xf32>
    %c0_10 = arith.constant 0 : index
    %c0_11 = arith.constant 0 : index
    %c0_12 = arith.constant 0 : index
    %13 = vector.load %arg5[%c0_10, %c0_11, %c0_12] : memref<1x8x1xf32, #tpu.memory_space<vmem>>, vector<1x8x1xf32>
    tpu.vector_store %arg5[%c0_10, %c0_11, %c0_12], %12 {strides = array<i32>} : memref<1x8x1xf32, #tpu.memory_space<vmem>>, vector<1x8x1xf32>,
    return
  }
  func.func @transform_0(%arg0: i32) -> (i32, i32) {
    %c0_i32 = arith.constant 0 : i32
    %c0_i32_0 = arith.constant 0 : i32
    %c0_i32_1 = arith.constant 0 : i32
    return %c0_i32, %c0_i32_0 : i32, i32
  }
  func.func @transform_1(%arg0: i32) -> (i32, i32) {
    %c0_i32 = arith.constant 0 : i32
    %c0_i32_0 = arith.constant 0 : i32
    return %c0_i32, %arg0 : i32, i32
  }
  func.func @transform_2(%arg0: i32) -> (i32, i32) {
    %c0_i32 = arith.constant 0 : i32
    %c0_i32_0 = arith.constant 0 : i32
    return %c0_i32, %arg0 : i32, i32
  }
  func.func @transform_3(%arg0: i32) -> (i32, i32, i32) {
    %c0_i32 = arith.constant 0 : i32
    %c0_i32_0 = arith.constant 0 : i32
    %c0_i32_1 = arith.constant 0 : i32
    return %arg0, %c0_i32, %c0_i32_0 : i32, i32, i32
  }
  func.func @transform_4(%arg0: i32) -> (i32, i32, i32) {
    %c0_i32 = arith.constant 0 : i32
    %c0_i32_0 = arith.constant 0 : i32
    %c0_i32_1 = arith.constant 0 : i32
    return %arg0, %c0_i32, %c0_i32_0 : i32, i32, i32
  }
}

module attributes {stable_mosaic.version = 11 : i64} {
  func.func @gemm_stats_kernel(%arg0: i32, %arg1: memref<8x32xbf16, #tpu.memory_space<vmem>>, %arg2: memref<32x512xbf16, #tpu.memory_space<vmem>>, %arg3: memref<8x512xbf16, #tpu.memory_space<vmem>>, %arg4: memref<1x8x1xf32, #tpu.memory_space<vmem>>, %arg5: memref<1x8x1xf32, #tpu.memory_space<vmem>>) attributes {dimension_semantics = [#tpu.dimension_semantics<parallel>], iteration_bounds = array<i64: 1>, scalar_prefetch = 0 : i64, scratch_operands = 0 : i64, tpu.core_type = #tpu.core_type<tc>, window_params = [{pipeline_mode = #tpu.pipeline_mode<synchronous>, transform_indices = @transform_0, window_bounds = array<i64: 8, 32>}, {transform_indices = @transform_1, window_bounds = array<i64: 32, 512>}, {transform_indices = @transform_2, window_bounds = array<i64: 8, 512>}, {transform_indices = @transform_3, window_bounds = array<i64: 1, 8, 1>}, {transform_indices = @transform_4, window_bounds = array<i64: 1, 8, 1>}]} {
    %c0 = arith.constant 0 : index
    %c0_0 = arith.constant 0 : index
    %0 = vector.load %arg1[%c0, %c0_0] : memref<8x32xbf16, #tpu.memory_space<vmem>>, vector<8x32xbf16>
    %c0_1 = arith.constant 0 : index
    %c0_2 = arith.constant 0 : index
    %1 = vector.load %arg2[%c0_1, %c0_2] : memref<32x512xbf16, #tpu.memory_space<vmem>>, vector<32x512xbf16>
    %cst = arith.constant dense<0.000000e+00> : vector<8x512xf32>
    %2 = tpu.matmul %0, %1, %cst {dimension_numbers = #tpu.dot_dimension_numbers<[1], [0], [0], [1], [0, 0, 1, 1], [], []>} : vector<8x32xbf16>, vector<32x512xbf16>, vector<8x512xf32> -> vector<8x512xf32>
    %3 = arith.truncf %2 : vector<8x512xf32> to vector<8x512xbf16>
    %c0_3 = arith.constant 0 : index
    %c0_4 = arith.constant 0 : index
    %4 = vector.load %arg3[%c0_3, %c0_4] : memref<8x512xbf16, #tpu.memory_space<vmem>>, vector<8x512xbf16>
    tpu.vector_store %arg3[%c0_3, %c0_4], %3 {strides = array<i32>} : memref<8x512xbf16, #tpu.memory_space<vmem>>, vector<8x512xbf16>,
    %cst_5 = arith.constant dense<0.000000e+00> : vector<8xf32>
    %5 = vector.multi_reduction <add>, %2, %cst_5 [1] : vector<8x512xf32> to vector<8xf32>
    %6 = vector.shape_cast %5 : vector<8xf32> to vector<8x1xf32>
    %7 = vector.shape_cast %6 : vector<8x1xf32> to vector<1x8x1xf32>
    %c0_6 = arith.constant 0 : index
    %c0_7 = arith.constant 0 : index
    %c0_8 = arith.constant 0 : index
    %8 = vector.load %arg4[%c0_6, %c0_7, %c0_8] : memref<1x8x1xf32, #tpu.memory_space<vmem>>, vector<1x8x1xf32>
    tpu.vector_store %arg4[%c0_6, %c0_7, %c0_8], %7 {strides = array<i32>} : memref<1x8x1xf32, #tpu.memory_space<vmem>>, vector<1x8x1xf32>,
    %9 = arith.mulf %2, %2 : vector<8x512xf32>
    %cst_9 = arith.constant dense<0.000000e+00> : vector<8xf32>
    %10 = vector.multi_reduction <add>, %9, %cst_9 [1] : vector<8x512xf32> to vector<8xf32>
    %11 = vector.shape_cast %10 : vector<8xf32> to vector<8x1xf32>
    %12 = vector.shape_cast %11 : vector<8x1xf32> to vector<1x8x1xf32>
    %c0_10 = arith.constant 0 : index
    %c0_11 = arith.constant 0 : index
    %c0_12 = arith.constant 0 : index
    %13 = vector.load %arg5[%c0_10, %c0_11, %c0_12] : memref<1x8x1xf32, #tpu.memory_space<vmem>>, vector<1x8x1xf32>
    tpu.vector_store %arg5[%c0_10, %c0_11, %c0_12], %12 {strides = array<i32>} : memref<1x8x1xf32, #tpu.memory_space<vmem>>, vector<1x8x1xf32>,
    return
  }
  func.func @transform_0(%arg0: i32) -> (i32, i32) {
    %c0_i32 = arith.constant 0 : i32
    %c0_i32_0 = arith.constant 0 : i32
    %c0_i32_1 = arith.constant 0 : i32
    return %c0_i32, %c0_i32_0 : i32, i32
  }
  func.func @transform_1(%arg0: i32) -> (i32, i32) {
    %c0_i32 = arith.constant 0 : i32
    %c0_i32_0 = arith.constant 0 : i32
    return %c0_i32, %arg0 : i32, i32
  }
  func.func @transform_2(%arg0: i32) -> (i32, i32) {
    %c0_i32 = arith.constant 0 : i32
    %c0_i32_0 = arith.constant 0 : i32
    return %c0_i32, %arg0 : i32, i32
  }
  func.func @transform_3(%arg0: i32) -> (i32, i32, i32) {
    %c0_i32 = arith.constant 0 : i32
    %c0_i32_0 = arith.constant 0 : i32
    %c0_i32_1 = arith.constant 0 : i32
    return %arg0, %c0_i32, %c0_i32_0 : i32, i32, i32
  }
  func.func @transform_4(%arg0: i32) -> (i32, i32, i32) {
    %c0_i32 = arith.constant 0 : i32
    %c0_i32_0 = arith.constant 0 : i32
    %c0_i32_1 = arith.constant 0 : i32
    return %arg0, %c0_i32, %c0_i32_0 : i32, i32, i32
  }
}

module attributes {stable_mosaic.version = 11 : i64} {
  func.func @gemm_stats_kernel(%arg0: i32, %arg1: memref<8x16xbf16, #tpu.memory_space<vmem>>, %arg2: memref<16x512xbf16, #tpu.memory_space<vmem>>, %arg3: memref<8x512xbf16, #tpu.memory_space<vmem>>, %arg4: memref<1x8x1xf32, #tpu.memory_space<vmem>>, %arg5: memref<1x8x1xf32, #tpu.memory_space<vmem>>) attributes {dimension_semantics = [#tpu.dimension_semantics<parallel>], iteration_bounds = array<i64: 1>, scalar_prefetch = 0 : i64, scratch_operands = 0 : i64, tpu.core_type = #tpu.core_type<tc>, window_params = [{pipeline_mode = #tpu.pipeline_mode<synchronous>, transform_indices = @transform_0, window_bounds = array<i64: 8, 16>}, {transform_indices = @transform_1, window_bounds = array<i64: 16, 512>}, {transform_indices = @transform_2, window_bounds = array<i64: 8, 512>}, {transform_indices = @transform_3, window_bounds = array<i64: 1, 8, 1>}, {transform_indices = @transform_4, window_bounds = array<i64: 1, 8, 1>}]} {
    %c0 = arith.constant 0 : index
    %c0_0 = arith.constant 0 : index
    %0 = vector.load %arg1[%c0, %c0_0] : memref<8x16xbf16, #tpu.memory_space<vmem>>, vector<8x16xbf16>
    %c0_1 = arith.constant 0 : index
    %c0_2 = arith.constant 0 : index
    %1 = vector.load %arg2[%c0_1, %c0_2] : memref<16x512xbf16, #tpu.memory_space<vmem>>, vector<16x512xbf16>
    %cst = arith.constant dense<0.000000e+00> : vector<8x512xf32>
    %2 = tpu.matmul %0, %1, %cst {dimension_numbers = #tpu.dot_dimension_numbers<[1], [0], [0], [1], [0, 0, 1, 1], [], []>} : vector<8x16xbf16>, vector<16x512xbf16>, vector<8x512xf32> -> vector<8x512xf32>
    %3 = arith.truncf %2 : vector<8x512xf32> to vector<8x512xbf16>
    %c0_3 = arith.constant 0 : index
    %c0_4 = arith.constant 0 : index
    %4 = vector.load %arg3[%c0_3, %c0_4] : memref<8x512xbf16, #tpu.memory_space<vmem>>, vector<8x512xbf16>
    tpu.vector_store %arg3[%c0_3, %c0_4], %3 {strides = array<i32>} : memref<8x512xbf16, #tpu.memory_space<vmem>>, vector<8x512xbf16>,
    %cst_5 = arith.constant dense<0.000000e+00> : vector<8xf32>
    %5 = vector.multi_reduction <add>, %2, %cst_5 [1] : vector<8x512xf32> to vector<8xf32>
    %6 = vector.shape_cast %5 : vector<8xf32> to vector<8x1xf32>
    %7 = vector.shape_cast %6 : vector<8x1xf32> to vector<1x8x1xf32>
    %c0_6 = arith.constant 0 : index
    %c0_7 = arith.constant 0 : index
    %c0_8 = arith.constant 0 : index
    %8 = vector.load %arg4[%c0_6, %c0_7, %c0_8] : memref<1x8x1xf32, #tpu.memory_space<vmem>>, vector<1x8x1xf32>
    tpu.vector_store %arg4[%c0_6, %c0_7, %c0_8], %7 {strides = array<i32>} : memref<1x8x1xf32, #tpu.memory_space<vmem>>, vector<1x8x1xf32>,
    %9 = arith.mulf %2, %2 : vector<8x512xf32>
    %cst_9 = arith.constant dense<0.000000e+00> : vector<8xf32>
    %10 = vector.multi_reduction <add>, %9, %cst_9 [1] : vector<8x512xf32> to vector<8xf32>
    %11 = vector.shape_cast %10 : vector<8xf32> to vector<8x1xf32>
    %12 = vector.shape_cast %11 : vector<8x1xf32> to vector<1x8x1xf32>
    %c0_10 = arith.constant 0 : index
    %c0_11 = arith.constant 0 : index
    %c0_12 = arith.constant 0 : index
    %13 = vector.load %arg5[%c0_10, %c0_11, %c0_12] : memref<1x8x1xf32, #tpu.memory_space<vmem>>, vector<1x8x1xf32>
    tpu.vector_store %arg5[%c0_10, %c0_11, %c0_12], %12 {strides = array<i32>} : memref<1x8x1xf32, #tpu.memory_space<vmem>>, vector<1x8x1xf32>,
    return
  }
  func.func @transform_0(%arg0: i32) -> (i32, i32) {
    %c0_i32 = arith.constant 0 : i32
    %c0_i32_0 = arith.constant 0 : i32
    %c0_i32_1 = arith.constant 0 : i32
    return %c0_i32, %c0_i32_0 : i32, i32
  }
  func.func @transform_1(%arg0: i32) -> (i32, i32) {
    %c0_i32 = arith.constant 0 : i32
    %c0_i32_0 = arith.constant 0 : i32
    return %c0_i32, %arg0 : i32, i32
  }
  func.func @transform_2(%arg0: i32) -> (i32, i32) {
    %c0_i32 = arith.constant 0 : i32
    %c0_i32_0 = arith.constant 0 : i32
    return %c0_i32, %arg0 : i32, i32
  }
  func.func @transform_3(%arg0: i32) -> (i32, i32, i32) {
    %c0_i32 = arith.constant 0 : i32
    %c0_i32_0 = arith.constant 0 : i32
    %c0_i32_1 = arith.constant 0 : i32
    return %arg0, %c0_i32, %c0_i32_0 : i32, i32, i32
  }
  func.func @transform_4(%arg0: i32) -> (i32, i32, i32) {
    %c0_i32 = arith.constant 0 : i32
    %c0_i32_0 = arith.constant 0 : i32
    %c0_i32_1 = arith.constant 0 : i32
    return %arg0, %c0_i32, %c0_i32_0 : i32, i32, i32
  }
}

module attributes {stable_mosaic.version = 11 : i64} {
  func.func @bn_relu_add_kernel(%arg0: i32, %arg1: memref<8x2048xbf16, #tpu.memory_space<vmem>>, %arg2: memref<8x1xf32, #tpu.memory_space<vmem>>, %arg3: memref<8x1xf32, #tpu.memory_space<vmem>>, %arg4: memref<8x2048xbf16, #tpu.memory_space<vmem>>, %arg5: memref<8x2048xbf16, #tpu.memory_space<vmem>>) attributes {dimension_semantics = [#tpu.dimension_semantics<parallel>], iteration_bounds = array<i64: 2>, scalar_prefetch = 0 : i64, scratch_operands = 0 : i64, tpu.core_type = #tpu.core_type<tc>, window_params = [{transform_indices = @transform_0, window_bounds = array<i64: 8, 2048>}, {pipeline_mode = #tpu.pipeline_mode<synchronous>, transform_indices = @transform_1, window_bounds = array<i64: 8, 1>}, {pipeline_mode = #tpu.pipeline_mode<synchronous>, transform_indices = @transform_2, window_bounds = array<i64: 8, 1>}, {transform_indices = @transform_3, window_bounds = array<i64: 8, 2048>}, {transform_indices = @transform_4, window_bounds = array<i64: 8, 2048>}]} {
    %c0 = arith.constant 0 : index
    %c0_0 = arith.constant 0 : index
    %0 = vector.load %arg1[%c0, %c0_0] : memref<8x2048xbf16, #tpu.memory_space<vmem>>, vector<8x2048xbf16>
    %1 = arith.extf %0 : vector<8x2048xbf16> to vector<8x2048xf32>
    %c0_1 = arith.constant 0 : index
    %c0_2 = arith.constant 0 : index
    %2 = vector.load %arg2[%c0_1, %c0_2] : memref<8x1xf32, #tpu.memory_space<vmem>>, vector<8x1xf32>
    %3 = vector.broadcast %2 : vector<8x1xf32> to vector<8x2048xf32>
    %4 = arith.mulf %1, %3 : vector<8x2048xf32>
    %c0_3 = arith.constant 0 : index
    %c0_4 = arith.constant 0 : index
    %5 = vector.load %arg3[%c0_3, %c0_4] : memref<8x1xf32, #tpu.memory_space<vmem>>, vector<8x1xf32>
    %6 = vector.broadcast %5 : vector<8x1xf32> to vector<8x2048xf32>
    %7 = arith.addf %4, %6 : vector<8x2048xf32>
    %cst = arith.constant 0.000000e+00 : f32
    %8 = vector.broadcast %cst : f32 to vector<8x2048xf32>
    %9 = arith.maximumf %7, %8 : vector<8x2048xf32>
    %c0_5 = arith.constant 0 : index
    %c0_6 = arith.constant 0 : index
    %10 = vector.load %arg4[%c0_5, %c0_6] : memref<8x2048xbf16, #tpu.memory_space<vmem>>, vector<8x2048xbf16>
    %11 = arith.extf %10 : vector<8x2048xbf16> to vector<8x2048xf32>
    %12 = arith.addf %11, %9 : vector<8x2048xf32>
    %13 = arith.truncf %12 : vector<8x2048xf32> to vector<8x2048xbf16>
    %c0_7 = arith.constant 0 : index
    %c0_8 = arith.constant 0 : index
    %14 = vector.load %arg5[%c0_7, %c0_8] : memref<8x2048xbf16, #tpu.memory_space<vmem>>, vector<8x2048xbf16>
    tpu.vector_store %arg5[%c0_7, %c0_8], %13 {strides = array<i32>} : memref<8x2048xbf16, #tpu.memory_space<vmem>>, vector<8x2048xbf16>,
    return
  }
  func.func @transform_0(%arg0: i32) -> (i32, i32) {
    %c0_i32 = arith.constant 0 : i32
    %c0_i32_0 = arith.constant 0 : i32
    return %c0_i32, %arg0 : i32, i32
  }
  func.func @transform_1(%arg0: i32) -> (i32, i32) {
    %c0_i32 = arith.constant 0 : i32
    %c0_i32_0 = arith.constant 0 : i32
    %c0_i32_1 = arith.constant 0 : i32
    return %c0_i32, %c0_i32_0 : i32, i32
  }
  func.func @transform_2(%arg0: i32) -> (i32, i32) {
    %c0_i32 = arith.constant 0 : i32
    %c0_i32_0 = arith.constant 0 : i32
    %c0_i32_1 = arith.constant 0 : i32
    return %c0_i32, %c0_i32_0 : i32, i32
  }
  func.func @transform_3(%arg0: i32) -> (i32, i32) {
    %c0_i32 = arith.constant 0 : i32
    %c0_i32_0 = arith.constant 0 : i32
    return %c0_i32, %arg0 : i32, i32
  }
  func.func @transform_4(%arg0: i32) -> (i32, i32) {
    %c0_i32 = arith.constant 0 : i32
    %c0_i32_0 = arith.constant 0 : i32
    return %c0_i32, %arg0 : i32, i32
  }
}

module attributes {stable_mosaic.version = 11 : i64} {
  func.func @gemm_kernel(%arg0: i32, %arg1: memref<8x216xbf16, #tpu.memory_space<vmem>>, %arg2: memref<216x2048xbf16, #tpu.memory_space<vmem>>, %arg3: memref<8x2048xf32, #tpu.memory_space<vmem>>) attributes {dimension_semantics = [#tpu.dimension_semantics<parallel>], iteration_bounds = array<i64: 2>, scalar_prefetch = 0 : i64, scratch_operands = 0 : i64, tpu.core_type = #tpu.core_type<tc>, window_params = [{pipeline_mode = #tpu.pipeline_mode<synchronous>, transform_indices = @transform_0, window_bounds = array<i64: 8, 216>}, {transform_indices = @transform_1, window_bounds = array<i64: 216, 2048>}, {transform_indices = @transform_2, window_bounds = array<i64: 8, 2048>}]} {
    %c0 = arith.constant 0 : index
    %c0_0 = arith.constant 0 : index
    %0 = vector.load %arg1[%c0, %c0_0] : memref<8x216xbf16, #tpu.memory_space<vmem>>, vector<8x216xbf16>
    %c0_1 = arith.constant 0 : index
    %c0_2 = arith.constant 0 : index
    %1 = vector.load %arg2[%c0_1, %c0_2] : memref<216x2048xbf16, #tpu.memory_space<vmem>>, vector<216x2048xbf16>
    %cst = arith.constant dense<0.000000e+00> : vector<8x2048xf32>
    %2 = tpu.matmul %0, %1, %cst {dimension_numbers = #tpu.dot_dimension_numbers<[1], [0], [0], [1], [0, 0, 1, 1], [], []>} : vector<8x216xbf16>, vector<216x2048xbf16>, vector<8x2048xf32> -> vector<8x2048xf32>
    %c0_3 = arith.constant 0 : index
    %c0_4 = arith.constant 0 : index
    %3 = vector.load %arg3[%c0_3, %c0_4] : memref<8x2048xf32, #tpu.memory_space<vmem>>, vector<8x2048xf32>
    tpu.vector_store %arg3[%c0_3, %c0_4], %2 {strides = array<i32>} : memref<8x2048xf32, #tpu.memory_space<vmem>>, vector<8x2048xf32>,
    return
  }
  func.func @transform_0(%arg0: i32) -> (i32, i32) {
    %c0_i32 = arith.constant 0 : i32
    %c0_i32_0 = arith.constant 0 : i32
    %c0_i32_1 = arith.constant 0 : i32
    return %c0_i32, %c0_i32_0 : i32, i32
  }
  func.func @transform_1(%arg0: i32) -> (i32, i32) {
    %c0_i32 = arith.constant 0 : i32
    %c0_i32_0 = arith.constant 0 : i32
    return %c0_i32, %arg0 : i32, i32
  }
  func.func @transform_2(%arg0: i32) -> (i32, i32) {
    %c0_i32 = arith.constant 0 : i32
    %c0_i32_0 = arith.constant 0 : i32
    return %c0_i32, %arg0 : i32, i32
  }
}

</mosaic_0001>

<bundles_post_ra>
// kernel: costregnet_small_forward.31
= control target key start
LH: loop header
LB: loop body
LE: loop exit
PB: predicated region body
PF: predicated region fallthrough
CT: control target
= control target key end

     0   :  { %s1986_s15 = smov 0   ;;  %s1988_s16 = smov 0   ;;  %s2444_s0 = inlined_call_operand.vmem [shape: bf16[8,108], index: 0, kind: input, shape index: {}]   ;;  %s2445_s1 = inlined_call_operand.vmem [shape: bf16[108,4096], index: 1, kind: input, shape index: {}]   ;;  %s2446_s2 = inlined_call_operand.vmem [shape: bf16[8,4096], index: 2, kind: output, shape index: {0}]   ;;  %s2447_s3 = inlined_call_operand.vmem [shape: f32[2,8,1], index: 3, kind: output, shape index: {1}]   ;;  %s2448_s4 = inlined_call_operand.vmem [shape: f32[2,8,1], index: 4, kind: output, shape index: {2}]  }
   0x1   :  { %s1990_s17 = smov 0  }
   0x2 LB: > { %s2002_s18 = sadd.s32 4294967295, %s1958_s17   ;;  %s2005_s19 = sadd.s32 1, %s1958_s17   ;;  %s1958_s17 = sphi %s1990_s17, %s2451_s17   ;;  %s1954_s16 = sphi %s1988_s16, %s2450_s16   ;;  %s1950_s15 = sphi %s1986_s15, %s2449_s15  }
   0x3   : > { %s40_s20 = ssub.s32 %s1958_s17, %s2005_s19  ;;  %s43_s21 = sadd.s32 1, %s1954_s16 }
   0x4   : > { %p41_p0 = scmp.eq.s32.totalorder %s40_s20, 0  ;;  %p50_p1 = scmp.ne.s32.totalorder %s1954_s16, %s1950_s15 }
   0x5   : > { %p51_p2 = scmp.eq.s32.totalorder %s1958_s17, 0  ;;  %p1754_p4 = scmp.ge.s32.totalorder %s1958_s17, 2 }
   0x6   : > { %s2014_s22 = scalar_select %p41_p0, %s1954_s16, %s43_s21  }
   0x7   : > { %p52_p3 = por %p51_p2, %p50_p1  ;;  %157 = sbr.rel (%p1754_p4) target bundleno = 75 (0x4b), region = 20 }
   0xe   : > { %160 = sbr.rel (!%p52_p3) target bundleno = 75 (0x4b), region = 24  ;;  %s162_s23 = sand.u32 (%p52_p3), 1, %s1954_s16  }
   0xf   : > { %s1900_s24 = sshll.u32 (%p52_p3), %s1958_s17, 6  ;;  %s1909_s25 = smul.u32 (%p52_p3), 896, %s162_s23 }
  0x10   : > { %s2022_s28 = scalar_lea.vmem (%p52_p3), %s2445_s1, %s1900_s24 }
  0x11   : > { %v180_v0 = vld [vmem:[%s2022_s28] sm:$0xff] (%p52_p3)  ;;  %v182_v1 = vld [vmem:[%s2022_s28 + $0x8] sm:$0xff] (%p52_p3)  ;;  %v184_v2 = vld [vmem:[%s2022_s28 + $0x10] sm:$0xff] (%p52_p3)  ;;  %s2030_s29 = scalar_lea.vmem (%p52_p3), [#allocation2], %s1909_s25 }
  0x12   : > { %v186_v3 = vld [vmem:[%s2022_s28 + $0x18] sm:$0xff] (%p52_p3)  ;;  %v188_v4 = vld [vmem:[%s2022_s28 + $0x20] sm:$0xff] (%p52_p3)  ;;  %v190_v5 = vld [vmem:[%s2022_s28 + $0x28] sm:$0xff] (%p52_p3)  ;;  %181 = vst [vmem:[%s2030_s29] sm:$0xff] (%p52_p3), %v180_v0 }
  0x13   : > { %183 = vst [vmem:[%s2030_s29 + $0x8] sm:$0xff] (%p52_p3), %v182_v1  ;;  %185 = vst [vmem:[%s2030_s29 + $0x10] sm:$0xff] (%p52_p3), %v184_v2  ;;  %v192_v6 = vld [vmem:[%s2022_s28 + $0x30] sm:$0xff] (%p52_p3)  ;;  %v194_v7 = vld [vmem:[%s2022_s28 + $0x38] sm:$0xff] (%p52_p3) }
  0x14   : > { %187 = vst [vmem:[%s2030_s29 + $0x18] sm:$0xff] (%p52_p3), %v186_v3  ;;  %189 = vst [vmem:[%s2030_s29 + $0x20] sm:$0xff] (%p52_p3), %v188_v4  ;;  %v196_v8 = vld [vmem:[%s2022_s28 + $0x80] sm:$0xff] (%p52_p3)  ;;  %v198_v9 = vld [vmem:[%s2022_s28 + $0x88] sm:$0xff] (%p52_p3) }
  0x15   : > { %191 = vst [vmem:[%s2030_s29 + $0x28] sm:$0xff] %v190_v5  ;;  %193 = vst [vmem:[%s2030_s29 + $0x30] sm:$0xff] %v192_v6  ;;  %v200_v10 = vld [vmem:[%s2022_s28 + $0x90] sm:$0xff]  ;;  %v202_v11 = vld [vmem:[%s2022_s28 + $0x98] sm:$0xff] }
  0x16   : > { %195 = vst [vmem:[%s2030_s29 + $0x38] sm:$0xff] %v194_v7  ;;  %197 = vst [vmem:[%s2030_s29 + $0x40] sm:$0xff] %v196_v8  ;;  %v204_v12 = vld [vmem:[%s2022_s28 + $0xa0] sm:$0xff]  ;;  %v206_v13 = vld [vmem:[%s2022_s28 + $0xa8] sm:$0xff] }
  0x17   : > { %199 = vst [vmem:[%s2030_s29 + $0x48] sm:$0xff] %v198_v9  ;;  %201 = vst [vmem:[%s2030_s29 + $0x50] sm:$0xff] %v200_v10  ;;  %v208_v14 = vld [vmem:[%s2022_s28 + $0xb0] sm:$0xff]  ;;  %v210_v15 = vld [vmem:[%s2022_s28 + $0xb8] sm:$0xff] }
  0x18   : > { %203 = vst [vmem:[%s2030_s29 + $0x58] sm:$0xff] %v202_v11  ;;  %205 = vst [vmem:[%s2030_s29 + $0x60] sm:$0xff] %v204_v12  ;;  %v212_v16 = vld [vmem:[%s2022_s28 + $0x100] sm:$0xff]  ;;  %v214_v17 = vld [vmem:[%s2022_s28 + $0x108] sm:$0xff] }
  0x19   : > { %207 = vst [vmem:[%s2030_s29 + $0x68] sm:$0xff] %v206_v13  ;;  %209 = vst [vmem:[%s2030_s29 + $0x70] sm:$0xff] %v208_v14  ;;  %v216_v18 = vld [vmem:[%s2022_s28 + $0x110] sm:$0xff]  ;;  %v218_v19 = vld [vmem:[%s2022_s28 + $0x118] sm:$0xff] }
  0x1a   : > { %211 = vst [vmem:[%s2030_s29 + $0x78] sm:$0xff] %v210_v15  ;;  %213 = vst [vmem:[%s2030_s29 + $0x80] sm:$0xff] %v212_v16  ;;  %v220_v20 = vld [vmem:[%s2022_s28 + $0x120] sm:$0xff]  ;;  %v222_v21 = vld [vmem:[%s2022_s28 + $0x128] sm:$0xff] }
  0x1b   : > { %215 = vst [vmem:[%s2030_s29 + $0x88] sm:$0xff] %v214_v17  ;;  %217 = vst [vmem:[%s2030_s29 + $0x90] sm:$0xff] %v216_v18  ;;  %v224_v22 = vld [vmem:[%s2022_s28 + $0x130] sm:$0xff]  ;;  %v226_v23 = vld [vmem:[%s2022_s28 + $0x138] sm:$0xff] }
  0x1c   : > { %219 = vst [vmem:[%s2030_s29 + $0x98] sm:$0xff] %v218_v19  ;;  %221 = vst [vmem:[%s2030_s29 + $0xa0] sm:$0xff] %v220_v20  ;;  %v228_v24 = vld [vmem:[%s2022_s28 + $0x180] sm:$0xff]  ;;  %v230_v25 = vld [vmem:[%s2022_s28 + $0x188] sm:$0xff] }
  0x1d   : > { %223 = vst [vmem:[%s2030_s29 + $0xa8] sm:$0xff] %v222_v21  ;;  %225 = vst [vmem:[%s2030_s29 + $0xb0] sm:$0xff] %v224_v22  ;;  %v232_v26 = vld [vmem:[%s2022_s28 + $0x190] sm:$0xff]  ;;  %v234_v27 = vld [vmem:[%s2022_s28 + $0x198] sm:$0xff] }
  0x1e   : > { %227 = vst [vmem:[%s2030_s29 + $0xb8] sm:$0xff] %v226_v23  ;;  %229 = vst [vmem:[%s2030_s29 + $0xc0] sm:$0xff] %v228_v24  ;;  %v236_v28 = vld [vmem:[%s2022_s28 + $0x1a0] sm:$0xff]  ;;  %v238_v29 = vld [vmem:[%s2022_s28 + $0x1a8] sm:$0xff] }
  0x1f   : > { %231 = vst [vmem:[%s2030_s29 + $0xc8] sm:$0xff] %v230_v25  ;;  %233 = vst [vmem:[%s2030_s29 + $0xd0] sm:$0xff] %v232_v26  ;;  %v240_v30 = vld [vmem:[%s2022_s28 + $0x1b0] sm:$0xff]  ;;  %v242_v31 = vld [vmem:[%s2022_s28 + $0x1b8] sm:$0xff] }
  0x20   : > { %235 = vst [vmem:[%s2030_s29 + $0xd8] sm:$0xff] %v234_v27  ;;  %237 = vst [vmem:[%s2030_s29 + $0xe0] sm:$0xff] %v236_v28  ;;  %v244_v32 = vld [vmem:[%s2022_s28 + $0x200] sm:$0xff]  ;;  %v246_v33 = vld [vmem:[%s2022_s28 + $0x208] sm:$0xff] }
  0x21   : > { %239 = vst [vmem:[%s2030_s29 + $0xe8] sm:$0xff] %v238_v29  ;;  %241 = vst [vmem:[%s2030_s29 + $0xf0] sm:$0xff] %v240_v30  ;;  %v248_v34 = vld [vmem:[%s2022_s28 + $0x210] sm:$0xff]  ;;  %v250_v35 = vld [vmem:[%s2022_s28 + $0x218] sm:$0xff] }
  0x22   : > { %243 = vst [vmem:[%s2030_s29 + $0xf8] sm:$0xff] %v242_v31  ;;  %245 = vst [vmem:[%s2030_s29 + $0x100] sm:$0xff] %v244_v32  ;;  %v252_v36 = vld [vmem:[%s2022_s28 + $0x220] sm:$0xff]  ;;  %v254_v37 = vld [vmem:[%s2022_s28 + $0x228] sm:$0xff] }
  0x23   : > { %247 = vst [vmem:[%s2030_s29 + $0x108] sm:$0xff] %v246_v33  ;;  %249 = vst [vmem:[%s2030_s29 + $0x110] sm:$0xff] %v248_v34  ;;  %v256_v38 = vld [vmem:[%s2022_s28 + $0x230] sm:$0xff]  ;;  %v258_v39 = vld [vmem:[%s2022_s28 + $0x238] sm:$0xff] }
  0x24   : > { %251 = vst [vmem:[%s2030_s29 + $0x118] sm:$0xff] %v250_v35  ;;  %253 = vst [vmem:[%s2030_s29 + $0x120] sm:$0xff] %v252_v36  ;;  %v260_v40 = vld [vmem:[%s2022_s28 + $0x280] sm:$0xff]  ;;  %v262_v41 = vld [vmem:[%s2022_s28 + $0x288] sm:$0xff] }
  0x25   : > { %255 = vst [vmem:[%s2030_s29 + $0x128] sm:$0xff] %v254_v37  ;;  %257 = vst [vmem:[%s2030_s29 + $0x130] sm:$0xff] %v256_v38  ;;  %v264_v42 = vld [vmem:[%s2022_s28 + $0x290] sm:$0xff]  ;;  %v266_v43 = vld [vmem:[%s2022_s28 + $0x298] sm:$0xff] }
  0x26   : > { %259 = vst [vmem:[%s2030_s29 + $0x138] sm:$0xff] %v258_v39  ;;  %261 = vst [vmem:[%s2030_s29 + $0x140] sm:$0xff] %v260_v40  ;;  %v268_v44 = vld [vmem:[%s2022_s28 + $0x2a0] sm:$0xff]  ;;  %v270_v45 = vld [vmem:[%s2022_s28 + $0x2a8] sm:$0xff] }
  0x27   : > { %263 = vst [vmem:[%s2030_s29 + $0x148] sm:$0xff] %v262_v41  ;;  %265 = vst [vmem:[%s2030_s29 + $0x150] sm:$0xff] %v264_v42  ;;  %v272_v46 = vld [vmem:[%s2022_s28 + $0x2b0] sm:$0xff]  ;;  %v274_v47 = vld [vmem:[%s2022_s28 + $0x2b8] sm:$0xff] }
  0x28   : > { %267 = vst [vmem:[%s2030_s29 + $0x158] sm:$0xff] %v266_v43  ;;  %269 = vst [vmem:[%s2030_s29 + $0x160] sm:$0xff] %v268_v44  ;;  %v276_v48 = vld [vmem:[%s2022_s28 + $0x300] sm:$0xff]  ;;  %v278_v49 = vld [vmem:[%s2022_s28 + $0x308] sm:$0xff] }
  0x29   : > { %271 = vst [vmem:[%s2030_s29 + $0x168] sm:$0xff] %v270_v45  ;;  %273 = vst [vmem:[%s2030_s29 + $0x170] sm:$0xff] %v272_v46  ;;  %v280_v50 = vld [vmem:[%s2022_s28 + $0x310] sm:$0xff]  ;;  %v282_v51 = vld [vmem:[%s2022_s28 + $0x318] sm:$0xff] }
  0x2a   : > { %275 = vst [vmem:[%s2030_s29 + $0x178] sm:$0xff] %v274_v47  ;;  %277 = vst [vmem:[%s2030_s29 + $0x180] sm:$0xff] %v276_v48  ;;  %v284_v52 = vld [vmem:[%s2022_s28 + $0x320] sm:$0xff]  ;;  %v286_v53 = vld [vmem:[%s2022_s28 + $0x328] sm:$0xff] }
  0x2b   : > { %279 = vst [vmem:[%s2030_s29 + $0x188] sm:$0xff] %v278_v49  ;;  %281 = vst [vmem:[%s2030_s29 + $0x190] sm:$0xff] %v280_v50  ;;  %v288_v54 = vld [vmem:[%s2022_s28 + $0x330] sm:$0xff]  ;;  %v290_v55 = vld [vmem:[%s2022_s28 + $0x338] sm:$0xff] }
  0x2c   : > { %283 = vst [vmem:[%s2030_s29 + $0x198] sm:$0xff] %v282_v51  ;;  %285 = vst [vmem:[%s2030_s29 + $0x1a0] sm:$0xff] %v284_v52  ;;  %v292_v56 = vld [vmem:[%s2022_s28 + $0x380] sm:$0xff]  ;;  %v294_v57 = vld [vmem:[%s2022_s28 + $0x388] sm:$0xff] }
  0x2d   : > { %287 = vst [vmem:[%s2030_s29 + $0x1a8] sm:$0xff] %v286_v53  ;;  %289 = vst [vmem:[%s2030_s29 + $0x1b0] sm:$0xff] %v288_v54  ;;  %v296_v58 = vld [vmem:[%s2022_s28 + $0x390] sm:$0xff]  ;;  %v298_v59 = vld [vmem:[%s2022_s28 + $0x398] sm:$0xff] }
  0x2e   : > { %291 = vst [vmem:[%s2030_s29 + $0x1b8] sm:$0xff] %v290_v55  ;;  %293 = vst [vmem:[%s2030_s29 + $0x1c0] sm:$0xff] %v292_v56  ;;  %v300_v60 = vld [vmem:[%s2022_s28 + $0x3a0] sm:$0xff]  ;;  %v302_v61 = vld [vmem:[%s2022_s28 + $0x3a8] sm:$0xff] }
  0x2f   : > { %295 = vst [vmem:[%s2030_s29 + $0x1c8] sm:$0xff] %v294_v57  ;;  %297 = vst [vmem:[%s2030_s29 + $0x1d0] sm:$0xff] %v296_v58  ;;  %v304_v62 = vld [vmem:[%s2022_s28 + $0x3b0] sm:$0xff]  ;;  %v306_v63 = vld [vmem:[%s2022_s28 + $0x3b8] sm:$0xff] }
  0x30   : > { %299 = vst [vmem:[%s2030_s29 + $0x1d8] sm:$0xff] %v298_v59  ;;  %301 = vst [vmem:[%s2030_s29 + $0x1e0] sm:$0xff] %v300_v60  ;;  %v308_v0 = vld [vmem:[%s2022_s28 + $0x400] sm:$0xff]  ;;  %v310_v1 = vld [vmem:[%s2022_s28 + $0x408] sm:$0xff] }
  0x31   : > { %303 = vst [vmem:[%s2030_s29 + $0x1e8] sm:$0xff] %v302_v61  ;;  %305 = vst [vmem:[%s2030_s29 + $0x1f0] sm:$0xff] %v304_v62  ;;  %v312_v2 = vld [vmem:[%s2022_s28 + $0x410] sm:$0xff]  ;;  %v314_v3 = vld [vmem:[%s2022_s28 + $0x418] sm:$0xff] }
  0x32   : > { %307 = vst [vmem:[%s2030_s29 + $0x1f8] sm:$0xff] %v306_v63  ;;  %309 = vst [vmem:[%s2030_s29 + $0x200] sm:$0xff] %v308_v0  ;;  %v316_v4 = vld [vmem:[%s2022_s28 + $0x420] sm:$0xff]  ;;  %v318_v5 = vld [vmem:[%s2022_s28 + $0x428] sm:$0xff] }
  0x33   : > { %311 = vst [vmem:[%s2030_s29 + $0x208] sm:$0xff] %v310_v1  ;;  %313 = vst [vmem:[%s2030_s29 + $0x210] sm:$0xff] %v312_v2  ;;  %v320_v6 = vld [vmem:[%s2022_s28 + $0x430] sm:$0xff]  ;;  %v322_v7 = vld [vmem:[%s2022_s28 + $0x438] sm:$0xff] }
  0x34   : > { %315 = vst [vmem:[%s2030_s29 + $0x218] sm:$0xff] %v314_v3  ;;  %317 = vst [vmem:[%s2030_s29 + $0x220] sm:$0xff] %v316_v4  ;;  %v324_v8 = vld [vmem:[%s2022_s28 + $0x480] sm:$0xff]  ;;  %v326_v9 = vld [vmem:[%s2022_s28 + $0x488] sm:$0xff] }
  0x35   : > { %319 = vst [vmem:[%s2030_s29 + $0x228] sm:$0xff] %v318_v5  ;;  %321 = vst [vmem:[%s2030_s29 + $0x230] sm:$0xff] %v320_v6  ;;  %v328_v10 = vld [vmem:[%s2022_s28 + $0x490] sm:$0xff]  ;;  %v330_v11 = vld [vmem:[%s2022_s28 + $0x498] sm:$0xff] }
  0x36   : > { %323 = vst [vmem:[%s2030_s29 + $0x238] sm:$0xff] %v322_v7  ;;  %325 = vst [vmem:[%s2030_s29 + $0x240] sm:$0xff] %v324_v8  ;;  %v332_v12 = vld [vmem:[%s2022_s28 + $0x4a0] sm:$0xff]  ;;  %v334_v13 = vld [vmem:[%s2022_s28 + $0x4a8] sm:$0xff] }
  0x37   : > { %327 = vst [vmem:[%s2030_s29 + $0x248] sm:$0xff] %v326_v9  ;;  %329 = vst [vmem:[%s2030_s29 + $0x250] sm:$0xff] %v328_v10  ;;  %v336_v14 = vld [vmem:[%s2022_s28 + $0x4b0] sm:$0xff]  ;;  %v338_v15 = vld [vmem:[%s2022_s28 + $0x4b8] sm:$0xff] }
  0x38   : > { %331 = vst [vmem:[%s2030_s29 + $0x258] sm:$0xff] %v330_v11  ;;  %333 = vst [vmem:[%s2030_s29 + $0x260] sm:$0xff] %v332_v12  ;;  %v340_v16 = vld [vmem:[%s2022_s28 + $0x500] sm:$0xff]  ;;  %v342_v17 = vld [vmem:[%s2022_s28 + $0x508] sm:$0xff] }
  0x39   : > { %335 = vst [vmem:[%s2030_s29 + $0x268] sm:$0xff] %v334_v13  ;;  %337 = vst [vmem:[%s2030_s29 + $0x270] sm:$0xff] %v336_v14  ;;  %v344_v18 = vld [vmem:[%s2022_s28 + $0x510] sm:$0xff]  ;;  %v346_v19 = vld [vmem:[%s2022_s28 + $0x518] sm:$0xff] }
  0x3a   : > { %339 = vst [vmem:[%s2030_s29 + $0x278] sm:$0xff] %v338_v15  ;;  %341 = vst [vmem:[%s2030_s29 + $0x280] sm:$0xff] %v340_v16  ;;  %v348_v20 = vld [vmem:[%s2022_s28 + $0x520] sm:$0xff]  ;;  %v350_v21 = vld [vmem:[%s2022_s28 + $0x528] sm:$0xff] }
  0x3b   : > { %343 = vst [vmem:[%s2030_s29 + $0x288] sm:$0xff] %v342_v17  ;;  %345 = vst [vmem:[%s2030_s29 + $0x290] sm:$0xff] %v344_v18  ;;  %v352_v22 = vld [vmem:[%s2022_s28 + $0x530] sm:$0xff]  ;;  %v354_v23 = vld [vmem:[%s2022_s28 + $0x538] sm:$0xff] }
  0x3c   : > { %347 = vst [vmem:[%s2030_s29 + $0x298] sm:$0xff] %v346_v19  ;;  %349 = vst [vmem:[%s2030_s29 + $0x2a0] sm:$0xff] %v348_v20  ;;  %v356_v24 = vld [vmem:[%s2022_s28 + $0x580] sm:$0xff]  ;;  %v358_v25 = vld [vmem:[%s2022_s28 + $0x588] sm:$0xff] }
  0x3d   : > { %351 = vst [vmem:[%s2030_s29 + $0x2a8] sm:$0xff] %v350_v21  ;;  %353 = vst [vmem:[%s2030_s29 + $0x2b0] sm:$0xff] %v352_v22  ;;  %v360_v26 = vld [vmem:[%s2022_s28 + $0x590] sm:$0xff]  ;;  %v362_v27 = vld [vmem:[%s2022_s28 + $0x598] sm:$0xff] }
  0x3e   : > { %355 = vst [vmem:[%s2030_s29 + $0x2b8] sm:$0xff] %v354_v23  ;;  %357 = vst [vmem:[%s2030_s29 + $0x2c0] sm:$0xff] %v356_v24  ;;  %v364_v28 = vld [vmem:[%s2022_s28 + $0x5a0] sm:$0xff]  ;;  %v366_v29 = vld [vmem:[%s2022_s28 + $0x5a8] sm:$0xff] }
  0x3f   : > { %359 = vst [vmem:[%s2030_s29 + $0x2c8] sm:$0xff] %v358_v25  ;;  %361 = vst [vmem:[%s2030_s29 + $0x2d0] sm:$0xff] %v360_v26  ;;  %v368_v30 = vld [vmem:[%s2022_s28 + $0x5b0] sm:$0xff]  ;;  %v370_v31 = vld [vmem:[%s2022_s28 + $0x5b8] sm:$0xff] }
  0x40   : > { %363 = vst [vmem:[%s2030_s29 + $0x2d8] sm:$0xff] %v362_v27  ;;  %365 = vst [vmem:[%s2030_s29 + $0x2e0] sm:$0xff] %v364_v28  ;;  %v372_v32 = vld [vmem:[%s2022_s28 + $0x600] sm:$0xff]  ;;  %v374_v33 = vld [vmem:[%s2022_s28 + $0x608] sm:$0xff] }
  0x41   : > { %367 = vst [vmem:[%s2030_s29 + $0x2e8] sm:$0xff] %v366_v29  ;;  %369 = vst [vmem:[%s2030_s29 + $0x2f0] sm:$0xff] %v368_v30  ;;  %v376_v34 = vld [vmem:[%s2022_s28 + $0x610] sm:$0xff]  ;;  %v378_v35 = vld [vmem:[%s2022_s28 + $0x618] sm:$0xff] }
  0x42   : > { %371 = vst [vmem:[%s2030_s29 + $0x2f8] sm:$0xff] %v370_v31  ;;  %373 = vst [vmem:[%s2030_s29 + $0x300] sm:$0xff] %v372_v32  ;;  %v380_v36 = vld [vmem:[%s2022_s28 + $0x620] sm:$0xff]  ;;  %v382_v37 = vld [vmem:[%s2022_s28 + $0x628] sm:$0xff] }
  0x43   : > { %375 = vst [vmem:[%s2030_s29 + $0x308] sm:$0xff] %v374_v33  ;;  %377 = vst [vmem:[%s2030_s29 + $0x310] sm:$0xff] %v376_v34  ;;  %v384_v38 = vld [vmem:[%s2022_s28 + $0x630] sm:$0xff]  ;;  %v386_v39 = vld [vmem:[%s2022_s28 + $0x638] sm:$0xff] }
  0x44   : > { %379 = vst [vmem:[%s2030_s29 + $0x318] sm:$0xff] %v378_v35  ;;  %381 = vst [vmem:[%s2030_s29 + $0x320] sm:$0xff] %v380_v36  ;;  %v388_v40 = vld [vmem:[%s2022_s28 + $0x680] sm:$0xff]  ;;  %v390_v41 = vld [vmem:[%s2022_s28 + $0x688] sm:$0xff] }
  0x45   : > { %383 = vst [vmem:[%s2030_s29 + $0x328] sm:$0xff] %v382_v37  ;;  %385 = vst [vmem:[%s2030_s29 + $0x330] sm:$0xff] %v384_v38  ;;  %v392_v42 = vld [vmem:[%s2022_s28 + $0x690] sm:$0xff]  ;;  %v394_v43 = vld [vmem:[%s2022_s28 + $0x698] sm:$0xff] }
  0x46   : > { %387 = vst [vmem:[%s2030_s29 + $0x338] sm:$0xff] %v386_v39  ;;  %389 = vst [vmem:[%s2030_s29 + $0x340] sm:$0xff] %v388_v40  ;;  %v396_v44 = vld [vmem:[%s2022_s28 + $0x6a0] sm:$0xff]  ;;  %v398_v45 = vld [vmem:[%s2022_s28 + $0x6a8] sm:$0xff] }
  0x47   : > { %391 = vst [vmem:[%s2030_s29 + $0x348] sm:$0xff] %v390_v41  ;;  %393 = vst [vmem:[%s2030_s29 + $0x350] sm:$0xff] %v392_v42  ;;  %v400_v46 = vld [vmem:[%s2022_s28 + $0x6b0] sm:$0xff]  ;;  %v402_v47 = vld [vmem:[%s2022_s28 + $0x6b8] sm:$0xff] }
  0x48   : > { %395 = vst [vmem:[%s2030_s29 + $0x358] sm:$0xff] %v394_v43  ;;  %397 = vst [vmem:[%s2030_s29 + $0x360] sm:$0xff] %v396_v44 }
  0x49   : > { %399 = vst [vmem:[%s2030_s29 + $0x368] sm:$0xff] %v398_v45  ;;  %401 = vst [vmem:[%s2030_s29 + $0x370] sm:$0xff] %v400_v46 }
  0x4a   : > { %403 = vst [vmem:[%s2030_s29 + $0x378] sm:$0xff] %v402_v47 }
  0x4b PF: > { %p1757_p5 = scmp.ge.s32.totalorder %s1958_s17, 1  ;;  %p408_p6 = scmp.lt.s32.totalorder %s1958_s17, 3 }
  0x4d   : > { %p409_p7 = pnand %p1757_p5, %p408_p6 }
  0x4e   : > { %s415_s30 = sand.u32 (!%p409_p7), 1, %s1950_s15   ;;  %v1960_v48 = vmov (!%p409_p7), 0   ;;  %vm1125_vm0 = vcmask (!%p409_p7), 1045504   ;;  %vm1121_vm1 = vcmask (!%p409_p7), 883712   ;;  %s1758_s9 = sshll.u32 (!%p409_p7), %s2002_s18, 4  ;;  %vm1591_vm2 = vcmask (!%p409_p7), 7168  }
  0x4f   : > { %412 = sbr.rel (%p409_p7) target bundleno = 566 (0x236), region = 47  ;;  %1206 = vmatprep.mubr.bf16.mxu0 (!%p409_p7), %v1960_v48  ;;  %1247 = vmatprep.mubr.bf16.mxu1 (!%p409_p7), %v1960_v48  ;;  %p450_p8 = scmp.lt.s32.totalorder (!%p409_p7), %s1758_s9, 31 }
  0x50   : > { %s1910_s5 = smul.u32 (!%p409_p7), 896, %s415_s30  ;;  %p455_p9 = scmp.lt.s32.totalorder (!%p409_p7), %s2002_s18, 1 }
  0x52   : > { %s2255_s6 = scalar_lea.vmem (!%p409_p7), [#allocation2], %s1910_s5 }
  0x53   : > { %v465_v49 = vld [vmem:[%s2255_s6] sm:$0xff] (!%p409_p7)  ;;  %v466_v51 = vld [vmem:[%s2255_s6 + $0x8] sm:$0xff] (!%p409_p7)  ;;  %v467_v41 = vld [vmem:[%s2255_s6 + $0x10] sm:$0xff] (!%p409_p7) }
  0x54   : > { %v473_v50 = vld [vmem:[%s2255_s6 + $0x40] sm:$0xff] (!%p409_p7)  ;;  %v474_v54 = vld [vmem:[%s2255_s6 + $0x48] sm:$0xff] (!%p409_p7)  ;;  %v475_v42 = vld [vmem:[%s2255_s6 + $0x50] sm:$0xff] (!%p409_p7) }
  0x55   : > { %v1763_v52 = vcombine.high (!%p409_p7), %v465_v49, %v473_v50  ;;  %v1762_v53 = vcombine.low (!%p409_p7), %v465_v49, %v473_v50  ;;  %v481_v55 = vld [vmem:[%s2255_s6 + $0x80] sm:$0xff] (!%p409_p7)  ;;  %v1765_v57 = vcombine.high (!%p409_p7), %v466_v51, %v474_v54  ;;  %v1764_v58 = vcombine.low (!%p409_p7), %v466_v51, %v474_v54  ;;  %v482_v60 = vld [vmem:[%s2255_s6 + $0x88] sm:$0xff] (!%p409_p7)  ;;  %v468_v43 = vld [vmem:[%s2255_s6 + $0x18] sm:$0xff] (!%p409_p7) }
  0x56   : > { %v489_v56 = vld [vmem:[%s2255_s6 + $0xc0] sm:$0xff]  ;;  %v490_v61 = vld [vmem:[%s2255_s6 + $0xc8] sm:$0xff]  ;;  %v476_v44 = vld [vmem:[%s2255_s6 + $0x58] sm:$0xff]  ;;  %v1767_v46 = vcombine.high %v467_v41, %v475_v42  ;;  %s2453_s9 = smov (!%p450_p8, %s1758_s9), 31  ;;  %s2455_s18 = smov (!%p455_p9, %s2002_s18), 1 }
  0x57   : > { %v1779_v59 = vcombine.high %v481_v55, %v489_v56  ;;  %v497_v62 = vld [vmem:[%s2255_s6 + $0x100] sm:$0xff]  ;;  %1174 = vmatprep.subr.bf16.mxu0 %v1763_v52  ;;  %v1781_v63 = vcombine.high %v482_v60, %v490_v61  ;;  %v498_v1 = vld [vmem:[%s2255_s6 + $0x108] sm:$0xff]  ;;  %1215 = vmatprep.subr.bf16.mxu1 %v1765_v57  ;;  %v1778_v3 = vcombine.low %v481_v55, %v489_v56  ;;  %v483_v50 = vld [vmem:[%s2255_s6 + $0x90] sm:$0xff]  ;;  %s1759_s10 = sshll.u32 %s2453_s9, 2  ;;  %s1760_s14 = sshll.u32 %s2455_s18, 3 }
  0x58   : > { %v505_v0 = vld [vmem:[%s2255_s6 + $0x140] sm:$0xff]  ;;  %v506_v2 = vld [vmem:[%s2255_s6 + $0x148] sm:$0xff]  ;;  %1175 = vmatpush1.bf16.msra.mxu0 %v1762_v53  ;;  %1216 = vmatpush1.bf16.msra.mxu1 %v1764_v58  ;;  %v1780_v4 = vcombine.low %v482_v60, %v490_v61  ;;  %v1769_v49 = vcombine.high %v468_v43, %v476_v44  ;;  %v491_v51 = vld [vmem:[%s2255_s6 + $0xd0] sm:$0xff]  ;;  %v1766_v55 = vcombine.low %v467_v41, %v475_v42  ;;  %s2416_s13 = scalar_lea.vmem %s2446_s2, %s1759_s10  ;;  %s458_s20 = scalar_lea.vmem %s2447_s3, %s1760_s14 }
  0x59   : > { %1176 = vmatprep.subr.bf16.mxu0 %v1779_v59  ;;  %v1795_v5 = vcombine.high %v497_v62, %v505_v0  ;;  %1217 = vmatprep.subr.bf16.mxu1 %v1781_v63  ;;  %v1797_v6 = vcombine.high %v498_v1, %v506_v2  ;;  %v513_v7 = vld [vmem:[%s2255_s6 + $0x180] sm:$0xff]  ;;  %v514_v9 = vld [vmem:[%s2255_s6 + $0x188] sm:$0xff]  ;;  %v1794_v11 = vcombine.low %v497_v62, %v505_v0  ;;  %v484_v52 = vld [vmem:[%s2255_s6 + $0x98] sm:$0xff]  ;;  %s462_s24 = scalar_lea.vmem %s2448_s4, %s1760_s14 }
  0x5a   : > { %v521_v8 = vld [vmem:[%s2255_s6 + $0x1c0] sm:$0xff]  ;;  %v522_v10 = vld [vmem:[%s2255_s6 + $0x1c8] sm:$0xff]  ;;  %v1796_v12 = vcombine.low %v498_v1, %v506_v2  ;;  %v492_v53 = vld [vmem:[%s2255_s6 + $0xd8] sm:$0xff]  ;;  %v1768_v56 = vcombine.low %v468_v43, %v476_v44  ;;  %v1783_v57 = vcombine.high %v483_v50, %v491_v51  ;;  %v1782_v63 = vcombine.low %v483_v50, %v491_v51 }
  0x5b   : > { %v1811_v13 = vcombine.high %v513_v7, %v521_v8  ;;  %v1813_v14 = vcombine.high %v514_v9, %v522_v10  ;;  %v529_v15 = vld [vmem:[%s2255_s6 + $0x200] sm:$0xff]  ;;  %v530_v17 = vld [vmem:[%s2255_s6 + $0x208] sm:$0xff]  ;;  %v1810_v19 = vcombine.low %v513_v7, %v521_v8  ;;  %v1812_v20 = vcombine.low %v514_v9, %v522_v10  ;;  %v499_v59 = vld [vmem:[%s2255_s6 + $0x110] sm:$0xff] }
  0x5c   : > { %1177 = vmatpush1.bf16.msra.mxu0 %v1778_v3  ;;  %1218 = vmatpush1.bf16.msra.mxu1 %v1780_v4  ;;  %v537_v16 = vld [vmem:[%s2255_s6 + $0x240] sm:$0xff]  ;;  %v538_v18 = vld [vmem:[%s2255_s6 + $0x248] sm:$0xff]  ;;  %v1785_v58 = vcombine.high %v484_v52, %v492_v53  ;;  %v507_v60 = vld [vmem:[%s2255_s6 + $0x150] sm:$0xff]  ;;  %v1784_v0 = vcombine.low %v484_v52, %v492_v53 }
  0x5d   : > { %1178 = vmatprep.subr.bf16.mxu0 %v1795_v5  ;;  %1219 = vmatprep.subr.bf16.mxu1 %v1797_v6  ;;  %v1827_v21 = vcombine.high %v529_v15, %v537_v16  ;;  %v1829_v22 = vcombine.high %v530_v17, %v538_v18  ;;  %v545_v23 = vld [vmem:[%s2255_s6 + $0x280] sm:$0xff]  ;;  %v546_v25 = vld [vmem:[%s2255_s6 + $0x288] sm:$0xff]  ;;  %v1826_v27 = vcombine.low %v529_v15, %v537_v16  ;;  %v500_v61 = vld [vmem:[%s2255_s6 + $0x118] sm:$0xff] }
  0x5e   : > { %v553_v24 = vld [vmem:[%s2255_s6 + $0x2c0] sm:$0xff]  ;;  %v554_v26 = vld [vmem:[%s2255_s6 + $0x2c8] sm:$0xff]  ;;  %v1828_v28 = vcombine.low %v530_v17, %v538_v18  ;;  %v508_v62 = vld [vmem:[%s2255_s6 + $0x158] sm:$0xff]  ;;  %v1799_v1 = vcombine.high %v499_v59, %v507_v60  ;;  %v1798_v7 = vcombine.low %v499_v59, %v507_v60 }
  0x5f   : > { %v1843_v29 = vcombine.high %v545_v23, %v553_v24  ;;  %v1845_v30 = vcombine.high %v546_v25, %v554_v26  ;;  %v561_v31 = vld [vmem:[%s2255_s6 + $0x300] sm:$0xff]  ;;  %v562_v33 = vld [vmem:[%s2255_s6 + $0x308] sm:$0xff]  ;;  %v1842_v35 = vcombine.low %v545_v23, %v553_v24  ;;  %v1844_v36 = vcombine.low %v546_v25, %v554_v26  ;;  %v515_v3 = vld [vmem:[%s2255_s6 + $0x190] sm:$0xff] }
  0x60   : > { %1179 = vmatpush1.bf16.msra.mxu0 %v1794_v11  ;;  %1220 = vmatpush1.bf16.msra.mxu1 %v1796_v12  ;;  %v569_v32 = vld [vmem:[%s2255_s6 + $0x340] sm:$0x33]  ;;  %v570_v34 = vld [vmem:[%s2255_s6 + $0x348] sm:$0x33]  ;;  %v1801_v2 = vcombine.high %v500_v61, %v508_v62  ;;  %v523_v4 = vld [vmem:[%s2255_s6 + $0x1d0] sm:$0xff]  ;;  %v1800_v8 = vcombine.low %v500_v61, %v508_v62 }
  0x61   : > { %1180 = vmatprep.subr.bf16.mxu0 %v1811_v13  ;;  %1221 = vmatprep.subr.bf16.mxu1 %v1813_v14  ;;  %v1859_v37 = vcombine.high %v561_v31, %v569_v32  ;;  %v1858_v38 = vcombine.low %v561_v31, %v569_v32  ;;  %v1861_v39 = vcombine.high %v562_v33, %v570_v34  ;;  %v2300_v54 = vld [vmem:[%s2444_s0] sm:$0xf]  ;;  %v516_v5 = vld [vmem:[%s2255_s6 + $0x198] sm:$0xff]  ;;  %v531_v11 = vld [vmem:[%s2255_s6 + $0x210] sm:$0xff] }
  0x62   : > { %v1860_v40 = vcombine.low %v562_v33, %v570_v34  ;;  %v524_v6 = vld [vmem:[%s2255_s6 + $0x1d8] sm:$0xff]  ;;  %v1815_v9 = vcombine.high %v515_v3, %v523_v4  ;;  %v539_v12 = vld [vmem:[%s2255_s6 + $0x250] sm:$0xff]  ;;  %v1814_v15 = vcombine.low %v515_v3, %v523_v4 }
  0x63   : > { %v1127_v45 = vsel %vm1125_vm0, %v1858_v38, 0  ;;  %v1817_v10 = vcombine.high %v516_v5, %v524_v6  ;;  %v532_v13 = vld [vmem:[%s2255_s6 + $0x218] sm:$0xff]  ;;  %v1816_v16 = vcombine.low %v516_v5, %v524_v6  ;;  %v1831_v17 = vcombine.high %v531_v11, %v539_v12  ;;  %v477_v38 = vld [vmem:[%s2255_s6 + $0x60] sm:$0xff] }
  0x64   : > { %1181 = vmatpush1.bf16.msra.mxu0 %v1810_v19  ;;  %1222 = vmatpush1.bf16.msra.mxu1 %v1812_v20  ;;  %v1133_v47 = vsel %vm1125_vm0, %v1860_v40, 0  ;;  %v540_v14 = vld [vmem:[%s2255_s6 + $0x258] sm:$0xff]  ;;  %v547_v19 = vld [vmem:[%s2255_s6 + $0x290] sm:$0xff]  ;;  %v1830_v23 = vcombine.low %v531_v11, %v539_v12  ;;  %v478_v40 = vld [vmem:[%s2255_s6 + $0x68] sm:$0xff] }
  0x65   : > { %1182 = vmatprep.subr.bf16.mxu0 %v1827_v21  ;;  %1223 = vmatprep.subr.bf16.mxu1 %v1829_v22  ;;  %v1833_v18 = vcombine.high %v532_v13, %v540_v14  ;;  %v555_v20 = vld [vmem:[%s2255_s6 + $0x2d0] sm:$0xff]  ;;  %v548_v21 = vld [vmem:[%s2255_s6 + $0x298] sm:$0xff]  ;;  %v1832_v24 = vcombine.low %v532_v13, %v540_v14 }
  0x66   : > { %v556_v22 = vld [vmem:[%s2255_s6 + $0x2d8] sm:$0xff]  ;;  %v1847_v25 = vcombine.high %v547_v19, %v555_v20  ;;  %v1846_v31 = vcombine.low %v547_v19, %v555_v20 }
  0x67   : > { %v1849_v26 = vcombine.high %v548_v21, %v556_v22  ;;  %v1848_v32 = vcombine.low %v548_v21, %v556_v22 }
  0x68   : > { %1183 = vmatpush1.bf16.msra.mxu0 %v1826_v27  ;;  %1224 = vmatpush1.bf16.msra.mxu1 %v1828_v28  ;;  %v563_v27 = vld [vmem:[%s2255_s6 + $0x310] sm:$0xff] }
  0x69   : > { %1184 = vmatprep.subr.bf16.mxu0 %v1843_v29  ;;  %1225 = vmatprep.subr.bf16.mxu1 %v1845_v30  ;;  %v571_v28 = vld [vmem:[%s2255_s6 + $0x350] sm:$0x33]  ;;  %v564_v29 = vld [vmem:[%s2255_s6 + $0x318] sm:$0xff] }
  0x6a   : > { %v572_v30 = vld [vmem:[%s2255_s6 + $0x358] sm:$0x33]  ;;  %v1863_v33 = vcombine.high %v563_v27, %v571_v28  ;;  %v1862_v34 = vcombine.low %v563_v27, %v571_v28 }
  0x6c   : > { %1185 = vmatpush1.bf16.msra.mxu0 %v1842_v35  ;;  %1226 = vmatpush1.bf16.msra.mxu1 %v1844_v36  ;;  %v1865_v35 = vcombine.high %v564_v29, %v572_v30  ;;  %v1864_v36 = vcombine.low %v564_v29, %v572_v30  ;;  %v1139_v41 = vsel %vm1125_vm0, %v1862_v34, 0  ;;  %v479_v34 = vld [vmem:[%s2255_s6 + $0x70] sm:$0xff] }
  0x6d   : > { %1874 = vmatprep.subr.msk.bf16.mxu0 %vm1125_vm0, %v1859_v37  ;;  %1876 = vmatprep.subr.msk.bf16.mxu1 %vm1125_vm0, %v1861_v39  ;;  %v469_v37 = vld [vmem:[%s2255_s6 + $0x20] sm:$0xff]  ;;  %v470_v39 = vld [vmem:[%s2255_s6 + $0x28] sm:$0xff] }
  0x6e   : > { %v1771_v42 = vcombine.high %v469_v37, %v477_v38  ;;  %v1145_v43 = vsel %vm1125_vm0, %v1864_v36, 0  ;;  %v1773_v44 = vcombine.high %v470_v39, %v478_v40  ;;  %v1770_v50 = vcombine.low %v469_v37, %v477_v38  ;;  %v480_v36 = vld [vmem:[%s2255_s6 + $0x78] sm:$0xff] }
  0x6f   : > { %v1772_v51 = vcombine.low %v470_v39, %v478_v40 }
  0x70   : > { %1187 = vmatpush1.bf16.msra.mxu0 %v1127_v45  ;;  %1228 = vmatpush1.bf16.msra.mxu1 %v1133_v47  ;;  %v485_v45 = vld [vmem:[%s2255_s6 + $0xa0] sm:$0xff]  ;;  %v486_v47 = vld [vmem:[%s2255_s6 + $0xa8] sm:$0xff] }
  0x71   : > { %1256 = vmatprep.subr.bf16.mxu0 %v1767_v46  ;;  %1297 = vmatprep.subr.bf16.mxu1 %v1769_v49  ;;  %v493_v46 = vld [vmem:[%s2255_s6 + $0xe0] sm:$0xff]  ;;  %v494_v49 = vld [vmem:[%s2255_s6 + $0xe8] sm:$0xff] }
  0x72   : > { %v1787_v52 = vcombine.high %v485_v45, %v493_v46  ;;  %v1789_v53 = vcombine.high %v486_v47, %v494_v49  ;;  %v1786_v59 = vcombine.low %v485_v45, %v493_v46  ;;  %v1788_v60 = vcombine.low %v486_v47, %v494_v49 }
  0x73   : > { %1875 = vmatmul.mubr.msk.bf16.vlgmr.msra.gmra.mrb[0].mxu0 %vm1121_vm1, %v2300_v54  ;;  %1877 = vmatmul.mubr.msk.bf16.vlgmr.msra.gmra.mrb[0].mxu1 %vm1121_vm1, %v2300_v54 }
  0x74   : > { %1257 = vmatpush1.bf16.msra.mxu0 %v1766_v55  ;;  %1298 = vmatpush1.bf16.msra.mxu1 %v1768_v56  ;;  %v501_v55 = vld [vmem:[%s2255_s6 + $0x120] sm:$0xff] }
  0x75   : > { %1258 = vmatprep.subr.bf16.mxu0 %v1783_v57  ;;  %1299 = vmatprep.subr.bf16.mxu1 %v1785_v58  ;;  %v509_v56 = vld [vmem:[%s2255_s6 + $0x160] sm:$0xff]  ;;  %v502_v57 = vld [vmem:[%s2255_s6 + $0x128] sm:$0xff] }
  0x76   : > { %1288 = vmatprep.mubr.bf16.mxu0 %v1960_v48  ;;  %1329 = vmatprep.mubr.bf16.mxu1 %v1960_v48  ;;  %v510_v58 = vld [vmem:[%s2255_s6 + $0x168] sm:$0xff]  ;;  %v1803_v61 = vcombine.high %v501_v55, %v509_v56  ;;  %v1802_v3 = vcombine.low %v501_v55, %v509_v56 }
  0x77   : > { %v1805_v62 = vcombine.high %v502_v57, %v510_v58  ;;  %v1804_v4 = vcombine.low %v502_v57, %v510_v58 }
  0x78   : > { %1259 = vmatpush1.bf16.msra.mxu0 %v1782_v63  ;;  %1300 = vmatpush1.bf16.msra.mxu1 %v1784_v0  ;;  %v517_v63 = vld [vmem:[%s2255_s6 + $0x1a0] sm:$0xff] }
  0x79   : > { %1260 = vmatprep.subr.bf16.mxu0 %v1799_v1  ;;  %1301 = vmatprep.subr.bf16.mxu1 %v1801_v2  ;;  %v525_v0 = vld [vmem:[%s2255_s6 + $0x1e0] sm:$0xff]  ;;  %v518_v1 = vld [vmem:[%s2255_s6 + $0x1a8] sm:$0xff] }
  0x7a   : > { %v526_v2 = vld [vmem:[%s2255_s6 + $0x1e8] sm:$0xff]  ;;  %v1819_v5 = vcombine.high %v517_v63, %v525_v0  ;;  %v1818_v11 = vcombine.low %v517_v63, %v525_v0 }
  0x7b   : > { %v1821_v6 = vcombine.high %v518_v1, %v526_v2  ;;  %v1820_v12 = vcombine.low %v518_v1, %v526_v2 }
  0x7c   : > { %1261 = vmatpush1.bf16.msra.mxu0 %v1798_v7  ;;  %1302 = vmatpush1.bf16.msra.mxu1 %v1800_v8  ;;  %v533_v7 = vld [vmem:[%s2255_s6 + $0x220] sm:$0xff] }
  0x7d   : > { %1262 = vmatprep.subr.bf16.mxu0 %v1815_v9  ;;  %1303 = vmatprep.subr.bf16.mxu1 %v1817_v10  ;;  %v541_v8 = vld [vmem:[%s2255_s6 + $0x260] sm:$0xff]  ;;  %v534_v9 = vld [vmem:[%s2255_s6 + $0x228] sm:$0xff] }
  0x7e   : > { %v542_v10 = vld [vmem:[%s2255_s6 + $0x268] sm:$0xff]  ;;  %v1835_v13 = vcombine.high %v533_v7, %v541_v8  ;;  %v1834_v19 = vcombine.low %v533_v7, %v541_v8 }
  0x7f   : > { %v1837_v14 = vcombine.high %v534_v9, %v542_v10  ;;  %v1836_v20 = vcombine.low %v534_v9, %v542_v10  ;;  %v551_v10 = vld [vmem:[%s2255_s6 + $0x2b0] sm:$0xff] }
  0x80   : > { %1263 = vmatpush1.bf16.msra.mxu0 %v1814_v15  ;;  %1304 = vmatpush1.bf16.msra.mxu1 %v1816_v16  ;;  %v549_v15 = vld [vmem:[%s2255_s6 + $0x2a0] sm:$0xff] }
  0x81   : > { %1264 = vmatprep.subr.bf16.mxu0 %v1831_v17  ;;  %1305 = vmatprep.subr.bf16.mxu1 %v1833_v18  ;;  %v557_v16 = vld [vmem:[%s2255_s6 + $0x2e0] sm:$0xff]  ;;  %v550_v17 = vld [vmem:[%s2255_s6 + $0x2a8] sm:$0xff] }
  0x82   : > { %v558_v18 = vld [vmem:[%s2255_s6 + $0x2e8] sm:$0xff]  ;;  %v1851_v21 = vcombine.high %v549_v15, %v557_v16  ;;  %v1850_v27 = vcombine.low %v549_v15, %v557_v16 }
  0x83   : > { %v1853_v22 = vcombine.high %v550_v17, %v558_v18  ;;  %v1852_v28 = vcombine.low %v550_v17, %v558_v18  ;;  %v567_v18 = vld [vmem:[%s2255_s6 + $0x330] sm:$0xff] }
  0x84   : > { %1265 = vmatpush1.bf16.msra.mxu0 %v1830_v23  ;;  %1306 = vmatpush1.bf16.msra.mxu1 %v1832_v24  ;;  %v565_v23 = vld [vmem:[%s2255_s6 + $0x320] sm:$0xff] }
  0x85   : > { %1266 = vmatprep.subr.bf16.mxu0 %v1847_v25  ;;  %1307 = vmatprep.subr.bf16.mxu1 %v1849_v26  ;;  %v573_v24 = vld [vmem:[%s2255_s6 + $0x360] sm:$0x33]  ;;  %v566_v25 = vld [vmem:[%s2255_s6 + $0x328] sm:$0xff] }
  0x86   : > { %v574_v26 = vld [vmem:[%s2255_s6 + $0x368] sm:$0x33]  ;;  %v1867_v29 = vcombine.high %v565_v23, %v573_v24  ;;  %v1866_v30 = vcombine.low %v565_v23, %v573_v24 }
  0x88   : > { %1267 = vmatpush1.bf16.msra.mxu0 %v1846_v31  ;;  %1308 = vmatpush1.bf16.msra.mxu1 %v1848_v32  ;;  %v1869_v31 = vcombine.high %v566_v25, %v574_v26  ;;  %v1868_v32 = vcombine.low %v566_v25, %v574_v26  ;;  %v1151_v37 = vsel %vm1125_vm0, %v1866_v30, 0 }
  0x89   : > { %1878 = vmatprep.subr.msk.bf16.mxu0 %vm1125_vm0, %v1863_v33  ;;  %1880 = vmatprep.subr.msk.bf16.mxu1 %vm1125_vm0, %v1865_v35  ;;  %v471_v33 = vld [vmem:[%s2255_s6 + $0x30] sm:$0xff]  ;;  %v472_v35 = vld [vmem:[%s2255_s6 + $0x38] sm:$0xff] }
  0x8a   : > { %v1775_v38 = vcombine.high %v471_v33, %v479_v34  ;;  %v1157_v39 = vsel %vm1125_vm0, %v1868_v32, 0  ;;  %v1777_v40 = vcombine.high %v472_v35, %v480_v36  ;;  %v1774_v45 = vcombine.low %v471_v33, %v479_v34 }
  0x8b   : > { %v1776_v46 = vcombine.low %v472_v35, %v480_v36 }
  0x8c   : > { %1269 = vmatpush1.bf16.msra.mxu0 %v1139_v41  ;;  %1310 = vmatpush1.bf16.msra.mxu1 %v1145_v43  ;;  %v487_v41 = vld [vmem:[%s2255_s6 + $0xb0] sm:$0xff]  ;;  %v488_v43 = vld [vmem:[%s2255_s6 + $0xb8] sm:$0xff] }
  0x8d   : > { %1338 = vmatprep.subr.bf16.mxu0 %v1771_v42  ;;  %1379 = vmatprep.subr.bf16.mxu1 %v1773_v44  ;;  %v495_v42 = vld [vmem:[%s2255_s6 + $0xf0] sm:$0xff]  ;;  %v496_v44 = vld [vmem:[%s2255_s6 + $0xf8] sm:$0xff] }
  0x8e   : > { %v1791_v47 = vcombine.high %v487_v41, %v495_v42  ;;  %v1793_v49 = vcombine.high %v488_v43, %v496_v44  ;;  %v1790_v55 = vcombine.low %v487_v41, %v495_v42  ;;  %v1792_v56 = vcombine.low %v488_v43, %v496_v44 }
  0x8f   : > { %1879 = vmatmul.mubr.msk.bf16.vlgmr.msra.gmra.mrb[4].mxu0 %vm1121_vm1, %v2300_v54  ;;  %1881 = vmatmul.mubr.msk.bf16.vlgmr.msra.gmra.mrb[4].mxu1 %vm1121_vm1, %v2300_v54 }
  0x90   : > { %1339 = vmatpush1.bf16.msra.mxu0 %v1770_v50  ;;  %1380 = vmatpush1.bf16.msra.mxu1 %v1772_v51  ;;  %v503_v50 = vld [vmem:[%s2255_s6 + $0x130] sm:$0xff] }
  0x91   : > { %1340 = vmatprep.subr.bf16.mxu0 %v1787_v52  ;;  %1381 = vmatprep.subr.bf16.mxu1 %v1789_v53  ;;  %v511_v51 = vld [vmem:[%s2255_s6 + $0x170] sm:$0xff]  ;;  %v504_v52 = vld [vmem:[%s2255_s6 + $0x138] sm:$0xff] }
  0x92   : > { %1370 = vmatprep.mubr.bf16.mxu0 %v1960_v48  ;;  %1411 = vmatprep.mubr.bf16.mxu1 %v1960_v48  ;;  %v512_v53 = vld [vmem:[%s2255_s6 + $0x178] sm:$0xff]  ;;  %v1807_v57 = vcombine.high %v503_v50, %v511_v51  ;;  %v1806_v63 = vcombine.low %v503_v50, %v511_v51 }
  0x93   : > { %v1809_v58 = vcombine.high %v504_v52, %v512_v53  ;;  %v1808_v0 = vcombine.low %v504_v52, %v512_v53 }
  0x94   : > { %1341 = vmatpush1.bf16.msra.mxu0 %v1786_v59  ;;  %1382 = vmatpush1.bf16.msra.mxu1 %v1788_v60  ;;  %v519_v59 = vld [vmem:[%s2255_s6 + $0x1b0] sm:$0xff] }
  0x95   : > { %1342 = vmatprep.subr.bf16.mxu0 %v1803_v61  ;;  %1383 = vmatprep.subr.bf16.mxu1 %v1805_v62  ;;  %v527_v60 = vld [vmem:[%s2255_s6 + $0x1f0] sm:$0xff]  ;;  %v520_v61 = vld [vmem:[%s2255_s6 + $0x1b8] sm:$0xff] }
  0x96   : > { %v528_v62 = vld [vmem:[%s2255_s6 + $0x1f8] sm:$0xff]  ;;  %v1823_v1 = vcombine.high %v519_v59, %v527_v60  ;;  %v1822_v7 = vcombine.low %v519_v59, %v527_v60 }
  0x97   : > { %v1825_v2 = vcombine.high %v520_v61, %v528_v62 }
  0x98   : > { %1343 = vmatpush1.bf16.msra.mxu0 %v1802_v3  ;;  %1384 = vmatpush1.bf16.msra.mxu1 %v1804_v4  ;;  %v535_v3 = vld [vmem:[%s2255_s6 + $0x230] sm:$0xff] }
  0x99   : > { %1344 = vmatprep.subr.bf16.mxu0 %v1819_v5  ;;  %1385 = vmatprep.subr.bf16.mxu1 %v1821_v6  ;;  %v543_v4 = vld [vmem:[%s2255_s6 + $0x270] sm:$0xff]  ;;  %v536_v5 = vld [vmem:[%s2255_s6 + $0x238] sm:$0xff] }
  0x9a   : > { %v544_v6 = vld [vmem:[%s2255_s6 + $0x278] sm:$0xff]  ;;  %v1839_v8 = vcombine.high %v535_v3, %v543_v4 }
  0x9b   : > { %v1841_v9 = vcombine.high %v536_v5, %v544_v6  ;;  %v1840_v15 = vcombine.low %v536_v5, %v544_v6 }
  0x9c   : > { %1345 = vmatpush1.bf16.msra.mxu0 %v1818_v11  ;;  %1386 = vmatpush1.bf16.msra.mxu1 %v1820_v12  ;;  %v559_v11 = vld [vmem:[%s2255_s6 + $0x2f0] sm:$0xff]  ;;  %v552_v12 = vld [vmem:[%s2255_s6 + $0x2b8] sm:$0xff] }
  0x9d   : > { %1346 = vmatprep.subr.bf16.mxu0 %v1835_v13  ;;  %1387 = vmatprep.subr.bf16.mxu1 %v1837_v14  ;;  %v560_v13 = vld [vmem:[%s2255_s6 + $0x2f8] sm:$0xff]  ;;  %v1838_v14 = vcombine.low %v535_v3, %v543_v4  ;;  %v1855_v16 = vcombine.high %v551_v10, %v559_v11 }
  0x9e   : > { %v1857_v17 = vcombine.high %v552_v12, %v560_v13  ;;  %v1856_v23 = vcombine.low %v552_v12, %v560_v13 }
  0xa0   : > { %1347 = vmatpush1.bf16.msra.mxu0 %v1834_v19  ;;  %1388 = vmatpush1.bf16.msra.mxu1 %v1836_v20  ;;  %v575_v19 = vld [vmem:[%s2255_s6 + $0x370] sm:$0x33]  ;;  %v568_v20 = vld [vmem:[%s2255_s6 + $0x338] sm:$0xff] }
  0xa1   : > { %1348 = vmatprep.subr.bf16.mxu0 %v1851_v21  ;;  %1389 = vmatprep.subr.bf16.mxu1 %v1853_v22  ;;  %v576_v21 = vld [vmem:[%s2255_s6 + $0x378] sm:$0x33]  ;;  %v1854_v22 = vcombine.low %v551_v10, %v559_v11  ;;  %v1871_v24 = vcombine.high %v567_v18, %v575_v19  ;;  %v1870_v25 = vcombine.low %v567_v18, %v575_v19 }
  0xa2   : > { %v1873_v26 = vcombine.high %v568_v20, %v576_v21 }
  0xa4   : > { %1349 = vmatpush1.bf16.msra.mxu0 %v1850_v27  ;;  %1390 = vmatpush1.bf16.msra.mxu1 %v1852_v28  ;;  %v1872_v27 = vcombine.low %v568_v20, %v576_v21  ;;  %v1163_v28 = vsel %vm1125_vm0, %v1870_v25, 0 }
  0xa5   : > { %1882 = vmatprep.subr.msk.bf16.mxu0 %vm1125_vm0, %v1867_v29  ;;  %1884 = vmatprep.subr.msk.bf16.mxu1 %vm1125_vm0, %v1869_v31 }
  0xa6   : > { %v1169_v29 = vsel %vm1125_vm0, %v1872_v27, 0 }
  0xa8   : > { %1351 = vmatpush1.bf16.msra.mxu0 %v1151_v37  ;;  %1392 = vmatpush1.bf16.msra.mxu1 %v1157_v39 }
  0xa9   : > { %1420 = vmatprep.subr.bf16.mxu0 %v1775_v38  ;;  %1461 = vmatprep.subr.bf16.mxu1 %v1777_v40 }
  0xab   : > { %1883 = vmatmul.mubr.msk.bf16.vlgmr.msra.gmra.mrb[8].mxu0 %vm1121_vm1, %v2300_v54  ;;  %1885 = vmatmul.mubr.msk.bf16.vlgmr.msra.gmra.mrb[8].mxu1 %vm1121_vm1, %v2300_v54 }
  0xac   : > { %1421 = vmatpush1.bf16.msra.mxu0 %v1774_v45  ;;  %1462 = vmatpush1.bf16.msra.mxu1 %v1776_v46 }
  0xad   : > { %1422 = vmatprep.subr.bf16.mxu0 %v1791_v47  ;;  %1463 = vmatprep.subr.bf16.mxu1 %v1793_v49 }
  0xae   : > { %1452 = vmatprep.mubr.bf16.mxu0 %v1960_v48  ;;  %1493 = vmatprep.mubr.bf16.mxu1 %v1960_v48  ;;  %v1824_v48 = vcombine.low %v520_v61, %v528_v62 }
  0xb0   : > { %1423 = vmatpush1.bf16.msra.mxu0 %v1790_v55  ;;  %1464 = vmatpush1.bf16.msra.mxu1 %v1792_v56 }
  0xb1   : > { %1424 = vmatprep.subr.bf16.mxu0 %v1807_v57  ;;  %1465 = vmatprep.subr.bf16.mxu1 %v1809_v58 }
  0xb4   : > { %1425 = vmatpush1.bf16.msra.mxu0 %v1806_v63  ;;  %1466 = vmatpush1.bf16.msra.mxu1 %v1808_v0 }
  0xb5   : > { %1426 = vmatprep.subr.bf16.mxu0 %v1823_v1  ;;  %1467 = vmatprep.subr.bf16.mxu1 %v1825_v2 }
  0xb8   : > { %1427 = vmatpush1.bf16.msra.mxu0 %v1822_v7  ;;  %1468 = vmatpush1.bf16.msra.mxu1 %v1824_v48 }
  0xb9   : > { %1428 = vmatprep.subr.bf16.mxu0 %v1839_v8  ;;  %1469 = vmatprep.subr.bf16.mxu1 %v1841_v9 }
  0xbc   : > { %1429 = vmatpush1.bf16.msra.mxu0 %v1838_v14  ;;  %1470 = vmatpush1.bf16.msra.mxu1 %v1840_v15 }
  0xbd   : > { %1430 = vmatprep.subr.bf16.mxu0 %v1855_v16  ;;  %1471 = vmatprep.subr.bf16.mxu1 %v1857_v17 }
  0xc0   : > { %1431 = vmatpush1.bf16.msra.mxu0 %v1854_v22  ;;  %1472 = vmatpush1.bf16.msra.mxu1 %v1856_v23 }
  0xc1   : > { %1886 = vmatprep.subr.msk.bf16.mxu0 %vm1125_vm0, %v1871_v24  ;;  %1888 = vmatprep.subr.msk.bf16.mxu1 %vm1125_vm0, %v1873_v26 }
  0xc4   : > { %1433 = vmatpush1.bf16.msra.mxu0 %v1163_v28  ;;  %1474 = vmatpush1.bf16.msra.mxu1 %v1169_v29 }
  0xc7   : > { %1887 = vmatmul.mubr.msk.bf16.vlgmr.msra.gmra.mrb[12].mxu0 %vm1121_vm1, %v2300_v54  ;;  %1889 = vmatmul.mubr.msk.bf16.vlgmr.msra.gmra.mrb[12].mxu1 %vm1121_vm1, %v2300_v54 }
 0x146   : > { %v1208_v30 = vpop.f32.mrb[0].mxu0  ;;  %v1249_v33 = vpop.f32.mrb[0].mxu1 }
 0x147   : > { %v1593_v31 = vmul.f32 %v1208_v30, %v1208_v30  ;;  %v1210_v32 = vpop.f32.mrb[1].mxu0  ;;  %v1595_v54 = vmul.f32 %v1249_v33, %v1249_v33  ;;  %v1251_v38 = vpop.f32.mrb[1].mxu1 }
 0x148   : > { %v1901_v34 = vpack.c.bf16 %v1210_v32, %v1208_v30  ;;  %v1574_v35 = vadd.f32 %v1210_v32, %v1208_v30  ;;  %v1594_v36 = vmul.f32 %v1210_v32, %v1210_v32  ;;  %v1212_v37 = vpop.f32.mrb[2].mxu0  ;;  %v1902_v40 = vpack.c.bf16 %v1251_v38, %v1249_v33  ;;  %v1253_v41 = vpop.f32.mrb[2].mxu1 }
 0x149   : > { %v1213_v39 = vpop.f32.mrb[3].mxu0  ;;  %v1596_v44 = vmul.f32 %v1251_v38, %v1251_v38  ;;  %v1254_v45 = vpop.f32.mrb[3].mxu1 }
 0x14a   : > { %1566 = vst [vmem:[%s2416_s13] sm:$0xff] %v1901_v34  ;;  %v1609_v42 = vadd.f32 %v1594_v36, %v1593_v31  ;;  %v1575_v43 = vadd.f32 %v1574_v35, %v1249_v33  ;;  %1567 = vst [vmem:[%s2416_s13 + $0x8] sm:$0xff] %v1902_v40 }
 0x14c   : > { %v1610_v46 = vadd.f32 %v1609_v42, %v1595_v54  ;;  %v1576_v47 = vadd.f32 %v1575_v43, %v1251_v38 }
 0x14e   : > { %v1611_v49 = vadd.f32 %v1610_v46, %v1596_v44 }
 0x162   : > { %v1290_v50 = vpop.f32.mrb[4].mxu0  ;;  %v1331_v55 = vpop.f32.mrb[4].mxu1 }
 0x163   : > { %v1577_v51 = vadd.f32 %v1576_v47, %v1290_v50  ;;  %v1597_v52 = vmul.f32 %v1290_v50, %v1290_v50  ;;  %v1292_v53 = vpop.f32.mrb[5].mxu0  ;;  %v1333_v59 = vpop.f32.mrb[5].mxu1  ;;  %v1599_v62 = vmul.f32 %v1331_v55, %v1331_v55 }
 0x164   : > { %v1903_v56 = vpack.c.bf16 %v1292_v53, %v1290_v50  ;;  %v1598_v57 = vmul.f32 %v1292_v53, %v1292_v53  ;;  %v1294_v58 = vpop.f32.mrb[6].mxu0  ;;  %v1904_v0 = vpack.c.bf16 %v1333_v59, %v1331_v55  ;;  %v1335_v1 = vpop.f32.mrb[6].mxu1  ;;  %v1600_v5 = vmul.f32 %v1333_v59, %v1333_v59 }
 0x165   : > { %v1612_v60 = vadd.f32 %v1611_v49, %v1597_v52  ;;  %v1578_v61 = vadd.f32 %v1577_v51, %v1292_v53  ;;  %v1295_v63 = vpop.f32.mrb[7].mxu0  ;;  %v1336_v2 = vpop.f32.mrb[7].mxu1 }
 0x166   : > { %1568 = vst [vmem:[%s2416_s13 + $0x10] sm:$0xff] %v1903_v56  ;;  %1569 = vst [vmem:[%s2416_s13 + $0x18] sm:$0xff] %v1904_v0 }
 0x167   : > { %v1613_v3 = vadd.f32 %v1612_v60, %v1598_v57  ;;  %v1579_v4 = vadd.f32 %v1578_v61, %v1331_v55 }
 0x169   : > { %v1614_v6 = vadd.f32 %v1613_v3, %v1599_v62  ;;  %v1580_v7 = vadd.f32 %v1579_v4, %v1333_v59 }
 0x16b   : > { %v1615_v48 = vadd.f32 %v1614_v6, %v1600_v5 }
 0x17e   : > { %v1372_v8 = vpop.f32.mrb[8].mxu0  ;;  %v1413_v12 = vpop.f32.mrb[8].mxu1 }
 0x17f   : > { %v1581_v9 = vadd.f32 %v1580_v7, %v1372_v8  ;;  %v1601_v10 = vmul.f32 %v1372_v8, %v1372_v8  ;;  %v1374_v11 = vpop.f32.mrb[9].mxu0  ;;  %v1415_v16 = vpop.f32.mrb[9].mxu1  ;;  %v1603_v19 = vmul.f32 %v1413_v12, %v1413_v12 }
 0x180   : > { %v1905_v13 = vpack.c.bf16 %v1374_v11, %v1372_v8  ;;  %v1602_v14 = vmul.f32 %v1374_v11, %v1374_v11  ;;  %v1376_v15 = vpop.f32.mrb[10].mxu0  ;;  %v1906_v21 = vpack.c.bf16 %v1415_v16, %v1413_v12  ;;  %v1417_v22 = vpop.f32.mrb[10].mxu1  ;;  %v1604_v26 = vmul.f32 %v1415_v16, %v1415_v16 }
 0x181   : > { %v1616_v17 = vadd.f32 %v1615_v48, %v1601_v10  ;;  %v1582_v18 = vadd.f32 %v1581_v9, %v1374_v11  ;;  %v1377_v20 = vpop.f32.mrb[11].mxu0  ;;  %v1418_v23 = vpop.f32.mrb[11].mxu1 }
 0x182   : > { %1570 = vst [vmem:[%s2416_s13 + $0x20] sm:$0xff] %v1905_v13  ;;  %1571 = vst [vmem:[%s2416_s13 + $0x28] sm:$0xff] %v1906_v21 }
 0x183   : > { %v1617_v24 = vadd.f32 %v1616_v17, %v1602_v14  ;;  %v1583_v25 = vadd.f32 %v1582_v18, %v1413_v12 }
 0x185   : > { %v1618_v27 = vadd.f32 %v1617_v24, %v1603_v19  ;;  %v1584_v28 = vadd.f32 %v1583_v25, %v1415_v16 }
 0x187   : > { %v1619_v29 = vadd.f32 %v1618_v27, %v1604_v26 }
 0x19a   : > { %v1454_v30 = vpop.f32.mrb[12].mxu0  ;;  %v1495_v34 = vpop.f32.mrb[12].mxu1 }
 0x19b   : > { %v1585_v31 = vadd.f32 %v1584_v28, %v1454_v30  ;;  %v1605_v32 = vmul.f32 %v1454_v30, %v1454_v30  ;;  %v1456_v33 = vpop.f32.mrb[13].mxu0  ;;  %v1497_v54 = vpop.f32.mrb[13].mxu1  ;;  %v1607_v40 = vmul.f32 %v1495_v34, %v1495_v34 }
 0x19c   : > { %v1907_v35 = vpack.c.bf16 %v1456_v33, %v1454_v30  ;;  %v1606_v36 = vmul.f32 %v1456_v33, %v1456_v33  ;;  %v1458_v37 = vpop.f32.mrb[14].mxu0  ;;  %v1908_v41 = vpack.c.bf16 %v1497_v54, %v1495_v34  ;;  %v1499_v43 = vpop.f32.mrb[14].mxu1  ;;  %v1608_v49 = vmul.f32 %v1497_v54, %v1497_v54 }
 0x19d   : > { %v1620_v38 = vadd.f32 %v1619_v29, %v1605_v32  ;;  %v1586_v39 = vadd.f32 %v1585_v31, %v1456_v33  ;;  %v1459_v42 = vpop.f32.mrb[15].mxu0  ;;  %v1500_v44 = vpop.f32.mrb[15].mxu1 }
 0x19e   : > { %1572 = vst [vmem:[%s2416_s13 + $0x30] sm:$0xff] %v1907_v35  ;;  %1573 = vst [vmem:[%s2416_s13 + $0x38] sm:$0xff] %v1908_v41 }
 0x19f   : > { %v1587_v45 = vadd.f32 %v1586_v39, %v1495_v34  ;;  %v1621_v46 = vadd.f32 %v1620_v38, %v1606_v36 }
 0x1a1   : > { %v1588_v47 = vadd.f32 %v1587_v45, %v1497_v54  ;;  %v1622_v50 = vadd.f32 %v1621_v46, %v1607_v40 }
 0x1a3   : > { %1589 = vadd.xlane.f32.xlu0 %v1588_v47  ;;  %v1623_v51 = vadd.f32 %v1622_v50, %v1608_v49 }
 0x1a7   : > { %1624 = vadd.xlane.f32.xlu0 %v1623_v51 }
 0x230   : > { %v1590_v52 = vpop.xlane.xlu0 %1589 }
 0x231   : > { %1592 = vst.msk [vmem:[%s458_s20] sm:$0xff] %vm1591_vm2, %v1590_v52 }
 0x234   : > { %v1625_v53 = vpop.xlane.xlu0 %1624 }
 0x235   : > { %1626 = vst.msk [vmem:[%s462_s24] sm:$0xff] %vm1591_vm2, %v1625_v53 }
 0x236 PF: > { %p12_p10 = scmp.ge.s32.totalorder %s2005_s19, 4   ;;  %s2449_s15 = smov %s1954_s16 }
 0x237   : > { %s2450_s16 = smov %s2014_s22  ;;  %s2451_s17 = smov %s2005_s19 }
 0x238   :  { %14 = sbr.rel (!%p12_p10) target bundleno = 2 (0x2), region = 110 }

// kernel: costregnet_small_forward.32
= control target key start
LH: loop header
LB: loop body
LE: loop exit
PB: predicated region body
PF: predicated region fallthrough
CT: control target
= control target key end

     0   :  { %s452_s12 = smov 0   ;;  %s482_s0 = inlined_call_operand.vmem [shape: bf16[8,4096], index: 0, kind: input, shape index: {}]   ;;  %s483_s1 = inlined_call_operand.vmem [shape: f32[8,1], index: 1, kind: input, shape index: {}]   ;;  %s484_s2 = inlined_call_operand.vmem [shape: f32[8,1], index: 2, kind: input, shape index: {}]   ;;  %s485_s3 = inlined_call_operand.vmem [shape: bf16[8,4096], index: 3, kind: output, shape index: {}]  }
   0x1 LB: > { %s386_s13 = sadd.s32 4294967295, %s429_s12   ;;  %p390_p0 = scmp.ge.s32.totalorder %s429_s12, 1  ;;  %s429_s12 = sphi %s452_s12, %s13_s12  }
   0x2   : > { %p138_p1 = scmp.lt.s32.totalorder %s429_s12, 3 }
   0x4   : > { %p139_p2 = pnand %p390_p0, %p138_p1 }
   0x5   : > { %v198_v0 = vld [vmem:[%s483_s1] sm:$0xff] (!%p139_p2)  ;;  %v431_v1 = vmov (!%p139_p2), 0   ;;  %s391_s18 = sshll.u32 (!%p139_p2), %s386_s13, 4 }
   0x6   : > { %142 = sbr.rel (%p139_p2) target bundleno = 153 (0x99), region = 32  ;;  %422 = vset.pattern.permute.xlu0 (!%p139_p2), %v431_v1  ;;  %v220_v2 = vld [vmem:[%s484_s2] sm:$0xff] (!%p139_p2)  ;;  %p163_p3 = scmp.lt.s32.totalorder (!%p139_p2), %s391_s18, 31 }
   0x7   : > { %201 = vperm.xlu0 (!%p139_p2), %422, %v198_v0  }
   0xb   : > { %223 = vperm.xlu0 (!%p139_p2), %422, %v220_v2  }
   0xd   : > { %s487_s18 = smov (!%p163_p3, %s391_s18), 31 }
   0xe   : > { %s392_s19 = sshll.u32 %s487_s18, 2 }
   0xf   : > { %s166_s22 = scalar_lea.vmem %s482_s0, %s392_s19  ;;  %s172_s25 = scalar_lea.vmem %s485_s3, %s392_s19 }
  0x10   : > { %v174_v3 = vld [vmem:[%s166_s22] sm:$0xff]  ;;  %v175_v4 = vld [vmem:[%s166_s22 + $0x8] sm:$0xff]  ;;  %v176_v5 = vld [vmem:[%s166_s22 + $0x10] sm:$0xff] }
  0x11   : > { %v177_v6 = vld [vmem:[%s166_s22 + $0x18] sm:$0xff]  ;;  %v178_v7 = vld [vmem:[%s166_s22 + $0x20] sm:$0xff]  ;;  %v179_v8 = vld [vmem:[%s166_s22 + $0x28] sm:$0xff]  ;;  %v182_v11 = vunpack.c.l.bf16 %v174_v3  ;;  %v183_v12 = vunpack.c.h.bf16 %v174_v3  ;;  %v184_v13 = vunpack.c.l.bf16 %v175_v4  ;;  %v185_v14 = vunpack.c.h.bf16 %v175_v4 }
  0x12   : > { %v180_v9 = vld [vmem:[%s166_s22 + $0x30] sm:$0xff]  ;;  %v181_v10 = vld [vmem:[%s166_s22 + $0x38] sm:$0xff]  ;;  %v186_v15 = vunpack.c.l.bf16 %v176_v5  ;;  %v187_v16 = vunpack.c.h.bf16 %v176_v5  ;;  %v188_v17 = vunpack.c.l.bf16 %v177_v6  ;;  %v189_v18 = vunpack.c.h.bf16 %v177_v6 }
  0x13   : > { %v190_v19 = vunpack.c.l.bf16 %v178_v7  ;;  %v191_v20 = vunpack.c.h.bf16 %v178_v7  ;;  %v192_v21 = vunpack.c.l.bf16 %v179_v8  ;;  %v193_v22 = vunpack.c.h.bf16 %v179_v8 }
  0x14   : > { %v194_v24 = vunpack.c.l.bf16 %v180_v9  ;;  %v195_v25 = vunpack.c.h.bf16 %v180_v9  ;;  %v196_v26 = vunpack.c.l.bf16 %v181_v10  ;;  %v197_v27 = vunpack.c.h.bf16 %v181_v10 }
  0x86   : > { %v202_v23 = vpop.permute.xlu0 %201 }
  0x87   : > { %v204_v28 = vmul.f32 %v202_v23, %v182_v11  ;;  %v205_v29 = vmul.f32 %v202_v23, %v183_v12  ;;  %v206_v30 = vmul.f32 %v202_v23, %v184_v13  ;;  %v207_v31 = vmul.f32 %v202_v23, %v185_v14 }
  0x88   : > { %v208_v32 = vmul.f32 %v202_v23, %v186_v15  ;;  %v209_v33 = vmul.f32 %v202_v23, %v187_v16  ;;  %v210_v34 = vmul.f32 %v202_v23, %v188_v17  ;;  %v211_v35 = vmul.f32 %v202_v23, %v189_v18 }
  0x89   : > { %v212_v36 = vmul.f32 %v202_v23, %v190_v19  ;;  %v213_v37 = vmul.f32 %v202_v23, %v191_v20  ;;  %v214_v38 = vmul.f32 %v202_v23, %v192_v21  ;;  %v215_v39 = vmul.f32 %v202_v23, %v193_v22 }
  0x8a   : > { %v224_v40 = vpop.permute.xlu0 %223  ;;  %v216_v41 = vmul.f32 %v202_v23, %v194_v24  ;;  %v217_v42 = vmul.f32 %v202_v23, %v195_v25  ;;  %v218_v43 = vmul.f32 %v202_v23, %v196_v26  ;;  %v219_v44 = vmul.f32 %v202_v23, %v197_v27 }
  0x8b   : > { %v226_v45 = vadd.f32 %v224_v40, %v204_v28  ;;  %v227_v46 = vadd.f32 %v224_v40, %v205_v29  ;;  %v228_v47 = vadd.f32 %v224_v40, %v206_v30  ;;  %v229_v48 = vadd.f32 %v224_v40, %v207_v31 }
  0x8c   : > { %v230_v49 = vadd.f32 %v224_v40, %v208_v32  ;;  %v231_v50 = vadd.f32 %v224_v40, %v209_v33  ;;  %v232_v51 = vadd.f32 %v224_v40, %v210_v34  ;;  %v233_v52 = vadd.f32 %v224_v40, %v211_v35 }
  0x8d   : > { %v234_v53 = vadd.f32 %v224_v40, %v212_v36  ;;  %v235_v54 = vadd.f32 %v224_v40, %v213_v37  ;;  %v236_v55 = vadd.f32 %v224_v40, %v214_v38  ;;  %v237_v56 = vadd.f32 %v224_v40, %v215_v39 }
  0x8e   : > { %v238_v57 = vadd.f32 %v224_v40, %v216_v41  ;;  %v239_v58 = vadd.f32 %v224_v40, %v217_v42  ;;  %v240_v59 = vadd.f32 %v224_v40, %v218_v43  ;;  %v241_v60 = vadd.f32 %v224_v40, %v219_v44 }
  0x8f   : > { %v242_v61 = vmax.f32 %v226_v45, 0.0  ;;  %v243_v62 = vmax.f32 %v227_v46, 0.0  ;;  %v244_v63 = vmax.f32 %v228_v47, 0.0  ;;  %v245_v0 = vmax.f32 %v229_v48, 0.0 }
  0x90   : > { %v246_v1 = vmax.f32 %v230_v49, 0.0  ;;  %v247_v2 = vmax.f32 %v231_v50, 0.0  ;;  %v248_v3 = vmax.f32 %v232_v51, 0.0  ;;  %v249_v4 = vmax.f32 %v233_v52, 0.0 }
  0x91   : > { %v250_v5 = vmax.f32 %v234_v53, 0.0  ;;  %v251_v6 = vmax.f32 %v235_v54, 0.0  ;;  %v252_v7 = vmax.f32 %v236_v55, 0.0  ;;  %v253_v8 = vmax.f32 %v237_v56, 0.0 }
  0x92   : > { %v254_v9 = vmax.f32 %v238_v57, 0.0  ;;  %v255_v10 = vmax.f32 %v239_v58, 0.0  ;;  %v256_v11 = vmax.f32 %v240_v59, 0.0  ;;  %v257_v12 = vmax.f32 %v241_v60, 0.0 }
  0x93   : > { %v405_v13 = vpack.c.bf16 %v243_v62, %v242_v61  ;;  %v406_v14 = vpack.c.bf16 %v245_v0, %v244_v63  ;;  %v407_v15 = vpack.c.bf16 %v247_v2, %v246_v1  ;;  %v408_v16 = vpack.c.bf16 %v249_v4, %v248_v3 }
  0x94   : > { %v409_v17 = vpack.c.bf16 %v251_v6, %v250_v5  ;;  %v410_v18 = vpack.c.bf16 %v253_v8, %v252_v7  ;;  %v411_v19 = vpack.c.bf16 %v255_v10, %v254_v9  ;;  %v412_v20 = vpack.c.bf16 %v257_v12, %v256_v11 }
  0x95   : > { %322 = vst [vmem:[%s172_s25] sm:$0xff] %v405_v13  ;;  %323 = vst [vmem:[%s172_s25 + $0x8] sm:$0xff] %v406_v14 }
  0x96   : > { %324 = vst [vmem:[%s172_s25 + $0x10] sm:$0xff] %v407_v15  ;;  %325 = vst [vmem:[%s172_s25 + $0x18] sm:$0xff] %v408_v16 }
  0x97   : > { %326 = vst [vmem:[%s172_s25 + $0x20] sm:$0xff] %v409_v17  ;;  %327 = vst [vmem:[%s172_s25 + $0x28] sm:$0xff] %v410_v18 }
  0x98   : > { %328 = vst [vmem:[%s172_s25 + $0x30] sm:$0xff] %v411_v19  ;;  %329 = vst [vmem:[%s172_s25 + $0x38] sm:$0xff] %v412_v20 }
  0x99 PF: > { %s13_s12 = sadd.s32 1, %s429_s12  }
  0x9a   : > { %p10_p4 = scmp.ge.s32.totalorder %s13_s12, 4  }
  0x9c   :  { %12 = sbr.rel (!%p10_p4) target bundleno = 1 (0x1), region = 62 }

// kernel: costregnet_small_forward.33
= control target key start
LH: loop header
LB: loop body
LE: loop exit
PB: predicated region body
PF: predicated region fallthrough
CT: control target
= control target key end

     0   :  { %s2970_s15 = smov 0   ;;  %s2972_s16 = smov 0   ;;  %s3748_s0 = inlined_call_operand.vmem [shape: bf16[8,216], index: 0, kind: input, shape index: {}]   ;;  %s3749_s1 = inlined_call_operand.vmem [shape: bf16[216,4096], index: 1, kind: input, shape index: {}]   ;;  %s3750_s2 = inlined_call_operand.vmem [shape: bf16[8,4096], index: 2, kind: output, shape index: {0}]   ;;  %s3751_s3 = inlined_call_operand.vmem [shape: f32[2,8,1], index: 3, kind: output, shape index: {1}]   ;;  %s3752_s4 = inlined_call_operand.vmem [shape: f32[2,8,1], index: 4, kind: output, shape index: {2}]  }
   0x1   :  { %s2974_s17 = smov 0  }
   0x2 LB: > { %s2986_s18 = sadd.s32 4294967295, %s2943_s17   ;;  %s2989_s19 = sadd.s32 1, %s2943_s17   ;;  %s2943_s17 = sphi %s2974_s17, %s3755_s17   ;;  %s2939_s16 = sphi %s2972_s16, %s3754_s16   ;;  %s2935_s15 = sphi %s2970_s15, %s3753_s15  }
   0x3   : > { %s40_s20 = ssub.s32 %s2943_s17, %s2989_s19  ;;  %s43_s21 = sadd.s32 1, %s2939_s16 }
   0x4   : > { %p41_p0 = scmp.eq.s32.totalorder %s40_s20, 0  ;;  %p50_p1 = scmp.ne.s32.totalorder %s2939_s16, %s2935_s15 }
   0x5   : > { %p51_p2 = scmp.eq.s32.totalorder %s2943_s17, 0  ;;  %p2608_p4 = scmp.ge.s32.totalorder %s2943_s17, 2 }
   0x6   : > { %s2998_s22 = scalar_select %p41_p0, %s2939_s16, %s43_s21  }
   0x7   : > { %p52_p3 = por %p51_p2, %p50_p1  ;;  %157 = sbr.rel (%p2608_p4) target bundleno = 127 (0x7f), region = 20 }
   0xe   : > { %160 = sbr.rel (!%p52_p3) target bundleno = 127 (0x7f), region = 24  ;;  %s162_s23 = sand.u32 (%p52_p3), 1, %s2939_s16  }
   0xf   : > { %s2868_s24 = sshll.u32 (%p52_p3), %s2943_s17, 6  ;;  %s2877_s25 = smul.u32 (%p52_p3), 1728, %s162_s23 }
  0x10   : > { %s3006_s28 = scalar_lea.vmem (%p52_p3), %s3749_s1, %s2868_s24 }
  0x11   : > { %v180_v0 = vld [vmem:[%s3006_s28] sm:$0xff] (%p52_p3)  ;;  %v182_v1 = vld [vmem:[%s3006_s28 + $0x8] sm:$0xff] (%p52_p3)  ;;  %v184_v2 = vld [vmem:[%s3006_s28 + $0x10] sm:$0xff] (%p52_p3)  ;;  %s3014_s29 = scalar_lea.vmem (%p52_p3), [#allocation2], %s2877_s25 }
  0x12   : > { %v186_v3 = vld [vmem:[%s3006_s28 + $0x18] sm:$0xff] (%p52_p3)  ;;  %v188_v4 = vld [vmem:[%s3006_s28 + $0x20] sm:$0xff] (%p52_p3)  ;;  %v190_v5 = vld [vmem:[%s3006_s28 + $0x28] sm:$0xff] (%p52_p3)  ;;  %181 = vst [vmem:[%s3014_s29] sm:$0xff] (%p52_p3), %v180_v0 }
  0x13   : > { %183 = vst [vmem:[%s3014_s29 + $0x8] sm:$0xff] (%p52_p3), %v182_v1  ;;  %185 = vst [vmem:[%s3014_s29 + $0x10] sm:$0xff] (%p52_p3), %v184_v2  ;;  %v192_v6 = vld [vmem:[%s3006_s28 + $0x30] sm:$0xff] (%p52_p3)  ;;  %v194_v7 = vld [vmem:[%s3006_s28 + $0x38] sm:$0xff] (%p52_p3) }
  0x14   : > { %187 = vst [vmem:[%s3014_s29 + $0x18] sm:$0xff] (%p52_p3), %v186_v3  ;;  %189 = vst [vmem:[%s3014_s29 + $0x20] sm:$0xff] (%p52_p3), %v188_v4  ;;  %v196_v8 = vld [vmem:[%s3006_s28 + $0x80] sm:$0xff] (%p52_p3)  ;;  %v198_v9 = vld [vmem:[%s3006_s28 + $0x88] sm:$0xff] (%p52_p3) }
  0x15   : > { %191 = vst [vmem:[%s3014_s29 + $0x28] sm:$0xff] %v190_v5  ;;  %193 = vst [vmem:[%s3014_s29 + $0x30] sm:$0xff] %v192_v6  ;;  %v200_v10 = vld [vmem:[%s3006_s28 + $0x90] sm:$0xff]  ;;  %v202_v11 = vld [vmem:[%s3006_s28 + $0x98] sm:$0xff] }
  0x16   : > { %195 = vst [vmem:[%s3014_s29 + $0x38] sm:$0xff] %v194_v7  ;;  %197 = vst [vmem:[%s3014_s29 + $0x40] sm:$0xff] %v196_v8  ;;  %v204_v12 = vld [vmem:[%s3006_s28 + $0xa0] sm:$0xff]  ;;  %v206_v13 = vld [vmem:[%s3006_s28 + $0xa8] sm:$0xff] }
  0x17   : > { %199 = vst [vmem:[%s3014_s29 + $0x48] sm:$0xff] %v198_v9  ;;  %201 = vst [vmem:[%s3014_s29 + $0x50] sm:$0xff] %v200_v10  ;;  %v208_v14 = vld [vmem:[%s3006_s28 + $0xb0] sm:$0xff]  ;;  %v210_v15 = vld [vmem:[%s3006_s28 + $0xb8] sm:$0xff] }
  0x18   : > { %203 = vst [vmem:[%s3014_s29 + $0x58] sm:$0xff] %v202_v11  ;;  %205 = vst [vmem:[%s3014_s29 + $0x60] sm:$0xff] %v204_v12  ;;  %v212_v16 = vld [vmem:[%s3006_s28 + $0x100] sm:$0xff]  ;;  %v214_v17 = vld [vmem:[%s3006_s28 + $0x108] sm:$0xff] }
  0x19   : > { %207 = vst [vmem:[%s3014_s29 + $0x68] sm:$0xff] %v206_v13  ;;  %209 = vst [vmem:[%s3014_s29 + $0x70] sm:$0xff] %v208_v14  ;;  %v216_v18 = vld [vmem:[%s3006_s28 + $0x110] sm:$0xff]  ;;  %v218_v19 = vld [vmem:[%s3006_s28 + $0x118] sm:$0xff] }
  0x1a   : > { %211 = vst [vmem:[%s3014_s29 + $0x78] sm:$0xff] %v210_v15  ;;  %213 = vst [vmem:[%s3014_s29 + $0x80] sm:$0xff] %v212_v16  ;;  %v220_v20 = vld [vmem:[%s3006_s28 + $0x120] sm:$0xff]  ;;  %v222_v21 = vld [vmem:[%s3006_s28 + $0x128] sm:$0xff] }
  0x1b   : > { %215 = vst [vmem:[%s3014_s29 + $0x88] sm:$0xff] %v214_v17  ;;  %217 = vst [vmem:[%s3014_s29 + $0x90] sm:$0xff] %v216_v18  ;;  %v224_v22 = vld [vmem:[%s3006_s28 + $0x130] sm:$0xff]  ;;  %v226_v23 = vld [vmem:[%s3006_s28 + $0x138] sm:$0xff] }
  0x1c   : > { %219 = vst [vmem:[%s3014_s29 + $0x98] sm:$0xff] %v218_v19  ;;  %221 = vst [vmem:[%s3014_s29 + $0xa0] sm:$0xff] %v220_v20  ;;  %v228_v24 = vld [vmem:[%s3006_s28 + $0x180] sm:$0xff]  ;;  %v230_v25 = vld [vmem:[%s3006_s28 + $0x188] sm:$0xff] }
  0x1d   : > { %223 = vst [vmem:[%s3014_s29 + $0xa8] sm:$0xff] %v222_v21  ;;  %225 = vst [vmem:[%s3014_s29 + $0xb0] sm:$0xff] %v224_v22  ;;  %v232_v26 = vld [vmem:[%s3006_s28 + $0x190] sm:$0xff]  ;;  %v234_v27 = vld [vmem:[%s3006_s28 + $0x198] sm:$0xff] }
  0x1e   : > { %227 = vst [vmem:[%s3014_s29 + $0xb8] sm:$0xff] %v226_v23  ;;  %229 = vst [vmem:[%s3014_s29 + $0xc0] sm:$0xff] %v228_v24  ;;  %v236_v28 = vld [vmem:[%s3006_s28 + $0x1a0] sm:$0xff]  ;;  %v238_v29 = vld [vmem:[%s3006_s28 + $0x1a8] sm:$0xff] }
  0x1f   : > { %231 = vst [vmem:[%s3014_s29 + $0xc8] sm:$0xff] %v230_v25  ;;  %233 = vst [vmem:[%s3014_s29 + $0xd0] sm:$0xff] %v232_v26  ;;  %v240_v30 = vld [vmem:[%s3006_s28 + $0x1b0] sm:$0xff]  ;;  %v242_v31 = vld [vmem:[%s3006_s28 + $0x1b8] sm:$0xff] }
  0x20   : > { %235 = vst [vmem:[%s3014_s29 + $0xd8] sm:$0xff] %v234_v27  ;;  %237 = vst [vmem:[%s3014_s29 + $0xe0] sm:$0xff] %v236_v28  ;;  %v244_v32 = vld [vmem:[%s3006_s28 + $0x200] sm:$0xff]  ;;  %v246_v33 = vld [vmem:[%s3006_s28 + $0x208] sm:$0xff] }
  0x21   : > { %239 = vst [vmem:[%s3014_s29 + $0xe8] sm:$0xff] %v238_v29  ;;  %241 = vst [vmem:[%s3014_s29 + $0xf0] sm:$0xff] %v240_v30  ;;  %v248_v34 = vld [vmem:[%s3006_s28 + $0x210] sm:$0xff]  ;;  %v250_v35 = vld [vmem:[%s3006_s28 + $0x218] sm:$0xff] }
  0x22   : > { %243 = vst [vmem:[%s3014_s29 + $0xf8] sm:$0xff] %v242_v31  ;;  %245 = vst [vmem:[%s3014_s29 + $0x100] sm:$0xff] %v244_v32  ;;  %v252_v36 = vld [vmem:[%s3006_s28 + $0x220] sm:$0xff]  ;;  %v254_v37 = vld [vmem:[%s3006_s28 + $0x228] sm:$0xff] }
  0x23   : > { %247 = vst [vmem:[%s3014_s29 + $0x108] sm:$0xff] %v246_v33  ;;  %249 = vst [vmem:[%s3014_s29 + $0x110] sm:$0xff] %v248_v34  ;;  %v256_v38 = vld [vmem:[%s3006_s28 + $0x230] sm:$0xff]  ;;  %v258_v39 = vld [vmem:[%s3006_s28 + $0x238] sm:$0xff] }
  0x24   : > { %251 = vst [vmem:[%s3014_s29 + $0x118] sm:$0xff] %v250_v35  ;;  %253 = vst [vmem:[%s3014_s29 + $0x120] sm:$0xff] %v252_v36  ;;  %v260_v40 = vld [vmem:[%s3006_s28 + $0x280] sm:$0xff]  ;;  %v262_v41 = vld [vmem:[%s3006_s28 + $0x288] sm:$0xff] }
  0x25   : > { %255 = vst [vmem:[%s3014_s29 + $0x128] sm:$0xff] %v254_v37  ;;  %257 = vst [vmem:[%s3014_s29 + $0x130] sm:$0xff] %v256_v38  ;;  %v264_v42 = vld [vmem:[%s3006_s28 + $0x290] sm:$0xff]  ;;  %v266_v43 = vld [vmem:[%s3006_s28 + $0x298] sm:$0xff] }
  0x26   : > { %259 = vst [vmem:[%s3014_s29 + $0x138] sm:$0xff] %v258_v39  ;;  %261 = vst [vmem:[%s3014_s29 + $0x140] sm:$0xff] %v260_v40  ;;  %v268_v44 = vld [vmem:[%s3006_s28 + $0x2a0] sm:$0xff]  ;;  %v270_v45 = vld [vmem:[%s3006_s28 + $0x2a8] sm:$0xff] }
  0x27   : > { %263 = vst [vmem:[%s3014_s29 + $0x148] sm:$0xff] %v262_v41  ;;  %265 = vst [vmem:[%s3014_s29 + $0x150] sm:$0xff] %v264_v42  ;;  %v272_v46 = vld [vmem:[%s3006_s28 + $0x2b0] sm:$0xff]  ;;  %v274_v47 = vld [vmem:[%s3006_s28 + $0x2b8] sm:$0xff] }
  0x28   : > { %267 = vst [vmem:[%s3014_s29 + $0x158] sm:$0xff] %v266_v43  ;;  %269 = vst [vmem:[%s3014_s29 + $0x160] sm:$0xff] %v268_v44  ;;  %v276_v48 = vld [vmem:[%s3006_s28 + $0x300] sm:$0xff]  ;;  %v278_v49 = vld [vmem:[%s3006_s28 + $0x308] sm:$0xff] }
  0x29   : > { %271 = vst [vmem:[%s3014_s29 + $0x168] sm:$0xff] %v270_v45  ;;  %273 = vst [vmem:[%s3014_s29 + $0x170] sm:$0xff] %v272_v46  ;;  %v280_v50 = vld [vmem:[%s3006_s28 + $0x310] sm:$0xff]  ;;  %v282_v51 = vld [vmem:[%s3006_s28 + $0x318] sm:$0xff] }
  0x2a   : > { %275 = vst [vmem:[%s3014_s29 + $0x178] sm:$0xff] %v274_v47  ;;  %277 = vst [vmem:[%s3014_s29 + $0x180] sm:$0xff] %v276_v48  ;;  %v284_v52 = vld [vmem:[%s3006_s28 + $0x320] sm:$0xff]  ;;  %v286_v53 = vld [vmem:[%s3006_s28 + $0x328] sm:$0xff] }
  0x2b   : > { %279 = vst [vmem:[%s3014_s29 + $0x188] sm:$0xff] %v278_v49  ;;  %281 = vst [vmem:[%s3014_s29 + $0x190] sm:$0xff] %v280_v50  ;;  %v288_v54 = vld [vmem:[%s3006_s28 + $0x330] sm:$0xff]  ;;  %v290_v55 = vld [vmem:[%s3006_s28 + $0x338] sm:$0xff] }
  0x2c   : > { %283 = vst [vmem:[%s3014_s29 + $0x198] sm:$0xff] %v282_v51  ;;  %285 = vst [vmem:[%s3014_s29 + $0x1a0] sm:$0xff] %v284_v52  ;;  %v292_v56 = vld [vmem:[%s3006_s28 + $0x380] sm:$0xff]  ;;  %v294_v57 = vld [vmem:[%s3006_s28 + $0x388] sm:$0xff] }
  0x2d   : > { %287 = vst [vmem:[%s3014_s29 + $0x1a8] sm:$0xff] %v286_v53  ;;  %289 = vst [vmem:[%s3014_s29 + $0x1b0] sm:$0xff] %v288_v54  ;;  %v296_v58 = vld [vmem:[%s3006_s28 + $0x390] sm:$0xff]  ;;  %v298_v59 = vld [vmem:[%s3006_s28 + $0x398] sm:$0xff] }
  0x2e   : > { %291 = vst [vmem:[%s3014_s29 + $0x1b8] sm:$0xff] %v290_v55  ;;  %293 = vst [vmem:[%s3014_s29 + $0x1c0] sm:$0xff] %v292_v56  ;;  %v300_v60 = vld [vmem:[%s3006_s28 + $0x3a0] sm:$0xff]  ;;  %v302_v61 = vld [vmem:[%s3006_s28 + $0x3a8] sm:$0xff] }
  0x2f   : > { %295 = vst [vmem:[%s3014_s29 + $0x1c8] sm:$0xff] %v294_v57  ;;  %297 = vst [vmem:[%s3014_s29 + $0x1d0] sm:$0xff] %v296_v58  ;;  %v304_v62 = vld [vmem:[%s3006_s28 + $0x3b0] sm:$0xff]  ;;  %v306_v63 = vld [vmem:[%s3006_s28 + $0x3b8] sm:$0xff] }
  0x30   : > { %299 = vst [vmem:[%s3014_s29 + $0x1d8] sm:$0xff] %v298_v59  ;;  %301 = vst [vmem:[%s3014_s29 + $0x1e0] sm:$0xff] %v300_v60  ;;  %v308_v0 = vld [vmem:[%s3006_s28 + $0x400] sm:$0xff]  ;;  %v310_v1 = vld [vmem:[%s3006_s28 + $0x408] sm:$0xff] }
  0x31   : > { %303 = vst [vmem:[%s3014_s29 + $0x1e8] sm:$0xff] %v302_v61  ;;  %305 = vst [vmem:[%s3014_s29 + $0x1f0] sm:$0xff] %v304_v62  ;;  %v312_v2 = vld [vmem:[%s3006_s28 + $0x410] sm:$0xff]  ;;  %v314_v3 = vld [vmem:[%s3006_s28 + $0x418] sm:$0xff] }
  0x32   : > { %307 = vst [vmem:[%s3014_s29 + $0x1f8] sm:$0xff] %v306_v63  ;;  %309 = vst [vmem:[%s3014_s29 + $0x200] sm:$0xff] %v308_v0  ;;  %v316_v4 = vld [vmem:[%s3006_s28 + $0x420] sm:$0xff]  ;;  %v318_v5 = vld [vmem:[%s3006_s28 + $0x428] sm:$0xff] }
  0x33   : > { %311 = vst [vmem:[%s3014_s29 + $0x208] sm:$0xff] %v310_v1  ;;  %313 = vst [vmem:[%s3014_s29 + $0x210] sm:$0xff] %v312_v2  ;;  %v320_v6 = vld [vmem:[%s3006_s28 + $0x430] sm:$0xff]  ;;  %v322_v7 = vld [vmem:[%s3006_s28 + $0x438] sm:$0xff] }
  0x34   : > { %315 = vst [vmem:[%s3014_s29 + $0x218] sm:$0xff] %v314_v3  ;;  %317 = vst [vmem:[%s3014_s29 + $0x220] sm:$0xff] %v316_v4  ;;  %v324_v8 = vld [vmem:[%s3006_s28 + $0x480] sm:$0xff]  ;;  %v326_v9 = vld [vmem:[%s3006_s28 + $0x488] sm:$0xff] }
  0x35   : > { %319 = vst [vmem:[%s3014_s29 + $0x228] sm:$0xff] %v318_v5  ;;  %321 = vst [vmem:[%s3014_s29 + $0x230] sm:$0xff] %v320_v6  ;;  %v328_v10 = vld [vmem:[%s3006_s28 + $0x490] sm:$0xff]  ;;  %v330_v11 = vld [vmem:[%s3006_s28 + $0x498] sm:$0xff] }
  0x36   : > { %323 = vst [vmem:[%s3014_s29 + $0x238] sm:$0xff] %v322_v7  ;;  %325 = vst [vmem:[%s3014_s29 + $0x240] sm:$0xff] %v324_v8  ;;  %v332_v12 = vld [vmem:[%s3006_s28 + $0x4a0] sm:$0xff]  ;;  %v334_v13 = vld [vmem:[%s3006_s28 + $0x4a8] sm:$0xff] }
  0x37   : > { %327 = vst [vmem:[%s3014_s29 + $0x248] sm:$0xff] %v326_v9  ;;  %329 = vst [vmem:[%s3014_s29 + $0x250] sm:$0xff] %v328_v10  ;;  %v336_v14 = vld [vmem:[%s3006_s28 + $0x4b0] sm:$0xff]  ;;  %v338_v15 = vld [vmem:[%s3006_s28 + $0x4b8] sm:$0xff] }
  0x38   : > { %331 = vst [vmem:[%s3014_s29 + $0x258] sm:$0xff] %v330_v11  ;;  %333 = vst [vmem:[%s3014_s29 + $0x260] sm:$0xff] %v332_v12  ;;  %v340_v16 = vld [vmem:[%s3006_s28 + $0x500] sm:$0xff]  ;;  %v342_v17 = vld [vmem:[%s3006_s28 + $0x508] sm:$0xff] }
  0x39   : > { %335 = vst [vmem:[%s3014_s29 + $0x268] sm:$0xff] %v334_v13  ;;  %337 = vst [vmem:[%s3014_s29 + $0x270] sm:$0xff] %v336_v14  ;;  %v344_v18 = vld [vmem:[%s3006_s28 + $0x510] sm:$0xff]  ;;  %v346_v19 = vld [vmem:[%s3006_s28 + $0x518] sm:$0xff] }
  0x3a   : > { %339 = vst [vmem:[%s3014_s29 + $0x278] sm:$0xff] %v338_v15  ;;  %341 = vst [vmem:[%s3014_s29 + $0x280] sm:$0xff] %v340_v16  ;;  %v348_v20 = vld [vmem:[%s3006_s28 + $0x520] sm:$0xff]  ;;  %v350_v21 = vld [vmem:[%s3006_s28 + $0x528] sm:$0xff] }
  0x3b   : > { %343 = vst [vmem:[%s3014_s29 + $0x288] sm:$0xff] %v342_v17  ;;  %345 = vst [vmem:[%s3014_s29 + $0x290] sm:$0xff] %v344_v18  ;;  %v352_v22 = vld [vmem:[%s3006_s28 + $0x530] sm:$0xff]  ;;  %v354_v23 = vld [vmem:[%s3006_s28 + $0x538] sm:$0xff] }
  0x3c   : > { %347 = vst [vmem:[%s3014_s29 + $0x298] sm:$0xff] %v346_v19  ;;  %349 = vst [vmem:[%s3014_s29 + $0x2a0] sm:$0xff] %v348_v20  ;;  %v356_v24 = vld [vmem:[%s3006_s28 + $0x580] sm:$0xff]  ;;  %v358_v25 = vld [vmem:[%s3006_s28 + $0x588] sm:$0xff] }
  0x3d   : > { %351 = vst [vmem:[%s3014_s29 + $0x2a8] sm:$0xff] %v350_v21  ;;  %353 = vst [vmem:[%s3014_s29 + $0x2b0] sm:$0xff] %v352_v22  ;;  %v360_v26 = vld [vmem:[%s3006_s28 + $0x590] sm:$0xff]  ;;  %v362_v27 = vld [vmem:[%s3006_s28 + $0x598] sm:$0xff] }
  0x3e   : > { %355 = vst [vmem:[%s3014_s29 + $0x2b8] sm:$0xff] %v354_v23  ;;  %357 = vst [vmem:[%s3014_s29 + $0x2c0] sm:$0xff] %v356_v24  ;;  %v364_v28 = vld [vmem:[%s3006_s28 + $0x5a0] sm:$0xff]  ;;  %v366_v29 = vld [vmem:[%s3006_s28 + $0x5a8] sm:$0xff] }
  0x3f   : > { %359 = vst [vmem:[%s3014_s29 + $0x2c8] sm:$0xff] %v358_v25  ;;  %361 = vst [vmem:[%s3014_s29 + $0x2d0] sm:$0xff] %v360_v26  ;;  %v368_v30 = vld [vmem:[%s3006_s28 + $0x5b0] sm:$0xff]  ;;  %v370_v31 = vld [vmem:[%s3006_s28 + $0x5b8] sm:$0xff] }
  0x40   : > { %363 = vst [vmem:[%s3014_s29 + $0x2d8] sm:$0xff] %v362_v27  ;;  %365 = vst [vmem:[%s3014_s29 + $0x2e0] sm:$0xff] %v364_v28  ;;  %v372_v32 = vld [vmem:[%s3006_s28 + $0x600] sm:$0xff]  ;;  %v374_v33 = vld [vmem:[%s3006_s28 + $0x608] sm:$0xff] }
  0x41   : > { %367 = vst [vmem:[%s3014_s29 + $0x2e8] sm:$0xff] %v366_v29  ;;  %369 = vst [vmem:[%s3014_s29 + $0x2f0] sm:$0xff] %v368_v30  ;;  %v376_v34 = vld [vmem:[%s3006_s28 + $0x610] sm:$0xff]  ;;  %v378_v35 = vld [vmem:[%s3006_s28 + $0x618] sm:$0xff] }
  0x42   : > { %371 = vst [vmem:[%s3014_s29 + $0x2f8] sm:$0xff] %v370_v31  ;;  %373 = vst [vmem:[%s3014_s29 + $0x300] sm:$0xff] %v372_v32  ;;  %v380_v36 = vld [vmem:[%s3006_s28 + $0x620] sm:$0xff]  ;;  %v382_v37 = vld [vmem:[%s3006_s28 + $0x628] sm:$0xff] }
  0x43   : > { %375 = vst [vmem:[%s3014_s29 + $0x308] sm:$0xff] %v374_v33  ;;  %377 = vst [vmem:[%s3014_s29 + $0x310] sm:$0xff] %v376_v34  ;;  %v384_v38 = vld [vmem:[%s3006_s28 + $0x630] sm:$0xff]  ;;  %v386_v39 = vld [vmem:[%s3006_s28 + $0x638] sm:$0xff] }
  0x44   : > { %379 = vst [vmem:[%s3014_s29 + $0x318] sm:$0xff] %v378_v35  ;;  %381 = vst [vmem:[%s3014_s29 + $0x320] sm:$0xff] %v380_v36  ;;  %v388_v40 = vld [vmem:[%s3006_s28 + $0x680] sm:$0xff]  ;;  %v390_v41 = vld [vmem:[%s3006_s28 + $0x688] sm:$0xff] }
  0x45   : > { %383 = vst [vmem:[%s3014_s29 + $0x328] sm:$0xff] %v382_v37  ;;  %385 = vst [vmem:[%s3014_s29 + $0x330] sm:$0xff] %v384_v38  ;;  %v392_v42 = vld [vmem:[%s3006_s28 + $0x690] sm:$0xff]  ;;  %v394_v43 = vld [vmem:[%s3006_s28 + $0x698] sm:$0xff] }
  0x46   : > { %387 = vst [vmem:[%s3014_s29 + $0x338] sm:$0xff] %v386_v39  ;;  %389 = vst [vmem:[%s3014_s29 + $0x340] sm:$0xff] %v388_v40  ;;  %v396_v44 = vld [vmem:[%s3006_s28 + $0x6a0] sm:$0xff]  ;;  %v398_v45 = vld [vmem:[%s3006_s28 + $0x6a8] sm:$0xff] }
  0x47   : > { %391 = vst [vmem:[%s3014_s29 + $0x348] sm:$0xff] %v390_v41  ;;  %393 = vst [vmem:[%s3014_s29 + $0x350] sm:$0xff] %v392_v42  ;;  %v400_v46 = vld [vmem:[%s3006_s28 + $0x6b0] sm:$0xff]  ;;  %v402_v47 = vld [vmem:[%s3006_s28 + $0x6b8] sm:$0xff] }
  0x48   : > { %395 = vst [vmem:[%s3014_s29 + $0x358] sm:$0xff] %v394_v43  ;;  %397 = vst [vmem:[%s3014_s29 + $0x360] sm:$0xff] %v396_v44  ;;  %v404_v48 = vld [vmem:[%s3006_s28 + $0x700] sm:$0xff]  ;;  %v406_v49 = vld [vmem:[%s3006_s28 + $0x708] sm:$0xff] }
  0x49   : > { %399 = vst [vmem:[%s3014_s29 + $0x368] sm:$0xff] %v398_v45  ;;  %401 = vst [vmem:[%s3014_s29 + $0x370] sm:$0xff] %v400_v46  ;;  %v408_v50 = vld [vmem:[%s3006_s28 + $0x710] sm:$0xff]  ;;  %v410_v51 = vld [vmem:[%s3006_s28 + $0x718] sm:$0xff] }
  0x4a   : > { %403 = vst [vmem:[%s3014_s29 + $0x378] sm:$0xff] %v402_v47  ;;  %405 = vst [vmem:[%s3014_s29 + $0x380] sm:$0xff] %v404_v48  ;;  %v412_v52 = vld [vmem:[%s3006_s28 + $0x720] sm:$0xff]  ;;  %v414_v53 = vld [vmem:[%s3006_s28 + $0x728] sm:$0xff] }
  0x4b   : > { %407 = vst [vmem:[%s3014_s29 + $0x388] sm:$0xff] %v406_v49  ;;  %409 = vst [vmem:[%s3014_s29 + $0x390] sm:$0xff] %v408_v50  ;;  %v416_v54 = vld [vmem:[%s3006_s28 + $0x730] sm:$0xff]  ;;  %v418_v55 = vld [vmem:[%s3006_s28 + $0x738] sm:$0xff] }
  0x4c   : > { %411 = vst [vmem:[%s3014_s29 + $0x398] sm:$0xff] %v410_v51  ;;  %413 = vst [vmem:[%s3014_s29 + $0x3a0] sm:$0xff] %v412_v52  ;;  %v420_v56 = vld [vmem:[%s3006_s28 + $0x780] sm:$0xff]  ;;  %v422_v57 = vld [vmem:[%s3006_s28 + $0x788] sm:$0xff] }
  0x4d   : > { %415 = vst [vmem:[%s3014_s29 + $0x3a8] sm:$0xff] %v414_v53  ;;  %417 = vst [vmem:[%s3014_s29 + $0x3b0] sm:$0xff] %v416_v54  ;;  %v424_v58 = vld [vmem:[%s3006_s28 + $0x790] sm:$0xff]  ;;  %v426_v59 = vld [vmem:[%s3006_s28 + $0x798] sm:$0xff] }
  0x4e   : > { %419 = vst [vmem:[%s3014_s29 + $0x3b8] sm:$0xff] %v418_v55  ;;  %421 = vst [vmem:[%s3014_s29 + $0x3c0] sm:$0xff] %v420_v56  ;;  %v428_v60 = vld [vmem:[%s3006_s28 + $0x7a0] sm:$0xff]  ;;  %v430_v61 = vld [vmem:[%s3006_s28 + $0x7a8] sm:$0xff] }
  0x4f   : > { %423 = vst [vmem:[%s3014_s29 + $0x3c8] sm:$0xff] %v422_v57  ;;  %425 = vst [vmem:[%s3014_s29 + $0x3d0] sm:$0xff] %v424_v58  ;;  %v432_v62 = vld [vmem:[%s3006_s28 + $0x7b0] sm:$0xff]  ;;  %v434_v63 = vld [vmem:[%s3006_s28 + $0x7b8] sm:$0xff] }
  0x50   : > { %427 = vst [vmem:[%s3014_s29 + $0x3d8] sm:$0xff] %v426_v59  ;;  %429 = vst [vmem:[%s3014_s29 + $0x3e0] sm:$0xff] %v428_v60  ;;  %v436_v0 = vld [vmem:[%s3006_s28 + $0x800] sm:$0xff]  ;;  %v438_v1 = vld [vmem:[%s3006_s28 + $0x808] sm:$0xff] }
  0x51   : > { %431 = vst [vmem:[%s3014_s29 + $0x3e8] sm:$0xff] %v430_v61  ;;  %433 = vst [vmem:[%s3014_s29 + $0x3f0] sm:$0xff] %v432_v62  ;;  %v440_v2 = vld [vmem:[%s3006_s28 + $0x810] sm:$0xff]  ;;  %v442_v3 = vld [vmem:[%s3006_s28 + $0x818] sm:$0xff] }
  0x52   : > { %435 = vst [vmem:[%s3014_s29 + $0x3f8] sm:$0xff] %v434_v63  ;;  %437 = vst [vmem:[%s3014_s29 + $0x400] sm:$0xff] %v436_v0  ;;  %v444_v4 = vld [vmem:[%s3006_s28 + $0x820] sm:$0xff]  ;;  %v446_v5 = vld [vmem:[%s3006_s28 + $0x828] sm:$0xff] }
  0x53   : > { %439 = vst [vmem:[%s3014_s29 + $0x408] sm:$0xff] %v438_v1  ;;  %441 = vst [vmem:[%s3014_s29 + $0x410] sm:$0xff] %v440_v2  ;;  %v448_v6 = vld [vmem:[%s3006_s28 + $0x830] sm:$0xff]  ;;  %v450_v7 = vld [vmem:[%s3006_s28 + $0x838] sm:$0xff] }
  0x54   : > { %443 = vst [vmem:[%s3014_s29 + $0x418] sm:$0xff] %v442_v3  ;;  %445 = vst [vmem:[%s3014_s29 + $0x420] sm:$0xff] %v444_v4  ;;  %v452_v8 = vld [vmem:[%s3006_s28 + $0x880] sm:$0xff]  ;;  %v454_v9 = vld [vmem:[%s3006_s28 + $0x888] sm:$0xff] }
  0x55   : > { %447 = vst [vmem:[%s3014_s29 + $0x428] sm:$0xff] %v446_v5  ;;  %449 = vst [vmem:[%s3014_s29 + $0x430] sm:$0xff] %v448_v6  ;;  %v456_v10 = vld [vmem:[%s3006_s28 + $0x890] sm:$0xff]  ;;  %v458_v11 = vld [vmem:[%s3006_s28 + $0x898] sm:$0xff] }
  0x56   : > { %451 = vst [vmem:[%s3014_s29 + $0x438] sm:$0xff] %v450_v7  ;;  %453 = vst [vmem:[%s3014_s29 + $0x440] sm:$0xff] %v452_v8  ;;  %v460_v12 = vld [vmem:[%s3006_s28 + $0x8a0] sm:$0xff]  ;;  %v462_v13 = vld [vmem:[%s3006_s28 + $0x8a8] sm:$0xff] }
  0x57   : > { %455 = vst [vmem:[%s3014_s29 + $0x448] sm:$0xff] %v454_v9  ;;  %457 = vst [vmem:[%s3014_s29 + $0x450] sm:$0xff] %v456_v10  ;;  %v464_v14 = vld [vmem:[%s3006_s28 + $0x8b0] sm:$0xff]  ;;  %v466_v15 = vld [vmem:[%s3006_s28 + $0x8b8] sm:$0xff] }
  0x58   : > { %459 = vst [vmem:[%s3014_s29 + $0x458] sm:$0xff] %v458_v11  ;;  %461 = vst [vmem:[%s3014_s29 + $0x460] sm:$0xff] %v460_v12  ;;  %v468_v16 = vld [vmem:[%s3006_s28 + $0x900] sm:$0xff]  ;;  %v470_v17 = vld [vmem:[%s3006_s28 + $0x908] sm:$0xff] }
  0x59   : > { %463 = vst [vmem:[%s3014_s29 + $0x468] sm:$0xff] %v462_v13  ;;  %465 = vst [vmem:[%s3014_s29 + $0x470] sm:$0xff] %v464_v14  ;;  %v472_v18 = vld [vmem:[%s3006_s28 + $0x910] sm:$0xff]  ;;  %v474_v19 = vld [vmem:[%s3006_s28 + $0x918] sm:$0xff] }
  0x5a   : > { %467 = vst [vmem:[%s3014_s29 + $0x478] sm:$0xff] %v466_v15  ;;  %469 = vst [vmem:[%s3014_s29 + $0x480] sm:$0xff] %v468_v16  ;;  %v476_v20 = vld [vmem:[%s3006_s28 + $0x920] sm:$0xff]  ;;  %v478_v21 = vld [vmem:[%s3006_s28 + $0x928] sm:$0xff] }
  0x5b   : > { %471 = vst [vmem:[%s3014_s29 + $0x488] sm:$0xff] %v470_v17  ;;  %473 = vst [vmem:[%s3014_s29 + $0x490] sm:$0xff] %v472_v18  ;;  %v480_v22 = vld [vmem:[%s3006_s28 + $0x930] sm:$0xff]  ;;  %v482_v23 = vld [vmem:[%s3006_s28 + $0x938] sm:$0xff] }
  0x5c   : > { %475 = vst [vmem:[%s3014_s29 + $0x498] sm:$0xff] %v474_v19  ;;  %477 = vst [vmem:[%s3014_s29 + $0x4a0] sm:$0xff] %v476_v20  ;;  %v484_v24 = vld [vmem:[%s3006_s28 + $0x980] sm:$0xff]  ;;  %v486_v25 = vld [vmem:[%s3006_s28 + $0x988] sm:$0xff] }
  0x5d   : > { %479 = vst [vmem:[%s3014_s29 + $0x4a8] sm:$0xff] %v478_v21  ;;  %481 = vst [vmem:[%s3014_s29 + $0x4b0] sm:$0xff] %v480_v22  ;;  %v488_v26 = vld [vmem:[%s3006_s28 + $0x990] sm:$0xff]  ;;  %v490_v27 = vld [vmem:[%s3006_s28 + $0x998] sm:$0xff] }
  0x5e   : > { %483 = vst [vmem:[%s3014_s29 + $0x4b8] sm:$0xff] %v482_v23  ;;  %485 = vst [vmem:[%s3014_s29 + $0x4c0] sm:$0xff] %v484_v24  ;;  %v492_v28 = vld [vmem:[%s3006_s28 + $0x9a0] sm:$0xff]  ;;  %v494_v29 = vld [vmem:[%s3006_s28 + $0x9a8] sm:$0xff] }
  0x5f   : > { %487 = vst [vmem:[%s3014_s29 + $0x4c8] sm:$0xff] %v486_v25  ;;  %489 = vst [vmem:[%s3014_s29 + $0x4d0] sm:$0xff] %v488_v26  ;;  %v496_v30 = vld [vmem:[%s3006_s28 + $0x9b0] sm:$0xff]  ;;  %v498_v31 = vld [vmem:[%s3006_s28 + $0x9b8] sm:$0xff] }
  0x60   : > { %491 = vst [vmem:[%s3014_s29 + $0x4d8] sm:$0xff] %v490_v27  ;;  %493 = vst [vmem:[%s3014_s29 + $0x4e0] sm:$0xff] %v492_v28  ;;  %v500_v32 = vld [vmem:[%s3006_s28 + $0xa00] sm:$0xff]  ;;  %v502_v33 = vld [vmem:[%s3006_s28 + $0xa08] sm:$0xff] }
  0x61   : > { %495 = vst [vmem:[%s3014_s29 + $0x4e8] sm:$0xff] %v494_v29  ;;  %497 = vst [vmem:[%s3014_s29 + $0x4f0] sm:$0xff] %v496_v30  ;;  %v504_v34 = vld [vmem:[%s3006_s28 + $0xa10] sm:$0xff]  ;;  %v506_v35 = vld [vmem:[%s3006_s28 + $0xa18] sm:$0xff] }
  0x62   : > { %499 = vst [vmem:[%s3014_s29 + $0x4f8] sm:$0xff] %v498_v31  ;;  %501 = vst [vmem:[%s3014_s29 + $0x500] sm:$0xff] %v500_v32  ;;  %v508_v36 = vld [vmem:[%s3006_s28 + $0xa20] sm:$0xff]  ;;  %v510_v37 = vld [vmem:[%s3006_s28 + $0xa28] sm:$0xff] }
  0x63   : > { %503 = vst [vmem:[%s3014_s29 + $0x508] sm:$0xff] %v502_v33  ;;  %505 = vst [vmem:[%s3014_s29 + $0x510] sm:$0xff] %v504_v34  ;;  %v512_v38 = vld [vmem:[%s3006_s28 + $0xa30] sm:$0xff]  ;;  %v514_v39 = vld [vmem:[%s3006_s28 + $0xa38] sm:$0xff] }
  0x64   : > { %507 = vst [vmem:[%s3014_s29 + $0x518] sm:$0xff] %v506_v35  ;;  %509 = vst [vmem:[%s3014_s29 + $0x520] sm:$0xff] %v508_v36  ;;  %v516_v40 = vld [vmem:[%s3006_s28 + $0xa80] sm:$0xff]  ;;  %v518_v41 = vld [vmem:[%s3006_s28 + $0xa88] sm:$0xff] }
  0x65   : > { %511 = vst [vmem:[%s3014_s29 + $0x528] sm:$0xff] %v510_v37  ;;  %513 = vst [vmem:[%s3014_s29 + $0x530] sm:$0xff] %v512_v38  ;;  %v520_v42 = vld [vmem:[%s3006_s28 + $0xa90] sm:$0xff]  ;;  %v522_v43 = vld [vmem:[%s3006_s28 + $0xa98] sm:$0xff] }
  0x66   : > { %515 = vst [vmem:[%s3014_s29 + $0x538] sm:$0xff] %v514_v39  ;;  %517 = vst [vmem:[%s3014_s29 + $0x540] sm:$0xff] %v516_v40  ;;  %v524_v44 = vld [vmem:[%s3006_s28 + $0xaa0] sm:$0xff]  ;;  %v526_v45 = vld [vmem:[%s3006_s28 + $0xaa8] sm:$0xff] }
  0x67   : > { %519 = vst [vmem:[%s3014_s29 + $0x548] sm:$0xff] %v518_v41  ;;  %521 = vst [vmem:[%s3014_s29 + $0x550] sm:$0xff] %v520_v42  ;;  %v528_v46 = vld [vmem:[%s3006_s28 + $0xab0] sm:$0xff]  ;;  %v530_v47 = vld [vmem:[%s3006_s28 + $0xab8] sm:$0xff] }
  0x68   : > { %523 = vst [vmem:[%s3014_s29 + $0x558] sm:$0xff] %v522_v43  ;;  %525 = vst [vmem:[%s3014_s29 + $0x560] sm:$0xff] %v524_v44  ;;  %v532_v48 = vld [vmem:[%s3006_s28 + $0xb00] sm:$0xff]  ;;  %v534_v49 = vld [vmem:[%s3006_s28 + $0xb08] sm:$0xff] }
  0x69   : > { %527 = vst [vmem:[%s3014_s29 + $0x568] sm:$0xff] %v526_v45  ;;  %529 = vst [vmem:[%s3014_s29 + $0x570] sm:$0xff] %v528_v46  ;;  %v536_v50 = vld [vmem:[%s3006_s28 + $0xb10] sm:$0xff]  ;;  %v538_v51 = vld [vmem:[%s3006_s28 + $0xb18] sm:$0xff] }
  0x6a   : > { %531 = vst [vmem:[%s3014_s29 + $0x578] sm:$0xff] %v530_v47  ;;  %533 = vst [vmem:[%s3014_s29 + $0x580] sm:$0xff] %v532_v48  ;;  %v540_v52 = vld [vmem:[%s3006_s28 + $0xb20] sm:$0xff]  ;;  %v542_v53 = vld [vmem:[%s3006_s28 + $0xb28] sm:$0xff] }
  0x6b   : > { %535 = vst [vmem:[%s3014_s29 + $0x588] sm:$0xff] %v534_v49  ;;  %537 = vst [vmem:[%s3014_s29 + $0x590] sm:$0xff] %v536_v50  ;;  %v544_v54 = vld [vmem:[%s3006_s28 + $0xb30] sm:$0xff]  ;;  %v546_v55 = vld [vmem:[%s3006_s28 + $0xb38] sm:$0xff] }
  0x6c   : > { %539 = vst [vmem:[%s3014_s29 + $0x598] sm:$0xff] %v538_v51  ;;  %541 = vst [vmem:[%s3014_s29 + $0x5a0] sm:$0xff] %v540_v52  ;;  %v548_v56 = vld [vmem:[%s3006_s28 + $0xb80] sm:$0xff]  ;;  %v550_v57 = vld [vmem:[%s3006_s28 + $0xb88] sm:$0xff] }
  0x6d   : > { %543 = vst [vmem:[%s3014_s29 + $0x5a8] sm:$0xff] %v542_v53  ;;  %545 = vst [vmem:[%s3014_s29 + $0x5b0] sm:$0xff] %v544_v54  ;;  %v552_v58 = vld [vmem:[%s3006_s28 + $0xb90] sm:$0xff]  ;;  %v554_v59 = vld [vmem:[%s3006_s28 + $0xb98] sm:$0xff] }
  0x6e   : > { %547 = vst [vmem:[%s3014_s29 + $0x5b8] sm:$0xff] %v546_v55  ;;  %549 = vst [vmem:[%s3014_s29 + $0x5c0] sm:$0xff] %v548_v56  ;;  %v556_v60 = vld [vmem:[%s3006_s28 + $0xba0] sm:$0xff]  ;;  %v558_v61 = vld [vmem:[%s3006_s28 + $0xba8] sm:$0xff] }
  0x6f   : > { %551 = vst [vmem:[%s3014_s29 + $0x5c8] sm:$0xff] %v550_v57  ;;  %553 = vst [vmem:[%s3014_s29 + $0x5d0] sm:$0xff] %v552_v58  ;;  %v560_v62 = vld [vmem:[%s3006_s28 + $0xbb0] sm:$0xff]  ;;  %v562_v63 = vld [vmem:[%s3006_s28 + $0xbb8] sm:$0xff] }
  0x70   : > { %555 = vst [vmem:[%s3014_s29 + $0x5d8] sm:$0xff] %v554_v59  ;;  %557 = vst [vmem:[%s3014_s29 + $0x5e0] sm:$0xff] %v556_v60  ;;  %v564_v0 = vld [vmem:[%s3006_s28 + $0xc00] sm:$0xff]  ;;  %v566_v1 = vld [vmem:[%s3006_s28 + $0xc08] sm:$0xff] }
  0x71   : > { %559 = vst [vmem:[%s3014_s29 + $0x5e8] sm:$0xff] %v558_v61  ;;  %561 = vst [vmem:[%s3014_s29 + $0x5f0] sm:$0xff] %v560_v62  ;;  %v568_v2 = vld [vmem:[%s3006_s28 + $0xc10] sm:$0xff]  ;;  %v570_v3 = vld [vmem:[%s3006_s28 + $0xc18] sm:$0xff] }
  0x72   : > { %563 = vst [vmem:[%s3014_s29 + $0x5f8] sm:$0xff] %v562_v63  ;;  %565 = vst [vmem:[%s3014_s29 + $0x600] sm:$0xff] %v564_v0  ;;  %v572_v4 = vld [vmem:[%s3006_s28 + $0xc20] sm:$0xff]  ;;  %v574_v5 = vld [vmem:[%s3006_s28 + $0xc28] sm:$0xff] }
  0x73   : > { %567 = vst [vmem:[%s3014_s29 + $0x608] sm:$0xff] %v566_v1  ;;  %569 = vst [vmem:[%s3014_s29 + $0x610] sm:$0xff] %v568_v2  ;;  %v576_v6 = vld [vmem:[%s3006_s28 + $0xc30] sm:$0xff]  ;;  %v578_v7 = vld [vmem:[%s3006_s28 + $0xc38] sm:$0xff] }
  0x74   : > { %571 = vst [vmem:[%s3014_s29 + $0x618] sm:$0xff] %v570_v3  ;;  %573 = vst [vmem:[%s3014_s29 + $0x620] sm:$0xff] %v572_v4  ;;  %v580_v8 = vld [vmem:[%s3006_s28 + $0xc80] sm:$0xff]  ;;  %v582_v9 = vld [vmem:[%s3006_s28 + $0xc88] sm:$0xff] }
  0x75   : > { %575 = vst [vmem:[%s3014_s29 + $0x628] sm:$0xff] %v574_v5  ;;  %577 = vst [vmem:[%s3014_s29 + $0x630] sm:$0xff] %v576_v6  ;;  %v584_v10 = vld [vmem:[%s3006_s28 + $0xc90] sm:$0xff]  ;;  %v586_v11 = vld [vmem:[%s3006_s28 + $0xc98] sm:$0xff] }
  0x76   : > { %579 = vst [vmem:[%s3014_s29 + $0x638] sm:$0xff] %v578_v7  ;;  %581 = vst [vmem:[%s3014_s29 + $0x640] sm:$0xff] %v580_v8  ;;  %v588_v12 = vld [vmem:[%s3006_s28 + $0xca0] sm:$0xff]  ;;  %v590_v13 = vld [vmem:[%s3006_s28 + $0xca8] sm:$0xff] }
  0x77   : > { %583 = vst [vmem:[%s3014_s29 + $0x648] sm:$0xff] %v582_v9  ;;  %585 = vst [vmem:[%s3014_s29 + $0x650] sm:$0xff] %v584_v10  ;;  %v592_v14 = vld [vmem:[%s3006_s28 + $0xcb0] sm:$0xff]  ;;  %v594_v15 = vld [vmem:[%s3006_s28 + $0xcb8] sm:$0xff] }
  0x78   : > { %587 = vst [vmem:[%s3014_s29 + $0x658] sm:$0xff] %v586_v11  ;;  %589 = vst [vmem:[%s3014_s29 + $0x660] sm:$0xff] %v588_v12  ;;  %v596_v16 = vld [vmem:[%s3006_s28 + $0xd00] sm:$0xff]  ;;  %v598_v17 = vld [vmem:[%s3006_s28 + $0xd08] sm:$0xff] }
  0x79   : > { %591 = vst [vmem:[%s3014_s29 + $0x668] sm:$0xff] %v590_v13  ;;  %593 = vst [vmem:[%s3014_s29 + $0x670] sm:$0xff] %v592_v14  ;;  %v600_v18 = vld [vmem:[%s3006_s28 + $0xd10] sm:$0xff]  ;;  %v602_v19 = vld [vmem:[%s3006_s28 + $0xd18] sm:$0xff] }
  0x7a   : > { %595 = vst [vmem:[%s3014_s29 + $0x678] sm:$0xff] %v594_v15  ;;  %597 = vst [vmem:[%s3014_s29 + $0x680] sm:$0xff] %v596_v16  ;;  %v604_v20 = vld [vmem:[%s3006_s28 + $0xd20] sm:$0xff]  ;;  %v606_v21 = vld [vmem:[%s3006_s28 + $0xd28] sm:$0xff] }
  0x7b   : > { %599 = vst [vmem:[%s3014_s29 + $0x688] sm:$0xff] %v598_v17  ;;  %601 = vst [vmem:[%s3014_s29 + $0x690] sm:$0xff] %v600_v18  ;;  %v608_v22 = vld [vmem:[%s3006_s28 + $0xd30] sm:$0xff]  ;;  %v610_v23 = vld [vmem:[%s3006_s28 + $0xd38] sm:$0xff] }
  0x7c   : > { %603 = vst [vmem:[%s3014_s29 + $0x698] sm:$0xff] %v602_v19  ;;  %605 = vst [vmem:[%s3014_s29 + $0x6a0] sm:$0xff] %v604_v20 }
  0x7d   : > { %607 = vst [vmem:[%s3014_s29 + $0x6a8] sm:$0xff] %v606_v21  ;;  %609 = vst [vmem:[%s3014_s29 + $0x6b0] sm:$0xff] %v608_v22 }
  0x7e   : > { %611 = vst [vmem:[%s3014_s29 + $0x6b8] sm:$0xff] %v610_v23 }
  0x7f PF: > { %p2611_p5 = scmp.ge.s32.totalorder %s2943_s17, 1  ;;  %p616_p6 = scmp.lt.s32.totalorder %s2943_s17, 3 }
  0x81   : > { %p617_p7 = pnand %p2611_p5, %p616_p6 }
  0x82   : > { %s623_s30 = sand.u32 (!%p617_p7), 1, %s2935_s15   ;;  %v3448_v24 = vld [vmem:[%s3748_s0] sm:$0xff] (!%p617_p7)  ;;  %vm1975_vm0 = vcmask (!%p617_p7), 719872   ;;  %vm1979_vm1 = vcmask (!%p617_p7), 1043456   ;;  %s2612_s9 = sshll.u32 (!%p617_p7), %s2986_s18, 4  ;;  %vm2445_vm2 = vcmask (!%p617_p7), 7168  }
  0x83   : > { %620 = sbr.rel (%p617_p7) target bundleno = 730 (0x2da), region = 47  ;;  %v3452_v25 = vcombine.high (!%p617_p7), %v3448_v24, %v3448_v24  ;;  %p658_p8 = scmp.lt.s32.totalorder (!%p617_p7), %s2612_s9, 31 }
  0x84   : > { %s2878_s7 = smul.u32 (!%p617_p7), 1728, %s623_s30  ;;  %p663_p9 = scmp.lt.s32.totalorder (!%p617_p7), %s2986_s18, 1 }
  0x85   : > { %2843 = vmatprep.mubr.msk.bf16.mxu0 (!%p617_p7), %vm1975_vm0, %v3452_v25  ;;  %2845 = vmatprep.mubr.msk.bf16.mxu1 (!%p617_p7), %vm1975_vm0, %v3452_v25 }
  0x86   : > { %s3458_s8 = scalar_lea.vmem (!%p617_p7), [#allocation2], %s2878_s7 }
  0x87   : > { %v673_v26 = vld [vmem:[%s3458_s8] sm:$0xff] (!%p617_p7)  ;;  %v674_v28 = vld [vmem:[%s3458_s8 + $0x8] sm:$0xff] (!%p617_p7) }
  0x88   : > { %v681_v27 = vld [vmem:[%s3458_s8 + $0x40] sm:$0xff] (!%p617_p7)  ;;  %v682_v31 = vld [vmem:[%s3458_s8 + $0x48] sm:$0xff] (!%p617_p7) }
  0x89   : > { %v2619_v29 = vcombine.high (!%p617_p7), %v673_v26, %v681_v27  ;;  %v2618_v30 = vcombine.low (!%p617_p7), %v673_v26, %v681_v27  ;;  %v689_v32 = vld [vmem:[%s3458_s8 + $0x80] sm:$0xff] (!%p617_p7)  ;;  %v2621_v34 = vcombine.high (!%p617_p7), %v674_v28, %v682_v31  ;;  %v2620_v35 = vcombine.low (!%p617_p7), %v674_v28, %v682_v31  ;;  %v690_v37 = vld [vmem:[%s3458_s8 + $0x88] sm:$0xff] (!%p617_p7) }
  0x8a   : > { %v697_v33 = vld [vmem:[%s3458_s8 + $0xc0] sm:$0xff]  ;;  %v698_v38 = vld [vmem:[%s3458_s8 + $0xc8] sm:$0xff]  ;;  %s3757_s9 = smov (!%p658_p8, %s2612_s9), 31  ;;  %s3759_s18 = smov (!%p663_p9, %s2986_s18), 1 }
  0x8b   : > { %v2635_v36 = vcombine.high %v689_v32, %v697_v33  ;;  %v705_v39 = vld [vmem:[%s3458_s8 + $0x100] sm:$0xff]  ;;  %2028 = vmatprep.subr.bf16.mxu0 %v2619_v29  ;;  %v2637_v40 = vcombine.high %v690_v37, %v698_v38  ;;  %v706_v42 = vld [vmem:[%s3458_s8 + $0x108] sm:$0xff]  ;;  %2069 = vmatprep.subr.bf16.mxu1 %v2621_v34  ;;  %v2634_v44 = vcombine.low %v689_v32, %v697_v33  ;;  %s2613_s10 = sshll.u32 %s3757_s9, 2  ;;  %s2614_s14 = sshll.u32 %s3759_s18, 3 }
  0x8c   : > { %v713_v41 = vld [vmem:[%s3458_s8 + $0x140] sm:$0xff]  ;;  %v714_v43 = vld [vmem:[%s3458_s8 + $0x148] sm:$0xff]  ;;  %2029 = vmatpush1.bf16.msra.mxu0 %v2618_v30  ;;  %2070 = vmatpush1.bf16.msra.mxu1 %v2620_v35  ;;  %v2636_v45 = vcombine.low %v690_v37, %v698_v38  ;;  %s3720_s13 = scalar_lea.vmem %s3750_s2, %s2613_s10  ;;  %s666_s20 = scalar_lea.vmem %s3751_s3, %s2614_s14 }
  0x8d   : > { %2030 = vmatprep.subr.bf16.mxu0 %v2635_v36  ;;  %v2651_v46 = vcombine.high %v705_v39, %v713_v41  ;;  %2071 = vmatprep.subr.bf16.mxu1 %v2637_v40  ;;  %v2653_v47 = vcombine.high %v706_v42, %v714_v43  ;;  %v721_v48 = vld [vmem:[%s3458_s8 + $0x180] sm:$0xff]  ;;  %v722_v50 = vld [vmem:[%s3458_s8 + $0x188] sm:$0xff]  ;;  %v2650_v52 = vcombine.low %v705_v39, %v713_v41  ;;  %s670_s24 = scalar_lea.vmem %s3752_s4, %s2614_s14 }
  0x8e   : > { %v729_v49 = vld [vmem:[%s3458_s8 + $0x1c0] sm:$0xff]  ;;  %v730_v51 = vld [vmem:[%s3458_s8 + $0x1c8] sm:$0xff]  ;;  %v2652_v53 = vcombine.low %v706_v42, %v714_v43 }
  0x8f   : > { %v2667_v54 = vcombine.high %v721_v48, %v729_v49  ;;  %v2669_v55 = vcombine.high %v722_v50, %v730_v51  ;;  %v737_v56 = vld [vmem:[%s3458_s8 + $0x200] sm:$0xff]  ;;  %v738_v58 = vld [vmem:[%s3458_s8 + $0x208] sm:$0xff]  ;;  %v2666_v60 = vcombine.low %v721_v48, %v729_v49  ;;  %v2668_v61 = vcombine.low %v722_v50, %v730_v51 }
  0x90   : > { %2031 = vmatpush1.bf16.msra.mxu0 %v2634_v44  ;;  %2072 = vmatpush1.bf16.msra.mxu1 %v2636_v45  ;;  %v745_v57 = vld [vmem:[%s3458_s8 + $0x240] sm:$0xff]  ;;  %v746_v59 = vld [vmem:[%s3458_s8 + $0x248] sm:$0xff] }
  0x91   : > { %2032 = vmatprep.subr.bf16.mxu0 %v2651_v46  ;;  %2073 = vmatprep.subr.bf16.mxu1 %v2653_v47  ;;  %v2683_v62 = vcombine.high %v737_v56, %v745_v57  ;;  %v2685_v63 = vcombine.high %v738_v58, %v746_v59  ;;  %v753_v0 = vld [vmem:[%s3458_s8 + $0x280] sm:$0xff]  ;;  %v754_v2 = vld [vmem:[%s3458_s8 + $0x288] sm:$0xff]  ;;  %v2682_v4 = vcombine.low %v737_v56, %v745_v57 }
  0x92   : > { %v761_v1 = vld [vmem:[%s3458_s8 + $0x2c0] sm:$0xff]  ;;  %v762_v3 = vld [vmem:[%s3458_s8 + $0x2c8] sm:$0xff]  ;;  %v2684_v5 = vcombine.low %v738_v58, %v746_v59 }
  0x93   : > { %v2699_v6 = vcombine.high %v753_v0, %v761_v1  ;;  %v2701_v7 = vcombine.high %v754_v2, %v762_v3  ;;  %v769_v8 = vld [vmem:[%s3458_s8 + $0x300] sm:$0xff]  ;;  %v770_v10 = vld [vmem:[%s3458_s8 + $0x308] sm:$0xff]  ;;  %v2698_v12 = vcombine.low %v753_v0, %v761_v1  ;;  %v2700_v13 = vcombine.low %v754_v2, %v762_v3 }
  0x94   : > { %2033 = vmatpush1.bf16.msra.mxu0 %v2650_v52  ;;  %2074 = vmatpush1.bf16.msra.mxu1 %v2652_v53  ;;  %v777_v9 = vld [vmem:[%s3458_s8 + $0x340] sm:$0xff]  ;;  %v778_v11 = vld [vmem:[%s3458_s8 + $0x348] sm:$0xff] }
  0x95   : > { %2034 = vmatprep.subr.bf16.mxu0 %v2667_v54  ;;  %2075 = vmatprep.subr.bf16.mxu1 %v2669_v55  ;;  %v2715_v14 = vcombine.high %v769_v8, %v777_v9  ;;  %v2717_v15 = vcombine.high %v770_v10, %v778_v11  ;;  %v785_v16 = vld [vmem:[%s3458_s8 + $0x380] sm:$0xff]  ;;  %v786_v18 = vld [vmem:[%s3458_s8 + $0x388] sm:$0xff]  ;;  %v2714_v20 = vcombine.low %v769_v8, %v777_v9 }
  0x96   : > { %v793_v17 = vld [vmem:[%s3458_s8 + $0x3c0] sm:$0xff]  ;;  %v794_v19 = vld [vmem:[%s3458_s8 + $0x3c8] sm:$0xff]  ;;  %v2716_v21 = vcombine.low %v770_v10, %v778_v11  ;;  %v675_v10 = vld [vmem:[%s3458_s8 + $0x10] sm:$0xff] }
  0x97   : > { %v2731_v22 = vcombine.high %v785_v16, %v793_v17  ;;  %v2733_v23 = vcombine.high %v786_v18, %v794_v19  ;;  %v801_v26 = vld [vmem:[%s3458_s8 + $0x400] sm:$0xff]  ;;  %v802_v28 = vld [vmem:[%s3458_s8 + $0x408] sm:$0xff]  ;;  %v2730_v30 = vcombine.low %v785_v16, %v793_v17  ;;  %v2732_v31 = vcombine.low %v786_v18, %v794_v19  ;;  %v683_v11 = vld [vmem:[%s3458_s8 + $0x50] sm:$0xff] }
  0x98   : > { %2035 = vmatpush1.bf16.msra.mxu0 %v2666_v60  ;;  %2076 = vmatpush1.bf16.msra.mxu1 %v2668_v61  ;;  %v809_v27 = vld [vmem:[%s3458_s8 + $0x440] sm:$0xff]  ;;  %v810_v29 = vld [vmem:[%s3458_s8 + $0x448] sm:$0xff]  ;;  %v691_v18 = vld [vmem:[%s3458_s8 + $0x90] sm:$0xff] }
  0x99   : > { %2036 = vmatprep.subr.bf16.mxu0 %v2683_v62  ;;  %2077 = vmatprep.subr.bf16.mxu1 %v2685_v63  ;;  %v2747_v32 = vcombine.high %v801_v26, %v809_v27  ;;  %v2749_v33 = vcombine.high %v802_v28, %v810_v29  ;;  %v817_v34 = vld [vmem:[%s3458_s8 + $0x480] sm:$0xff]  ;;  %v818_v36 = vld [vmem:[%s3458_s8 + $0x488] sm:$0xff]  ;;  %v2746_v38 = vcombine.low %v801_v26, %v809_v27  ;;  %v699_v19 = vld [vmem:[%s3458_s8 + $0xd0] sm:$0xff] }
  0x9a   : > { %v825_v35 = vld [vmem:[%s3458_s8 + $0x4c0] sm:$0xff]  ;;  %v826_v37 = vld [vmem:[%s3458_s8 + $0x4c8] sm:$0xff]  ;;  %v2748_v39 = vcombine.low %v802_v28, %v810_v29  ;;  %v2639_v27 = vcombine.high %v691_v18, %v699_v19  ;;  %v707_v29 = vld [vmem:[%s3458_s8 + $0x110] sm:$0xff] }
  0x9b   : > { %v2763_v40 = vcombine.high %v817_v34, %v825_v35  ;;  %v2765_v41 = vcombine.high %v818_v36, %v826_v37  ;;  %v833_v42 = vld [vmem:[%s3458_s8 + $0x500] sm:$0xff]  ;;  %v834_v44 = vld [vmem:[%s3458_s8 + $0x508] sm:$0xff]  ;;  %v2762_v46 = vcombine.low %v817_v34, %v825_v35  ;;  %v2764_v47 = vcombine.low %v818_v36, %v826_v37  ;;  %v723_v36 = vld [vmem:[%s3458_s8 + $0x190] sm:$0xff] }
  0x9c   : > { %2037 = vmatpush1.bf16.msra.mxu0 %v2682_v4  ;;  %2078 = vmatpush1.bf16.msra.mxu1 %v2684_v5  ;;  %v841_v43 = vld [vmem:[%s3458_s8 + $0x540] sm:$0xff]  ;;  %v842_v45 = vld [vmem:[%s3458_s8 + $0x548] sm:$0xff]  ;;  %v731_v37 = vld [vmem:[%s3458_s8 + $0x1d0] sm:$0xff] }
  0x9d   : > { %2038 = vmatprep.subr.bf16.mxu0 %v2699_v6  ;;  %2079 = vmatprep.subr.bf16.mxu1 %v2701_v7  ;;  %v2779_v48 = vcombine.high %v833_v42, %v841_v43  ;;  %v2781_v49 = vcombine.high %v834_v44, %v842_v45  ;;  %v849_v50 = vld [vmem:[%s3458_s8 + $0x580] sm:$0xff]  ;;  %v850_v52 = vld [vmem:[%s3458_s8 + $0x588] sm:$0xff]  ;;  %v2778_v54 = vcombine.low %v833_v42, %v841_v43 }
  0x9e   : > { %v857_v51 = vld [vmem:[%s3458_s8 + $0x5c0] sm:$0xff]  ;;  %v858_v53 = vld [vmem:[%s3458_s8 + $0x5c8] sm:$0xff]  ;;  %v2780_v55 = vcombine.low %v834_v44, %v842_v45  ;;  %v2671_v42 = vcombine.high %v723_v36, %v731_v37  ;;  %v739_v44 = vld [vmem:[%s3458_s8 + $0x210] sm:$0xff] }
  0x9f   : > { %v2795_v56 = vcombine.high %v849_v50, %v857_v51  ;;  %v2797_v57 = vcombine.high %v850_v52, %v858_v53  ;;  %v865_v58 = vld [vmem:[%s3458_s8 + $0x600] sm:$0xff]  ;;  %v866_v60 = vld [vmem:[%s3458_s8 + $0x608] sm:$0xff]  ;;  %v2794_v62 = vcombine.low %v849_v50, %v857_v51  ;;  %v2796_v63 = vcombine.low %v850_v52, %v858_v53  ;;  %v747_v45 = vld [vmem:[%s3458_s8 + $0x250] sm:$0xff] }
  0xa0   : > { %2039 = vmatpush1.bf16.msra.mxu0 %v2698_v12  ;;  %2080 = vmatpush1.bf16.msra.mxu1 %v2700_v13  ;;  %v873_v59 = vld [vmem:[%s3458_s8 + $0x640] sm:$0xff]  ;;  %v874_v61 = vld [vmem:[%s3458_s8 + $0x648] sm:$0xff]  ;;  %v676_v12 = vld [vmem:[%s3458_s8 + $0x18] sm:$0xff]  ;;  %v2687_v50 = vcombine.high %v739_v44, %v747_v45 }
  0xa1   : > { %2040 = vmatprep.subr.bf16.mxu0 %v2715_v14  ;;  %2081 = vmatprep.subr.bf16.mxu1 %v2717_v15  ;;  %v2811_v0 = vcombine.high %v865_v58, %v873_v59  ;;  %v2813_v1 = vcombine.high %v866_v60, %v874_v61  ;;  %v881_v2 = vld [vmem:[%s3458_s8 + $0x680] sm:$0xff]  ;;  %v882_v3 = vld [vmem:[%s3458_s8 + $0x688] sm:$0xff]  ;;  %v2810_v4 = vcombine.low %v865_v58, %v873_v59  ;;  %v684_v13 = vld [vmem:[%s3458_s8 + $0x58] sm:$0xff] }
  0xa2   : > { %v2812_v5 = vcombine.low %v866_v60, %v874_v61  ;;  %v2827_v6 = vcombine.high %v881_v2, %v881_v2  ;;  %v2826_v7 = vcombine.low %v881_v2, %v881_v2  ;;  %v2829_v8 = vcombine.high %v882_v3, %v882_v3  ;;  %v755_v52 = vld [vmem:[%s3458_s8 + $0x290] sm:$0xff] }
  0xa3   : > { %v2828_v9 = vcombine.low %v882_v3, %v882_v3  ;;  %v2623_v15 = vcombine.high %v675_v10, %v683_v11  ;;  %v2625_v17 = vcombine.high %v676_v12, %v684_v13  ;;  %v2624_v26 = vcombine.low %v676_v12, %v684_v13  ;;  %v763_v53 = vld [vmem:[%s3458_s8 + $0x2d0] sm:$0xff] }
  0xa4   : > { %2041 = vmatpush1.bf16.msra.mxu0 %v2714_v20  ;;  %2082 = vmatpush1.bf16.msra.mxu1 %v2716_v21  ;;  %v1981_v14 = vsel %vm1979_vm1, %v2826_v7, 0  ;;  %v3526_v20 = vcombine.low %v3448_v24, %v3448_v24  ;;  %v692_v21 = vld [vmem:[%s3458_s8 + $0x98] sm:$0xff]  ;;  %v2703_v58 = vcombine.high %v755_v52, %v763_v53  ;;  %v771_v60 = vld [vmem:[%s3458_s8 + $0x310] sm:$0xff] }
  0xa5   : > { %2042 = vmatprep.subr.bf16.mxu0 %v2731_v22  ;;  %2083 = vmatprep.subr.bf16.mxu1 %v2733_v23  ;;  %v1987_v16 = vsel %vm1979_vm1, %v2828_v9, 0  ;;  %v700_v22 = vld [vmem:[%s3458_s8 + $0xd8] sm:$0xff]  ;;  %v2622_v23 = vcombine.low %v675_v10, %v683_v11  ;;  %v779_v61 = vld [vmem:[%s3458_s8 + $0x350] sm:$0xff] }
  0xa6   : > { %v2641_v28 = vcombine.high %v692_v21, %v700_v22  ;;  %v708_v24 = vld [vmem:[%s3458_s8 + $0x118] sm:$0xff]  ;;  %v2719_v2 = vcombine.high %v771_v60, %v779_v61  ;;  %v803_v12 = vld [vmem:[%s3458_s8 + $0x410] sm:$0xff] }
  0xa7   : > { %v796_v7 = vld [vmem:[%s3458_s8 + $0x3d8] sm:$0xff]  ;;  %v811_v13 = vld [vmem:[%s3458_s8 + $0x450] sm:$0xff] }
  0xa8   : > { %2043 = vmatpush1.bf16.msra.mxu0 %v2730_v30  ;;  %2084 = vmatpush1.bf16.msra.mxu1 %v2732_v31  ;;  %v715_v30 = vld [vmem:[%s3458_s8 + $0x150] sm:$0xff]  ;;  %v716_v31 = vld [vmem:[%s3458_s8 + $0x158] sm:$0xff] }
  0xa9   : > { %2044 = vmatprep.subr.bf16.mxu0 %v2747_v32  ;;  %2085 = vmatprep.subr.bf16.mxu1 %v2749_v33  ;;  %v2638_v32 = vcombine.low %v691_v18, %v699_v19  ;;  %v2640_v33 = vcombine.low %v692_v21, %v700_v22  ;;  %v2655_v34 = vcombine.high %v707_v29, %v715_v30  ;;  %v819_v21 = vld [vmem:[%s3458_s8 + $0x490] sm:$0xff] }
  0xaa   : > { %v2657_v35 = vcombine.high %v708_v24, %v716_v31  ;;  %v2751_v18 = vcombine.high %v803_v12, %v811_v13  ;;  %v827_v22 = vld [vmem:[%s3458_s8 + $0x4d0] sm:$0xff] }
  0xac   : > { %2045 = vmatpush1.bf16.msra.mxu0 %v2746_v38  ;;  %2086 = vmatpush1.bf16.msra.mxu1 %v2748_v39  ;;  %v724_v38 = vld [vmem:[%s3458_s8 + $0x198] sm:$0xff] }
  0xad   : > { %2046 = vmatprep.subr.bf16.mxu0 %v2763_v40  ;;  %2087 = vmatprep.subr.bf16.mxu1 %v2765_v41  ;;  %v732_v39 = vld [vmem:[%s3458_s8 + $0x1d8] sm:$0xff]  ;;  %v2654_v40 = vcombine.low %v707_v29, %v715_v30  ;;  %v2656_v41 = vcombine.low %v708_v24, %v716_v31  ;;  %v2767_v29 = vcombine.high %v819_v21, %v827_v22  ;;  %v835_v24 = vld [vmem:[%s3458_s8 + $0x510] sm:$0xff] }
  0xae   : > { %v2673_v43 = vcombine.high %v724_v38, %v732_v39  ;;  %v843_v31 = vld [vmem:[%s3458_s8 + $0x550] sm:$0xff] }
  0xb0   : > { %2047 = vmatpush1.bf16.msra.mxu0 %v2762_v46  ;;  %2088 = vmatpush1.bf16.msra.mxu1 %v2764_v47  ;;  %v740_v46 = vld [vmem:[%s3458_s8 + $0x218] sm:$0xff] }
  0xb1   : > { %2048 = vmatprep.subr.bf16.mxu0 %v2779_v48  ;;  %2089 = vmatprep.subr.bf16.mxu1 %v2781_v49  ;;  %v748_v47 = vld [vmem:[%s3458_s8 + $0x258] sm:$0xff]  ;;  %v2670_v48 = vcombine.low %v723_v36, %v731_v37  ;;  %v2672_v49 = vcombine.low %v724_v38, %v732_v39  ;;  %v2783_v36 = vcombine.high %v835_v24, %v843_v31  ;;  %v851_v38 = vld [vmem:[%s3458_s8 + $0x590] sm:$0xff] }
  0xb2   : > { %v2689_v51 = vcombine.high %v740_v46, %v748_v47  ;;  %v859_v39 = vld [vmem:[%s3458_s8 + $0x5d0] sm:$0xff] }
  0xb4   : > { %2049 = vmatpush1.bf16.msra.mxu0 %v2778_v54  ;;  %2090 = vmatpush1.bf16.msra.mxu1 %v2780_v55  ;;  %v756_v54 = vld [vmem:[%s3458_s8 + $0x298] sm:$0xff] }
  0xb5   : > { %2050 = vmatprep.subr.bf16.mxu0 %v2795_v56  ;;  %2091 = vmatprep.subr.bf16.mxu1 %v2797_v57  ;;  %v764_v55 = vld [vmem:[%s3458_s8 + $0x2d8] sm:$0xff]  ;;  %v2686_v56 = vcombine.low %v739_v44, %v747_v45  ;;  %v2688_v57 = vcombine.low %v740_v46, %v748_v47  ;;  %v2799_v44 = vcombine.high %v851_v38, %v859_v39  ;;  %v867_v46 = vld [vmem:[%s3458_s8 + $0x610] sm:$0xff] }
  0xb6   : > { %v2705_v59 = vcombine.high %v756_v54, %v764_v55  ;;  %v875_v47 = vld [vmem:[%s3458_s8 + $0x650] sm:$0xff] }
  0xb8   : > { %2051 = vmatpush1.bf16.msra.mxu0 %v2794_v62  ;;  %2092 = vmatpush1.bf16.msra.mxu1 %v2796_v63  ;;  %v772_v62 = vld [vmem:[%s3458_s8 + $0x318] sm:$0xff] }
  0xb9   : > { %2052 = vmatprep.subr.bf16.mxu0 %v2811_v0  ;;  %2093 = vmatprep.subr.bf16.mxu1 %v2813_v1  ;;  %v780_v63 = vld [vmem:[%s3458_s8 + $0x358] sm:$0xff]  ;;  %v2702_v0 = vcombine.low %v755_v52, %v763_v53  ;;  %v2704_v1 = vcombine.low %v756_v54, %v764_v55  ;;  %v2815_v52 = vcombine.high %v867_v46, %v875_v47  ;;  %v883_v54 = vld [vmem:[%s3458_s8 + $0x690] sm:$0xff] }
  0xba   : > { %v2721_v3 = vcombine.high %v772_v62, %v780_v63  ;;  %v2720_v9 = vcombine.low %v772_v62, %v780_v63  ;;  %v884_v55 = vld [vmem:[%s3458_s8 + $0x698] sm:$0xff]  ;;  %v677_v62 = vld [vmem:[%s3458_s8 + $0x20] sm:$0xff] }
  0xbb   : > { %v685_v63 = vld [vmem:[%s3458_s8 + $0x60] sm:$0xff] }
  0xbc   : > { %2053 = vmatpush1.bf16.msra.mxu0 %v2810_v4  ;;  %2094 = vmatpush1.bf16.msra.mxu1 %v2812_v5  ;;  %v787_v4 = vld [vmem:[%s3458_s8 + $0x390] sm:$0xff] }
  0xbd   : > { %2842 = vmatprep.subr.msk.bf16.mxu0 %vm1979_vm1, %v2827_v6  ;;  %2844 = vmatprep.subr.msk.bf16.mxu1 %vm1979_vm1, %v2829_v8  ;;  %v795_v5 = vld [vmem:[%s3458_s8 + $0x3d0] sm:$0xff]  ;;  %v788_v6 = vld [vmem:[%s3458_s8 + $0x398] sm:$0xff]  ;;  %v2718_v8 = vcombine.low %v771_v60, %v779_v61  ;;  %v2833_v60 = vcombine.high %v884_v55, %v884_v55  ;;  %v2832_v61 = vcombine.low %v884_v55, %v884_v55 }
  0xbe   : > { %v2735_v10 = vcombine.high %v787_v4, %v795_v5  ;;  %v2737_v11 = vcombine.high %v788_v6, %v796_v7 }
  0xc0   : > { %2055 = vmatpush1.bf16.msra.mxu0 %v1981_v14  ;;  %2096 = vmatpush1.bf16.msra.mxu1 %v1987_v16  ;;  %v804_v14 = vld [vmem:[%s3458_s8 + $0x418] sm:$0xff]  ;;  %v2734_v16 = vcombine.low %v787_v4, %v795_v5  ;;  %v1999_v4 = vsel %vm1979_vm1, %v2832_v61, 0 }
  0xc1   : > { %2110 = vmatprep.subr.bf16.mxu0 %v2623_v15  ;;  %2151 = vmatprep.subr.bf16.mxu1 %v2625_v17  ;;  %v812_v15 = vld [vmem:[%s3458_s8 + $0x458] sm:$0xff]  ;;  %v2736_v17 = vcombine.low %v788_v6, %v796_v7  ;;  %v693_v6 = vld [vmem:[%s3458_s8 + $0xa0] sm:$0xff] }
  0xc2   : > { %v2753_v19 = vcombine.high %v804_v14, %v812_v15  ;;  %v701_v7 = vld [vmem:[%s3458_s8 + $0xe0] sm:$0xff] }
  0xc3   : > { %2061 = vmatmul.mubr.bf16.vlgmr.msra.gmra.mrb[0].mxu0 %v3526_v20  ;;  %2102 = vmatmul.mubr.bf16.vlgmr.msra.gmra.mrb[0].mxu1 %v3526_v20 }
  0xc4   : > { %2111 = vmatpush1.bf16.msra.mxu0 %v2622_v23  ;;  %2152 = vmatpush1.bf16.msra.mxu1 %v2624_v26  ;;  %v820_v23 = vld [vmem:[%s3458_s8 + $0x498] sm:$0xff] }
  0xc5   : > { %2112 = vmatprep.subr.bf16.mxu0 %v2639_v27  ;;  %2153 = vmatprep.subr.bf16.mxu1 %v2641_v28  ;;  %v828_v26 = vld [vmem:[%s3458_s8 + $0x4d8] sm:$0xff]  ;;  %v2750_v27 = vcombine.low %v803_v12, %v811_v13  ;;  %v2752_v28 = vcombine.low %v804_v14, %v812_v15  ;;  %v2643_v12 = vcombine.high %v693_v6, %v701_v7  ;;  %v709_v14 = vld [vmem:[%s3458_s8 + $0x120] sm:$0xff] }
  0xc6   : > { %2847 = vmatprep.mubr.msk.bf16.mxu0 %vm1975_vm0, %v3452_v25  ;;  %2849 = vmatprep.mubr.msk.bf16.mxu1 %vm1975_vm0, %v3452_v25  ;;  %v2769_v30 = vcombine.high %v820_v23, %v828_v26  ;;  %v717_v15 = vld [vmem:[%s3458_s8 + $0x160] sm:$0xff] }
  0xc8   : > { %2113 = vmatpush1.bf16.msra.mxu0 %v2638_v32  ;;  %2154 = vmatpush1.bf16.msra.mxu1 %v2640_v33  ;;  %v836_v32 = vld [vmem:[%s3458_s8 + $0x518] sm:$0xff] }
  0xc9   : > { %2114 = vmatprep.subr.bf16.mxu0 %v2655_v34  ;;  %2155 = vmatprep.subr.bf16.mxu1 %v2657_v35  ;;  %v844_v33 = vld [vmem:[%s3458_s8 + $0x558] sm:$0xff]  ;;  %v2766_v34 = vcombine.low %v819_v21, %v827_v22  ;;  %v2768_v35 = vcombine.low %v820_v23, %v828_v26  ;;  %v2659_v21 = vcombine.high %v709_v14, %v717_v15  ;;  %v725_v23 = vld [vmem:[%s3458_s8 + $0x1a0] sm:$0xff] }
  0xca   : > { %v2785_v37 = vcombine.high %v836_v32, %v844_v33  ;;  %v733_v26 = vld [vmem:[%s3458_s8 + $0x1e0] sm:$0xff] }
  0xcc   : > { %2115 = vmatpush1.bf16.msra.mxu0 %v2654_v40  ;;  %2156 = vmatpush1.bf16.msra.mxu1 %v2656_v41  ;;  %v852_v40 = vld [vmem:[%s3458_s8 + $0x598] sm:$0xff] }
  0xcd   : > { %2116 = vmatprep.subr.bf16.mxu0 %v2671_v42  ;;  %2157 = vmatprep.subr.bf16.mxu1 %v2673_v43  ;;  %v860_v41 = vld [vmem:[%s3458_s8 + $0x5d8] sm:$0xff]  ;;  %v2782_v42 = vcombine.low %v835_v24, %v843_v31  ;;  %v2784_v43 = vcombine.low %v836_v32, %v844_v33  ;;  %v2675_v24 = vcombine.high %v725_v23, %v733_v26  ;;  %v741_v32 = vld [vmem:[%s3458_s8 + $0x220] sm:$0xff] }
  0xce   : > { %v2801_v45 = vcombine.high %v852_v40, %v860_v41  ;;  %v749_v33 = vld [vmem:[%s3458_s8 + $0x260] sm:$0xff] }
  0xd0   : > { %2117 = vmatpush1.bf16.msra.mxu0 %v2670_v48  ;;  %2158 = vmatpush1.bf16.msra.mxu1 %v2672_v49  ;;  %v868_v48 = vld [vmem:[%s3458_s8 + $0x618] sm:$0xff] }
  0xd1   : > { %2118 = vmatprep.subr.bf16.mxu0 %v2687_v50  ;;  %2159 = vmatprep.subr.bf16.mxu1 %v2689_v51  ;;  %v876_v49 = vld [vmem:[%s3458_s8 + $0x658] sm:$0xff]  ;;  %v2798_v50 = vcombine.low %v851_v38, %v859_v39  ;;  %v2800_v51 = vcombine.low %v852_v40, %v860_v41  ;;  %v2691_v38 = vcombine.high %v741_v32, %v749_v33  ;;  %v757_v40 = vld [vmem:[%s3458_s8 + $0x2a0] sm:$0xff] }
  0xd2   : > { %v2817_v53 = vcombine.high %v868_v48, %v876_v49  ;;  %v765_v41 = vld [vmem:[%s3458_s8 + $0x2e0] sm:$0xff] }
  0xd4   : > { %2119 = vmatpush1.bf16.msra.mxu0 %v2686_v56  ;;  %2160 = vmatpush1.bf16.msra.mxu1 %v2688_v57  ;;  %v2814_v56 = vcombine.low %v867_v46, %v875_v47  ;;  %v2816_v57 = vcombine.low %v868_v48, %v876_v49  ;;  %v2707_v46 = vcombine.high %v757_v40, %v765_v41  ;;  %v773_v48 = vld [vmem:[%s3458_s8 + $0x320] sm:$0xff] }
  0xd5   : > { %2120 = vmatprep.subr.bf16.mxu0 %v2703_v58  ;;  %2161 = vmatprep.subr.bf16.mxu1 %v2705_v59  ;;  %v2831_v58 = vcombine.high %v883_v54, %v883_v54  ;;  %v2830_v59 = vcombine.low %v883_v54, %v883_v54  ;;  %v781_v49 = vld [vmem:[%s3458_s8 + $0x360] sm:$0xff] }
  0xd6   : > { %v2723_v54 = vcombine.high %v773_v48, %v781_v49 }
  0xd8   : > { %2121 = vmatpush1.bf16.msra.mxu0 %v2702_v0  ;;  %2162 = vmatpush1.bf16.msra.mxu1 %v2704_v1  ;;  %v678_v0 = vld [vmem:[%s3458_s8 + $0x28] sm:$0xff] }
  0xd9   : > { %2122 = vmatprep.subr.bf16.mxu0 %v2719_v2  ;;  %2163 = vmatprep.subr.bf16.mxu1 %v2721_v3  ;;  %v686_v1 = vld [vmem:[%s3458_s8 + $0x68] sm:$0xff]  ;;  %v1993_v2 = vsel %vm1979_vm1, %v2830_v59, 0  ;;  %v2627_v3 = vcombine.high %v677_v62, %v685_v63 }
  0xda   : > { %v2629_v5 = vcombine.high %v678_v0, %v686_v1  ;;  %v798_v59 = vld [vmem:[%s3458_s8 + $0x3e8] sm:$0xff] }
  0xdc   : > { %2123 = vmatpush1.bf16.msra.mxu0 %v2718_v8  ;;  %2164 = vmatpush1.bf16.msra.mxu1 %v2720_v9  ;;  %v694_v8 = vld [vmem:[%s3458_s8 + $0xa8] sm:$0xff] }
  0xdd   : > { %2124 = vmatprep.subr.bf16.mxu0 %v2735_v10  ;;  %2165 = vmatprep.subr.bf16.mxu1 %v2737_v11  ;;  %v702_v9 = vld [vmem:[%s3458_s8 + $0xe8] sm:$0xff]  ;;  %v2626_v10 = vcombine.low %v677_v62, %v685_v63  ;;  %v2628_v11 = vcombine.low %v678_v0, %v686_v1  ;;  %v805_v0 = vld [vmem:[%s3458_s8 + $0x420] sm:$0xff] }
  0xde   : > { %v2645_v13 = vcombine.high %v694_v8, %v702_v9  ;;  %v813_v1 = vld [vmem:[%s3458_s8 + $0x460] sm:$0xff] }
  0xe0   : > { %2125 = vmatpush1.bf16.msra.mxu0 %v2734_v16  ;;  %2166 = vmatpush1.bf16.msra.mxu1 %v2736_v17  ;;  %v710_v16 = vld [vmem:[%s3458_s8 + $0x128] sm:$0xff] }
  0xe1   : > { %2126 = vmatprep.subr.bf16.mxu0 %v2751_v18  ;;  %2167 = vmatprep.subr.bf16.mxu1 %v2753_v19  ;;  %v718_v17 = vld [vmem:[%s3458_s8 + $0x168] sm:$0xff]  ;;  %v2642_v18 = vcombine.low %v693_v6, %v701_v7  ;;  %v2644_v19 = vcombine.low %v694_v8, %v702_v9  ;;  %v2755_v6 = vcombine.high %v805_v0, %v813_v1  ;;  %v821_v8 = vld [vmem:[%s3458_s8 + $0x4a0] sm:$0xff] }
  0xe2   : > { %v2661_v22 = vcombine.high %v710_v16, %v718_v17  ;;  %v829_v9 = vld [vmem:[%s3458_s8 + $0x4e0] sm:$0xff] }
  0xe4   : > { %2127 = vmatpush1.bf16.msra.mxu0 %v2750_v27  ;;  %2168 = vmatpush1.bf16.msra.mxu1 %v2752_v28  ;;  %v726_v27 = vld [vmem:[%s3458_s8 + $0x1a8] sm:$0xff] }
  0xe5   : > { %2128 = vmatprep.subr.bf16.mxu0 %v2767_v29  ;;  %2169 = vmatprep.subr.bf16.mxu1 %v2769_v30  ;;  %v734_v28 = vld [vmem:[%s3458_s8 + $0x1e8] sm:$0xff]  ;;  %v2658_v29 = vcombine.low %v709_v14, %v717_v15  ;;  %v2660_v30 = vcombine.low %v710_v16, %v718_v17  ;;  %v2771_v14 = vcombine.high %v821_v8, %v829_v9  ;;  %v837_v16 = vld [vmem:[%s3458_s8 + $0x520] sm:$0xff] }
  0xe6   : > { %v2677_v31 = vcombine.high %v726_v27, %v734_v28  ;;  %v845_v17 = vld [vmem:[%s3458_s8 + $0x560] sm:$0xff] }
  0xe8   : > { %2129 = vmatpush1.bf16.msra.mxu0 %v2766_v34  ;;  %2170 = vmatpush1.bf16.msra.mxu1 %v2768_v35  ;;  %v742_v34 = vld [vmem:[%s3458_s8 + $0x228] sm:$0xff] }
  0xe9   : > { %2130 = vmatprep.subr.bf16.mxu0 %v2783_v36  ;;  %2171 = vmatprep.subr.bf16.mxu1 %v2785_v37  ;;  %v750_v35 = vld [vmem:[%s3458_s8 + $0x268] sm:$0xff]  ;;  %v2674_v36 = vcombine.low %v725_v23, %v733_v26  ;;  %v2676_v37 = vcombine.low %v726_v27, %v734_v28  ;;  %v2787_v23 = vcombine.high %v837_v16, %v845_v17  ;;  %v853_v27 = vld [vmem:[%s3458_s8 + $0x5a0] sm:$0xff] }
  0xea   : > { %v2693_v39 = vcombine.high %v742_v34, %v750_v35  ;;  %v861_v28 = vld [vmem:[%s3458_s8 + $0x5e0] sm:$0xff] }
  0xec   : > { %2131 = vmatpush1.bf16.msra.mxu0 %v2782_v42  ;;  %2172 = vmatpush1.bf16.msra.mxu1 %v2784_v43  ;;  %v758_v42 = vld [vmem:[%s3458_s8 + $0x2a8] sm:$0xff] }
  0xed   : > { %2132 = vmatprep.subr.bf16.mxu0 %v2799_v44  ;;  %2173 = vmatprep.subr.bf16.mxu1 %v2801_v45  ;;  %v766_v43 = vld [vmem:[%s3458_s8 + $0x2e8] sm:$0xff]  ;;  %v2690_v44 = vcombine.low %v741_v32, %v749_v33  ;;  %v2692_v45 = vcombine.low %v742_v34, %v750_v35  ;;  %v2803_v32 = vcombine.high %v853_v27, %v861_v28  ;;  %v869_v34 = vld [vmem:[%s3458_s8 + $0x620] sm:$0xff] }
  0xee   : > { %v2709_v47 = vcombine.high %v758_v42, %v766_v43  ;;  %v877_v35 = vld [vmem:[%s3458_s8 + $0x660] sm:$0xff] }
  0xf0   : > { %2133 = vmatpush1.bf16.msra.mxu0 %v2798_v50  ;;  %2174 = vmatpush1.bf16.msra.mxu1 %v2800_v51  ;;  %v774_v50 = vld [vmem:[%s3458_s8 + $0x328] sm:$0xff] }
  0xf1   : > { %2134 = vmatprep.subr.bf16.mxu0 %v2815_v52  ;;  %2175 = vmatprep.subr.bf16.mxu1 %v2817_v53  ;;  %v782_v51 = vld [vmem:[%s3458_s8 + $0x368] sm:$0xff]  ;;  %v2706_v52 = vcombine.low %v757_v40, %v765_v41  ;;  %v2708_v53 = vcombine.low %v758_v42, %v766_v43  ;;  %v2819_v40 = vcombine.high %v869_v34, %v877_v35  ;;  %v885_v42 = vld [vmem:[%s3458_s8 + $0x6a0] sm:$0xff] }
  0xf2   : > { %v2725_v55 = vcombine.high %v774_v50, %v782_v51  ;;  %v2724_v61 = vcombine.low %v774_v50, %v782_v51  ;;  %v886_v43 = vld [vmem:[%s3458_s8 + $0x6a8] sm:$0xff]  ;;  %v679_v50 = vld [vmem:[%s3458_s8 + $0x30] sm:$0xff] }
  0xf3   : > { %v687_v51 = vld [vmem:[%s3458_s8 + $0x70] sm:$0xff] }
  0xf4   : > { %2135 = vmatpush1.bf16.msra.mxu0 %v2814_v56  ;;  %2176 = vmatpush1.bf16.msra.mxu1 %v2816_v57  ;;  %v789_v56 = vld [vmem:[%s3458_s8 + $0x3a0] sm:$0xff] }
  0xf5   : > { %2846 = vmatprep.subr.msk.bf16.mxu0 %vm1979_vm1, %v2831_v58  ;;  %2848 = vmatprep.subr.msk.bf16.mxu1 %vm1979_vm1, %v2833_v60  ;;  %v797_v57 = vld [vmem:[%s3458_s8 + $0x3e0] sm:$0xff]  ;;  %v790_v58 = vld [vmem:[%s3458_s8 + $0x3a8] sm:$0xff]  ;;  %v2722_v60 = vcombine.low %v773_v48, %v781_v49  ;;  %v2837_v48 = vcombine.high %v886_v43, %v886_v43  ;;  %v2836_v49 = vcombine.low %v886_v43, %v886_v43  ;;  %v791_v43 = vld [vmem:[%s3458_s8 + $0x3b0] sm:$0xff] }
  0xf6   : > { %v2739_v62 = vcombine.high %v789_v56, %v797_v57  ;;  %v2741_v63 = vcombine.high %v790_v58, %v798_v59 }
  0xf8   : > { %2137 = vmatpush1.bf16.msra.mxu0 %v1993_v2  ;;  %2178 = vmatpush1.bf16.msra.mxu1 %v1999_v4  ;;  %v806_v2 = vld [vmem:[%s3458_s8 + $0x428] sm:$0xff]  ;;  %v2738_v4 = vcombine.low %v789_v56, %v797_v57  ;;  %v2011_v56 = vsel %vm1979_vm1, %v2836_v49, 0 }
  0xf9   : > { %2192 = vmatprep.subr.bf16.mxu0 %v2627_v3  ;;  %2233 = vmatprep.subr.bf16.mxu1 %v2629_v5  ;;  %v814_v3 = vld [vmem:[%s3458_s8 + $0x468] sm:$0xff]  ;;  %v2740_v5 = vcombine.low %v790_v58, %v798_v59  ;;  %v695_v58 = vld [vmem:[%s3458_s8 + $0xb0] sm:$0xff] }
  0xfa   : > { %v2757_v7 = vcombine.high %v806_v2, %v814_v3  ;;  %v703_v59 = vld [vmem:[%s3458_s8 + $0xf0] sm:$0xff] }
  0xfb   : > { %2143 = vmatmul.mubr.bf16.vlgmr.msra.gmra.mrb[4].mxu0 %v3526_v20  ;;  %2184 = vmatmul.mubr.bf16.vlgmr.msra.gmra.mrb[4].mxu1 %v3526_v20 }
  0xfc   : > { %2193 = vmatpush1.bf16.msra.mxu0 %v2626_v10  ;;  %2234 = vmatpush1.bf16.msra.mxu1 %v2628_v11  ;;  %v822_v10 = vld [vmem:[%s3458_s8 + $0x4a8] sm:$0xff] }
  0xfd   : > { %2194 = vmatprep.subr.bf16.mxu0 %v2643_v12  ;;  %2235 = vmatprep.subr.bf16.mxu1 %v2645_v13  ;;  %v830_v11 = vld [vmem:[%s3458_s8 + $0x4e8] sm:$0xff]  ;;  %v2754_v12 = vcombine.low %v805_v0, %v813_v1  ;;  %v2756_v13 = vcombine.low %v806_v2, %v814_v3  ;;  %v2647_v0 = vcombine.high %v695_v58, %v703_v59  ;;  %v711_v2 = vld [vmem:[%s3458_s8 + $0x130] sm:$0xff] }
  0xfe   : > { %2851 = vmatprep.mubr.msk.bf16.mxu0 %vm1975_vm0, %v3452_v25  ;;  %2853 = vmatprep.mubr.msk.bf16.mxu1 %vm1975_vm0, %v3452_v25  ;;  %v2773_v15 = vcombine.high %v822_v10, %v830_v11  ;;  %v719_v3 = vld [vmem:[%s3458_s8 + $0x170] sm:$0xff] }
 0x100   : > { %2195 = vmatpush1.bf16.msra.mxu0 %v2642_v18  ;;  %2236 = vmatpush1.bf16.msra.mxu1 %v2644_v19  ;;  %v838_v18 = vld [vmem:[%s3458_s8 + $0x528] sm:$0xff] }
 0x101   : > { %2196 = vmatprep.subr.bf16.mxu0 %v2659_v21  ;;  %2237 = vmatprep.subr.bf16.mxu1 %v2661_v22  ;;  %v846_v19 = vld [vmem:[%s3458_s8 + $0x568] sm:$0xff]  ;;  %v2770_v21 = vcombine.low %v821_v8, %v829_v9  ;;  %v2772_v22 = vcombine.low %v822_v10, %v830_v11  ;;  %v2663_v8 = vcombine.high %v711_v2, %v719_v3  ;;  %v727_v10 = vld [vmem:[%s3458_s8 + $0x1b0] sm:$0xff] }
 0x102   : > { %v2789_v26 = vcombine.high %v838_v18, %v846_v19  ;;  %v735_v11 = vld [vmem:[%s3458_s8 + $0x1f0] sm:$0xff] }
 0x104   : > { %2197 = vmatpush1.bf16.msra.mxu0 %v2658_v29  ;;  %2238 = vmatpush1.bf16.msra.mxu1 %v2660_v30  ;;  %v854_v29 = vld [vmem:[%s3458_s8 + $0x5a8] sm:$0xff] }
 0x105   : > { %2198 = vmatprep.subr.bf16.mxu0 %v2675_v24  ;;  %2239 = vmatprep.subr.bf16.mxu1 %v2677_v31  ;;  %v862_v30 = vld [vmem:[%s3458_s8 + $0x5e8] sm:$0xff]  ;;  %v2786_v24 = vcombine.low %v837_v16, %v845_v17  ;;  %v2788_v31 = vcombine.low %v838_v18, %v846_v19  ;;  %v2679_v16 = vcombine.high %v727_v10, %v735_v11  ;;  %v743_v18 = vld [vmem:[%s3458_s8 + $0x230] sm:$0xff] }
 0x106   : > { %v2805_v33 = vcombine.high %v854_v29, %v862_v30  ;;  %v751_v19 = vld [vmem:[%s3458_s8 + $0x270] sm:$0xff] }
 0x108   : > { %2199 = vmatpush1.bf16.msra.mxu0 %v2674_v36  ;;  %2240 = vmatpush1.bf16.msra.mxu1 %v2676_v37  ;;  %v870_v36 = vld [vmem:[%s3458_s8 + $0x628] sm:$0xff] }
 0x109   : > { %2200 = vmatprep.subr.bf16.mxu0 %v2691_v38  ;;  %2241 = vmatprep.subr.bf16.mxu1 %v2693_v39  ;;  %v878_v37 = vld [vmem:[%s3458_s8 + $0x668] sm:$0xff]  ;;  %v2802_v38 = vcombine.low %v853_v27, %v861_v28  ;;  %v2804_v39 = vcombine.low %v854_v29, %v862_v30  ;;  %v759_v28 = vld [vmem:[%s3458_s8 + $0x2b0] sm:$0xff]  ;;  %v760_v30 = vld [vmem:[%s3458_s8 + $0x2b8] sm:$0xff] }
 0x10a   : > { %v2821_v41 = vcombine.high %v870_v36, %v878_v37  ;;  %v767_v29 = vld [vmem:[%s3458_s8 + $0x2f0] sm:$0xff] }
 0x10c   : > { %2201 = vmatpush1.bf16.msra.mxu0 %v2690_v44  ;;  %2242 = vmatpush1.bf16.msra.mxu1 %v2692_v45  ;;  %v2818_v44 = vcombine.low %v869_v34, %v877_v35  ;;  %v2820_v45 = vcombine.low %v870_v36, %v878_v37  ;;  %v775_v35 = vld [vmem:[%s3458_s8 + $0x330] sm:$0xff]  ;;  %v776_v37 = vld [vmem:[%s3458_s8 + $0x338] sm:$0xff] }
 0x10d   : > { %2202 = vmatprep.subr.bf16.mxu0 %v2707_v46  ;;  %2243 = vmatprep.subr.bf16.mxu1 %v2709_v47  ;;  %v2835_v46 = vcombine.high %v885_v42, %v885_v42  ;;  %v2834_v47 = vcombine.low %v885_v42, %v885_v42  ;;  %v783_v36 = vld [vmem:[%s3458_s8 + $0x370] sm:$0xff] }
 0x110   : > { %2203 = vmatpush1.bf16.msra.mxu0 %v2706_v52  ;;  %2244 = vmatpush1.bf16.msra.mxu1 %v2708_v53  ;;  %v680_v52 = vld [vmem:[%s3458_s8 + $0x38] sm:$0xff] }
 0x111   : > { %2204 = vmatprep.subr.bf16.mxu0 %v2723_v54  ;;  %2245 = vmatprep.subr.bf16.mxu1 %v2725_v55  ;;  %v688_v53 = vld [vmem:[%s3458_s8 + $0x78] sm:$0xff]  ;;  %v2005_v54 = vsel %vm1979_vm1, %v2834_v47, 0  ;;  %v2631_v55 = vcombine.high %v679_v50, %v687_v51  ;;  %v2726_v47 = vcombine.low %v775_v35, %v783_v36 }
 0x112   : > { %v2633_v57 = vcombine.high %v680_v52, %v688_v53 }
 0x114   : > { %2205 = vmatpush1.bf16.msra.mxu0 %v2722_v60  ;;  %2246 = vmatpush1.bf16.msra.mxu1 %v2724_v61  ;;  %v696_v60 = vld [vmem:[%s3458_s8 + $0xb8] sm:$0xff] }
 0x115   : > { %2206 = vmatprep.subr.bf16.mxu0 %v2739_v62  ;;  %2247 = vmatprep.subr.bf16.mxu1 %v2741_v63  ;;  %v704_v61 = vld [vmem:[%s3458_s8 + $0xf8] sm:$0xff]  ;;  %v2630_v62 = vcombine.low %v679_v50, %v687_v51  ;;  %v2632_v63 = vcombine.low %v680_v52, %v688_v53  ;;  %v807_v51 = vld [vmem:[%s3458_s8 + $0x430] sm:$0xff] }
 0x116   : > { %v2649_v1 = vcombine.high %v696_v60, %v704_v61  ;;  %v815_v52 = vld [vmem:[%s3458_s8 + $0x470] sm:$0xff]  ;;  %v808_v53 = vld [vmem:[%s3458_s8 + $0x438] sm:$0xff] }
 0x118   : > { %2207 = vmatpush1.bf16.msra.mxu0 %v2738_v4  ;;  %2248 = vmatpush1.bf16.msra.mxu1 %v2740_v5  ;;  %v712_v4 = vld [vmem:[%s3458_s8 + $0x138] sm:$0xff] }
 0x119   : > { %2208 = vmatprep.subr.bf16.mxu0 %v2755_v6  ;;  %2249 = vmatprep.subr.bf16.mxu1 %v2757_v7  ;;  %v720_v5 = vld [vmem:[%s3458_s8 + $0x178] sm:$0xff]  ;;  %v2646_v6 = vcombine.low %v695_v58, %v703_v59  ;;  %v2648_v7 = vcombine.low %v696_v60, %v704_v61  ;;  %v823_v59 = vld [vmem:[%s3458_s8 + $0x4b0] sm:$0xff] }
 0x11a   : > { %v2665_v9 = vcombine.high %v712_v4, %v720_v5  ;;  %v831_v60 = vld [vmem:[%s3458_s8 + $0x4f0] sm:$0xff]  ;;  %v824_v61 = vld [vmem:[%s3458_s8 + $0x4b8] sm:$0xff] }
 0x11c   : > { %2209 = vmatpush1.bf16.msra.mxu0 %v2754_v12  ;;  %2250 = vmatpush1.bf16.msra.mxu1 %v2756_v13  ;;  %v728_v12 = vld [vmem:[%s3458_s8 + $0x1b8] sm:$0xff] }
 0x11d   : > { %2210 = vmatprep.subr.bf16.mxu0 %v2771_v14  ;;  %2251 = vmatprep.subr.bf16.mxu1 %v2773_v15  ;;  %v736_v13 = vld [vmem:[%s3458_s8 + $0x1f8] sm:$0xff]  ;;  %v2662_v14 = vcombine.low %v711_v2, %v719_v3  ;;  %v2664_v15 = vcombine.low %v712_v4, %v720_v5  ;;  %v839_v3 = vld [vmem:[%s3458_s8 + $0x530] sm:$0xff] }
 0x11e   : > { %v2681_v17 = vcombine.high %v728_v12, %v736_v13  ;;  %v847_v4 = vld [vmem:[%s3458_s8 + $0x570] sm:$0xff]  ;;  %v840_v5 = vld [vmem:[%s3458_s8 + $0x538] sm:$0xff] }
 0x120   : > { %2211 = vmatpush1.bf16.msra.mxu0 %v2770_v21  ;;  %2252 = vmatpush1.bf16.msra.mxu1 %v2772_v22  ;;  %v744_v21 = vld [vmem:[%s3458_s8 + $0x238] sm:$0xff] }
 0x121   : > { %2212 = vmatprep.subr.bf16.mxu0 %v2787_v23  ;;  %2253 = vmatprep.subr.bf16.mxu1 %v2789_v26  ;;  %v752_v22 = vld [vmem:[%s3458_s8 + $0x278] sm:$0xff]  ;;  %v2678_v23 = vcombine.low %v727_v10, %v735_v11  ;;  %v2695_v26 = vcombine.high %v743_v18, %v751_v19  ;;  %v855_v11 = vld [vmem:[%s3458_s8 + $0x5b0] sm:$0xff] }
 0x122   : > { %v2697_v27 = vcombine.high %v744_v21, %v752_v22 }
 0x124   : > { %2213 = vmatpush1.bf16.msra.mxu0 %v2786_v24  ;;  %2254 = vmatpush1.bf16.msra.mxu1 %v2788_v31  ;;  %v768_v24 = vld [vmem:[%s3458_s8 + $0x2f8] sm:$0xff]  ;;  %v2694_v31 = vcombine.low %v743_v18, %v751_v19  ;;  %v871_v19 = vld [vmem:[%s3458_s8 + $0x630] sm:$0xff] }
 0x125   : > { %2214 = vmatprep.subr.bf16.mxu0 %v2803_v32  ;;  %2255 = vmatprep.subr.bf16.mxu1 %v2805_v33  ;;  %v2696_v32 = vcombine.low %v744_v21, %v752_v22  ;;  %v2711_v33 = vcombine.high %v759_v28, %v767_v29  ;;  %v2713_v34 = vcombine.high %v760_v30, %v768_v24  ;;  %v879_v21 = vld [vmem:[%s3458_s8 + $0x670] sm:$0xff]  ;;  %v872_v22 = vld [vmem:[%s3458_s8 + $0x638] sm:$0xff] }
 0x128   : > { %2215 = vmatpush1.bf16.msra.mxu0 %v2802_v38  ;;  %2256 = vmatpush1.bf16.msra.mxu1 %v2804_v39  ;;  %v784_v38 = vld [vmem:[%s3458_s8 + $0x378] sm:$0xff]  ;;  %v2710_v39 = vcombine.low %v759_v28, %v767_v29  ;;  %v887_v29 = vld [vmem:[%s3458_s8 + $0x6b0] sm:$0xff] }
 0x129   : > { %2216 = vmatprep.subr.bf16.mxu0 %v2819_v40  ;;  %2257 = vmatprep.subr.bf16.mxu1 %v2821_v41  ;;  %v2712_v40 = vcombine.low %v760_v30, %v768_v24  ;;  %v2727_v41 = vcombine.high %v775_v35, %v783_v36  ;;  %v2729_v42 = vcombine.high %v776_v37, %v784_v38  ;;  %v888_v30 = vld [vmem:[%s3458_s8 + $0x6b8] sm:$0xff] }
 0x12a   : > { %v2822_v24 = vcombine.low %v871_v19, %v879_v21  ;;  %v2840_v35 = vcombine.low %v888_v30, %v888_v30 }
 0x12c   : > { %2217 = vmatpush1.bf16.msra.mxu0 %v2818_v44  ;;  %2258 = vmatpush1.bf16.msra.mxu1 %v2820_v45  ;;  %v799_v44 = vld [vmem:[%s3458_s8 + $0x3f0] sm:$0xff]  ;;  %v792_v45 = vld [vmem:[%s3458_s8 + $0x3b8] sm:$0xff] }
 0x12d   : > { %2850 = vmatprep.subr.msk.bf16.mxu0 %vm1979_vm1, %v2835_v46  ;;  %2852 = vmatprep.subr.msk.bf16.mxu1 %vm1979_vm1, %v2837_v48  ;;  %v800_v46 = vld [vmem:[%s3458_s8 + $0x3f8] sm:$0xff]  ;;  %v2728_v48 = vcombine.low %v776_v37, %v784_v38  ;;  %v2743_v49 = vcombine.high %v791_v43, %v799_v44  ;;  %v2023_v37 = vsel %vm1979_vm1, %v2840_v35, 0 }
 0x12e   : > { %v2745_v50 = vcombine.high %v792_v45, %v800_v46 }
 0x130   : > { %2219 = vmatpush1.bf16.msra.mxu0 %v2005_v54  ;;  %2260 = vmatpush1.bf16.msra.mxu1 %v2011_v56  ;;  %v816_v54 = vld [vmem:[%s3458_s8 + $0x478] sm:$0xff]  ;;  %v2744_v56 = vcombine.low %v792_v45, %v800_v46 }
 0x131   : > { %2274 = vmatprep.subr.bf16.mxu0 %v2631_v55  ;;  %2315 = vmatprep.subr.bf16.mxu1 %v2633_v57  ;;  %v2742_v55 = vcombine.low %v791_v43, %v799_v44  ;;  %v2759_v57 = vcombine.high %v807_v51, %v815_v52  ;;  %v2761_v58 = vcombine.high %v808_v53, %v816_v54 }
 0x133   : > { %2225 = vmatmul.mubr.bf16.vlgmr.msra.gmra.mrb[8].mxu0 %v3526_v20  ;;  %2266 = vmatmul.mubr.bf16.vlgmr.msra.gmra.mrb[8].mxu1 %v3526_v20 }
 0x134   : > { %2275 = vmatpush1.bf16.msra.mxu0 %v2630_v62  ;;  %2316 = vmatpush1.bf16.msra.mxu1 %v2632_v63  ;;  %v832_v62 = vld [vmem:[%s3458_s8 + $0x4f8] sm:$0xff]  ;;  %v2758_v63 = vcombine.low %v807_v51, %v815_v52 }
 0x135   : > { %2276 = vmatprep.subr.bf16.mxu0 %v2647_v0  ;;  %2317 = vmatprep.subr.bf16.mxu1 %v2649_v1  ;;  %v2760_v0 = vcombine.low %v808_v53, %v816_v54  ;;  %v2775_v1 = vcombine.high %v823_v59, %v831_v60  ;;  %v2777_v2 = vcombine.high %v824_v61, %v832_v62 }
 0x136   : > { %2855 = vmatprep.mubr.msk.bf16.mxu0 %vm1975_vm0, %v3452_v25  ;;  %2857 = vmatprep.mubr.msk.bf16.mxu1 %vm1975_vm0, %v3452_v25  ;;  %v2680_v25 = vcombine.low %v728_v12, %v736_v13  ;;  %v863_v12 = vld [vmem:[%s3458_s8 + $0x5f0] sm:$0xff]  ;;  %v856_v13 = vld [vmem:[%s3458_s8 + $0x5b8] sm:$0xff] }
 0x138   : > { %2277 = vmatpush1.bf16.msra.mxu0 %v2646_v6  ;;  %2318 = vmatpush1.bf16.msra.mxu1 %v2648_v7  ;;  %v848_v6 = vld [vmem:[%s3458_s8 + $0x578] sm:$0xff]  ;;  %v2774_v7 = vcombine.low %v823_v59, %v831_v60 }
 0x139   : > { %2278 = vmatprep.subr.bf16.mxu0 %v2663_v8  ;;  %2319 = vmatprep.subr.bf16.mxu1 %v2665_v9  ;;  %v2776_v8 = vcombine.low %v824_v61, %v832_v62  ;;  %v2791_v9 = vcombine.high %v839_v3, %v847_v4  ;;  %v2793_v10 = vcombine.high %v840_v5, %v848_v6 }
 0x13c   : > { %2279 = vmatpush1.bf16.msra.mxu0 %v2662_v14  ;;  %2320 = vmatpush1.bf16.msra.mxu1 %v2664_v15  ;;  %v864_v14 = vld [vmem:[%s3458_s8 + $0x5f8] sm:$0xff]  ;;  %v2790_v15 = vcombine.low %v839_v3, %v847_v4 }
 0x13d   : > { %2280 = vmatprep.subr.bf16.mxu0 %v2679_v16  ;;  %2321 = vmatprep.subr.bf16.mxu1 %v2681_v17  ;;  %v2792_v16 = vcombine.low %v840_v5, %v848_v6  ;;  %v2807_v17 = vcombine.high %v855_v11, %v863_v12  ;;  %v2809_v18 = vcombine.high %v856_v13, %v864_v14 }
 0x140   : > { %2281 = vmatpush1.bf16.msra.mxu0 %v2678_v23  ;;  %2322 = vmatpush1.bf16.msra.mxu1 %v2680_v25  ;;  %v880_v23 = vld [vmem:[%s3458_s8 + $0x678] sm:$0xff]  ;;  %v2806_v25 = vcombine.low %v855_v11, %v863_v12 }
 0x141   : > { %2282 = vmatprep.subr.bf16.mxu0 %v2695_v26  ;;  %2323 = vmatprep.subr.bf16.mxu1 %v2697_v27  ;;  %v2808_v26 = vcombine.low %v856_v13, %v864_v14  ;;  %v2823_v27 = vcombine.high %v871_v19, %v879_v21  ;;  %v2825_v28 = vcombine.high %v872_v22, %v880_v23 }
 0x144   : > { %2283 = vmatpush1.bf16.msra.mxu0 %v2694_v31  ;;  %2324 = vmatpush1.bf16.msra.mxu1 %v2696_v32  ;;  %v2824_v31 = vcombine.low %v872_v22, %v880_v23  ;;  %v2839_v32 = vcombine.high %v887_v29, %v887_v29 }
 0x145   : > { %2284 = vmatprep.subr.bf16.mxu0 %v2711_v33  ;;  %2325 = vmatprep.subr.bf16.mxu1 %v2713_v34  ;;  %v2838_v33 = vcombine.low %v887_v29, %v887_v29  ;;  %v2841_v34 = vcombine.high %v888_v30, %v888_v30 }
 0x147   : > { %v2017_v36 = vsel %vm1979_vm1, %v2838_v33, 0 }
 0x148   : > { %2285 = vmatpush1.bf16.msra.mxu0 %v2710_v39  ;;  %2326 = vmatpush1.bf16.msra.mxu1 %v2712_v40 }
 0x149   : > { %2286 = vmatprep.subr.bf16.mxu0 %v2727_v41  ;;  %2327 = vmatprep.subr.bf16.mxu1 %v2729_v42 }
 0x14c   : > { %2287 = vmatpush1.bf16.msra.mxu0 %v2726_v47  ;;  %2328 = vmatpush1.bf16.msra.mxu1 %v2728_v48 }
 0x14d   : > { %2288 = vmatprep.subr.bf16.mxu0 %v2743_v49  ;;  %2329 = vmatprep.subr.bf16.mxu1 %v2745_v50 }
 0x150   : > { %2289 = vmatpush1.bf16.msra.mxu0 %v2742_v55  ;;  %2330 = vmatpush1.bf16.msra.mxu1 %v2744_v56 }
 0x151   : > { %2290 = vmatprep.subr.bf16.mxu0 %v2759_v57  ;;  %2331 = vmatprep.subr.bf16.mxu1 %v2761_v58 }
 0x154   : > { %2291 = vmatpush1.bf16.msra.mxu0 %v2758_v63  ;;  %2332 = vmatpush1.bf16.msra.mxu1 %v2760_v0 }
 0x155   : > { %2292 = vmatprep.subr.bf16.mxu0 %v2775_v1  ;;  %2333 = vmatprep.subr.bf16.mxu1 %v2777_v2 }
 0x158   : > { %2293 = vmatpush1.bf16.msra.mxu0 %v2774_v7  ;;  %2334 = vmatpush1.bf16.msra.mxu1 %v2776_v8 }
 0x159   : > { %2294 = vmatprep.subr.bf16.mxu0 %v2791_v9  ;;  %2335 = vmatprep.subr.bf16.mxu1 %v2793_v10 }
 0x15c   : > { %2295 = vmatpush1.bf16.msra.mxu0 %v2790_v15  ;;  %2336 = vmatpush1.bf16.msra.mxu1 %v2792_v16 }
 0x15d   : > { %2296 = vmatprep.subr.bf16.mxu0 %v2807_v17  ;;  %2337 = vmatprep.subr.bf16.mxu1 %v2809_v18 }
 0x160   : > { %2297 = vmatpush1.bf16.msra.mxu0 %v2806_v25  ;;  %2338 = vmatpush1.bf16.msra.mxu1 %v2808_v26 }
 0x161   : > { %2298 = vmatprep.subr.bf16.mxu0 %v2823_v27  ;;  %2339 = vmatprep.subr.bf16.mxu1 %v2825_v28 }
 0x164   : > { %2299 = vmatpush1.bf16.msra.mxu0 %v2822_v24  ;;  %2340 = vmatpush1.bf16.msra.mxu1 %v2824_v31 }
 0x165   : > { %2854 = vmatprep.subr.msk.bf16.mxu0 %vm1979_vm1, %v2839_v32  ;;  %2856 = vmatprep.subr.msk.bf16.mxu1 %vm1979_vm1, %v2841_v34 }
 0x168   : > { %2301 = vmatpush1.bf16.msra.mxu0 %v2017_v36  ;;  %2342 = vmatpush1.bf16.msra.mxu1 %v2023_v37 }
 0x16b   : > { %2307 = vmatmul.mubr.bf16.vlgmr.msra.gmra.mrb[12].mxu0 %v3526_v20  ;;  %2348 = vmatmul.mubr.bf16.vlgmr.msra.gmra.mrb[12].mxu1 %v3526_v20 }
 0x196   : > { %v2062_v38 = vpop.f32.mrb[0].mxu0  ;;  %v2103_v41 = vpop.f32.mrb[0].mxu1 }
 0x197   : > { %v2447_v39 = vmul.f32 %v2062_v38, %v2062_v38  ;;  %v2064_v40 = vpop.f32.mrb[1].mxu0  ;;  %v2449_v20 = vmul.f32 %v2103_v41, %v2103_v41  ;;  %v2105_v46 = vpop.f32.mrb[1].mxu1 }
 0x198   : > { %v2869_v42 = vpack.c.bf16 %v2064_v40, %v2062_v38  ;;  %v2428_v43 = vadd.f32 %v2064_v40, %v2062_v38  ;;  %v2448_v44 = vmul.f32 %v2064_v40, %v2064_v40  ;;  %v2066_v45 = vpop.f32.mrb[2].mxu0  ;;  %v2870_v48 = vpack.c.bf16 %v2105_v46, %v2103_v41  ;;  %v2107_v49 = vpop.f32.mrb[2].mxu1 }
 0x199   : > { %v2067_v47 = vpop.f32.mrb[3].mxu0  ;;  %v2450_v52 = vmul.f32 %v2105_v46, %v2105_v46  ;;  %v2108_v53 = vpop.f32.mrb[3].mxu1 }
 0x19a   : > { %2420 = vst [vmem:[%s3720_s13] sm:$0xff] %v2869_v42  ;;  %v2463_v50 = vadd.f32 %v2448_v44, %v2447_v39  ;;  %v2429_v51 = vadd.f32 %v2428_v43, %v2103_v41  ;;  %2421 = vst [vmem:[%s3720_s13 + $0x8] sm:$0xff] %v2870_v48 }
 0x19c   : > { %v2464_v54 = vadd.f32 %v2463_v50, %v2449_v20  ;;  %v2430_v55 = vadd.f32 %v2429_v51, %v2105_v46 }
 0x19e   : > { %v2465_v56 = vadd.f32 %v2464_v54, %v2450_v52 }
 0x1ce   : > { %v2144_v57 = vpop.f32.mrb[4].mxu0  ;;  %v2185_v61 = vpop.f32.mrb[4].mxu1 }
 0x1cf   : > { %v2431_v58 = vadd.f32 %v2430_v55, %v2144_v57  ;;  %v2451_v59 = vmul.f32 %v2144_v57, %v2144_v57  ;;  %v2146_v60 = vpop.f32.mrb[5].mxu0  ;;  %v2187_v1 = vpop.f32.mrb[5].mxu1  ;;  %v2453_v4 = vmul.f32 %v2185_v61, %v2185_v61 }
 0x1d0   : > { %v2871_v62 = vpack.c.bf16 %v2146_v60, %v2144_v57  ;;  %v2452_v63 = vmul.f32 %v2146_v60, %v2146_v60  ;;  %v2148_v0 = vpop.f32.mrb[6].mxu0  ;;  %v2872_v6 = vpack.c.bf16 %v2187_v1, %v2185_v61  ;;  %v2189_v7 = vpop.f32.mrb[6].mxu1  ;;  %v2454_v11 = vmul.f32 %v2187_v1, %v2187_v1 }
 0x1d1   : > { %v2466_v2 = vadd.f32 %v2465_v56, %v2451_v59  ;;  %v2432_v3 = vadd.f32 %v2431_v58, %v2146_v60  ;;  %v2149_v5 = vpop.f32.mrb[7].mxu0  ;;  %v2190_v8 = vpop.f32.mrb[7].mxu1 }
 0x1d2   : > { %2422 = vst [vmem:[%s3720_s13 + $0x10] sm:$0xff] %v2871_v62  ;;  %2423 = vst [vmem:[%s3720_s13 + $0x18] sm:$0xff] %v2872_v6 }
 0x1d3   : > { %v2467_v9 = vadd.f32 %v2466_v2, %v2452_v63  ;;  %v2433_v10 = vadd.f32 %v2432_v3, %v2185_v61 }
 0x1d5   : > { %v2468_v12 = vadd.f32 %v2467_v9, %v2453_v4  ;;  %v2434_v13 = vadd.f32 %v2433_v10, %v2187_v1 }
 0x1d7   : > { %v2469_v14 = vadd.f32 %v2468_v12, %v2454_v11 }
 0x206   : > { %v2226_v15 = vpop.f32.mrb[8].mxu0  ;;  %v2267_v19 = vpop.f32.mrb[8].mxu1 }
 0x207   : > { %v2435_v16 = vadd.f32 %v2434_v13, %v2226_v15  ;;  %v2455_v17 = vmul.f32 %v2226_v15, %v2226_v15  ;;  %v2228_v18 = vpop.f32.mrb[9].mxu0  ;;  %v2269_v25 = vpop.f32.mrb[9].mxu1  ;;  %v2457_v28 = vmul.f32 %v2267_v19, %v2267_v19 }
 0x208   : > { %v2873_v21 = vpack.c.bf16 %v2228_v18, %v2226_v15  ;;  %v2456_v22 = vmul.f32 %v2228_v18, %v2228_v18  ;;  %v2230_v23 = vpop.f32.mrb[10].mxu0  ;;  %v2874_v30 = vpack.c.bf16 %v2269_v25, %v2267_v19  ;;  %v2271_v24 = vpop.f32.mrb[10].mxu1  ;;  %v2458_v34 = vmul.f32 %v2269_v25, %v2269_v25 }
 0x209   : > { %v2470_v26 = vadd.f32 %v2469_v14, %v2455_v17  ;;  %v2436_v27 = vadd.f32 %v2435_v16, %v2228_v18  ;;  %v2231_v29 = vpop.f32.mrb[11].mxu0  ;;  %v2272_v31 = vpop.f32.mrb[11].mxu1 }
 0x20a   : > { %2424 = vst [vmem:[%s3720_s13 + $0x20] sm:$0xff] %v2873_v21  ;;  %2425 = vst [vmem:[%s3720_s13 + $0x28] sm:$0xff] %v2874_v30 }
 0x20b   : > { %v2471_v32 = vadd.f32 %v2470_v26, %v2456_v22  ;;  %v2437_v33 = vadd.f32 %v2436_v27, %v2267_v19 }
 0x20d   : > { %v2472_v35 = vadd.f32 %v2471_v32, %v2457_v28  ;;  %v2438_v36 = vadd.f32 %v2437_v33, %v2269_v25 }
 0x20f   : > { %v2473_v37 = vadd.f32 %v2472_v35, %v2458_v34 }
 0x23e   : > { %v2308_v38 = vpop.f32.mrb[12].mxu0  ;;  %v2349_v42 = vpop.f32.mrb[12].mxu1 }
 0x23f   : > { %v2439_v39 = vadd.f32 %v2438_v36, %v2308_v38  ;;  %v2459_v40 = vmul.f32 %v2308_v38, %v2308_v38  ;;  %v2310_v41 = vpop.f32.mrb[13].mxu0  ;;  %v2351_v20 = vpop.f32.mrb[13].mxu1  ;;  %v2461_v48 = vmul.f32 %v2349_v42, %v2349_v42 }
 0x240   : > { %v2875_v43 = vpack.c.bf16 %v2310_v41, %v2308_v38  ;;  %v2460_v44 = vmul.f32 %v2310_v41, %v2310_v41  ;;  %v2312_v45 = vpop.f32.mrb[14].mxu0  ;;  %v2876_v49 = vpack.c.bf16 %v2351_v20, %v2349_v42  ;;  %v2353_v51 = vpop.f32.mrb[14].mxu1  ;;  %v2462_v56 = vmul.f32 %v2351_v20, %v2351_v20 }
 0x241   : > { %v2474_v46 = vadd.f32 %v2473_v37, %v2459_v40  ;;  %v2440_v47 = vadd.f32 %v2439_v39, %v2310_v41  ;;  %v2313_v50 = vpop.f32.mrb[15].mxu0  ;;  %v2354_v52 = vpop.f32.mrb[15].mxu1 }
 0x242   : > { %2426 = vst [vmem:[%s3720_s13 + $0x30] sm:$0xff] %v2875_v43  ;;  %2427 = vst [vmem:[%s3720_s13 + $0x38] sm:$0xff] %v2876_v49 }
 0x243   : > { %v2441_v53 = vadd.f32 %v2440_v47, %v2349_v42  ;;  %v2475_v54 = vadd.f32 %v2474_v46, %v2460_v44 }
 0x245   : > { %v2442_v55 = vadd.f32 %v2441_v53, %v2351_v20  ;;  %v2476_v57 = vadd.f32 %v2475_v54, %v2461_v48 }
 0x247   : > { %2443 = vadd.xlane.f32.xlu0 %v2442_v55  ;;  %v2477_v58 = vadd.f32 %v2476_v57, %v2462_v56 }
 0x24b   : > { %2478 = vadd.xlane.f32.xlu0 %v2477_v58 }
 0x2d4   : > { %v2444_v59 = vpop.xlane.xlu0 %2443 }
 0x2d5   : > { %2446 = vst.msk [vmem:[%s666_s20] sm:$0xff] %vm2445_vm2, %v2444_v59 }
 0x2d8   : > { %v2479_v60 = vpop.xlane.xlu0 %2478 }
 0x2d9   : > { %2480 = vst.msk [vmem:[%s670_s24] sm:$0xff] %vm2445_vm2, %v2479_v60 }
 0x2da PF: > { %p12_p10 = scmp.ge.s32.totalorder %s2989_s19, 4   ;;  %s3753_s15 = smov %s2939_s16 }
 0x2db   : > { %s3754_s16 = smov %s2998_s22  ;;  %s3755_s17 = smov %s2989_s19 }
 0x2dc   :  { %14 = sbr.rel (!%p12_p10) target bundleno = 2 (0x2), region = 110 }

// kernel: costregnet_small_forward.35
= control target key start
LH: loop header
LB: loop body
LE: loop exit
PB: predicated region body
PF: predicated region fallthrough
CT: control target
= control target key end

     0   :  { %vm350_vm0 = vcmask 719872   ;;  %vm354_vm1 = vcmask 1043456   ;;  %vm491_vm2 = vcmask 7168   ;;  %s898_s1 = inlined_call_operand.vmem [shape: bf16[216,512], index: 1, kind: input, shape index: {}]   ;;  %s899_s0 = inlined_call_operand.vmem [shape: bf16[16,216], index: 0, kind: input, shape index: {}]   ;;  %s900_s2 = inlined_call_operand.vmem [shape: bf16[16,512], index: 2, kind: output, shape index: {0}]   ;;  %s901_s3 = inlined_call_operand.vmem [shape: f32[1,16,1], index: 3, kind: output, shape index: {1}]   ;;  %s902_s4 = inlined_call_operand.vmem [shape: f32[1,16,1], index: 4, kind: output, shape index: {2}]  }
   0x1   :  { %v596_v0 = vld [vmem:[%s898_s1 + $0x4] ss:$16 sps:$4 sm:$0xff]   ;;  %v598_v1 = vld [vmem:[%s898_s1 + $0xc] ss:$16 sps:$4 sm:$0xff]   ;;  %v600_v2 = vld [vmem:[%s898_s1] ss:$16 sps:$4 sm:$0xff]  }
   0x2   :  { %367 = vmatprep.subr.bf16.mxu0 %v596_v0  ;;  %v601_v3 = vld [vmem:[%s898_s1 + $0x8] ss:$16 sps:$4 sm:$0xff]   ;;  %410 = vmatprep.subr.bf16.mxu1 %v598_v1  ;;  %v602_v4 = vld [vmem:[%s898_s1 + $0x24] ss:$16 sps:$4 sm:$0xff]   ;;  %v604_v5 = vld [vmem:[%s898_s1 + $0x2c] ss:$16 sps:$4 sm:$0xff]  }
   0x3   :  { %368 = vmatpush1.bf16.msra.mxu0 %v600_v2  ;;  %411 = vmatpush1.bf16.msra.mxu1 %v601_v3  ;;  %v606_v6 = vld [vmem:[%s898_s1 + $0x20] ss:$16 sps:$4 sm:$0xff]   ;;  %v607_v7 = vld [vmem:[%s898_s1 + $0x28] ss:$16 sps:$4 sm:$0xff]   ;;  %v608_v8 = vld [vmem:[%s898_s1 + $0x44] ss:$16 sps:$4 sm:$0xff]  }
   0x4   :  { %369 = vmatprep.subr.bf16.mxu0 %v602_v4  ;;  %412 = vmatprep.subr.bf16.mxu1 %v604_v5  ;;  %v610_v9 = vld [vmem:[%s898_s1 + $0x4c] ss:$16 sps:$4 sm:$0xff]   ;;  %v612_v10 = vld [vmem:[%s898_s1 + $0x40] ss:$16 sps:$4 sm:$0xff]   ;;  %v613_v11 = vld [vmem:[%s898_s1 + $0x48] ss:$16 sps:$4 sm:$0xff]  }
   0x5   :  { %v614_v12 = vld [vmem:[%s898_s1 + $0x64] ss:$16 sps:$4 sm:$0xff]   ;;  %v616_v13 = vld [vmem:[%s898_s1 + $0x6c] ss:$16 sps:$4 sm:$0xff]   ;;  %v618_v14 = vld [vmem:[%s898_s1 + $0x60] ss:$16 sps:$4 sm:$0xff]  }
   0x6   :  { %v619_v15 = vld [vmem:[%s898_s1 + $0x68] ss:$16 sps:$4 sm:$0xff]   ;;  %v620_v16 = vld [vmem:[%s898_s1 + $0x84] ss:$16 sps:$4 sm:$0xff]   ;;  %v622_v17 = vld [vmem:[%s898_s1 + $0x8c] ss:$16 sps:$4 sm:$0xff]  }
   0x7   :  { %370 = vmatpush1.bf16.msra.mxu0 %v606_v6  ;;  %413 = vmatpush1.bf16.msra.mxu1 %v607_v7  ;;  %v624_v18 = vld [vmem:[%s898_s1 + $0x80] ss:$16 sps:$4 sm:$0xff]   ;;  %v625_v19 = vld [vmem:[%s898_s1 + $0x88] ss:$16 sps:$4 sm:$0xff]   ;;  %v626_v20 = vld [vmem:[%s898_s1 + $0xa4] ss:$16 sps:$4 sm:$0xff]  }
   0x8   :  { %371 = vmatprep.subr.bf16.mxu0 %v608_v8  ;;  %414 = vmatprep.subr.bf16.mxu1 %v610_v9  ;;  %v628_v21 = vld [vmem:[%s898_s1 + $0xac] ss:$16 sps:$4 sm:$0xff]   ;;  %v630_v22 = vld [vmem:[%s898_s1 + $0xa0] ss:$16 sps:$4 sm:$0xff]   ;;  %v631_v23 = vld [vmem:[%s898_s1 + $0xa8] ss:$16 sps:$4 sm:$0xff]  }
   0x9   :  { %v632_v24 = vld [vmem:[%s898_s1 + $0xc4] ss:$16 sps:$4 sm:$0xff]   ;;  %v634_v25 = vld [vmem:[%s898_s1 + $0xcc] ss:$16 sps:$4 sm:$0xff]   ;;  %v636_v26 = vld [vmem:[%s898_s1 + $0xc0] ss:$16 sps:$4 sm:$0xff]  }
   0xa   :  { %v637_v27 = vld [vmem:[%s898_s1 + $0xc8] ss:$16 sps:$4 sm:$0xff]   ;;  %v638_v28 = vld [vmem:[%s898_s1 + $0xe4] ss:$16 sps:$4 sm:$0xff]   ;;  %v640_v29 = vld [vmem:[%s898_s1 + $0xec] ss:$16 sps:$4 sm:$0xff]  }
   0xb   :  { %372 = vmatpush1.bf16.msra.mxu0 %v612_v10  ;;  %415 = vmatpush1.bf16.msra.mxu1 %v613_v11  ;;  %v642_v30 = vld [vmem:[%s898_s1 + $0xe0] ss:$16 sps:$4 sm:$0xff]   ;;  %v643_v31 = vld [vmem:[%s898_s1 + $0xe8] ss:$16 sps:$4 sm:$0xff]   ;;  %v644_v32 = vld [vmem:[%s898_s1 + $0x104] ss:$16 sps:$4 sm:$0xff]  }
   0xc   :  { %373 = vmatprep.subr.bf16.mxu0 %v614_v12  ;;  %416 = vmatprep.subr.bf16.mxu1 %v616_v13  ;;  %v646_v33 = vld [vmem:[%s898_s1 + $0x10c] ss:$16 sps:$4 sm:$0xff]   ;;  %v648_v34 = vld [vmem:[%s898_s1 + $0x100] ss:$16 sps:$4 sm:$0xff]   ;;  %v649_v35 = vld [vmem:[%s898_s1 + $0x108] ss:$16 sps:$4 sm:$0xff]  }
   0xd   :  { %v650_v36 = vld [vmem:[%s898_s1 + $0x124] ss:$16 sps:$4 sm:$0xff]   ;;  %v652_v37 = vld [vmem:[%s898_s1 + $0x12c] ss:$16 sps:$4 sm:$0xff]   ;;  %v654_v38 = vld [vmem:[%s898_s1 + $0x120] ss:$16 sps:$4 sm:$0xff]  }
   0xe   :  { %v655_v39 = vld [vmem:[%s898_s1 + $0x128] ss:$16 sps:$4 sm:$0xff]   ;;  %v680_v40 = vld [vmem:[%s899_s0 + $0x4] ss:$8 sps:$4 sm:$0xff]   ;;  %v660_v43 = vld [vmem:[%s898_s1 + $0x140] ss:$16 sps:$4 sm:$0xff]  }
   0xf   :  { %374 = vmatpush1.bf16.msra.mxu0 %v618_v14  ;;  %417 = vmatpush1.bf16.msra.mxu1 %v619_v15  ;;  %v656_v41 = vld [vmem:[%s898_s1 + $0x144] ss:$16 sps:$4 sm:$0xff]   ;;  %v658_v42 = vld [vmem:[%s898_s1 + $0x14c] ss:$16 sps:$4 sm:$0xff]   ;;  %v661_v44 = vld [vmem:[%s898_s1 + $0x148] ss:$16 sps:$4 sm:$0xff]  }
  0x10   :  { %375 = vmatprep.subr.bf16.mxu0 %v620_v16  ;;  %418 = vmatprep.subr.bf16.mxu1 %v622_v17  ;;  %v662_v45 = vld [vmem:[%s898_s1 + $0x164] ss:$16 sps:$4 sm:$0xff]   ;;  %v664_v46 = vld [vmem:[%s898_s1 + $0x16c] ss:$16 sps:$4 sm:$0xff]   ;;  %v666_v47 = vld [vmem:[%s898_s1 + $0x160] ss:$16 sps:$4 sm:$0xff]  }
  0x11   :  { %585 = vmatprep.mubr.msk.bf16.mxu0 %vm350_vm0, %v680_v40  ;;  %587 = vmatprep.mubr.msk.bf16.mxu1 %vm350_vm0, %v680_v40  ;;  %v667_v48 = vld [vmem:[%s898_s1 + $0x168] ss:$16 sps:$4 sm:$0xff]   ;;  %v668_v49 = vld [vmem:[%s898_s1 + $0x184] ss:$16 sps:$4 sm:$0xff]   ;;  %v670_v50 = vld [vmem:[%s898_s1 + $0x18c] ss:$16 sps:$4 sm:$0xff]  }
  0x12   :  { %v69_v51 = vld [vmem:[%s898_s1 + $0x1a0] sm:$0xff]  ;;  %v70_v52 = vld [vmem:[%s898_s1 + $0x1a8] sm:$0xff] }
  0x13   :  { %376 = vmatpush1.bf16.msra.mxu0 %v624_v18  ;;  %419 = vmatpush1.bf16.msra.mxu1 %v625_v19  ;;  %v672_v53 = vld [vmem:[%s898_s1 + $0x180] ss:$16 sps:$4 sm:$0xff]   ;;  %v673_v54 = vld [vmem:[%s898_s1 + $0x188] ss:$16 sps:$4 sm:$0xff]   ;;  %v581_v55 = vcombine.high %v69_v51, %v69_v51  ;;  %v583_v56 = vcombine.high %v70_v52, %v70_v52  ;;  %v580_v57 = vcombine.low %v69_v51, %v69_v51 }
  0x14   :  { %377 = vmatprep.subr.bf16.mxu0 %v626_v20  ;;  %420 = vmatprep.subr.bf16.mxu1 %v628_v21  ;;  %v582_v58 = vcombine.low %v70_v52, %v70_v52  ;;  %v678_v61 = vld [vmem:[%s899_s0] ss:$8 sps:$4 sm:$0xff]  }
  0x15   :  { %v356_v59 = vsel %vm354_vm1, %v580_v57, 0 }
  0x16   :  { %v362_v60 = vsel %vm354_vm1, %v582_v58, 0 }
  0x17   :  { %378 = vmatpush1.bf16.msra.mxu0 %v630_v22  ;;  %421 = vmatpush1.bf16.msra.mxu1 %v631_v23 }
  0x18   :  { %379 = vmatprep.subr.bf16.mxu0 %v632_v24  ;;  %422 = vmatprep.subr.bf16.mxu1 %v634_v25 }
  0x1b   :  { %380 = vmatpush1.bf16.msra.mxu0 %v636_v26  ;;  %423 = vmatpush1.bf16.msra.mxu1 %v637_v27 }
  0x1c   :  { %381 = vmatprep.subr.bf16.mxu0 %v638_v28  ;;  %424 = vmatprep.subr.bf16.mxu1 %v640_v29 }
  0x1f   :  { %382 = vmatpush1.bf16.msra.mxu0 %v642_v30  ;;  %425 = vmatpush1.bf16.msra.mxu1 %v643_v31 }
  0x20   :  { %383 = vmatprep.subr.bf16.mxu0 %v644_v32  ;;  %426 = vmatprep.subr.bf16.mxu1 %v646_v33 }
  0x23   :  { %384 = vmatpush1.bf16.msra.mxu0 %v648_v34  ;;  %427 = vmatpush1.bf16.msra.mxu1 %v649_v35 }
  0x24   :  { %385 = vmatprep.subr.bf16.mxu0 %v650_v36  ;;  %428 = vmatprep.subr.bf16.mxu1 %v652_v37 }
  0x27   :  { %386 = vmatpush1.bf16.msra.mxu0 %v654_v38  ;;  %429 = vmatpush1.bf16.msra.mxu1 %v655_v39 }
  0x28   :  { %387 = vmatprep.subr.bf16.mxu0 %v656_v41  ;;  %430 = vmatprep.subr.bf16.mxu1 %v658_v42 }
  0x2b   :  { %388 = vmatpush1.bf16.msra.mxu0 %v660_v43  ;;  %431 = vmatpush1.bf16.msra.mxu1 %v661_v44 }
  0x2c   :  { %389 = vmatprep.subr.bf16.mxu0 %v662_v45  ;;  %432 = vmatprep.subr.bf16.mxu1 %v664_v46 }
  0x2f   :  { %390 = vmatpush1.bf16.msra.mxu0 %v666_v47  ;;  %433 = vmatpush1.bf16.msra.mxu1 %v667_v48 }
  0x30   :  { %391 = vmatprep.subr.bf16.mxu0 %v668_v49  ;;  %434 = vmatprep.subr.bf16.mxu1 %v670_v50 }
  0x33   :  { %392 = vmatpush1.bf16.msra.mxu0 %v672_v53  ;;  %435 = vmatpush1.bf16.msra.mxu1 %v673_v54 }
  0x34   :  { %584 = vmatprep.subr.msk.bf16.mxu0 %vm354_vm1, %v581_v55  ;;  %586 = vmatprep.subr.msk.bf16.mxu1 %vm354_vm1, %v583_v56 }
  0x37   :  { %394 = vmatpush1.bf16.msra.mxu0 %v356_v59  ;;  %437 = vmatpush1.bf16.msra.mxu1 %v362_v60 }
  0x3a   :  { %400 = vmatmul.mubr.bf16.vlgmr.msra.gmra.mrb[0].mxu0 %v678_v61  ;;  %443 = vmatmul.mubr.bf16.vlgmr.msra.gmra.mrb[0].mxu1 %v678_v61 }
 0x10d   :  { %v401_v62 = vpop.f32.mrb[0].mxu0  ;;  %v444_v63 = vpop.f32.mrb[0].mxu1 }
 0x10e   :  { %v494_v0 = vmul.f32 %v401_v62, %v401_v62  ;;  %v403_v1 = vpop.f32.mrb[1].mxu0  ;;  %v446_v2 = vpop.f32.mrb[1].mxu1  ;;  %v496_v9 = vmul.f32 %v444_v63, %v444_v63 }
 0x10f   :  { %v592_v3 = vpack.c.bf16 %v403_v1, %v401_v62  ;;  %v481_v4 = vadd.f32 %v403_v1, %v401_v62  ;;  %v495_v5 = vmul.f32 %v403_v1, %v403_v1  ;;  %v593_v6 = vpack.c.bf16 %v446_v2, %v444_v63  ;;  %v405_v7 = vpop.f32.mrb[2].mxu0  ;;  %v448_v8 = vpop.f32.mrb[2].mxu1 }
 0x110   :  { %v498_v10 = vmul.f32 %v405_v7, %v405_v7  ;;  %v407_v11 = vpop.f32.mrb[3].mxu0  ;;  %v450_v12 = vpop.f32.mrb[3].mxu1  ;;  %v500_v19 = vmul.f32 %v448_v8, %v448_v8  ;;  %v497_v23 = vmul.f32 %v446_v2, %v446_v2 }
 0x111   :  { %477 = vst [vmem:[%s900_s2] sm:$0xff] %v592_v3  ;;  %478 = vst [vmem:[%s900_s2 + $0x8] sm:$0xff] %v593_v6  ;;  %v594_v13 = vpack.c.bf16 %v407_v11, %v405_v7  ;;  %v486_v14 = vadd.f32 %v407_v11, %v405_v7  ;;  %v499_v15 = vmul.f32 %v407_v11, %v407_v11 }
 0x112   :  { %v595_v16 = vpack.c.bf16 %v450_v12, %v448_v8  ;;  %v482_v17 = vadd.f32 %v481_v4, %v444_v63  ;;  %v502_v18 = vadd.f32 %v495_v5, %v494_v0  ;;  %v501_v25 = vmul.f32 %v450_v12, %v450_v12 }
 0x113   :  { %479 = vst [vmem:[%s900_s2 + $0x10] sm:$0xff] %v594_v13  ;;  %v507_v20 = vadd.f32 %v499_v15, %v498_v10  ;;  %v487_v21 = vadd.f32 %v486_v14, %v448_v8 }
 0x114   :  { %480 = vst [vmem:[%s900_s2 + $0x18] sm:$0xff] %v595_v16  ;;  %v483_v22 = vadd.f32 %v482_v17, %v446_v2  ;;  %v503_v24 = vadd.f32 %v502_v18, %v496_v9 }
 0x115   :  { %v488_v26 = vadd.f32 %v487_v21, %v450_v12  ;;  %v508_v27 = vadd.f32 %v507_v20, %v500_v19 }
 0x116   :  { %484 = vadd.xlane.f32.xlu0 %v483_v22  ;;  %v504_v28 = vadd.f32 %v503_v24, %v497_v23 }
 0x117   :  { %v509_v29 = vadd.f32 %v508_v27, %v501_v25 }
 0x118   :  { %505 = vadd.xlane.f32.xlu1 %v504_v28 }
 0x11a   :  { %489 = vadd.xlane.f32.xlu0 %v488_v26 }
 0x11c   :  { %510 = vadd.xlane.f32.xlu1 %v509_v29 }
 0x1a3   :  { %v485_v30 = vpop.xlane.xlu0 %484 }
 0x1a4   :  { %492 = vst.msk [vmem:[%s901_s3] sm:$0xff] %vm491_vm2, %v485_v30 }
 0x1a5   :  { %v506_v31 = vpop.xlane.xlu1 %505 }
 0x1a6   :  { %512 = vst.msk [vmem:[%s902_s4] sm:$0xff] %vm491_vm2, %v506_v31 }
 0x1a7   :  { %v490_v32 = vpop.xlane.xlu0 %489 }
 0x1a8   :  { %493 = vst.msk [vmem:[%s901_s3 + $0x8] sm:$0xff] %vm491_vm2, %v490_v32 }
 0x1a9   :  { %v511_v33 = vpop.xlane.xlu1 %510 }
 0x1aa   :  { %513 = vst.msk [vmem:[%s902_s4 + $0x8] sm:$0xff] %vm491_vm2, %v511_v33 }

// kernel: costregnet_small_forward.36
= control target key start
LH: loop header
LB: loop body
LE: loop exit
PB: predicated region body
PF: predicated region fallthrough
CT: control target
= control target key end

     0   :  { %v117_v0 = vmov 0   ;;  %s174_s2 = inlined_call_operand.vmem [shape: f32[16,1], index: 2, kind: input, shape index: {}]   ;;  %s175_s1 = inlined_call_operand.vmem [shape: f32[16,1], index: 1, kind: input, shape index: {}]   ;;  %s176_s0 = inlined_call_operand.vmem [shape: bf16[16,512], index: 0, kind: input, shape index: {}]   ;;  %s177_s3 = inlined_call_operand.vmem [shape: bf16[16,512], index: 3, kind: output, shape index: {}]  }
   0x1   :  { %116 = vset.pattern.permute.xlu1 %v117_v0  ;;  %115 = vset.pattern.permute.xlu0 %v117_v0  ;;  %v46_v1 = vld [vmem:[%s174_s2] sm:$0xff]  ;;  %v47_v3 = vld [vmem:[%s174_s2 + $0x8] sm:$0xff]  ;;  %v16_v11 = vld [vmem:[%s176_s0 + $0x10] sm:$0xff] }
   0x2   :  { %v26_v2 = vld [vmem:[%s175_s1] sm:$0xff]  ;;  %50 = vperm.xlu1 %116, %v46_v1   ;;  %v27_v4 = vld [vmem:[%s175_s1 + $0x8] sm:$0xff]  ;;  %v17_v12 = vld [vmem:[%s176_s0 + $0x18] sm:$0xff]  ;;  %v22_v19 = vunpack.c.l.bf16 %v16_v11  ;;  %v23_v20 = vunpack.c.h.bf16 %v16_v11 }
   0x3   :  { %30 = vperm.xlu0 %115, %v26_v2   ;;  %v14_v5 = vld [vmem:[%s176_s0] sm:$0xff]  ;;  %v15_v6 = vld [vmem:[%s176_s0 + $0x8] sm:$0xff]  ;;  %v24_v21 = vunpack.c.l.bf16 %v17_v12  ;;  %v25_v22 = vunpack.c.h.bf16 %v17_v12 }
   0x4   :  { %v18_v7 = vunpack.c.l.bf16 %v14_v5  ;;  %v19_v8 = vunpack.c.h.bf16 %v14_v5  ;;  %v20_v9 = vunpack.c.l.bf16 %v15_v6  ;;  %v21_v10 = vunpack.c.h.bf16 %v15_v6 }
   0x6   :  { %55 = vperm.xlu1 %116, %v47_v3  }
   0x7   :  { %35 = vperm.xlu0 %115, %v27_v4  }
  0x81   :  { %v51_v14 = vpop.permute.xlu1 %50 }
  0x82   :  { %v31_v13 = vpop.permute.xlu0 %30 }
  0x83   :  { %v38_v15 = vmul.f32 %v31_v13, %v18_v7  ;;  %v39_v16 = vmul.f32 %v31_v13, %v19_v8  ;;  %v40_v17 = vmul.f32 %v31_v13, %v20_v9  ;;  %v41_v18 = vmul.f32 %v31_v13, %v21_v10 }
  0x85   :  { %v58_v23 = vadd.f32 %v51_v14, %v38_v15  ;;  %v59_v24 = vadd.f32 %v51_v14, %v39_v16  ;;  %v60_v25 = vadd.f32 %v51_v14, %v40_v17  ;;  %v61_v26 = vadd.f32 %v51_v14, %v41_v18  ;;  %v56_v38 = vpop.permute.xlu1 %55 }
  0x86   :  { %v36_v27 = vpop.permute.xlu0 %35 }
  0x87   :  { %v66_v28 = vmax.f32 %v58_v23, 0.0  ;;  %v67_v29 = vmax.f32 %v59_v24, 0.0  ;;  %v68_v30 = vmax.f32 %v60_v25, 0.0  ;;  %v69_v31 = vmax.f32 %v61_v26, 0.0 }
  0x88   :  { %v42_v32 = vmul.f32 %v36_v27, %v22_v19  ;;  %v43_v33 = vmul.f32 %v36_v27, %v23_v20  ;;  %v44_v34 = vmul.f32 %v36_v27, %v24_v21  ;;  %v45_v35 = vmul.f32 %v36_v27, %v25_v22 }
  0x89   :  { %v110_v36 = vpack.c.bf16 %v67_v29, %v66_v28  ;;  %v111_v37 = vpack.c.bf16 %v69_v31, %v68_v30 }
  0x8a   :  { %v62_v39 = vadd.f32 %v56_v38, %v42_v32  ;;  %v63_v40 = vadd.f32 %v56_v38, %v43_v33  ;;  %v64_v41 = vadd.f32 %v56_v38, %v44_v34  ;;  %v65_v42 = vadd.f32 %v56_v38, %v45_v35 }
  0x8b   :  { %98 = vst [vmem:[%s177_s3] sm:$0xff] %v110_v36  ;;  %99 = vst [vmem:[%s177_s3 + $0x8] sm:$0xff] %v111_v37 }
  0x8c   :  { %v70_v43 = vmax.f32 %v62_v39, 0.0  ;;  %v71_v44 = vmax.f32 %v63_v40, 0.0  ;;  %v72_v45 = vmax.f32 %v64_v41, 0.0  ;;  %v73_v46 = vmax.f32 %v65_v42, 0.0 }
  0x8e   :  { %v112_v47 = vpack.c.bf16 %v71_v44, %v70_v43  ;;  %v113_v48 = vpack.c.bf16 %v73_v46, %v72_v45 }
  0x90   :  { %100 = vst [vmem:[%s177_s3 + $0x10] sm:$0xff] %v112_v47  ;;  %101 = vst [vmem:[%s177_s3 + $0x18] sm:$0xff] %v113_v48 }

// kernel: costregnet_small_forward.37
= control target key start
LH: loop header
LB: loop body
LE: loop exit
PB: predicated region body
PF: predicated region fallthrough
CT: control target
= control target key end

     0   :  { %vm686_vm0 = vcmask 392192   ;;  %vm900_vm1 = vcmask 7168   ;;  %s1618_s1 = inlined_call_operand.vmem [shape: bf16[432,512], index: 1, kind: input, shape index: {}]   ;;  %s1619_s0 = inlined_call_operand.vmem [shape: bf16[16,432], index: 0, kind: input, shape index: {}]   ;;  %s1620_s2 = inlined_call_operand.vmem [shape: bf16[16,512], index: 2, kind: output, shape index: {0}]   ;;  %s1621_s3 = inlined_call_operand.vmem [shape: f32[1,16,1], index: 3, kind: output, shape index: {1}]   ;;  %s1622_s4 = inlined_call_operand.vmem [shape: f32[1,16,1], index: 4, kind: output, shape index: {2}]  }
   0x1   :  { %v1065_v0 = vld [vmem:[%s1618_s1 + $0x4] ss:$16 sps:$4 sm:$0xff]   ;;  %v1067_v1 = vld [vmem:[%s1618_s1 + $0xc] ss:$16 sps:$4 sm:$0xff]   ;;  %v1069_v2 = vld [vmem:[%s1618_s1] ss:$16 sps:$4 sm:$0xff]  }
   0x2   :  { %690 = vmatprep.subr.bf16.mxu0 %v1065_v0  ;;  %v1070_v3 = vld [vmem:[%s1618_s1 + $0x8] ss:$16 sps:$4 sm:$0xff]   ;;  %776 = vmatprep.subr.bf16.mxu1 %v1067_v1  ;;  %v1071_v4 = vld [vmem:[%s1618_s1 + $0x24] ss:$16 sps:$4 sm:$0xff]   ;;  %v1073_v5 = vld [vmem:[%s1618_s1 + $0x2c] ss:$16 sps:$4 sm:$0xff]  }
   0x3   :  { %691 = vmatpush1.bf16.msra.mxu0 %v1069_v2  ;;  %777 = vmatpush1.bf16.msra.mxu1 %v1070_v3  ;;  %v1075_v6 = vld [vmem:[%s1618_s1 + $0x20] ss:$16 sps:$4 sm:$0xff]   ;;  %v1076_v7 = vld [vmem:[%s1618_s1 + $0x28] ss:$16 sps:$4 sm:$0xff]   ;;  %v1077_v8 = vld [vmem:[%s1618_s1 + $0x44] ss:$16 sps:$4 sm:$0xff]  }
   0x4   :  { %692 = vmatprep.subr.bf16.mxu0 %v1071_v4  ;;  %778 = vmatprep.subr.bf16.mxu1 %v1073_v5  ;;  %v1079_v9 = vld [vmem:[%s1618_s1 + $0x4c] ss:$16 sps:$4 sm:$0xff]   ;;  %v1081_v10 = vld [vmem:[%s1618_s1 + $0x40] ss:$16 sps:$4 sm:$0xff]   ;;  %v1082_v11 = vld [vmem:[%s1618_s1 + $0x48] ss:$16 sps:$4 sm:$0xff]  }
   0x5   :  { %v1083_v12 = vld [vmem:[%s1618_s1 + $0x64] ss:$16 sps:$4 sm:$0xff]   ;;  %v1085_v13 = vld [vmem:[%s1618_s1 + $0x6c] ss:$16 sps:$4 sm:$0xff]   ;;  %v1087_v14 = vld [vmem:[%s1618_s1 + $0x60] ss:$16 sps:$4 sm:$0xff]  }
   0x6   :  { %v1088_v15 = vld [vmem:[%s1618_s1 + $0x68] ss:$16 sps:$4 sm:$0xff]   ;;  %v1089_v16 = vld [vmem:[%s1618_s1 + $0x84] ss:$16 sps:$4 sm:$0xff]   ;;  %v1091_v17 = vld [vmem:[%s1618_s1 + $0x8c] ss:$16 sps:$4 sm:$0xff]  }
   0x7   :  { %693 = vmatpush1.bf16.msra.mxu0 %v1075_v6  ;;  %779 = vmatpush1.bf16.msra.mxu1 %v1076_v7  ;;  %v1093_v18 = vld [vmem:[%s1618_s1 + $0x80] ss:$16 sps:$4 sm:$0xff]   ;;  %v1094_v19 = vld [vmem:[%s1618_s1 + $0x88] ss:$16 sps:$4 sm:$0xff]   ;;  %v1095_v20 = vld [vmem:[%s1618_s1 + $0xa4] ss:$16 sps:$4 sm:$0xff]  }
   0x8   :  { %694 = vmatprep.subr.bf16.mxu0 %v1077_v8  ;;  %780 = vmatprep.subr.bf16.mxu1 %v1079_v9  ;;  %v1097_v21 = vld [vmem:[%s1618_s1 + $0xac] ss:$16 sps:$4 sm:$0xff]   ;;  %v1099_v22 = vld [vmem:[%s1618_s1 + $0xa0] ss:$16 sps:$4 sm:$0xff]   ;;  %v1100_v23 = vld [vmem:[%s1618_s1 + $0xa8] ss:$16 sps:$4 sm:$0xff]  }
   0x9   :  { %v1101_v24 = vld [vmem:[%s1618_s1 + $0xc4] ss:$16 sps:$4 sm:$0xff]   ;;  %v1103_v25 = vld [vmem:[%s1618_s1 + $0xcc] ss:$16 sps:$4 sm:$0xff]   ;;  %v1105_v26 = vld [vmem:[%s1618_s1 + $0xc0] ss:$16 sps:$4 sm:$0xff]  }
   0xa   :  { %v1106_v27 = vld [vmem:[%s1618_s1 + $0xc8] ss:$16 sps:$4 sm:$0xff]   ;;  %v1107_v28 = vld [vmem:[%s1618_s1 + $0xe4] ss:$16 sps:$4 sm:$0xff]   ;;  %v1109_v29 = vld [vmem:[%s1618_s1 + $0xec] ss:$16 sps:$4 sm:$0xff]  }
   0xb   :  { %695 = vmatpush1.bf16.msra.mxu0 %v1081_v10  ;;  %781 = vmatpush1.bf16.msra.mxu1 %v1082_v11  ;;  %v1111_v30 = vld [vmem:[%s1618_s1 + $0xe0] ss:$16 sps:$4 sm:$0xff]   ;;  %v1112_v31 = vld [vmem:[%s1618_s1 + $0xe8] ss:$16 sps:$4 sm:$0xff]   ;;  %v1113_v32 = vld [vmem:[%s1618_s1 + $0x104] ss:$16 sps:$4 sm:$0xff]  }
   0xc   :  { %696 = vmatprep.subr.bf16.mxu0 %v1083_v12  ;;  %782 = vmatprep.subr.bf16.mxu1 %v1085_v13  ;;  %v1115_v33 = vld [vmem:[%s1618_s1 + $0x10c] ss:$16 sps:$4 sm:$0xff]   ;;  %v1117_v34 = vld [vmem:[%s1618_s1 + $0x100] ss:$16 sps:$4 sm:$0xff]   ;;  %v1118_v35 = vld [vmem:[%s1618_s1 + $0x108] ss:$16 sps:$4 sm:$0xff]  }
   0xd   :  { %v1119_v36 = vld [vmem:[%s1618_s1 + $0x124] ss:$16 sps:$4 sm:$0xff]   ;;  %v1121_v37 = vld [vmem:[%s1618_s1 + $0x12c] ss:$16 sps:$4 sm:$0xff]   ;;  %v1123_v38 = vld [vmem:[%s1618_s1 + $0x120] ss:$16 sps:$4 sm:$0xff]  }
   0xe   :  { %v1124_v39 = vld [vmem:[%s1618_s1 + $0x128] ss:$16 sps:$4 sm:$0xff]   ;;  %v1125_v40 = vld [vmem:[%s1618_s1 + $0x144] ss:$16 sps:$4 sm:$0xff]   ;;  %v1127_v41 = vld [vmem:[%s1618_s1 + $0x14c] ss:$16 sps:$4 sm:$0xff]  }
   0xf   :  { %697 = vmatpush1.bf16.msra.mxu0 %v1087_v14  ;;  %783 = vmatpush1.bf16.msra.mxu1 %v1088_v15  ;;  %v1129_v42 = vld [vmem:[%s1618_s1 + $0x140] ss:$16 sps:$4 sm:$0xff]   ;;  %v1130_v43 = vld [vmem:[%s1618_s1 + $0x148] ss:$16 sps:$4 sm:$0xff]   ;;  %v1131_v44 = vld [vmem:[%s1618_s1 + $0x164] ss:$16 sps:$4 sm:$0xff]  }
  0x10   :  { %698 = vmatprep.subr.bf16.mxu0 %v1089_v16  ;;  %784 = vmatprep.subr.bf16.mxu1 %v1091_v17  ;;  %v1133_v45 = vld [vmem:[%s1618_s1 + $0x16c] ss:$16 sps:$4 sm:$0xff]   ;;  %v1135_v46 = vld [vmem:[%s1618_s1 + $0x160] ss:$16 sps:$4 sm:$0xff]   ;;  %v1136_v47 = vld [vmem:[%s1618_s1 + $0x168] ss:$16 sps:$4 sm:$0xff]  }
  0x11   :  { %v1163_v48 = vld [vmem:[%s1619_s0 + $0x4] ss:$16 sps:$4 sm:$0xff]   ;;  %v1139_v50 = vld [vmem:[%s1618_s1 + $0x18c] ss:$16 sps:$4 sm:$0xff]   ;;  %v1141_v51 = vld [vmem:[%s1618_s1 + $0x180] ss:$16 sps:$4 sm:$0xff]  }
  0x12   :  { %v1137_v49 = vld [vmem:[%s1618_s1 + $0x184] ss:$16 sps:$4 sm:$0xff]   ;;  %722 = vmatprep.mubr.bf16.mxu0 %v1163_v48  ;;  %808 = vmatprep.mubr.bf16.mxu1 %v1163_v48  ;;  %v1142_v52 = vld [vmem:[%s1618_s1 + $0x188] ss:$16 sps:$4 sm:$0xff]   ;;  %v1145_v54 = vld [vmem:[%s1618_s1 + $0x1ac] ss:$16 sps:$4 sm:$0xff]  }
  0x13   :  { %699 = vmatpush1.bf16.msra.mxu0 %v1093_v18  ;;  %785 = vmatpush1.bf16.msra.mxu1 %v1094_v19  ;;  %v1143_v53 = vld [vmem:[%s1618_s1 + $0x1a4] ss:$16 sps:$4 sm:$0xff]   ;;  %v1147_v55 = vld [vmem:[%s1618_s1 + $0x1a0] ss:$16 sps:$4 sm:$0xff]   ;;  %v1148_v56 = vld [vmem:[%s1618_s1 + $0x1a8] ss:$16 sps:$4 sm:$0xff]  }
  0x14   :  { %700 = vmatprep.subr.bf16.mxu0 %v1095_v20  ;;  %786 = vmatprep.subr.bf16.mxu1 %v1097_v21  ;;  %v1149_v57 = vld [vmem:[%s1618_s1 + $0x1c4] ss:$16 sps:$4 sm:$0xff]   ;;  %v1151_v58 = vld [vmem:[%s1618_s1 + $0x1cc] ss:$16 sps:$4 sm:$0xff]   ;;  %v1153_v59 = vld [vmem:[%s1618_s1 + $0x1c0] ss:$16 sps:$4 sm:$0xff]  }
  0x15   :  { %v1154_v60 = vld [vmem:[%s1618_s1 + $0x1c8] ss:$16 sps:$4 sm:$0xff]   ;;  %v1155_v61 = vld [vmem:[%s1618_s1 + $0x1e4] ss:$16 sps:$4 sm:$0xff]   ;;  %v1157_v62 = vld [vmem:[%s1618_s1 + $0x1ec] ss:$16 sps:$4 sm:$0xff]  }
  0x16   :  { %v1159_v63 = vld [vmem:[%s1618_s1 + $0x1e0] ss:$16 sps:$4 sm:$0xff]   ;;  %v1160_v0 = vld [vmem:[%s1618_s1 + $0x1e8] ss:$16 sps:$4 sm:$0xff]   ;;  %v1166_v1 = vld [vmem:[%s1618_s1 + $0x204] ss:$16 sps:$4 sm:$0xff]  }
  0x17   :  { %701 = vmatpush1.bf16.msra.mxu0 %v1099_v22  ;;  %787 = vmatpush1.bf16.msra.mxu1 %v1100_v23  ;;  %v1169_v2 = vld [vmem:[%s1618_s1 + $0x20c] ss:$16 sps:$4 sm:$0xff]   ;;  %v1161_v3 = vld [vmem:[%s1619_s0] ss:$16 sps:$4 sm:$0xff]   ;;  %v1167_v5 = vld [vmem:[%s1618_s1 + $0x208] ss:$16 sps:$4 sm:$0xff]  }
  0x18   :  { %702 = vmatprep.subr.bf16.mxu0 %v1101_v24  ;;  %788 = vmatprep.subr.bf16.mxu1 %v1103_v25  ;;  %v1164_v4 = vld [vmem:[%s1618_s1 + $0x200] ss:$16 sps:$4 sm:$0xff]   ;;  %v1172_v6 = vld [vmem:[%s1618_s1 + $0x224] ss:$16 sps:$4 sm:$0xff]   ;;  %v1175_v7 = vld [vmem:[%s1618_s1 + $0x22c] ss:$16 sps:$4 sm:$0xff]  }
  0x19   :  { %v1170_v8 = vld [vmem:[%s1618_s1 + $0x220] ss:$16 sps:$4 sm:$0xff]   ;;  %v1173_v9 = vld [vmem:[%s1618_s1 + $0x228] ss:$16 sps:$4 sm:$0xff]   ;;  %v1178_v10 = vld [vmem:[%s1618_s1 + $0x244] ss:$16 sps:$4 sm:$0xff]  }
  0x1a   :  { %v1181_v11 = vld [vmem:[%s1618_s1 + $0x24c] ss:$16 sps:$4 sm:$0xff]   ;;  %v1176_v12 = vld [vmem:[%s1618_s1 + $0x240] ss:$16 sps:$4 sm:$0xff]   ;;  %v1179_v13 = vld [vmem:[%s1618_s1 + $0x248] ss:$16 sps:$4 sm:$0xff]  }
  0x1b   :  { %703 = vmatpush1.bf16.msra.mxu0 %v1105_v26  ;;  %789 = vmatpush1.bf16.msra.mxu1 %v1106_v27  ;;  %v1184_v14 = vld [vmem:[%s1618_s1 + $0x264] ss:$16 sps:$4 sm:$0xff]   ;;  %v1187_v15 = vld [vmem:[%s1618_s1 + $0x26c] ss:$16 sps:$4 sm:$0xff]   ;;  %v1182_v17 = vld [vmem:[%s1618_s1 + $0x260] ss:$16 sps:$4 sm:$0xff]  }
  0x1c   :  { %704 = vmatprep.subr.bf16.mxu0 %v1107_v28  ;;  %790 = vmatprep.subr.bf16.mxu1 %v1109_v29  ;;  %v1230_v16 = vld [vmem:[%s1619_s0 + $0xc] ss:$16 sps:$4 sm:$0xff]   ;;  %v1185_v18 = vld [vmem:[%s1618_s1 + $0x268] ss:$16 sps:$4 sm:$0xff]   ;;  %v1190_v19 = vld [vmem:[%s1618_s1 + $0x284] ss:$16 sps:$4 sm:$0xff]  }
  0x1d   :  { %v1193_v20 = vld [vmem:[%s1618_s1 + $0x28c] ss:$16 sps:$4 sm:$0xff]   ;;  %v1188_v21 = vld [vmem:[%s1618_s1 + $0x280] ss:$16 sps:$4 sm:$0xff]   ;;  %v1191_v22 = vld [vmem:[%s1618_s1 + $0x288] ss:$16 sps:$4 sm:$0xff]  }
  0x1e   :  { %v1196_v23 = vld [vmem:[%s1618_s1 + $0x2a4] ss:$16 sps:$4 sm:$0xff]   ;;  %v1199_v24 = vld [vmem:[%s1618_s1 + $0x2ac] ss:$16 sps:$4 sm:$0xff]   ;;  %v1194_v25 = vld [vmem:[%s1618_s1 + $0x2a0] ss:$16 sps:$4 sm:$0xff]  }
  0x1f   :  { %705 = vmatpush1.bf16.msra.mxu0 %v1111_v30  ;;  %791 = vmatpush1.bf16.msra.mxu1 %v1112_v31  ;;  %v1197_v26 = vld [vmem:[%s1618_s1 + $0x2a8] ss:$16 sps:$4 sm:$0xff]   ;;  %v1202_v27 = vld [vmem:[%s1618_s1 + $0x2c4] ss:$16 sps:$4 sm:$0xff]   ;;  %v1205_v28 = vld [vmem:[%s1618_s1 + $0x2cc] ss:$16 sps:$4 sm:$0xff]  }
  0x20   :  { %706 = vmatprep.subr.bf16.mxu0 %v1113_v32  ;;  %792 = vmatprep.subr.bf16.mxu1 %v1115_v33  ;;  %v1200_v29 = vld [vmem:[%s1618_s1 + $0x2c0] ss:$16 sps:$4 sm:$0xff]   ;;  %v1203_v30 = vld [vmem:[%s1618_s1 + $0x2c8] ss:$16 sps:$4 sm:$0xff]   ;;  %v1208_v31 = vld [vmem:[%s1618_s1 + $0x2e4] ss:$16 sps:$4 sm:$0xff]  }
  0x21   :  { %v1211_v32 = vld [vmem:[%s1618_s1 + $0x2ec] ss:$16 sps:$4 sm:$0xff]   ;;  %v1206_v33 = vld [vmem:[%s1618_s1 + $0x2e0] ss:$16 sps:$4 sm:$0xff]  }
  0x23   :  { %707 = vmatpush1.bf16.msra.mxu0 %v1117_v34  ;;  %793 = vmatpush1.bf16.msra.mxu1 %v1118_v35  ;;  %v1209_v34 = vld [vmem:[%s1618_s1 + $0x2e8] ss:$16 sps:$4 sm:$0xff]   ;;  %v1214_v35 = vld [vmem:[%s1618_s1 + $0x304] ss:$16 sps:$4 sm:$0xff]  }
  0x24   :  { %708 = vmatprep.subr.bf16.mxu0 %v1119_v36  ;;  %794 = vmatprep.subr.bf16.mxu1 %v1121_v37  ;;  %v1217_v36 = vld [vmem:[%s1618_s1 + $0x30c] ss:$16 sps:$4 sm:$0xff]   ;;  %v1212_v37 = vld [vmem:[%s1618_s1 + $0x300] ss:$16 sps:$4 sm:$0xff]  }
  0x27   :  { %709 = vmatpush1.bf16.msra.mxu0 %v1123_v38  ;;  %795 = vmatpush1.bf16.msra.mxu1 %v1124_v39  ;;  %v1215_v38 = vld [vmem:[%s1618_s1 + $0x308] ss:$16 sps:$4 sm:$0xff]   ;;  %v1220_v39 = vld [vmem:[%s1618_s1 + $0x324] ss:$16 sps:$4 sm:$0xff]  }
  0x28   :  { %710 = vmatprep.subr.bf16.mxu0 %v1125_v40  ;;  %796 = vmatprep.subr.bf16.mxu1 %v1127_v41  ;;  %v1223_v40 = vld [vmem:[%s1618_s1 + $0x32c] ss:$16 sps:$4 sm:$0xff]   ;;  %v1218_v41 = vld [vmem:[%s1618_s1 + $0x320] ss:$16 sps:$4 sm:$0xff]  }
  0x2b   :  { %711 = vmatpush1.bf16.msra.mxu0 %v1129_v42  ;;  %797 = vmatpush1.bf16.msra.mxu1 %v1130_v43  ;;  %v1221_v42 = vld [vmem:[%s1618_s1 + $0x328] ss:$16 sps:$4 sm:$0xff]   ;;  %v1226_v43 = vld [vmem:[%s1618_s1 + $0x344] ss:$16 sps:$4 sm:$0xff]  }
  0x2c   :  { %712 = vmatprep.subr.bf16.mxu0 %v1131_v44  ;;  %798 = vmatprep.subr.bf16.mxu1 %v1133_v45  ;;  %v1229_v44 = vld [vmem:[%s1618_s1 + $0x34c] ss:$16 sps:$4 sm:$0xff]   ;;  %v1224_v45 = vld [vmem:[%s1618_s1 + $0x340] ss:$16 sps:$4 sm:$0xff]  }
  0x2f   :  { %713 = vmatpush1.bf16.msra.mxu0 %v1135_v46  ;;  %799 = vmatpush1.bf16.msra.mxu1 %v1136_v47  ;;  %v1227_v46 = vld [vmem:[%s1618_s1 + $0x348] ss:$16 sps:$4 sm:$0xff]  }
  0x30   :  { %714 = vmatprep.subr.bf16.mxu0 %v1137_v49  ;;  %800 = vmatprep.subr.bf16.mxu1 %v1139_v50  ;;  %v1232_v47 = vld [vmem:[%s1619_s0 + $0x8] ss:$16 sps:$4 sm:$0xff]  }
  0x33   :  { %715 = vmatpush1.bf16.msra.mxu0 %v1141_v51  ;;  %801 = vmatpush1.bf16.msra.mxu1 %v1142_v52 }
  0x34   :  { %716 = vmatprep.subr.bf16.mxu0 %v1143_v53  ;;  %802 = vmatprep.subr.bf16.mxu1 %v1145_v54 }
  0x37   :  { %717 = vmatpush1.bf16.msra.mxu0 %v1147_v55  ;;  %803 = vmatpush1.bf16.msra.mxu1 %v1148_v56 }
  0x38   :  { %718 = vmatprep.subr.bf16.mxu0 %v1149_v57  ;;  %804 = vmatprep.subr.bf16.mxu1 %v1151_v58 }
  0x3b   :  { %719 = vmatpush1.bf16.msra.mxu0 %v1153_v59  ;;  %805 = vmatpush1.bf16.msra.mxu1 %v1154_v60 }
  0x3c   :  { %720 = vmatprep.subr.bf16.mxu0 %v1155_v61  ;;  %806 = vmatprep.subr.bf16.mxu1 %v1157_v62 }
  0x3f   :  { %721 = vmatpush1.bf16.msra.mxu0 %v1159_v63  ;;  %807 = vmatpush1.bf16.msra.mxu1 %v1160_v0 }
  0x40   :  { %733 = vmatprep.subr.bf16.mxu0 %v1166_v1  ;;  %819 = vmatprep.subr.bf16.mxu1 %v1169_v2 }
  0x42   :  { %723 = vmatmul.mubr.bf16.vlgmr.msra.gmra.mrb[0].mxu0 %v1161_v3  ;;  %809 = vmatmul.mubr.bf16.vlgmr.msra.gmra.mrb[0].mxu1 %v1161_v3 }
  0x43   :  { %734 = vmatpush1.bf16.msra.mxu0 %v1164_v4  ;;  %820 = vmatpush1.bf16.msra.mxu1 %v1167_v5 }
  0x44   :  { %735 = vmatprep.subr.bf16.mxu0 %v1172_v6  ;;  %821 = vmatprep.subr.bf16.mxu1 %v1175_v7 }
  0x45   :  { %1047 = vmatprep.mubr.msk.bf16.mxu0 %vm686_vm0, %v1230_v16  ;;  %1048 = vmatprep.mubr.msk.bf16.mxu1 %vm686_vm0, %v1230_v16 }
  0x47   :  { %736 = vmatpush1.bf16.msra.mxu0 %v1170_v8  ;;  %822 = vmatpush1.bf16.msra.mxu1 %v1173_v9 }
  0x48   :  { %737 = vmatprep.subr.bf16.mxu0 %v1178_v10  ;;  %823 = vmatprep.subr.bf16.mxu1 %v1181_v11 }
  0x4b   :  { %738 = vmatpush1.bf16.msra.mxu0 %v1176_v12  ;;  %824 = vmatpush1.bf16.msra.mxu1 %v1179_v13 }
  0x4c   :  { %739 = vmatprep.subr.bf16.mxu0 %v1184_v14  ;;  %825 = vmatprep.subr.bf16.mxu1 %v1187_v15 }
  0x4f   :  { %740 = vmatpush1.bf16.msra.mxu0 %v1182_v17  ;;  %826 = vmatpush1.bf16.msra.mxu1 %v1185_v18 }
  0x50   :  { %741 = vmatprep.subr.bf16.mxu0 %v1190_v19  ;;  %827 = vmatprep.subr.bf16.mxu1 %v1193_v20 }
  0x53   :  { %742 = vmatpush1.bf16.msra.mxu0 %v1188_v21  ;;  %828 = vmatpush1.bf16.msra.mxu1 %v1191_v22 }
  0x54   :  { %743 = vmatprep.subr.bf16.mxu0 %v1196_v23  ;;  %829 = vmatprep.subr.bf16.mxu1 %v1199_v24 }
  0x57   :  { %744 = vmatpush1.bf16.msra.mxu0 %v1194_v25  ;;  %830 = vmatpush1.bf16.msra.mxu1 %v1197_v26 }
  0x58   :  { %745 = vmatprep.subr.bf16.mxu0 %v1202_v27  ;;  %831 = vmatprep.subr.bf16.mxu1 %v1205_v28 }
  0x5b   :  { %746 = vmatpush1.bf16.msra.mxu0 %v1200_v29  ;;  %832 = vmatpush1.bf16.msra.mxu1 %v1203_v30 }
  0x5c   :  { %747 = vmatprep.subr.bf16.mxu0 %v1208_v31  ;;  %833 = vmatprep.subr.bf16.mxu1 %v1211_v32 }
  0x5f   :  { %748 = vmatpush1.bf16.msra.mxu0 %v1206_v33  ;;  %834 = vmatpush1.bf16.msra.mxu1 %v1209_v34 }
  0x60   :  { %749 = vmatprep.subr.bf16.mxu0 %v1214_v35  ;;  %835 = vmatprep.subr.bf16.mxu1 %v1217_v36 }
  0x63   :  { %750 = vmatpush1.bf16.msra.mxu0 %v1212_v37  ;;  %836 = vmatpush1.bf16.msra.mxu1 %v1215_v38 }
  0x64   :  { %751 = vmatprep.subr.bf16.mxu0 %v1220_v39  ;;  %837 = vmatprep.subr.bf16.mxu1 %v1223_v40 }
  0x67   :  { %752 = vmatpush1.bf16.msra.mxu0 %v1218_v41  ;;  %838 = vmatpush1.bf16.msra.mxu1 %v1221_v42 }
  0x68   :  { %753 = vmatprep.subr.bf16.mxu0 %v1226_v43  ;;  %839 = vmatprep.subr.bf16.mxu1 %v1229_v44 }
  0x6b   :  { %754 = vmatpush1.bf16.msra.mxu0 %v1224_v45  ;;  %840 = vmatpush1.bf16.msra.mxu1 %v1227_v46 }
  0x6e   :  { %766 = vmatmul.mubr.bf16.vlgmr.msra.gmra.mrb[0].mxu0 %v1232_v47  ;;  %852 = vmatmul.mubr.bf16.vlgmr.msra.gmra.mrb[0].mxu1 %v1232_v47 }
 0x141   :  { %v767_v48 = vpop.f32.mrb[0].mxu0  ;;  %v853_v49 = vpop.f32.mrb[0].mxu1 }
 0x142   :  { %v903_v50 = vmul.f32 %v767_v48, %v767_v48  ;;  %v769_v51 = vpop.f32.mrb[1].mxu0  ;;  %v855_v52 = vpop.f32.mrb[1].mxu1  ;;  %v905_v2 = vmul.f32 %v853_v49, %v853_v49 }
 0x143   :  { %v1053_v53 = vpack.c.bf16 %v769_v51, %v767_v48  ;;  %v890_v54 = vadd.f32 %v769_v51, %v767_v48  ;;  %v904_v55 = vmul.f32 %v769_v51, %v769_v51  ;;  %v1054_v56 = vpack.c.bf16 %v855_v52, %v853_v49  ;;  %v771_v57 = vpop.f32.mrb[2].mxu0  ;;  %v857_v58 = vpop.f32.mrb[2].mxu1 }
 0x144   :  { %v907_v59 = vmul.f32 %v771_v57, %v771_v57  ;;  %v773_v60 = vpop.f32.mrb[3].mxu0  ;;  %v859_v61 = vpop.f32.mrb[3].mxu1  ;;  %v909_v5 = vmul.f32 %v857_v58, %v857_v58  ;;  %v906_v9 = vmul.f32 %v855_v52, %v855_v52 }
 0x145   :  { %886 = vst [vmem:[%s1620_s2] sm:$0xff] %v1053_v53  ;;  %887 = vst [vmem:[%s1620_s2 + $0x8] sm:$0xff] %v1054_v56  ;;  %v1055_v62 = vpack.c.bf16 %v773_v60, %v771_v57  ;;  %v895_v63 = vadd.f32 %v773_v60, %v771_v57  ;;  %v908_v0 = vmul.f32 %v773_v60, %v773_v60 }
 0x146   :  { %v1056_v1 = vpack.c.bf16 %v859_v61, %v857_v58  ;;  %v891_v3 = vadd.f32 %v890_v54, %v853_v49  ;;  %v911_v4 = vadd.f32 %v904_v55, %v903_v50  ;;  %v910_v11 = vmul.f32 %v859_v61, %v859_v61 }
 0x147   :  { %888 = vst [vmem:[%s1620_s2 + $0x10] sm:$0xff] %v1055_v62  ;;  %v916_v6 = vadd.f32 %v908_v0, %v907_v59  ;;  %v896_v7 = vadd.f32 %v895_v63, %v857_v58 }
 0x148   :  { %889 = vst [vmem:[%s1620_s2 + $0x18] sm:$0xff] %v1056_v1  ;;  %v892_v8 = vadd.f32 %v891_v3, %v855_v52  ;;  %v912_v10 = vadd.f32 %v911_v4, %v905_v2 }
 0x149   :  { %v897_v12 = vadd.f32 %v896_v7, %v859_v61  ;;  %v917_v13 = vadd.f32 %v916_v6, %v909_v5 }
 0x14a   :  { %893 = vadd.xlane.f32.xlu0 %v892_v8  ;;  %v913_v14 = vadd.f32 %v912_v10, %v906_v9 }
 0x14b   :  { %v918_v15 = vadd.f32 %v917_v13, %v910_v11 }
 0x14c   :  { %914 = vadd.xlane.f32.xlu1 %v913_v14 }
 0x14e   :  { %898 = vadd.xlane.f32.xlu0 %v897_v12 }
 0x150   :  { %919 = vadd.xlane.f32.xlu1 %v918_v15 }
 0x1d7   :  { %v894_v16 = vpop.xlane.xlu0 %893 }
 0x1d8   :  { %901 = vst.msk [vmem:[%s1621_s3] sm:$0xff] %vm900_vm1, %v894_v16 }
 0x1d9   :  { %v915_v17 = vpop.xlane.xlu1 %914 }
 0x1da   :  { %921 = vst.msk [vmem:[%s1622_s4] sm:$0xff] %vm900_vm1, %v915_v17 }
 0x1db   :  { %v899_v18 = vpop.xlane.xlu0 %898 }
 0x1dc   :  { %902 = vst.msk [vmem:[%s1621_s3 + $0x8] sm:$0xff] %vm900_vm1, %v899_v18 }
 0x1dd   :  { %v920_v19 = vpop.xlane.xlu1 %919 }
 0x1de   :  { %922 = vst.msk [vmem:[%s1622_s4 + $0x8] sm:$0xff] %vm900_vm1, %v920_v19 }

// kernel: costregnet_small_forward.39
= control target key start
LH: loop header
LB: loop body
LE: loop exit
PB: predicated region body
PF: predicated region fallthrough
CT: control target
= control target key end

     0   :  { %v567_v0 = vmov 0   ;;  %vm277_vm0 = vcmask 392192   ;;  %vm410_vm1 = vcmask 7168   ;;  %s749_s1 = inlined_call_operand.vmem [shape: bf16[432,128], index: 1, kind: input, shape index: {}]   ;;  %s750_s0 = inlined_call_operand.vmem [shape: bf16[32,432], index: 0, kind: input, shape index: {}]   ;;  %s751_s2 = inlined_call_operand.vmem [shape: bf16[32,128], index: 2, kind: output, shape index: {0}]   ;;  %s752_s3 = inlined_call_operand.vmem [shape: f32[1,32,1], index: 3, kind: output, shape index: {1}]   ;;  %s753_s4 = inlined_call_operand.vmem [shape: f32[1,32,1], index: 4, kind: output, shape index: {2}]  }
   0x1   :  { %333 = vmatprep.subr.bf16.mxu1 %v567_v0  ;;  %v528_v1 = vld [vmem:[%s749_s1 + $0x80] sm:$0xff]   ;;  %v529_v2 = vld [vmem:[%s749_s1 + $0x88] sm:$0xff]   ;;  %v532_v5 = vld [vmem:[%s749_s1 + $0x90] sm:$0xff]  }
   0x2   :  { %334 = vmatpush1.bf16.msra.mxu1 %v528_v1  ;;  %v530_v3 = vld [vmem:[%s749_s1 + $0x40] sm:$0xff]   ;;  %v533_v6 = vld [vmem:[%s749_s1 + $0x48] sm:$0xff]   ;;  %v536_v8 = vld [vmem:[%s749_s1 + $0x50] sm:$0xff]  }
   0x3   :  { %335 = vmatprep.subr.bf16.mxu1 %v567_v0  ;;  %v531_v4 = vld [vmem:[%s749_s1] sm:$0xff]   ;;  %499 = vmatprep.subr.bf16.mxu0 %v530_v3  ;;  %v534_v7 = vld [vmem:[%s749_s1 + $0x8] sm:$0xff]   ;;  %v537_v9 = vld [vmem:[%s749_s1 + $0x10] sm:$0xff]  }
   0x4   :  { %500 = vmatpush3.bf16.msra.mxu0 %v531_v4  ;;  %v535_v10 = vld [vmem:[%s749_s1 + $0x98] sm:$0xff]   ;;  %v538_v12 = vld [vmem:[%s749_s1 + $0xa0] sm:$0xff]   ;;  %v541_v15 = vld [vmem:[%s749_s1 + $0xa8] sm:$0xff]  }
   0x5   :  { %501 = vmatprep.subr.bf16.mxu0 %v533_v6  ;;  %v539_v11 = vld [vmem:[%s749_s1 + $0x58] sm:$0xff]   ;;  %v542_v14 = vld [vmem:[%s749_s1 + $0x60] sm:$0xff]   ;;  %v545_v17 = vld [vmem:[%s749_s1 + $0x68] sm:$0xff]  }
   0x6   :  { %336 = vmatpush1.bf16.msra.mxu1 %v529_v2  ;;  %v540_v13 = vld [vmem:[%s749_s1 + $0x18] sm:$0xff]   ;;  %v543_v16 = vld [vmem:[%s749_s1 + $0x20] sm:$0xff]   ;;  %v544_v18 = vld [vmem:[%s749_s1 + $0xb0] sm:$0xff]  }
   0x7   :  { %337 = vmatprep.subr.bf16.mxu1 %v567_v0  ;;  %v546_v19 = vld [vmem:[%s749_s1 + $0x28] sm:$0xff]   ;;  %v548_v20 = vld [vmem:[%s749_s1 + $0x70] sm:$0xff]   ;;  %v547_v21 = vld [vmem:[%s749_s1 + $0xb8] sm:$0xff]  }
   0x8   :  { %502 = vmatpush3.bf16.msra.mxu0 %v534_v7  ;;  %v549_v22 = vld [vmem:[%s749_s1 + $0x30] sm:$0xff]   ;;  %v551_v23 = vld [vmem:[%s749_s1 + $0x78] sm:$0xff]   ;;  %v550_v27 = vld [vmem:[%s749_s1 + $0xc0] sm:$0xff]  }
   0x9   :  { %503 = vmatprep.subr.bf16.mxu0 %v536_v8  ;;  %v555_v24 = vld [vmem:[%s750_s0 + $0x4] ss:$16 sps:$4 sm:$0xff]   ;;  %v552_v25 = vld [vmem:[%s749_s1 + $0x38] sm:$0xff]   ;;  %v553_v28 = vld [vmem:[%s750_s0] ss:$16 sps:$4 sm:$0xff]  }
   0xa   :  { %338 = vmatpush1.bf16.msra.mxu1 %v532_v5  ;;  %316 = vmatprep.mubr.bf16.mxu0 %v555_v24  ;;  %v560_v26 = vld [vmem:[%s750_s0 + $0xc] ss:$16 sps:$4 sm:$0xff]   ;;  %v561_v29 = vld [vmem:[%s750_s0 + $0x24] ss:$16 sps:$4 sm:$0xff]   ;;  %v563_v32 = vld [vmem:[%s750_s0 + $0x20] ss:$16 sps:$4 sm:$0xff]  }
   0xb   :  { %339 = vmatprep.subr.bf16.mxu1 %v567_v0  ;;  %478 = vmatprep.mubr.msk.bf16.mxu1 %vm277_vm0, %v560_v26  ;;  %v556_v30 = vld [vmem:[%s749_s1 + $0xc8] sm:$0xff]   ;;  %v557_v31 = vld [vmem:[%s749_s1 + $0xd0] sm:$0xff]  }
   0xc   :  { %504 = vmatpush3.bf16.msra.mxu0 %v537_v9  ;;  %v558_v33 = vld [vmem:[%s750_s0 + $0x8] ss:$16 sps:$4 sm:$0xff]   ;;  %v564_v34 = vld [vmem:[%s750_s0 + $0x2c] ss:$16 sps:$4 sm:$0xff]  }
   0xd   :  { %505 = vmatprep.subr.bf16.mxu0 %v539_v11  ;;  %v566_v35 = vld [vmem:[%s750_s0 + $0x28] ss:$16 sps:$4 sm:$0xff]  }
   0xe   :  { %340 = vmatpush1.bf16.msra.mxu1 %v535_v10 }
   0xf   :  { %341 = vmatprep.subr.bf16.mxu1 %v567_v0 }
  0x10   :  { %506 = vmatpush3.bf16.msra.mxu0 %v540_v13 }
  0x11   :  { %507 = vmatprep.subr.bf16.mxu0 %v542_v14 }
  0x12   :  { %342 = vmatpush1.bf16.msra.mxu1 %v538_v12 }
  0x13   :  { %343 = vmatprep.subr.bf16.mxu1 %v567_v0 }
  0x14   :  { %508 = vmatpush3.bf16.msra.mxu0 %v543_v16 }
  0x15   :  { %509 = vmatprep.subr.bf16.mxu0 %v545_v17 }
  0x16   :  { %344 = vmatpush1.bf16.msra.mxu1 %v541_v15 }
  0x17   :  { %345 = vmatprep.subr.bf16.mxu1 %v567_v0 }
  0x18   :  { %510 = vmatpush3.bf16.msra.mxu0 %v546_v19 }
  0x19   :  { %511 = vmatprep.subr.bf16.mxu0 %v548_v20 }
  0x1a   :  { %346 = vmatpush1.bf16.msra.mxu1 %v544_v18 }
  0x1b   :  { %347 = vmatprep.subr.bf16.mxu1 %v567_v0 }
  0x1c   :  { %512 = vmatpush3.bf16.msra.mxu0 %v549_v22 }
  0x1d   :  { %513 = vmatprep.subr.bf16.mxu0 %v551_v23 }
  0x1e   :  { %348 = vmatpush1.bf16.msra.mxu1 %v547_v21 }
  0x1f   :  { %349 = vmatprep.subr.bf16.mxu1 %v567_v0 }
  0x20   :  { %514 = vmatpush3.bf16.msra.mxu0 %v552_v25 }
  0x22   :  { %350 = vmatpush1.bf16.msra.mxu1 %v550_v27 }
  0x23   :  { %351 = vmatprep.subr.bf16.mxu1 %v567_v0  ;;  %317 = vmatmul.mubr.bf16.vlgmr.msra.gmra.mrb[0].mxu0 %v553_v28 }
  0x24   :  { %324 = vmatprep.mubr.bf16.mxu0 %v561_v29 }
  0x26   :  { %352 = vmatpush1.bf16.msra.mxu1 %v556_v30 }
  0x27   :  { %353 = vmatprep.subr.bf16.mxu1 %v567_v0 }
  0x2a   :  { %354 = vmatpush1.bf16.msra.mxu1 %v557_v31 }
  0x2b   :  { %325 = vmatmul.mubr.bf16.gmra.mrb[4].mxu0 %v563_v32 }
  0x2d   :  { %366 = vmatmul.mubr.bf16.vlgmr.msra.gmra.mrb[0].mxu1 %v558_v33 }
  0x2e   :  { %479 = vmatprep.mubr.msk.bf16.mxu1 %vm277_vm0, %v564_v34 }
  0x35   :  { %374 = vmatmul.mubr.bf16.gmra.mrb[4].mxu1 %v566_v35 }
  0xf6   :  { %v515_v36 = vpop.f32.mrb[0].mxu0 }
  0xf7   :  { %v516_v37 = vpop.f32.mrb[1].mxu0 }
  0xf8   :  { %v517_v38 = vadd.f32 %v516_v37, %v515_v36  ;;  %v518_v39 = vpop.f32.mrb[2].mxu0 }
  0xf9   :  { %v519_v40 = vpop.f32.mrb[3].mxu0 }
  0xfa   :  { %v520_v41 = vadd.f32 %v519_v40, %v518_v39 }
  0xfe   :  { %v521_v42 = vpop.f32.mrb[4].mxu0 }
  0xff   :  { %v522_v44 = vpop.f32.mrb[5].mxu0 }
 0x100   :  { %v367_v43 = vpop.f32.mrb[0].mxu1  ;;  %v523_v47 = vadd.f32 %v522_v44, %v521_v42  ;;  %v524_v48 = vpop.f32.mrb[6].mxu0 }
 0x101   :  { %v368_v45 = vadd.f32 %v517_v38, %v367_v43  ;;  %v369_v46 = vpop.f32.mrb[1].mxu1  ;;  %v525_v50 = vpop.f32.mrb[7].mxu0 }
 0x102   :  { %v370_v49 = vpop.f32.mrb[2].mxu1  ;;  %v526_v53 = vadd.f32 %v525_v50, %v524_v48 }
 0x103   :  { %v371_v51 = vadd.f32 %v520_v41, %v370_v49  ;;  %v372_v52 = vpop.f32.mrb[3].mxu1  ;;  %402 = vadd.xlane.f32.xlu0 %v368_v45  ;;  %v415_v59 = vmul.f32 %v368_v45, %v368_v45 }
 0x105   :  { %v491_v54 = vpack.c.bf16 %v371_v51, %v368_v45  ;;  %v416_v55 = vmul.f32 %v371_v51, %v371_v51 }
 0x107   :  { %492 = vst [vmem:[%s751_s2] sm:$0xff] %v491_v54   ;;  %421 = vadd.xlane.f32.xlu1 %v416_v55  ;;  %404 = vadd.xlane.f32.xlu0 %v371_v51 }
 0x108   :  { %v375_v56 = vpop.f32.mrb[4].mxu1 }
 0x109   :  { %v376_v57 = vadd.f32 %v523_v47, %v375_v56  ;;  %v377_v58 = vpop.f32.mrb[5].mxu1 }
 0x10a   :  { %v378_v60 = vpop.f32.mrb[6].mxu1 }
 0x10b   :  { %v379_v61 = vadd.f32 %v526_v53, %v378_v60  ;;  %v380_v62 = vpop.f32.mrb[7].mxu1  ;;  %406 = vadd.xlane.f32.xlu1 %v376_v57  ;;  %419 = vadd.xlane.f32.xlu0 %v415_v59  ;;  %v417_v0 = vmul.f32 %v376_v57, %v376_v57 }
 0x10d   :  { %v496_v63 = vpack.c.bf16 %v379_v61, %v376_v57  ;;  %v418_v1 = vmul.f32 %v379_v61, %v379_v61 }
 0x10f   :  { %498 = vst [vmem:[%s751_s2 + $0x8] sm:$0xff] %v496_v63   ;;  %408 = vadd.xlane.f32.xlu1 %v379_v61  ;;  %423 = vadd.xlane.f32.xlu0 %v417_v0 }
 0x113   :  { %425 = vadd.xlane.f32.xlu1 %v418_v1 }
 0x190   :  { %v403_v2 = vpop.xlane.xlu0 %402 }
 0x191   :  { %411 = vst.msk [vmem:[%s752_s3] sm:$0xff] %vm410_vm1, %v403_v2 }
 0x194   :  { %v422_v3 = vpop.xlane.xlu1 %421  ;;  %v405_v4 = vpop.xlane.xlu0 %404 }
 0x195   :  { %428 = vst.msk [vmem:[%s753_s4 + $0x8] sm:$0xff] %vm410_vm1, %v422_v3  ;;  %412 = vst.msk [vmem:[%s752_s3 + $0x8] sm:$0xff] %vm410_vm1, %v405_v4 }
 0x198   :  { %v407_v5 = vpop.xlane.xlu1 %406  ;;  %v420_v6 = vpop.xlane.xlu0 %419 }
 0x199   :  { %413 = vst.msk [vmem:[%s752_s3 + $0x10] sm:$0xff] %vm410_vm1, %v407_v5  ;;  %427 = vst.msk [vmem:[%s753_s4] sm:$0xff] %vm410_vm1, %v420_v6 }
 0x19c   :  { %v409_v7 = vpop.xlane.xlu1 %408  ;;  %v424_v8 = vpop.xlane.xlu0 %423 }
 0x19d   :  { %414 = vst.msk [vmem:[%s752_s3 + $0x18] sm:$0xff] %vm410_vm1, %v409_v7  ;;  %429 = vst.msk [vmem:[%s753_s4 + $0x10] sm:$0xff] %vm410_vm1, %v424_v8 }
 0x1a0   :  { %v426_v9 = vpop.xlane.xlu1 %425 }
 0x1a1   :  { %430 = vst.msk [vmem:[%s753_s4 + $0x18] sm:$0xff] %vm410_vm1, %v426_v9 }

// kernel: costregnet_small_forward.40
= control target key start
LH: loop header
LB: loop body
LE: loop exit
PB: predicated region body
PF: predicated region fallthrough
CT: control target
= control target key end

     0   :  { %v137_v0 = vmov 0   ;;  %s194_s1 = inlined_call_operand.vmem [shape: f32[32,1], index: 1, kind: input, shape index: {}]   ;;  %s195_s2 = inlined_call_operand.vmem [shape: f32[32,1], index: 2, kind: input, shape index: {}]   ;;  %s196_s0 = inlined_call_operand.vmem [shape: bf16[32,128], index: 0, kind: input, shape index: {}]   ;;  %s197_s3 = inlined_call_operand.vmem [shape: bf16[32,128], index: 3, kind: output, shape index: {}]  }
   0x1   :  { %136 = vset.pattern.permute.xlu1 %v137_v0  ;;  %135 = vset.pattern.permute.xlu0 %v137_v0  ;;  %v24_v1 = vld [vmem:[%s194_s1 + $0x10] sm:$0xff]  ;;  %v22_v2 = vld [vmem:[%s194_s1] sm:$0xff]  ;;  %v25_v3 = vld [vmem:[%s194_s1 + $0x18] sm:$0xff] }
   0x2   :  { %38 = vperm.xlu1 %136, %v24_v1   ;;  %28 = vperm.xlu0 %135, %v22_v2   ;;  %v23_v4 = vld [vmem:[%s194_s1 + $0x8] sm:$0xff]  ;;  %v50_v6 = vld [vmem:[%s195_s2] sm:$0xff]  ;;  %v53_v7 = vld [vmem:[%s195_s2 + $0x18] sm:$0xff] }
   0x3   :  { %v51_v5 = vld [vmem:[%s195_s2 + $0x8] sm:$0xff]  ;;  %v52_v8 = vld [vmem:[%s195_s2 + $0x10] sm:$0xff]  ;;  %v115_v11 = vld [vmem:[%s196_s0] sm:$0xff]  }
   0x4   :  { %v116_v12 = vunpack.c.l.bf16 %v115_v11  ;;  %v117_v13 = vunpack.c.h.bf16 %v115_v11  ;;  %v132_v14 = vld [vmem:[%s196_s0 + $0x8] sm:$0xff]  }
   0x5   :  { %v120_v17 = vunpack.c.l.bf16 %v132_v14  ;;  %v121_v19 = vunpack.c.h.bf16 %v132_v14 }
   0x6   :  { %43 = vperm.xlu1 %136, %v25_v3   ;;  %33 = vperm.xlu0 %135, %v23_v4  }
   0xa   :  { %61 = vperm.xlu1 %136, %v51_v5   ;;  %56 = vperm.xlu0 %135, %v50_v6  }
   0xe   :  { %71 = vperm.xlu1 %136, %v53_v7   ;;  %66 = vperm.xlu0 %135, %v52_v8  }
  0x81   :  { %v39_v9 = vpop.permute.xlu1 %38  ;;  %v29_v10 = vpop.permute.xlu0 %28 }
  0x82   :  { %v46_v18 = vmul.f32 %v116_v12, %v29_v10  ;;  %v48_v25 = vmul.f32 %v120_v17, %v39_v9 }
  0x85   :  { %v44_v15 = vpop.permute.xlu1 %43  ;;  %v34_v16 = vpop.permute.xlu0 %33 }
  0x86   :  { %v47_v20 = vmul.f32 %v117_v13, %v34_v16  ;;  %v49_v26 = vmul.f32 %v121_v19, %v44_v15 }
  0x89   :  { %v62_v21 = vpop.permute.xlu1 %61  ;;  %v57_v22 = vpop.permute.xlu0 %56 }
  0x8a   :  { %v75_v23 = vadd.f32 %v62_v21, %v47_v20  ;;  %v74_v24 = vadd.f32 %v57_v22, %v46_v18 }
  0x8c   :  { %v79_v27 = vmax.f32 %v75_v23, 0.0  ;;  %v78_v28 = vmax.f32 %v74_v24, 0.0 }
  0x8d   :  { %v72_v29 = vpop.permute.xlu1 %71  ;;  %v67_v30 = vpop.permute.xlu0 %66 }
  0x8e   :  { %v125_v31 = vpack.c.bf16 %v79_v27, %v78_v28  ;;  %v77_v32 = vadd.f32 %v72_v29, %v49_v26  ;;  %v76_v33 = vadd.f32 %v67_v30, %v48_v25 }
  0x90   :  { %126 = vst [vmem:[%s197_s3] sm:$0xff] %v125_v31   ;;  %v81_v34 = vmax.f32 %v77_v32, 0.0  ;;  %v80_v35 = vmax.f32 %v76_v33, 0.0 }
  0x92   :  { %v130_v36 = vpack.c.bf16 %v81_v34, %v80_v35 }
  0x94   :  { %133 = vst [vmem:[%s197_s3 + $0x8] sm:$0xff] %v130_v36  }

// kernel: costregnet_small_forward.41
= control target key start
LH: loop header
LB: loop body
LE: loop exit
PB: predicated region body
PF: predicated region fallthrough
CT: control target
= control target key end

     0   :  { %vm533_vm0 = vcmask 785408   ;;  %vm764_vm1 = vcmask 7168   ;;  %s1335_s1 = inlined_call_operand.vmem [shape: bf16[864,128], index: 1, kind: input, shape index: {}]   ;;  %s1336_s0 = inlined_call_operand.vmem [shape: bf16[32,864], index: 0, kind: input, shape index: {}]   ;;  %s1337_s2 = inlined_call_operand.vmem [shape: bf16[32,128], index: 2, kind: output, shape index: {0}]   ;;  %s1338_s3 = inlined_call_operand.vmem [shape: f32[1,32,1], index: 3, kind: output, shape index: {1}]   ;;  %s1339_s4 = inlined_call_operand.vmem [shape: f32[1,32,1], index: 4, kind: output, shape index: {2}]  }
   0x1   :  { %v994_v0 = vld [vmem:[%s1335_s1 + $0x40] sm:$0xff]   ;;  %v998_v4 = vld [vmem:[%s1335_s1 + $0x48] sm:$0xff]   ;;  %v1002_v8 = vld [vmem:[%s1335_s1 + $0x50] sm:$0xff]  }
   0x2   :  { %v995_v1 = vld [vmem:[%s1335_s1 + $0xc0] sm:$0xff]   ;;  %886 = vmatprep.subr.bf16.mxu0 %v994_v0  ;;  %v999_v5 = vld [vmem:[%s1335_s1 + $0xc8] sm:$0xff]   ;;  %v1003_v9 = vld [vmem:[%s1335_s1 + $0xd0] sm:$0xff]  }
   0x3   :  { %v996_v2 = vld [vmem:[%s1335_s1] sm:$0xff]   ;;  %914 = vmatprep.subr.bf16.mxu1 %v995_v1  ;;  %v1000_v6 = vld [vmem:[%s1335_s1 + $0x8] sm:$0xff]   ;;  %v1004_v10 = vld [vmem:[%s1335_s1 + $0x10] sm:$0xff]  }
   0x4   :  { %v997_v3 = vld [vmem:[%s1335_s1 + $0x80] sm:$0xff]   ;;  %887 = vmatpush3.bf16.msra.mxu0 %v996_v2  ;;  %v1001_v7 = vld [vmem:[%s1335_s1 + $0x88] sm:$0xff]   ;;  %v1005_v11 = vld [vmem:[%s1335_s1 + $0x90] sm:$0xff]  }
   0x5   :  { %915 = vmatpush3.bf16.msra.mxu1 %v997_v3  ;;  %888 = vmatprep.subr.bf16.mxu0 %v998_v4  ;;  %v1006_v12 = vld [vmem:[%s1335_s1 + $0x58] sm:$0xff]   ;;  %v1010_v16 = vld [vmem:[%s1335_s1 + $0x60] sm:$0xff]   ;;  %v1014_v20 = vld [vmem:[%s1335_s1 + $0x68] sm:$0xff]  }
   0x6   :  { %916 = vmatprep.subr.bf16.mxu1 %v999_v5  ;;  %v1007_v13 = vld [vmem:[%s1335_s1 + $0xd8] sm:$0xff]   ;;  %v1011_v17 = vld [vmem:[%s1335_s1 + $0xe0] sm:$0xff]   ;;  %v1015_v21 = vld [vmem:[%s1335_s1 + $0xe8] sm:$0xff]  }
   0x7   :  { %v1008_v14 = vld [vmem:[%s1335_s1 + $0x18] sm:$0xff]   ;;  %v1012_v18 = vld [vmem:[%s1335_s1 + $0x20] sm:$0xff]   ;;  %v1016_v22 = vld [vmem:[%s1335_s1 + $0x28] sm:$0xff]  }
   0x8   :  { %889 = vmatpush3.bf16.msra.mxu0 %v1000_v6  ;;  %v1009_v15 = vld [vmem:[%s1335_s1 + $0x98] sm:$0xff]   ;;  %v1013_v19 = vld [vmem:[%s1335_s1 + $0xa0] sm:$0xff]   ;;  %v1017_v23 = vld [vmem:[%s1335_s1 + $0xa8] sm:$0xff]  }
   0x9   :  { %917 = vmatpush3.bf16.msra.mxu1 %v1001_v7  ;;  %890 = vmatprep.subr.bf16.mxu0 %v1002_v8  ;;  %v1018_v24 = vld [vmem:[%s1335_s1 + $0x70] sm:$0xff]   ;;  %v1022_v28 = vld [vmem:[%s1335_s1 + $0x78] sm:$0xff]   ;;  %v1028_v33 = vld [vmem:[%s1336_s0 + $0x4] ss:$28 sps:$4 sm:$0xff]  }
   0xa   :  { %918 = vmatprep.subr.bf16.mxu1 %v1003_v9  ;;  %v1019_v25 = vld [vmem:[%s1335_s1 + $0xf0] sm:$0xff]   ;;  %v1023_v29 = vld [vmem:[%s1335_s1 + $0xf8] sm:$0xff]   ;;  %v1029_v34 = vld [vmem:[%s1336_s0 + $0x8] ss:$28 sps:$4 sm:$0xff]   ;;  %572 = vmatprep.mubr.bf16.mxu0 %v1028_v33 }
   0xb   :  { %v1020_v26 = vld [vmem:[%s1335_s1 + $0x30] sm:$0xff]   ;;  %v1024_v30 = vld [vmem:[%s1335_s1 + $0x38] sm:$0xff]   ;;  %v1031_v35 = vld [vmem:[%s1336_s0 + $0xc] ss:$28 sps:$4 sm:$0xff]  }
   0xc   :  { %891 = vmatpush3.bf16.msra.mxu0 %v1004_v10  ;;  %v1021_v27 = vld [vmem:[%s1335_s1 + $0xb0] sm:$0xff]   ;;  %v1025_v31 = vld [vmem:[%s1335_s1 + $0xb8] sm:$0xff]   ;;  %v1032_v36 = vld [vmem:[%s1335_s1 + $0x140] sm:$0xff]   ;;  %621 = vmatprep.mubr.bf16.mxu1 %v1031_v35 }
   0xd   :  { %919 = vmatpush3.bf16.msra.mxu1 %v1005_v11  ;;  %892 = vmatprep.subr.bf16.mxu0 %v1006_v12  ;;  %v1026_v32 = vld [vmem:[%s1336_s0] ss:$28 sps:$4 sm:$0xff]   ;;  %v1034_v38 = vld [vmem:[%s1335_s1 + $0x148] sm:$0xff]   ;;  %v1036_v40 = vld [vmem:[%s1335_s1 + $0x150] sm:$0xff]  }
   0xe   :  { %920 = vmatprep.subr.bf16.mxu1 %v1007_v13  ;;  %v1033_v37 = vld [vmem:[%s1335_s1 + $0x100] sm:$0xff]   ;;  %v1035_v39 = vld [vmem:[%s1335_s1 + $0x108] sm:$0xff]   ;;  %v1037_v42 = vld [vmem:[%s1335_s1 + $0x110] sm:$0xff]  }
   0xf   :  { %v1038_v41 = vld [vmem:[%s1335_s1 + $0x180] sm:$0xff]   ;;  %v1039_v43 = vld [vmem:[%s1335_s1 + $0x158] sm:$0xff]   ;;  %v1041_v44 = vld [vmem:[%s1335_s1 + $0x188] sm:$0xff]  }
  0x10   :  { %893 = vmatpush3.bf16.msra.mxu0 %v1008_v14  ;;  %v1040_v45 = vld [vmem:[%s1335_s1 + $0x118] sm:$0xff]   ;;  %v1042_v46 = vld [vmem:[%s1335_s1 + $0x160] sm:$0xff]   ;;  %v1044_v47 = vld [vmem:[%s1335_s1 + $0x190] sm:$0xff]  }
  0x11   :  { %921 = vmatpush3.bf16.msra.mxu1 %v1009_v15  ;;  %894 = vmatprep.subr.bf16.mxu0 %v1010_v16  ;;  %v1043_v48 = vld [vmem:[%s1335_s1 + $0x120] sm:$0xff]   ;;  %v1045_v49 = vld [vmem:[%s1336_s0 + $0x3c] ss:$28 sps:$4 sm:$0xff]   ;;  %v1049_v51 = vld [vmem:[%s1335_s1 + $0x168] sm:$0xff]  }
  0x12   :  { %922 = vmatprep.subr.bf16.mxu1 %v1011_v17  ;;  %v1047_v50 = vld [vmem:[%s1336_s0 + $0x44] ss:$28 sps:$4 sm:$0xff]   ;;  %v1050_v52 = vld [vmem:[%s1336_s0 + $0x38] ss:$28 sps:$4 sm:$0xff]   ;;  %v1052_v55 = vld [vmem:[%s1335_s1 + $0x128] sm:$0xff]  }
  0x13   :  { %v1051_v53 = vld [vmem:[%s1336_s0 + $0x40] ss:$28 sps:$4 sm:$0xff]   ;;  %v1054_v56 = vld [vmem:[%s1335_s1 + $0x170] sm:$0xff]   ;;  %v1059_v60 = vld [vmem:[%s1335_s1 + $0x1a8] sm:$0xff]  }
  0x14   :  { %895 = vmatpush3.bf16.msra.mxu0 %v1012_v18  ;;  %v1053_v54 = vld [vmem:[%s1335_s1 + $0x198] sm:$0xff]   ;;  %v1056_v57 = vld [vmem:[%s1335_s1 + $0x1a0] sm:$0xff]   ;;  %v1055_v58 = vld [vmem:[%s1335_s1 + $0x130] sm:$0xff]  }
  0x15   :  { %923 = vmatpush3.bf16.msra.mxu1 %v1013_v19  ;;  %896 = vmatprep.subr.bf16.mxu0 %v1014_v20  ;;  %v1057_v59 = vld [vmem:[%s1335_s1 + $0x178] sm:$0xff]   ;;  %v1062_v61 = vld [vmem:[%s1336_s0 + $0x14] ss:$28 sps:$4 sm:$0xff]   ;;  %v1065_v2 = vld [vmem:[%s1336_s0 + $0x4c] ss:$28 sps:$4 sm:$0xff]  }
  0x16   :  { %924 = vmatprep.subr.bf16.mxu1 %v1015_v21  ;;  %v1063_v62 = vld [vmem:[%s1336_s0 + $0x18] ss:$28 sps:$4 sm:$0xff]   ;;  %v1064_v0 = vld [vmem:[%s1336_s0 + $0x50] ss:$28 sps:$4 sm:$0xff]   ;;  %v1067_v3 = vld [vmem:[%s1336_s0 + $0x48] ss:$28 sps:$4 sm:$0xff]  }
  0x17   :  { %v1058_v63 = vld [vmem:[%s1335_s1 + $0x138] sm:$0xff]   ;;  %v1060_v1 = vld [vmem:[%s1336_s0 + $0x10] ss:$28 sps:$4 sm:$0xff]  }
  0x18   :  { %897 = vmatpush3.bf16.msra.mxu0 %v1016_v22 }
  0x19   :  { %925 = vmatpush3.bf16.msra.mxu1 %v1017_v23  ;;  %898 = vmatprep.subr.bf16.mxu0 %v1018_v24 }
  0x1a   :  { %926 = vmatprep.subr.bf16.mxu1 %v1019_v25 }
  0x1c   :  { %899 = vmatpush3.bf16.msra.mxu0 %v1020_v26 }
  0x1d   :  { %927 = vmatpush3.bf16.msra.mxu1 %v1021_v27  ;;  %900 = vmatprep.subr.bf16.mxu0 %v1022_v28 }
  0x1e   :  { %928 = vmatprep.subr.bf16.mxu1 %v1023_v29 }
  0x20   :  { %901 = vmatpush3.bf16.msra.mxu0 %v1024_v30 }
  0x21   :  { %929 = vmatpush3.bf16.msra.mxu1 %v1025_v31  ;;  %942 = vmatprep.subr.bf16.mxu0 %v1032_v36 }
  0x22   :  { %978 = vmatprep.subr.bf16.mxu1 %v1038_v41 }
  0x23   :  { %573 = vmatmul.mubr.bf16.vlgmr.msra.gmra.mrb[0].mxu0 %v1026_v32 }
  0x24   :  { %622 = vmatmul.mubr.bf16.vlgmr.msra.gmra.mrb[0].mxu1 %v1029_v34  ;;  %943 = vmatpush3.bf16.msra.mxu0 %v1033_v37 }
  0x25   :  { %944 = vmatprep.subr.bf16.mxu0 %v1034_v38  ;;  %979 = vmatpush3.bf16.msra.mxu1 %v1038_v41 }
  0x26   :  { %980 = vmatprep.subr.bf16.mxu1 %v1041_v44  ;;  %580 = vmatprep.mubr.bf16.mxu0 %v1045_v49 }
  0x27   :  { %629 = vmatprep.mubr.bf16.mxu1 %v1047_v50 }
  0x28   :  { %945 = vmatpush3.bf16.msra.mxu0 %v1035_v39 }
  0x29   :  { %946 = vmatprep.subr.bf16.mxu0 %v1036_v40  ;;  %981 = vmatpush3.bf16.msra.mxu1 %v1041_v44 }
  0x2a   :  { %982 = vmatprep.subr.bf16.mxu1 %v1044_v47 }
  0x2b   :  { %581 = vmatmul.mubr.bf16.gmra.mrb[4].mxu0 %v1050_v52 }
  0x2c   :  { %947 = vmatpush3.bf16.msra.mxu0 %v1037_v42  ;;  %630 = vmatmul.mubr.bf16.gmra.mrb[4].mxu1 %v1051_v53 }
  0x2d   :  { %948 = vmatprep.subr.bf16.mxu0 %v1039_v43  ;;  %983 = vmatpush3.bf16.msra.mxu1 %v1044_v47 }
  0x2e   :  { %984 = vmatprep.subr.bf16.mxu1 %v1053_v54  ;;  %670 = vmatprep.mubr.bf16.mxu0 %v1062_v61 }
  0x2f   :  { %990 = vmatprep.mubr.msk.bf16.mxu1 %vm533_vm0, %v1063_v62 }
  0x30   :  { %949 = vmatpush3.bf16.msra.mxu0 %v1040_v45 }
  0x31   :  { %950 = vmatprep.subr.bf16.mxu0 %v1042_v46  ;;  %985 = vmatpush3.bf16.msra.mxu1 %v1053_v54 }
  0x32   :  { %986 = vmatprep.subr.bf16.mxu1 %v1056_v57 }
  0x34   :  { %951 = vmatpush3.bf16.msra.mxu0 %v1043_v48 }
  0x35   :  { %952 = vmatprep.subr.bf16.mxu0 %v1049_v51  ;;  %987 = vmatpush3.bf16.msra.mxu1 %v1056_v57 }
  0x36   :  { %988 = vmatprep.subr.bf16.mxu1 %v1059_v60 }
  0x38   :  { %953 = vmatpush3.bf16.msra.mxu0 %v1052_v55 }
  0x39   :  { %954 = vmatprep.subr.bf16.mxu0 %v1054_v56  ;;  %989 = vmatpush3.bf16.msra.mxu1 %v1059_v60 }
  0x3c   :  { %955 = vmatpush3.bf16.msra.mxu0 %v1055_v58  ;;  %991 = vmatmul.mubr.msk.bf16.vlgmr.msra.gmra.mrb[8].mxu1 %vm533_vm0, %v1064_v0 }
  0x3d   :  { %956 = vmatprep.subr.bf16.mxu0 %v1057_v59 }
  0x40   :  { %957 = vmatpush3.bf16.msra.mxu0 %v1058_v63 }
  0x43   :  { %671 = vmatmul.mubr.bf16.vlgmr.msra.gmra.mrb[8].mxu0 %v1060_v1 }
  0x44   :  { %678 = vmatprep.mubr.bf16.mxu0 %v1065_v2 }
  0x4b   :  { %679 = vmatmul.mubr.bf16.gmra.mrb[12].mxu0 %v1067_v3 }
  0xf6   :  { %v902_v4 = vpop.f32.mrb[0].mxu0 }
  0xf7   :  { %v930_v5 = vpop.f32.mrb[0].mxu1  ;;  %v903_v6 = vpop.f32.mrb[1].mxu0 }
  0xf8   :  { %v904_v7 = vadd.f32 %v903_v6, %v902_v4  ;;  %v931_v8 = vpop.f32.mrb[1].mxu1  ;;  %v905_v9 = vpop.f32.mrb[2].mxu0 }
  0xf9   :  { %v932_v10 = vadd.f32 %v931_v8, %v930_v5  ;;  %v933_v11 = vpop.f32.mrb[2].mxu1  ;;  %v906_v12 = vpop.f32.mrb[3].mxu0 }
  0xfa   :  { %v907_v13 = vadd.f32 %v906_v12, %v905_v9  ;;  %v934_v14 = vpop.f32.mrb[3].mxu1 }
  0xfb   :  { %v624_v15 = vadd.f32 %v932_v10, %v904_v7  ;;  %v935_v16 = vadd.f32 %v934_v14, %v933_v11 }
  0xfd   :  { %v627_v17 = vadd.f32 %v935_v16, %v907_v13 }
  0xfe   :  { %v908_v18 = vpop.f32.mrb[4].mxu0 }
  0xff   :  { %v936_v19 = vpop.f32.mrb[4].mxu1  ;;  %v909_v20 = vpop.f32.mrb[5].mxu0 }
 0x100   :  { %v910_v21 = vadd.f32 %v909_v20, %v908_v18  ;;  %v937_v22 = vpop.f32.mrb[5].mxu1  ;;  %v911_v23 = vpop.f32.mrb[6].mxu0 }
 0x101   :  { %v938_v24 = vadd.f32 %v937_v22, %v936_v19  ;;  %v939_v25 = vpop.f32.mrb[6].mxu1  ;;  %v912_v26 = vpop.f32.mrb[7].mxu0 }
 0x102   :  { %v913_v27 = vadd.f32 %v912_v26, %v911_v23  ;;  %v940_v28 = vpop.f32.mrb[7].mxu1 }
 0x103   :  { %v632_v29 = vadd.f32 %v938_v24, %v910_v21  ;;  %v941_v30 = vadd.f32 %v940_v28, %v939_v25 }
 0x105   :  { %v635_v31 = vadd.f32 %v941_v30, %v913_v27 }
 0x10f   :  { %v992_v32 = vpop.f32.mrb[8].mxu1 }
 0x110   :  { %v721_v33 = vpop.f32.mrb[9].mxu1 }
 0x111   :  { %v993_v35 = vpop.f32.mrb[10].mxu1 }
 0x112   :  { %v724_v37 = vpop.f32.mrb[11].mxu1 }
 0x116   :  { %v958_v34 = vpop.f32.mrb[8].mxu0 }
 0x117   :  { %v959_v36 = vpop.f32.mrb[9].mxu0 }
 0x118   :  { %v960_v38 = vadd.f32 %v959_v36, %v958_v34  ;;  %v961_v39 = vpop.f32.mrb[10].mxu0 }
 0x119   :  { %v962_v40 = vpop.f32.mrb[11].mxu0 }
 0x11a   :  { %v673_v41 = vadd.f32 %v960_v38, %v624_v15  ;;  %v963_v42 = vadd.f32 %v962_v40, %v961_v39 }
 0x11c   :  { %v722_v43 = vadd.f32 %v721_v33, %v673_v41  ;;  %v676_v44 = vadd.f32 %v963_v42, %v627_v17 }
 0x11e   :  { %v725_v45 = vadd.f32 %v724_v37, %v676_v44  ;;  %v964_v46 = vpop.f32.mrb[12].mxu0  ;;  %756 = vadd.xlane.f32.xlu0 %v722_v43  ;;  %v769_v57 = vmul.f32 %v722_v43, %v722_v43 }
 0x11f   :  { %v965_v47 = vpop.f32.mrb[13].mxu0 }
 0x120   :  { %v878_v48 = vpack.c.bf16 %v725_v45, %v722_v43  ;;  %v966_v49 = vadd.f32 %v965_v47, %v964_v46  ;;  %v967_v50 = vpop.f32.mrb[14].mxu0  ;;  %v770_v51 = vmul.f32 %v725_v45, %v725_v45 }
 0x121   :  { %v968_v52 = vpop.f32.mrb[15].mxu0 }
 0x122   :  { %879 = vst [vmem:[%s1337_s2] sm:$0xff] %v878_v48   ;;  %v681_v53 = vadd.f32 %v966_v49, %v632_v29  ;;  %v969_v54 = vadd.f32 %v968_v52, %v967_v50  ;;  %775 = vadd.xlane.f32.xlu1 %v770_v51  ;;  %758 = vadd.xlane.f32.xlu0 %v725_v45 }
 0x124   :  { %v684_v55 = vadd.f32 %v969_v54, %v635_v31  ;;  %v730_v56 = vadd.f32 %v992_v32, %v681_v53 }
 0x126   :  { %760 = vadd.xlane.f32.xlu1 %v730_v56  ;;  %773 = vadd.xlane.f32.xlu0 %v769_v57  ;;  %v733_v58 = vadd.f32 %v993_v35, %v684_v55  ;;  %v771_v60 = vmul.f32 %v730_v56, %v730_v56 }
 0x128   :  { %v883_v59 = vpack.c.bf16 %v733_v58, %v730_v56  ;;  %v772_v61 = vmul.f32 %v733_v58, %v733_v58 }
 0x12a   :  { %885 = vst [vmem:[%s1337_s2 + $0x8] sm:$0xff] %v883_v59   ;;  %762 = vadd.xlane.f32.xlu1 %v733_v58  ;;  %777 = vadd.xlane.f32.xlu0 %v771_v60 }
 0x12e   :  { %779 = vadd.xlane.f32.xlu1 %v772_v61 }
 0x1ab   :  { %v757_v62 = vpop.xlane.xlu0 %756 }
 0x1ac   :  { %765 = vst.msk [vmem:[%s1338_s3] sm:$0xff] %vm764_vm1, %v757_v62 }
 0x1af   :  { %v776_v63 = vpop.xlane.xlu1 %775  ;;  %v759_v0 = vpop.xlane.xlu0 %758 }
 0x1b0   :  { %782 = vst.msk [vmem:[%s1339_s4 + $0x8] sm:$0xff] %vm764_vm1, %v776_v63  ;;  %766 = vst.msk [vmem:[%s1338_s3 + $0x8] sm:$0xff] %vm764_vm1, %v759_v0 }
 0x1b3   :  { %v761_v1 = vpop.xlane.xlu1 %760  ;;  %v774_v2 = vpop.xlane.xlu0 %773 }
 0x1b4   :  { %767 = vst.msk [vmem:[%s1338_s3 + $0x10] sm:$0xff] %vm764_vm1, %v761_v1  ;;  %781 = vst.msk [vmem:[%s1339_s4] sm:$0xff] %vm764_vm1, %v774_v2 }
 0x1b7   :  { %v763_v3 = vpop.xlane.xlu1 %762  ;;  %v778_v4 = vpop.xlane.xlu0 %777 }
 0x1b8   :  { %768 = vst.msk [vmem:[%s1338_s3 + $0x18] sm:$0xff] %vm764_vm1, %v763_v3  ;;  %783 = vst.msk [vmem:[%s1339_s4 + $0x10] sm:$0xff] %vm764_vm1, %v778_v4 }
 0x1bb   :  { %v780_v5 = vpop.xlane.xlu1 %779 }
 0x1bc   :  { %784 = vst.msk [vmem:[%s1339_s4 + $0x18] sm:$0xff] %vm764_vm1, %v780_v5 }

// kernel: costregnet_small_forward.50
= control target key start
LH: loop header
LB: loop body
LE: loop exit
PB: predicated region body
PF: predicated region fallthrough
CT: control target
= control target key end

     0   :  { %vm210_vm0 = vcmask 7168   ;;  %s395_s1 = inlined_call_operand.vmem [shape: bf16[256,128], index: 1, kind: input, shape index: {}]   ;;  %s396_s0 = inlined_call_operand.vmem [shape: bf16[16,256], index: 0, kind: input, shape index: {}]   ;;  %s397_s2 = inlined_call_operand.vmem [shape: bf16[16,128], index: 2, kind: output, shape index: {0}]   ;;  %s398_s3 = inlined_call_operand.vmem [shape: f32[1,16,1], index: 3, kind: output, shape index: {1}]   ;;  %s399_s4 = inlined_call_operand.vmem [shape: f32[1,16,1], index: 4, kind: output, shape index: {2}]  }
   0x1   :  { %v282_v0 = vld [vmem:[%s395_s1 + $0x40] sm:$0xff]   ;;  %v284_v2 = vld [vmem:[%s395_s1 + $0x48] sm:$0xff]   ;;  %v286_v4 = vld [vmem:[%s395_s1 + $0x50] sm:$0xff]  }
   0x2   :  { %v283_v1 = vld [vmem:[%s395_s1] sm:$0xff]   ;;  %260 = vmatprep.subr.bf16.mxu0 %v282_v0  ;;  %v285_v3 = vld [vmem:[%s395_s1 + $0x8] sm:$0xff]   ;;  %v287_v5 = vld [vmem:[%s395_s1 + $0x10] sm:$0xff]  }
   0x3   :  { %261 = vmatpush3.bf16.msra.mxu0 %v283_v1  ;;  %v288_v6 = vld [vmem:[%s395_s1 + $0x58] sm:$0xff]   ;;  %v290_v8 = vld [vmem:[%s395_s1 + $0x60] sm:$0xff]   ;;  %v292_v10 = vld [vmem:[%s395_s1 + $0x68] sm:$0xff]  }
   0x4   :  { %262 = vmatprep.subr.bf16.mxu0 %v284_v2  ;;  %v289_v7 = vld [vmem:[%s395_s1 + $0x18] sm:$0xff]   ;;  %v291_v9 = vld [vmem:[%s395_s1 + $0x20] sm:$0xff]   ;;  %v293_v12 = vld [vmem:[%s395_s1 + $0x28] sm:$0xff]  }
   0x5   :  { %v300_v11 = vld [vmem:[%s396_s0 + $0x4] ss:$8 sps:$4 sm:$0xff]   ;;  %v294_v13 = vld [vmem:[%s395_s1 + $0x70] sm:$0xff]   ;;  %v296_v15 = vld [vmem:[%s395_s1 + $0x78] sm:$0xff]  }
   0x6   :  { %187 = vmatprep.mubr.bf16.mxu0 %v300_v11  ;;  %v295_v14 = vld [vmem:[%s395_s1 + $0x30] sm:$0xff]   ;;  %v297_v16 = vld [vmem:[%s395_s1 + $0x38] sm:$0xff]   ;;  %v298_v17 = vld [vmem:[%s396_s0] ss:$8 sps:$4 sm:$0xff]  }
   0x7   :  { %263 = vmatpush3.bf16.msra.mxu0 %v285_v3 }
   0x8   :  { %264 = vmatprep.subr.bf16.mxu0 %v286_v4 }
   0xb   :  { %265 = vmatpush3.bf16.msra.mxu0 %v287_v5 }
   0xc   :  { %266 = vmatprep.subr.bf16.mxu0 %v288_v6 }
   0xf   :  { %267 = vmatpush3.bf16.msra.mxu0 %v289_v7 }
  0x10   :  { %268 = vmatprep.subr.bf16.mxu0 %v290_v8 }
  0x13   :  { %269 = vmatpush3.bf16.msra.mxu0 %v291_v9 }
  0x14   :  { %270 = vmatprep.subr.bf16.mxu0 %v292_v10 }
  0x17   :  { %271 = vmatpush3.bf16.msra.mxu0 %v293_v12 }
  0x18   :  { %272 = vmatprep.subr.bf16.mxu0 %v294_v13 }
  0x1b   :  { %273 = vmatpush3.bf16.msra.mxu0 %v295_v14 }
  0x1c   :  { %274 = vmatprep.subr.bf16.mxu0 %v296_v15 }
  0x1f   :  { %275 = vmatpush3.bf16.msra.mxu0 %v297_v16 }
  0x22   :  { %188 = vmatmul.mubr.bf16.vlgmr.msra.gmra.mrb[0].mxu0 %v298_v17 }
  0xf5   :  { %v276_v18 = vpop.f32.mrb[0].mxu0 }
  0xf6   :  { %v277_v19 = vpop.f32.mrb[1].mxu0 }
  0xf7   :  { %v278_v20 = vadd.f32 %v277_v19, %v276_v18  ;;  %v279_v21 = vpop.f32.mrb[2].mxu0 }
  0xf8   :  { %v280_v22 = vpop.f32.mrb[3].mxu0 }
  0xf9   :  { %v281_v23 = vadd.f32 %v280_v22, %v279_v21  ;;  %206 = vadd.xlane.f32.xlu0 %v278_v20  ;;  %v213_v24 = vmul.f32 %v278_v20, %v278_v20 }
  0xfb   :  { %v258_v25 = vpack.c.bf16 %v281_v23, %v278_v20  ;;  %215 = vadd.xlane.f32.xlu1 %v213_v24  ;;  %v214_v26 = vmul.f32 %v281_v23, %v281_v23 }
  0xfd   :  { %259 = vst [vmem:[%s397_s2] sm:$0xff] %v258_v25   ;;  %208 = vadd.xlane.f32.xlu0 %v281_v23 }
  0xff   :  { %217 = vadd.xlane.f32.xlu1 %v214_v26 }
 0x186   :  { %v207_v27 = vpop.xlane.xlu0 %206 }
 0x187   :  { %211 = vst.msk [vmem:[%s398_s3] sm:$0xff] %vm210_vm0, %v207_v27 }
 0x188   :  { %v216_v28 = vpop.xlane.xlu1 %215 }
 0x189   :  { %219 = vst.msk [vmem:[%s399_s4] sm:$0xff] %vm210_vm0, %v216_v28 }
 0x18a   :  { %v209_v29 = vpop.xlane.xlu0 %208 }
 0x18b   :  { %212 = vst.msk [vmem:[%s398_s3 + $0x8] sm:$0xff] %vm210_vm0, %v209_v29 }
 0x18c   :  { %v218_v30 = vpop.xlane.xlu1 %217 }
 0x18d   :  { %220 = vst.msk [vmem:[%s399_s4 + $0x8] sm:$0xff] %vm210_vm0, %v218_v30 }

// kernel: costregnet_small_forward.48
= control target key start
LH: loop header
LB: loop body
LE: loop exit
PB: predicated region body
PF: predicated region fallthrough
CT: control target
= control target key end

     0   :  { %v223_v0 = vmov 0.0   ;;  %vm224_vm0 = vmmov 0   ;;  %vm142_vm1 = vcmask 7168   ;;  %s292_s1 = inlined_call_operand.vmem [shape: bf16[128,128], index: 1, kind: input, shape index: {}]   ;;  %s293_s0 = inlined_call_operand.vmem [shape: bf16[16,128], index: 0, kind: input, shape index: {}]   ;;  %s294_s2 = inlined_call_operand.vmem [shape: bf16[16,128], index: 2, kind: output, shape index: {0}]   ;;  %s295_s3 = inlined_call_operand.vmem [shape: f32[1,16,1], index: 3, kind: output, shape index: {1}]   ;;  %s296_s4 = inlined_call_operand.vmem [shape: f32[1,16,1], index: 4, kind: output, shape index: {2}]  }
   0x1   :  { %192 = vmatprep.subr.bf16.mxu0 %v223_v0  ;;  %v214_v1 = vld [vmem:[%s292_s1] sm:$0xff]   ;;  %208 = vmatprep.mubr.msk.bf16.mxu0 %vm224_vm0, %v223_v0  ;;  %v215_v2 = vld [vmem:[%s292_s1 + $0x8] sm:$0xff]   ;;  %v216_v3 = vld [vmem:[%s292_s1 + $0x10] sm:$0xff]  }
   0x2   :  { %193 = vmatpush3.bf16.msra.mxu0 %v214_v1  ;;  %v217_v4 = vld [vmem:[%s292_s1 + $0x18] sm:$0xff]   ;;  %v218_v5 = vld [vmem:[%s292_s1 + $0x20] sm:$0xff]   ;;  %v219_v6 = vld [vmem:[%s292_s1 + $0x28] sm:$0xff]  }
   0x3   :  { %194 = vmatprep.subr.bf16.mxu0 %v223_v0  ;;  %v220_v7 = vld [vmem:[%s292_s1 + $0x30] sm:$0xff]   ;;  %v221_v8 = vld [vmem:[%s292_s1 + $0x38] sm:$0xff]   ;;  %v222_v9 = vld [vmem:[%s293_s0] sm:$0xff]  }
   0x6   :  { %195 = vmatpush3.bf16.msra.mxu0 %v215_v2 }
   0x7   :  { %196 = vmatprep.subr.bf16.mxu0 %v223_v0 }
   0xa   :  { %197 = vmatpush3.bf16.msra.mxu0 %v216_v3 }
   0xb   :  { %198 = vmatprep.subr.bf16.mxu0 %v223_v0 }
   0xe   :  { %199 = vmatpush3.bf16.msra.mxu0 %v217_v4 }
   0xf   :  { %200 = vmatprep.subr.bf16.mxu0 %v223_v0 }
  0x12   :  { %201 = vmatpush3.bf16.msra.mxu0 %v218_v5 }
  0x13   :  { %202 = vmatprep.subr.bf16.mxu0 %v223_v0 }
  0x16   :  { %203 = vmatpush3.bf16.msra.mxu0 %v219_v6 }
  0x17   :  { %204 = vmatprep.subr.bf16.mxu0 %v223_v0 }
  0x1a   :  { %205 = vmatpush3.bf16.msra.mxu0 %v220_v7 }
  0x1b   :  { %206 = vmatprep.subr.bf16.mxu0 %v223_v0 }
  0x1e   :  { %207 = vmatpush3.bf16.msra.mxu0 %v221_v8 }
  0x21   :  { %209 = vmatmul.mubr.bf16.vlgmr.msra.gmra.mrb[0].mxu0 %v222_v9 }
  0xf4   :  { %v121_v10 = vpop.f32.mrb[0].mxu0 }
  0xf5   :  { %138 = vadd.xlane.f32.xlu0 %v121_v10  ;;  %v210_v11 = vpop.f32.mrb[1].mxu0  ;;  %v145_v12 = vmul.f32 %v121_v10, %v121_v10 }
  0xf6   :  { %v124_v13 = vpop.f32.mrb[2].mxu0 }
  0xf7   :  { %v181_v14 = vpack.c.bf16 %v124_v13, %v121_v10  ;;  %147 = vadd.xlane.f32.xlu1 %v145_v12  ;;  %v211_v15 = vpop.f32.mrb[3].mxu0  ;;  %v146_v16 = vmul.f32 %v124_v13, %v124_v13 }
  0xf9   :  { %182 = vst [vmem:[%s294_s2] sm:$0xff] %v181_v14   ;;  %140 = vadd.xlane.f32.xlu0 %v124_v13 }
  0xfb   :  { %149 = vadd.xlane.f32.xlu1 %v146_v16 }
 0x182   :  { %v139_v17 = vpop.xlane.xlu0 %138 }
 0x183   :  { %143 = vst.msk [vmem:[%s295_s3] sm:$0xff] %vm142_vm1, %v139_v17 }
 0x184   :  { %v148_v18 = vpop.xlane.xlu1 %147 }
 0x185   :  { %151 = vst.msk [vmem:[%s296_s4] sm:$0xff] %vm142_vm1, %v148_v18 }
 0x186   :  { %v141_v19 = vpop.xlane.xlu0 %140 }
 0x187   :  { %144 = vst.msk [vmem:[%s295_s3 + $0x8] sm:$0xff] %vm142_vm1, %v141_v19 }
 0x188   :  { %v150_v20 = vpop.xlane.xlu1 %149 }
 0x189   :  { %152 = vst.msk [vmem:[%s296_s4 + $0x8] sm:$0xff] %vm142_vm1, %v150_v20 }

// kernel: costregnet_small_forward.45
= control target key start
LH: loop header
LB: loop body
LE: loop exit
PB: predicated region body
PF: predicated region fallthrough
CT: control target
= control target key end

     0   :  { %v175_v0 = vmov 0.0   ;;  %vm176_vm0 = vmmov 0   ;;  %vm54_vm1 = vcmask 523264   ;;  %vm113_vm2 = vcmask 7168   ;;  %s232_s1 = inlined_call_operand.vmem [shape: bf16[64,128], index: 1, kind: input, shape index: {}]   ;;  %s233_s0 = inlined_call_operand.vmem [shape: bf16[16,64], index: 0, kind: input, shape index: {}]   ;;  %s234_s2 = inlined_call_operand.vmem [shape: bf16[16,128], index: 2, kind: output, shape index: {0}]   ;;  %s235_s3 = inlined_call_operand.vmem [shape: f32[1,16,1], index: 3, kind: output, shape index: {1}]   ;;  %s236_s4 = inlined_call_operand.vmem [shape: f32[1,16,1], index: 4, kind: output, shape index: {2}]  }
   0x1   :  { %156 = vmatprep.subr.bf16.mxu0 %v175_v0  ;;  %v170_v1 = vld [vmem:[%s232_s1] sm:$0xff]   ;;  %164 = vmatprep.mubr.msk.bf16.mxu0 %vm176_vm0, %v175_v0  ;;  %v171_v2 = vld [vmem:[%s232_s1 + $0x8] sm:$0xff]   ;;  %v172_v3 = vld [vmem:[%s232_s1 + $0x10] sm:$0xff]  }
   0x2   :  { %157 = vmatpush3.bf16.msra.mxu0 %v170_v1  ;;  %v173_v4 = vld [vmem:[%s232_s1 + $0x18] sm:$0xff]   ;;  %v174_v5 = vld [vmem:[%s233_s0] sm:$0xff]  }
   0x3   :  { %158 = vmatprep.subr.bf16.mxu0 %v175_v0 }
   0x6   :  { %159 = vmatpush3.bf16.msra.mxu0 %v171_v2 }
   0x7   :  { %160 = vmatprep.subr.bf16.mxu0 %v175_v0 }
   0xa   :  { %161 = vmatpush3.bf16.msra.mxu0 %v172_v3 }
   0xb   :  { %162 = vmatprep.subr.bf16.mxu0 %v175_v0 }
   0xe   :  { %163 = vmatpush3.bf16.msra.mxu0 %v173_v4 }
  0x11   :  { %165 = vmatmul.mubr.msk.bf16.vlgmr.msra.gmra.mrb[0].mxu0 %vm54_vm1, %v174_v5 }
  0xe4   :  { %v92_v6 = vpop.f32.mrb[0].mxu0 }
  0xe5   :  { %109 = vadd.xlane.f32.xlu0 %v92_v6  ;;  %v166_v7 = vpop.f32.mrb[1].mxu0  ;;  %v116_v8 = vmul.f32 %v92_v6, %v92_v6 }
  0xe6   :  { %v95_v9 = vpop.f32.mrb[2].mxu0 }
  0xe7   :  { %v149_v10 = vpack.c.bf16 %v95_v9, %v92_v6  ;;  %118 = vadd.xlane.f32.xlu1 %v116_v8  ;;  %v167_v11 = vpop.f32.mrb[3].mxu0  ;;  %v117_v12 = vmul.f32 %v95_v9, %v95_v9 }
  0xe9   :  { %150 = vst [vmem:[%s234_s2] sm:$0xff] %v149_v10   ;;  %111 = vadd.xlane.f32.xlu0 %v95_v9 }
  0xeb   :  { %120 = vadd.xlane.f32.xlu1 %v117_v12 }
 0x172   :  { %v110_v13 = vpop.xlane.xlu0 %109 }
 0x173   :  { %114 = vst.msk [vmem:[%s235_s3] sm:$0xff] %vm113_vm2, %v110_v13 }
 0x174   :  { %v119_v14 = vpop.xlane.xlu1 %118 }
 0x175   :  { %122 = vst.msk [vmem:[%s236_s4] sm:$0xff] %vm113_vm2, %v119_v14 }
 0x176   :  { %v112_v15 = vpop.xlane.xlu0 %111 }
 0x177   :  { %115 = vst.msk [vmem:[%s235_s3 + $0x8] sm:$0xff] %vm113_vm2, %v112_v15 }
 0x178   :  { %v121_v16 = vpop.xlane.xlu1 %120 }
 0x179   :  { %123 = vst.msk [vmem:[%s236_s4 + $0x8] sm:$0xff] %vm113_vm2, %v121_v16 }

// kernel: costregnet_small_forward.43
= control target key start
LH: loop header
LB: loop body
LE: loop exit
PB: predicated region body
PF: predicated region fallthrough
CT: control target
= control target key end

     0   :  { %v149_v0 = vmov 0.0   ;;  %vm150_vm0 = vmmov 0   ;;  %vm38_vm1 = vcmask 261120   ;;  %vm97_vm2 = vcmask 7168   ;;  %s200_s1 = inlined_call_operand.vmem [shape: bf16[32,128], index: 1, kind: input, shape index: {}]   ;;  %s201_s0 = inlined_call_operand.vmem [shape: bf16[16,32], index: 0, kind: input, shape index: {}]   ;;  %s202_s2 = inlined_call_operand.vmem [shape: bf16[16,128], index: 2, kind: output, shape index: {0}]   ;;  %s203_s3 = inlined_call_operand.vmem [shape: f32[1,16,1], index: 3, kind: output, shape index: {1}]   ;;  %s204_s4 = inlined_call_operand.vmem [shape: f32[1,16,1], index: 4, kind: output, shape index: {2}]  }
   0x1   :  { %136 = vmatprep.subr.bf16.mxu0 %v149_v0  ;;  %v146_v1 = vld [vmem:[%s200_s1] sm:$0xff]   ;;  %140 = vmatprep.mubr.msk.bf16.mxu0 %vm150_vm0, %v149_v0  ;;  %v147_v2 = vld [vmem:[%s200_s1 + $0x8] sm:$0xff]  }
   0x2   :  { %137 = vmatpush3.bf16.msra.mxu0 %v146_v1  ;;  %v148_v3 = vld [vmem:[%s201_s0] sm:$0xff]  }
   0x3   :  { %138 = vmatprep.subr.bf16.mxu0 %v149_v0 }
   0x6   :  { %139 = vmatpush3.bf16.msra.mxu0 %v147_v2 }
   0x9   :  { %141 = vmatmul.mubr.msk.bf16.vlgmr.msra.gmra.mrb[0].mxu0 %vm38_vm1, %v148_v3 }
  0xdc   :  { %v76_v4 = vpop.f32.mrb[0].mxu0 }
  0xdd   :  { %93 = vadd.xlane.f32.xlu0 %v76_v4  ;;  %v142_v5 = vpop.f32.mrb[1].mxu0  ;;  %v100_v6 = vmul.f32 %v76_v4, %v76_v4 }
  0xde   :  { %v79_v7 = vpop.f32.mrb[2].mxu0 }
  0xdf   :  { %v131_v8 = vpack.c.bf16 %v79_v7, %v76_v4  ;;  %102 = vadd.xlane.f32.xlu1 %v100_v6  ;;  %v143_v9 = vpop.f32.mrb[3].mxu0  ;;  %v101_v10 = vmul.f32 %v79_v7, %v79_v7 }
  0xe1   :  { %132 = vst [vmem:[%s202_s2] sm:$0xff] %v131_v8   ;;  %95 = vadd.xlane.f32.xlu0 %v79_v7 }
  0xe3   :  { %104 = vadd.xlane.f32.xlu1 %v101_v10 }
 0x16a   :  { %v94_v11 = vpop.xlane.xlu0 %93 }
 0x16b   :  { %98 = vst.msk [vmem:[%s203_s3] sm:$0xff] %vm97_vm2, %v94_v11 }
 0x16c   :  { %v103_v12 = vpop.xlane.xlu1 %102 }
 0x16d   :  { %106 = vst.msk [vmem:[%s204_s4] sm:$0xff] %vm97_vm2, %v103_v12 }
 0x16e   :  { %v96_v13 = vpop.xlane.xlu0 %95 }
 0x16f   :  { %99 = vst.msk [vmem:[%s203_s3 + $0x8] sm:$0xff] %vm97_vm2, %v96_v13 }
 0x170   :  { %v105_v14 = vpop.xlane.xlu1 %104 }
 0x171   :  { %107 = vst.msk [vmem:[%s204_s4 + $0x8] sm:$0xff] %vm97_vm2, %v105_v14 }

// kernel: costregnet_small_forward.51
= control target key start
LH: loop header
LB: loop body
LE: loop exit
PB: predicated region body
PF: predicated region fallthrough
CT: control target
= control target key end

     0   :  { %v140_v0 = vmov 0   ;;  %s214_s2 = inlined_call_operand.vmem [shape: f32[16,1], index: 2, kind: input, shape index: {}]   ;;  %s215_s1 = inlined_call_operand.vmem [shape: f32[16,1], index: 1, kind: input, shape index: {}]   ;;  %s216_s0 = inlined_call_operand.vmem [shape: bf16[16,512], index: 0, kind: input, shape index: {}]   ;;  %s217_s3 = inlined_call_operand.vmem [shape: bf16[16,512], index: 3, kind: input, shape index: {}]   ;;  %s218_s4 = inlined_call_operand.vmem [shape: bf16[16,512], index: 4, kind: output, shape index: {}]  }
   0x1   :  { %139 = vset.pattern.permute.xlu1 %v140_v0  ;;  %138 = vset.pattern.permute.xlu0 %v140_v0  ;;  %v49_v1 = vld [vmem:[%s214_s2] sm:$0xff]  ;;  %v50_v3 = vld [vmem:[%s214_s2 + $0x8] sm:$0xff]  ;;  %v19_v13 = vld [vmem:[%s216_s0 + $0x10] sm:$0xff] }
   0x2   :  { %v29_v2 = vld [vmem:[%s215_s1] sm:$0xff]  ;;  %53 = vperm.xlu1 %139, %v49_v1   ;;  %v30_v4 = vld [vmem:[%s215_s1 + $0x8] sm:$0xff]  ;;  %v20_v14 = vld [vmem:[%s216_s0 + $0x18] sm:$0xff]  ;;  %v25_v27 = vunpack.c.l.bf16 %v19_v13  ;;  %v26_v28 = vunpack.c.h.bf16 %v19_v13 }
   0x3   :  { %33 = vperm.xlu0 %138, %v29_v2   ;;  %v17_v5 = vld [vmem:[%s216_s0] sm:$0xff]  ;;  %v18_v6 = vld [vmem:[%s216_s0 + $0x8] sm:$0xff]  ;;  %v79_v25 = vld [vmem:[%s217_s3 + $0x10] sm:$0xff]  ;;  %v27_v29 = vunpack.c.l.bf16 %v20_v14  ;;  %v28_v30 = vunpack.c.h.bf16 %v20_v14 }
   0x4   :  { %v77_v7 = vld [vmem:[%s217_s3] sm:$0xff]  ;;  %v78_v8 = vld [vmem:[%s217_s3 + $0x8] sm:$0xff]  ;;  %v21_v9 = vunpack.c.l.bf16 %v17_v5  ;;  %v22_v10 = vunpack.c.h.bf16 %v17_v5  ;;  %v23_v11 = vunpack.c.l.bf16 %v18_v6  ;;  %v24_v12 = vunpack.c.h.bf16 %v18_v6  ;;  %v80_v26 = vld [vmem:[%s217_s3 + $0x18] sm:$0xff] }
   0x5   :  { %v81_v15 = vunpack.c.l.bf16 %v77_v7  ;;  %v82_v16 = vunpack.c.h.bf16 %v77_v7  ;;  %v83_v17 = vunpack.c.l.bf16 %v78_v8  ;;  %v84_v18 = vunpack.c.h.bf16 %v78_v8 }
   0x6   :  { %58 = vperm.xlu1 %139, %v50_v3   ;;  %v85_v35 = vunpack.c.l.bf16 %v79_v25  ;;  %v86_v36 = vunpack.c.h.bf16 %v79_v25  ;;  %v87_v37 = vunpack.c.l.bf16 %v80_v26  ;;  %v88_v38 = vunpack.c.h.bf16 %v80_v26 }
   0x7   :  { %38 = vperm.xlu0 %138, %v30_v4  }
  0x81   :  { %v54_v20 = vpop.permute.xlu1 %53 }
  0x82   :  { %v34_v19 = vpop.permute.xlu0 %33 }
  0x83   :  { %v41_v21 = vmul.f32 %v34_v19, %v21_v9  ;;  %v42_v22 = vmul.f32 %v34_v19, %v22_v10  ;;  %v43_v23 = vmul.f32 %v34_v19, %v23_v11  ;;  %v44_v24 = vmul.f32 %v34_v19, %v24_v12 }
  0x85   :  { %v61_v31 = vadd.f32 %v54_v20, %v41_v21  ;;  %v62_v32 = vadd.f32 %v54_v20, %v42_v22  ;;  %v63_v33 = vadd.f32 %v54_v20, %v43_v23  ;;  %v64_v34 = vadd.f32 %v54_v20, %v44_v24  ;;  %v59_v52 = vpop.permute.xlu1 %58 }
  0x86   :  { %v39_v39 = vpop.permute.xlu0 %38 }
  0x87   :  { %v69_v40 = vmax.f32 %v61_v31, 0.0  ;;  %v70_v41 = vmax.f32 %v62_v32, 0.0  ;;  %v71_v42 = vmax.f32 %v63_v33, 0.0  ;;  %v72_v43 = vmax.f32 %v64_v34, 0.0 }
  0x88   :  { %v45_v44 = vmul.f32 %v39_v39, %v25_v27  ;;  %v46_v45 = vmul.f32 %v39_v39, %v26_v28  ;;  %v47_v46 = vmul.f32 %v39_v39, %v27_v29  ;;  %v48_v47 = vmul.f32 %v39_v39, %v28_v30 }
  0x89   :  { %v89_v48 = vadd.f32 %v81_v15, %v69_v40  ;;  %v90_v49 = vadd.f32 %v82_v16, %v70_v41  ;;  %v91_v50 = vadd.f32 %v83_v17, %v71_v42  ;;  %v92_v51 = vadd.f32 %v84_v18, %v72_v43 }
  0x8a   :  { %v65_v53 = vadd.f32 %v59_v52, %v45_v44  ;;  %v66_v54 = vadd.f32 %v59_v52, %v46_v45  ;;  %v67_v55 = vadd.f32 %v59_v52, %v47_v46  ;;  %v68_v56 = vadd.f32 %v59_v52, %v48_v47 }
  0x8b   :  { %v133_v57 = vpack.c.bf16 %v90_v49, %v89_v48  ;;  %v134_v58 = vpack.c.bf16 %v92_v51, %v91_v50 }
  0x8c   :  { %v73_v59 = vmax.f32 %v65_v53, 0.0  ;;  %v74_v60 = vmax.f32 %v66_v54, 0.0  ;;  %v75_v61 = vmax.f32 %v67_v55, 0.0  ;;  %v76_v62 = vmax.f32 %v68_v56, 0.0 }
  0x8d   :  { %121 = vst [vmem:[%s218_s4] sm:$0xff] %v133_v57  ;;  %122 = vst [vmem:[%s218_s4 + $0x8] sm:$0xff] %v134_v58 }
  0x8e   :  { %v93_v63 = vadd.f32 %v85_v35, %v73_v59  ;;  %v94_v0 = vadd.f32 %v86_v36, %v74_v60  ;;  %v95_v1 = vadd.f32 %v87_v37, %v75_v61  ;;  %v96_v2 = vadd.f32 %v88_v38, %v76_v62 }
  0x90   :  { %v135_v3 = vpack.c.bf16 %v94_v0, %v93_v63  ;;  %v136_v4 = vpack.c.bf16 %v96_v2, %v95_v1 }
  0x92   :  { %123 = vst [vmem:[%s218_s4 + $0x10] sm:$0xff] %v135_v3  ;;  %124 = vst [vmem:[%s218_s4 + $0x18] sm:$0xff] %v136_v4 }

// kernel: costregnet_small_forward.59
= control target key start
LH: loop header
LB: loop body
LE: loop exit
PB: predicated region body
PF: predicated region fallthrough
CT: control target
= control target key end

     0   :  { %v422_v1 = vmov 0   ;;  %vm313_vm0 = vcmask 7168   ;;  %s559_s1 = inlined_call_operand.vmem [shape: bf16[128,512], index: 1, kind: input, shape index: {}]   ;;  %s560_s0 = inlined_call_operand.vmem [shape: bf16[8,128], index: 0, kind: input, shape index: {}]   ;;  %s561_s2 = inlined_call_operand.vmem [shape: bf16[8,512], index: 2, kind: output, shape index: {0}]   ;;  %s562_s3 = inlined_call_operand.vmem [shape: f32[1,8,1], index: 3, kind: output, shape index: {1}]   ;;  %s563_s4 = inlined_call_operand.vmem [shape: f32[1,8,1], index: 4, kind: output, shape index: {2}]  }
   0x1   :  { %v374_v0 = vld [vmem:[%s559_s1 + $0x4] ss:$16 sps:$4 sm:$0xff]   ;;  %240 = vmatprep.mubr.bf16.mxu0 %v422_v1  ;;  %281 = vmatprep.mubr.bf16.mxu1 %v422_v1  ;;  %v376_v2 = vld [vmem:[%s559_s1 + $0xc] ss:$16 sps:$4 sm:$0xff]   ;;  %v378_v3 = vld [vmem:[%s559_s1] ss:$16 sps:$4 sm:$0xff]  }
   0x2   :  { %208 = vmatprep.subr.bf16.mxu0 %v374_v0  ;;  %v379_v4 = vld [vmem:[%s559_s1 + $0x8] ss:$16 sps:$4 sm:$0xff]   ;;  %249 = vmatprep.subr.bf16.mxu1 %v376_v2  ;;  %v380_v5 = vld [vmem:[%s559_s1 + $0x24] ss:$16 sps:$4 sm:$0xff]   ;;  %v382_v6 = vld [vmem:[%s559_s1 + $0x2c] ss:$16 sps:$4 sm:$0xff]  }
   0x3   :  { %209 = vmatpush1.bf16.msra.mxu0 %v378_v3  ;;  %250 = vmatpush1.bf16.msra.mxu1 %v379_v4  ;;  %v384_v7 = vld [vmem:[%s559_s1 + $0x20] ss:$16 sps:$4 sm:$0xff]   ;;  %v385_v8 = vld [vmem:[%s559_s1 + $0x28] ss:$16 sps:$4 sm:$0xff]   ;;  %v386_v9 = vld [vmem:[%s559_s1 + $0x44] ss:$16 sps:$4 sm:$0xff]  }
   0x4   :  { %210 = vmatprep.subr.bf16.mxu0 %v380_v5  ;;  %251 = vmatprep.subr.bf16.mxu1 %v382_v6  ;;  %v388_v10 = vld [vmem:[%s559_s1 + $0x4c] ss:$16 sps:$4 sm:$0xff]   ;;  %v390_v11 = vld [vmem:[%s559_s1 + $0x40] ss:$16 sps:$4 sm:$0xff]   ;;  %v391_v12 = vld [vmem:[%s559_s1 + $0x48] ss:$16 sps:$4 sm:$0xff]  }
   0x5   :  { %v392_v13 = vld [vmem:[%s559_s1 + $0x64] ss:$16 sps:$4 sm:$0xff]   ;;  %v394_v14 = vld [vmem:[%s559_s1 + $0x6c] ss:$16 sps:$4 sm:$0xff]   ;;  %v396_v15 = vld [vmem:[%s559_s1 + $0x60] ss:$16 sps:$4 sm:$0xff]  }
   0x6   :  { %v397_v16 = vld [vmem:[%s559_s1 + $0x68] ss:$16 sps:$4 sm:$0xff]   ;;  %v398_v17 = vld [vmem:[%s559_s1 + $0x84] ss:$16 sps:$4 sm:$0xff]   ;;  %v400_v18 = vld [vmem:[%s559_s1 + $0x8c] ss:$16 sps:$4 sm:$0xff]  }
   0x7   :  { %211 = vmatpush1.bf16.msra.mxu0 %v384_v7  ;;  %252 = vmatpush1.bf16.msra.mxu1 %v385_v8  ;;  %v402_v19 = vld [vmem:[%s559_s1 + $0x80] ss:$16 sps:$4 sm:$0xff]   ;;  %v403_v20 = vld [vmem:[%s559_s1 + $0x88] ss:$16 sps:$4 sm:$0xff]   ;;  %v404_v21 = vld [vmem:[%s559_s1 + $0xa4] ss:$16 sps:$4 sm:$0xff]  }
   0x8   :  { %212 = vmatprep.subr.bf16.mxu0 %v386_v9  ;;  %253 = vmatprep.subr.bf16.mxu1 %v388_v10  ;;  %v406_v22 = vld [vmem:[%s559_s1 + $0xac] ss:$16 sps:$4 sm:$0xff]   ;;  %v408_v23 = vld [vmem:[%s559_s1 + $0xa0] ss:$16 sps:$4 sm:$0xff]   ;;  %v409_v24 = vld [vmem:[%s559_s1 + $0xa8] ss:$16 sps:$4 sm:$0xff]  }
   0x9   :  { %v410_v25 = vld [vmem:[%s559_s1 + $0xc4] ss:$16 sps:$4 sm:$0xff]   ;;  %v412_v26 = vld [vmem:[%s559_s1 + $0xcc] ss:$16 sps:$4 sm:$0xff]   ;;  %v414_v27 = vld [vmem:[%s559_s1 + $0xc0] ss:$16 sps:$4 sm:$0xff]  }
   0xa   :  { %v415_v28 = vld [vmem:[%s559_s1 + $0xc8] ss:$16 sps:$4 sm:$0xff]   ;;  %v416_v29 = vld [vmem:[%s559_s1 + $0xe4] ss:$16 sps:$4 sm:$0xff]   ;;  %v418_v30 = vld [vmem:[%s559_s1 + $0xec] ss:$16 sps:$4 sm:$0xff]  }
   0xb   :  { %213 = vmatpush1.bf16.msra.mxu0 %v390_v11  ;;  %254 = vmatpush1.bf16.msra.mxu1 %v391_v12  ;;  %v420_v31 = vld [vmem:[%s559_s1 + $0xe0] ss:$16 sps:$4 sm:$0xff]   ;;  %v421_v32 = vld [vmem:[%s559_s1 + $0xe8] ss:$16 sps:$4 sm:$0xff]  }
   0xc   :  { %214 = vmatprep.subr.bf16.mxu0 %v392_v13  ;;  %255 = vmatprep.subr.bf16.mxu1 %v394_v14  ;;  %v15_v33 = vld [vmem:[%s560_s0] sm:$0xf] }
   0xf   :  { %215 = vmatpush1.bf16.msra.mxu0 %v396_v15  ;;  %256 = vmatpush1.bf16.msra.mxu1 %v397_v16 }
  0x10   :  { %216 = vmatprep.subr.bf16.mxu0 %v398_v17  ;;  %257 = vmatprep.subr.bf16.mxu1 %v400_v18 }
  0x13   :  { %217 = vmatpush1.bf16.msra.mxu0 %v402_v19  ;;  %258 = vmatpush1.bf16.msra.mxu1 %v403_v20 }
  0x14   :  { %218 = vmatprep.subr.bf16.mxu0 %v404_v21  ;;  %259 = vmatprep.subr.bf16.mxu1 %v406_v22 }
  0x17   :  { %219 = vmatpush1.bf16.msra.mxu0 %v408_v23  ;;  %260 = vmatpush1.bf16.msra.mxu1 %v409_v24 }
  0x18   :  { %220 = vmatprep.subr.bf16.mxu0 %v410_v25  ;;  %261 = vmatprep.subr.bf16.mxu1 %v412_v26 }
  0x1b   :  { %221 = vmatpush1.bf16.msra.mxu0 %v414_v27  ;;  %262 = vmatpush1.bf16.msra.mxu1 %v415_v28 }
  0x1c   :  { %222 = vmatprep.subr.bf16.mxu0 %v416_v29  ;;  %263 = vmatprep.subr.bf16.mxu1 %v418_v30 }
  0x1f   :  { %223 = vmatpush1.bf16.msra.mxu0 %v420_v31  ;;  %264 = vmatpush1.bf16.msra.mxu1 %v421_v32 }
  0x22   :  { %241 = vmatmul.mubr.bf16.vlgmr.msra.gmra.mrb[0].mxu0 %v15_v33  ;;  %282 = vmatmul.mubr.bf16.vlgmr.msra.gmra.mrb[0].mxu1 %v15_v33 }
  0xf5   :  { %v242_v34 = vpop.f32.mrb[0].mxu0  ;;  %v283_v35 = vpop.f32.mrb[0].mxu1 }
  0xf6   :  { %v315_v36 = vmul.f32 %v242_v34, %v242_v34  ;;  %v317_v37 = vmul.f32 %v283_v35, %v283_v35  ;;  %v244_v38 = vpop.f32.mrb[1].mxu0  ;;  %v285_v39 = vpop.f32.mrb[1].mxu1 }
  0xf7   :  { %v371_v40 = vpack.c.bf16 %v244_v38, %v242_v34  ;;  %v308_v41 = vadd.f32 %v244_v38, %v242_v34  ;;  %v316_v42 = vmul.f32 %v244_v38, %v244_v38  ;;  %v372_v43 = vpack.c.bf16 %v285_v39, %v283_v35  ;;  %v246_v44 = vpop.f32.mrb[2].mxu0  ;;  %v287_v45 = vpop.f32.mrb[2].mxu1 }
  0xf8   :  { %v247_v46 = vpop.f32.mrb[3].mxu0  ;;  %v288_v47 = vpop.f32.mrb[3].mxu1  ;;  %v318_v51 = vmul.f32 %v285_v39, %v285_v39 }
  0xf9   :  { %306 = vst [vmem:[%s561_s2] sm:$0xff] %v371_v40  ;;  %307 = vst [vmem:[%s561_s2 + $0x8] sm:$0xff] %v372_v43  ;;  %v309_v48 = vadd.f32 %v308_v41, %v283_v35  ;;  %v319_v49 = vadd.f32 %v316_v42, %v315_v36 }
  0xfb   :  { %v310_v50 = vadd.f32 %v309_v48, %v285_v39  ;;  %v320_v52 = vadd.f32 %v319_v49, %v317_v37 }
  0xfd   :  { %311 = vadd.xlane.f32.xlu0 %v310_v50  ;;  %v321_v53 = vadd.f32 %v320_v52, %v318_v51 }
 0x101   :  { %322 = vadd.xlane.f32.xlu0 %v321_v53 }
 0x18a   :  { %v312_v54 = vpop.xlane.xlu0 %311 }
 0x18b   :  { %314 = vst.msk [vmem:[%s562_s3] sm:$0xff] %vm313_vm0, %v312_v54 }
 0x18e   :  { %v323_v55 = vpop.xlane.xlu0 %322 }
 0x18f   :  { %324 = vst.msk [vmem:[%s563_s4] sm:$0xff] %vm313_vm0, %v323_v55 }

// kernel: costregnet_small_forward.57
= control target key start
LH: loop header
LB: loop body
LE: loop exit
PB: predicated region body
PF: predicated region fallthrough
CT: control target
= control target key end

     0   :  { %v292_v1 = vmov 0   ;;  %vm112_vm0 = vcmask 523264   ;;  %vm221_vm1 = vcmask 7168   ;;  %s381_s1 = inlined_call_operand.vmem [shape: bf16[64,512], index: 1, kind: input, shape index: {}]   ;;  %s382_s0 = inlined_call_operand.vmem [shape: bf16[8,64], index: 0, kind: input, shape index: {}]   ;;  %s383_s2 = inlined_call_operand.vmem [shape: bf16[8,512], index: 2, kind: output, shape index: {0}]   ;;  %s384_s3 = inlined_call_operand.vmem [shape: f32[1,8,1], index: 3, kind: output, shape index: {1}]   ;;  %s385_s4 = inlined_call_operand.vmem [shape: f32[1,8,1], index: 4, kind: output, shape index: {2}]  }
   0x1   :  { %v268_v0 = vld [vmem:[%s381_s1 + $0x4] ss:$16 sps:$4 sm:$0xff]   ;;  %148 = vmatprep.mubr.bf16.mxu0 %v292_v1  ;;  %189 = vmatprep.mubr.bf16.mxu1 %v292_v1  ;;  %v270_v2 = vld [vmem:[%s381_s1 + $0xc] ss:$16 sps:$4 sm:$0xff]   ;;  %v272_v3 = vld [vmem:[%s381_s1] ss:$16 sps:$4 sm:$0xff]  }
   0x2   :  { %116 = vmatprep.subr.bf16.mxu0 %v268_v0  ;;  %v273_v4 = vld [vmem:[%s381_s1 + $0x8] ss:$16 sps:$4 sm:$0xff]   ;;  %157 = vmatprep.subr.bf16.mxu1 %v270_v2  ;;  %v274_v5 = vld [vmem:[%s381_s1 + $0x24] ss:$16 sps:$4 sm:$0xff]   ;;  %v276_v6 = vld [vmem:[%s381_s1 + $0x2c] ss:$16 sps:$4 sm:$0xff]  }
   0x3   :  { %117 = vmatpush1.bf16.msra.mxu0 %v272_v3  ;;  %158 = vmatpush1.bf16.msra.mxu1 %v273_v4  ;;  %v278_v7 = vld [vmem:[%s381_s1 + $0x20] ss:$16 sps:$4 sm:$0xff]   ;;  %v279_v8 = vld [vmem:[%s381_s1 + $0x28] ss:$16 sps:$4 sm:$0xff]   ;;  %v280_v9 = vld [vmem:[%s381_s1 + $0x44] ss:$16 sps:$4 sm:$0xff]  }
   0x4   :  { %118 = vmatprep.subr.bf16.mxu0 %v274_v5  ;;  %159 = vmatprep.subr.bf16.mxu1 %v276_v6  ;;  %v282_v10 = vld [vmem:[%s381_s1 + $0x4c] ss:$16 sps:$4 sm:$0xff]   ;;  %v284_v11 = vld [vmem:[%s381_s1 + $0x40] ss:$16 sps:$4 sm:$0xff]   ;;  %v285_v12 = vld [vmem:[%s381_s1 + $0x48] ss:$16 sps:$4 sm:$0xff]  }
   0x5   :  { %v286_v13 = vld [vmem:[%s381_s1 + $0x64] ss:$16 sps:$4 sm:$0xff]   ;;  %v288_v14 = vld [vmem:[%s381_s1 + $0x6c] ss:$16 sps:$4 sm:$0xff]   ;;  %v290_v15 = vld [vmem:[%s381_s1 + $0x60] ss:$16 sps:$4 sm:$0xff]  }
   0x6   :  { %v291_v16 = vld [vmem:[%s381_s1 + $0x68] ss:$16 sps:$4 sm:$0xff]   ;;  %v15_v17 = vld [vmem:[%s382_s0] sm:$0xf] }
   0x7   :  { %119 = vmatpush1.bf16.msra.mxu0 %v278_v7  ;;  %160 = vmatpush1.bf16.msra.mxu1 %v279_v8 }
   0x8   :  { %120 = vmatprep.subr.bf16.mxu0 %v280_v9  ;;  %161 = vmatprep.subr.bf16.mxu1 %v282_v10 }
   0xb   :  { %121 = vmatpush1.bf16.msra.mxu0 %v284_v11  ;;  %162 = vmatpush1.bf16.msra.mxu1 %v285_v12 }
   0xc   :  { %122 = vmatprep.subr.bf16.mxu0 %v286_v13  ;;  %163 = vmatprep.subr.bf16.mxu1 %v288_v14 }
   0xf   :  { %123 = vmatpush1.bf16.msra.mxu0 %v290_v15  ;;  %164 = vmatpush1.bf16.msra.mxu1 %v291_v16 }
  0x12   :  { %261 = vmatmul.mubr.msk.bf16.vlgmr.msra.gmra.mrb[0].mxu0 %vm112_vm0, %v15_v17  ;;  %262 = vmatmul.mubr.msk.bf16.vlgmr.msra.gmra.mrb[0].mxu1 %vm112_vm0, %v15_v17 }
  0xe5   :  { %v150_v18 = vpop.f32.mrb[0].mxu0  ;;  %v191_v19 = vpop.f32.mrb[0].mxu1 }
  0xe6   :  { %v223_v20 = vmul.f32 %v150_v18, %v150_v18  ;;  %v225_v21 = vmul.f32 %v191_v19, %v191_v19  ;;  %v152_v22 = vpop.f32.mrb[1].mxu0  ;;  %v193_v23 = vpop.f32.mrb[1].mxu1 }
  0xe7   :  { %v265_v24 = vpack.c.bf16 %v152_v22, %v150_v18  ;;  %v216_v25 = vadd.f32 %v152_v22, %v150_v18  ;;  %v224_v26 = vmul.f32 %v152_v22, %v152_v22  ;;  %v266_v27 = vpack.c.bf16 %v193_v23, %v191_v19  ;;  %v154_v28 = vpop.f32.mrb[2].mxu0  ;;  %v195_v29 = vpop.f32.mrb[2].mxu1 }
  0xe8   :  { %v155_v30 = vpop.f32.mrb[3].mxu0  ;;  %v196_v31 = vpop.f32.mrb[3].mxu1  ;;  %v226_v35 = vmul.f32 %v193_v23, %v193_v23 }
  0xe9   :  { %214 = vst [vmem:[%s383_s2] sm:$0xff] %v265_v24  ;;  %215 = vst [vmem:[%s383_s2 + $0x8] sm:$0xff] %v266_v27  ;;  %v217_v32 = vadd.f32 %v216_v25, %v191_v19  ;;  %v227_v33 = vadd.f32 %v224_v26, %v223_v20 }
  0xeb   :  { %v218_v34 = vadd.f32 %v217_v32, %v193_v23  ;;  %v228_v36 = vadd.f32 %v227_v33, %v225_v21 }
  0xed   :  { %219 = vadd.xlane.f32.xlu0 %v218_v34  ;;  %v229_v37 = vadd.f32 %v228_v36, %v226_v35 }
  0xf1   :  { %230 = vadd.xlane.f32.xlu0 %v229_v37 }
 0x17a   :  { %v220_v38 = vpop.xlane.xlu0 %219 }
 0x17b   :  { %222 = vst.msk [vmem:[%s384_s3] sm:$0xff] %vm221_vm1, %v220_v38 }
 0x17e   :  { %v231_v39 = vpop.xlane.xlu0 %230 }
 0x17f   :  { %232 = vst.msk [vmem:[%s385_s4] sm:$0xff] %vm221_vm1, %v231_v39 }

// kernel: costregnet_small_forward.54
= control target key start
LH: loop header
LB: loop body
LE: loop exit
PB: predicated region body
PF: predicated region fallthrough
CT: control target
= control target key end

     0   :  { %v224_v1 = vmov 0   ;;  %vm64_vm0 = vcmask 261120   ;;  %vm173_vm1 = vcmask 7168   ;;  %s289_s1 = inlined_call_operand.vmem [shape: bf16[32,512], index: 1, kind: input, shape index: {}]   ;;  %s290_s0 = inlined_call_operand.vmem [shape: bf16[8,32], index: 0, kind: input, shape index: {}]   ;;  %s291_s2 = inlined_call_operand.vmem [shape: bf16[8,512], index: 2, kind: output, shape index: {0}]   ;;  %s292_s3 = inlined_call_operand.vmem [shape: f32[1,8,1], index: 3, kind: output, shape index: {1}]   ;;  %s293_s4 = inlined_call_operand.vmem [shape: f32[1,8,1], index: 4, kind: output, shape index: {2}]  }
   0x1   :  { %v212_v0 = vld [vmem:[%s289_s1 + $0x4] ss:$16 sps:$4 sm:$0xff]   ;;  %100 = vmatprep.mubr.bf16.mxu0 %v224_v1  ;;  %141 = vmatprep.mubr.bf16.mxu1 %v224_v1  ;;  %v214_v2 = vld [vmem:[%s289_s1 + $0xc] ss:$16 sps:$4 sm:$0xff]   ;;  %v216_v3 = vld [vmem:[%s289_s1] ss:$16 sps:$4 sm:$0xff]  }
   0x2   :  { %68 = vmatprep.subr.bf16.mxu0 %v212_v0  ;;  %v217_v4 = vld [vmem:[%s289_s1 + $0x8] ss:$16 sps:$4 sm:$0xff]   ;;  %109 = vmatprep.subr.bf16.mxu1 %v214_v2  ;;  %v218_v5 = vld [vmem:[%s289_s1 + $0x24] ss:$16 sps:$4 sm:$0xff]   ;;  %v220_v6 = vld [vmem:[%s289_s1 + $0x2c] ss:$16 sps:$4 sm:$0xff]  }
   0x3   :  { %69 = vmatpush1.bf16.msra.mxu0 %v216_v3  ;;  %110 = vmatpush1.bf16.msra.mxu1 %v217_v4  ;;  %v222_v7 = vld [vmem:[%s289_s1 + $0x20] ss:$16 sps:$4 sm:$0xff]   ;;  %v223_v8 = vld [vmem:[%s289_s1 + $0x28] ss:$16 sps:$4 sm:$0xff]  }
   0x4   :  { %70 = vmatprep.subr.bf16.mxu0 %v218_v5  ;;  %111 = vmatprep.subr.bf16.mxu1 %v220_v6  ;;  %v15_v9 = vld [vmem:[%s290_s0] sm:$0xf] }
   0x7   :  { %71 = vmatpush1.bf16.msra.mxu0 %v222_v7  ;;  %112 = vmatpush1.bf16.msra.mxu1 %v223_v8 }
   0xa   :  { %205 = vmatmul.mubr.msk.bf16.vlgmr.msra.gmra.mrb[0].mxu0 %vm64_vm0, %v15_v9  ;;  %206 = vmatmul.mubr.msk.bf16.vlgmr.msra.gmra.mrb[0].mxu1 %vm64_vm0, %v15_v9 }
  0xdd   :  { %v102_v10 = vpop.f32.mrb[0].mxu0  ;;  %v143_v11 = vpop.f32.mrb[0].mxu1 }
  0xde   :  { %v175_v12 = vmul.f32 %v102_v10, %v102_v10  ;;  %v177_v13 = vmul.f32 %v143_v11, %v143_v11  ;;  %v104_v14 = vpop.f32.mrb[1].mxu0  ;;  %v145_v15 = vpop.f32.mrb[1].mxu1 }
  0xdf   :  { %v209_v16 = vpack.c.bf16 %v104_v14, %v102_v10  ;;  %v168_v17 = vadd.f32 %v104_v14, %v102_v10  ;;  %v176_v18 = vmul.f32 %v104_v14, %v104_v14  ;;  %v210_v19 = vpack.c.bf16 %v145_v15, %v143_v11  ;;  %v106_v20 = vpop.f32.mrb[2].mxu0  ;;  %v147_v21 = vpop.f32.mrb[2].mxu1 }
  0xe0   :  { %v107_v22 = vpop.f32.mrb[3].mxu0  ;;  %v148_v23 = vpop.f32.mrb[3].mxu1  ;;  %v178_v27 = vmul.f32 %v145_v15, %v145_v15 }
  0xe1   :  { %166 = vst [vmem:[%s291_s2] sm:$0xff] %v209_v16  ;;  %167 = vst [vmem:[%s291_s2 + $0x8] sm:$0xff] %v210_v19  ;;  %v169_v24 = vadd.f32 %v168_v17, %v143_v11  ;;  %v179_v25 = vadd.f32 %v176_v18, %v175_v12 }
  0xe3   :  { %v170_v26 = vadd.f32 %v169_v24, %v145_v15  ;;  %v180_v28 = vadd.f32 %v179_v25, %v177_v13 }
  0xe5   :  { %171 = vadd.xlane.f32.xlu0 %v170_v26  ;;  %v181_v29 = vadd.f32 %v180_v28, %v178_v27 }
  0xe9   :  { %182 = vadd.xlane.f32.xlu0 %v181_v29 }
 0x172   :  { %v172_v30 = vpop.xlane.xlu0 %171 }
 0x173   :  { %174 = vst.msk [vmem:[%s292_s3] sm:$0xff] %vm173_vm1, %v172_v30 }
 0x176   :  { %v183_v31 = vpop.xlane.xlu0 %182 }
 0x177   :  { %184 = vst.msk [vmem:[%s293_s4] sm:$0xff] %vm173_vm1, %v183_v31 }

// kernel: costregnet_small_forward.52
= control target key start
LH: loop header
LB: loop body
LE: loop exit
PB: predicated region body
PF: predicated region fallthrough
CT: control target
= control target key end

     0   :  { %v190_v1 = vmov 0   ;;  %vm40_vm0 = vcmask 130048   ;;  %vm149_vm1 = vcmask 7168   ;;  %s243_s1 = inlined_call_operand.vmem [shape: bf16[16,512], index: 1, kind: input, shape index: {}]   ;;  %s244_s0 = inlined_call_operand.vmem [shape: bf16[8,16], index: 0, kind: input, shape index: {}]   ;;  %s245_s2 = inlined_call_operand.vmem [shape: bf16[8,512], index: 2, kind: output, shape index: {0}]   ;;  %s246_s3 = inlined_call_operand.vmem [shape: f32[1,8,1], index: 3, kind: output, shape index: {1}]   ;;  %s247_s4 = inlined_call_operand.vmem [shape: f32[1,8,1], index: 4, kind: output, shape index: {2}]  }
   0x1   :  { %v184_v0 = vld [vmem:[%s243_s1 + $0x4] ss:$16 sps:$4 sm:$0xff]   ;;  %76 = vmatprep.mubr.bf16.mxu0 %v190_v1  ;;  %117 = vmatprep.mubr.bf16.mxu1 %v190_v1  ;;  %v186_v2 = vld [vmem:[%s243_s1 + $0xc] ss:$16 sps:$4 sm:$0xff]   ;;  %v188_v3 = vld [vmem:[%s243_s1] ss:$16 sps:$4 sm:$0xff]  }
   0x2   :  { %44 = vmatprep.subr.bf16.mxu0 %v184_v0  ;;  %v189_v4 = vld [vmem:[%s243_s1 + $0x8] ss:$16 sps:$4 sm:$0xff]   ;;  %85 = vmatprep.subr.bf16.mxu1 %v186_v2  ;;  %v15_v5 = vld [vmem:[%s244_s0] sm:$0xf] }
   0x3   :  { %45 = vmatpush1.bf16.msra.mxu0 %v188_v3  ;;  %86 = vmatpush1.bf16.msra.mxu1 %v189_v4 }
   0x6   :  { %177 = vmatmul.mubr.msk.bf16.vlgmr.msra.gmra.mrb[0].mxu0 %vm40_vm0, %v15_v5  ;;  %178 = vmatmul.mubr.msk.bf16.vlgmr.msra.gmra.mrb[0].mxu1 %vm40_vm0, %v15_v5 }
  0xd9   :  { %v78_v6 = vpop.f32.mrb[0].mxu0  ;;  %v119_v7 = vpop.f32.mrb[0].mxu1 }
  0xda   :  { %v151_v8 = vmul.f32 %v78_v6, %v78_v6  ;;  %v153_v9 = vmul.f32 %v119_v7, %v119_v7  ;;  %v80_v10 = vpop.f32.mrb[1].mxu0  ;;  %v121_v11 = vpop.f32.mrb[1].mxu1 }
  0xdb   :  { %v181_v12 = vpack.c.bf16 %v80_v10, %v78_v6  ;;  %v144_v13 = vadd.f32 %v80_v10, %v78_v6  ;;  %v152_v14 = vmul.f32 %v80_v10, %v80_v10  ;;  %v182_v15 = vpack.c.bf16 %v121_v11, %v119_v7  ;;  %v82_v16 = vpop.f32.mrb[2].mxu0  ;;  %v123_v17 = vpop.f32.mrb[2].mxu1 }
  0xdc   :  { %v83_v18 = vpop.f32.mrb[3].mxu0  ;;  %v124_v19 = vpop.f32.mrb[3].mxu1  ;;  %v154_v23 = vmul.f32 %v121_v11, %v121_v11 }
  0xdd   :  { %142 = vst [vmem:[%s245_s2] sm:$0xff] %v181_v12  ;;  %143 = vst [vmem:[%s245_s2 + $0x8] sm:$0xff] %v182_v15  ;;  %v145_v20 = vadd.f32 %v144_v13, %v119_v7  ;;  %v155_v21 = vadd.f32 %v152_v14, %v151_v8 }
  0xdf   :  { %v146_v22 = vadd.f32 %v145_v20, %v121_v11  ;;  %v156_v24 = vadd.f32 %v155_v21, %v153_v9 }
  0xe1   :  { %147 = vadd.xlane.f32.xlu0 %v146_v22  ;;  %v157_v25 = vadd.f32 %v156_v24, %v154_v23 }
  0xe5   :  { %158 = vadd.xlane.f32.xlu0 %v157_v25 }
 0x16e   :  { %v148_v26 = vpop.xlane.xlu0 %147 }
 0x16f   :  { %150 = vst.msk [vmem:[%s246_s3] sm:$0xff] %vm149_vm1, %v148_v26 }
 0x172   :  { %v159_v27 = vpop.xlane.xlu0 %158 }
 0x173   :  { %160 = vst.msk [vmem:[%s247_s4] sm:$0xff] %vm149_vm1, %v159_v27 }

// kernel: costregnet_small_forward.60
= control target key start
LH: loop header
LB: loop body
LE: loop exit
PB: predicated region body
PF: predicated region fallthrough
CT: control target
= control target key end

     0   :  { %s560_s15 = smov 0   ;;  %s655_s0 = inlined_call_operand.vmem [shape: bf16[8,4096], index: 0, kind: input, shape index: {}]   ;;  %s656_s1 = inlined_call_operand.vmem [shape: f32[8,1], index: 1, kind: input, shape index: {}]   ;;  %s657_s2 = inlined_call_operand.vmem [shape: f32[8,1], index: 2, kind: input, shape index: {}]   ;;  %s658_s3 = inlined_call_operand.vmem [shape: bf16[8,4096], index: 3, kind: input, shape index: {}]   ;;  %s659_s4 = inlined_call_operand.vmem [shape: bf16[8,4096], index: 4, kind: output, shape index: {}]  }
   0x1 LB: > { %s487_s16 = sadd.s32 4294967295, %s532_s15   ;;  %p491_p0 = scmp.ge.s32.totalorder %s532_s15, 1  ;;  %s532_s15 = sphi %s560_s15, %s14_s15  }
   0x2   : > { %p174_p1 = scmp.lt.s32.totalorder %s532_s15, 3 }
   0x4   : > { %p175_p2 = pnand %p491_p0, %p174_p1 }
   0x5   : > { %v247_v0 = vld [vmem:[%s656_s1] sm:$0xff] (!%p175_p2)  ;;  %v534_v1 = vmov (!%p175_p2), 0   ;;  %s492_s21 = sshll.u32 (!%p175_p2), %s487_s16, 4 }
   0x6   : > { %178 = sbr.rel (%p175_p2) target bundleno = 157 (0x9d), region = 36  ;;  %525 = vset.pattern.permute.xlu0 (!%p175_p2), %v534_v1  ;;  %v269_v2 = vld [vmem:[%s657_s2] sm:$0xff] (!%p175_p2)  ;;  %p206_p3 = scmp.lt.s32.totalorder (!%p175_p2), %s492_s21, 31 }
   0x7   : > { %250 = vperm.xlu0 (!%p175_p2), %525, %v247_v0  }
   0xb   : > { %272 = vperm.xlu0 (!%p175_p2), %525, %v269_v2  }
   0xd   : > { %s661_s21 = smov (!%p206_p3, %s492_s21), 31 }
   0xe   : > { %s574_s22 = sshll.u32 %s661_s21, 2 }
   0xf   : > { %s209_s25 = scalar_lea.vmem %s655_s0, %s574_s22  ;;  %s215_s28 = scalar_lea.vmem %s658_s3, %s574_s22 }
  0x10   : > { %v223_v3 = vld [vmem:[%s209_s25] sm:$0xff]  ;;  %v224_v4 = vld [vmem:[%s209_s25 + $0x8] sm:$0xff]  ;;  %v225_v5 = vld [vmem:[%s209_s25 + $0x10] sm:$0xff]  ;;  %s221_s5 = scalar_lea.vmem %s659_s4, %s574_s22 }
  0x11   : > { %v226_v6 = vld [vmem:[%s209_s25 + $0x18] sm:$0xff]  ;;  %v227_v7 = vld [vmem:[%s209_s25 + $0x20] sm:$0xff]  ;;  %v228_v8 = vld [vmem:[%s209_s25 + $0x28] sm:$0xff]  ;;  %v231_v11 = vunpack.c.l.bf16 %v223_v3  ;;  %v232_v12 = vunpack.c.h.bf16 %v223_v3  ;;  %v233_v13 = vunpack.c.l.bf16 %v224_v4  ;;  %v234_v14 = vunpack.c.h.bf16 %v224_v4 }
  0x12   : > { %v229_v9 = vld [vmem:[%s209_s25 + $0x30] sm:$0xff]  ;;  %v230_v10 = vld [vmem:[%s209_s25 + $0x38] sm:$0xff]  ;;  %v235_v15 = vunpack.c.l.bf16 %v225_v5  ;;  %v236_v16 = vunpack.c.h.bf16 %v225_v5  ;;  %v237_v17 = vunpack.c.l.bf16 %v226_v6  ;;  %v238_v18 = vunpack.c.h.bf16 %v226_v6  ;;  %v584_v19 = vld [vmem:[%s215_s28] sm:$0xff] }
  0x13   : > { %v586_v20 = vld [vmem:[%s215_s28 + $0x8] sm:$0xff]  ;;  %v239_v21 = vunpack.c.l.bf16 %v227_v7  ;;  %v240_v22 = vunpack.c.h.bf16 %v227_v7  ;;  %v241_v23 = vunpack.c.l.bf16 %v228_v8  ;;  %v242_v24 = vunpack.c.h.bf16 %v228_v8  ;;  %v588_v25 = vld [vmem:[%s215_s28 + $0x10] sm:$0xff]  ;;  %v590_v26 = vld [vmem:[%s215_s28 + $0x18] sm:$0xff] }
  0x14   : > { %v243_v27 = vunpack.c.l.bf16 %v229_v9  ;;  %v244_v28 = vunpack.c.h.bf16 %v229_v9  ;;  %v245_v29 = vunpack.c.l.bf16 %v230_v10  ;;  %v246_v30 = vunpack.c.h.bf16 %v230_v10  ;;  %v592_v31 = vld [vmem:[%s215_s28 + $0x20] sm:$0xff]  ;;  %v594_v32 = vld [vmem:[%s215_s28 + $0x28] sm:$0xff]  ;;  %v596_v33 = vld [vmem:[%s215_s28 + $0x30] sm:$0xff] }
  0x15   : > { %v598_v34 = vld [vmem:[%s215_s28 + $0x38] sm:$0xff]  ;;  %v315_v35 = vunpack.c.l.bf16 %v584_v19  ;;  %v316_v36 = vunpack.c.h.bf16 %v584_v19  ;;  %v317_v37 = vunpack.c.l.bf16 %v586_v20  ;;  %v318_v38 = vunpack.c.h.bf16 %v586_v20 }
  0x16   : > { %v319_v39 = vunpack.c.l.bf16 %v588_v25  ;;  %v320_v40 = vunpack.c.h.bf16 %v588_v25  ;;  %v321_v41 = vunpack.c.l.bf16 %v590_v26  ;;  %v322_v42 = vunpack.c.h.bf16 %v590_v26 }
  0x17   : > { %v323_v43 = vunpack.c.l.bf16 %v592_v31  ;;  %v324_v44 = vunpack.c.h.bf16 %v592_v31  ;;  %v325_v45 = vunpack.c.l.bf16 %v594_v32  ;;  %v326_v46 = vunpack.c.h.bf16 %v594_v32 }
  0x18   : > { %v327_v48 = vunpack.c.l.bf16 %v596_v33  ;;  %v328_v49 = vunpack.c.h.bf16 %v596_v33  ;;  %v329_v50 = vunpack.c.l.bf16 %v598_v34  ;;  %v330_v51 = vunpack.c.h.bf16 %v598_v34 }
  0x86   : > { %v251_v47 = vpop.permute.xlu0 %250 }
  0x87   : > { %v253_v52 = vmul.f32 %v251_v47, %v231_v11  ;;  %v254_v53 = vmul.f32 %v251_v47, %v232_v12  ;;  %v255_v54 = vmul.f32 %v251_v47, %v233_v13  ;;  %v256_v55 = vmul.f32 %v251_v47, %v234_v14 }
  0x88   : > { %v257_v56 = vmul.f32 %v251_v47, %v235_v15  ;;  %v258_v57 = vmul.f32 %v251_v47, %v236_v16  ;;  %v259_v58 = vmul.f32 %v251_v47, %v237_v17  ;;  %v260_v59 = vmul.f32 %v251_v47, %v238_v18 }
  0x89   : > { %v261_v60 = vmul.f32 %v251_v47, %v239_v21  ;;  %v262_v61 = vmul.f32 %v251_v47, %v240_v22  ;;  %v263_v62 = vmul.f32 %v251_v47, %v241_v23  ;;  %v264_v63 = vmul.f32 %v251_v47, %v242_v24 }
  0x8a   : > { %v273_v0 = vpop.permute.xlu0 %272  ;;  %v265_v1 = vmul.f32 %v251_v47, %v243_v27  ;;  %v266_v2 = vmul.f32 %v251_v47, %v244_v28  ;;  %v267_v3 = vmul.f32 %v251_v47, %v245_v29  ;;  %v268_v4 = vmul.f32 %v251_v47, %v246_v30 }
  0x8b   : > { %v275_v5 = vadd.f32 %v273_v0, %v253_v52  ;;  %v276_v6 = vadd.f32 %v273_v0, %v254_v53  ;;  %v277_v7 = vadd.f32 %v273_v0, %v255_v54  ;;  %v278_v8 = vadd.f32 %v273_v0, %v256_v55 }
  0x8c   : > { %v279_v9 = vadd.f32 %v273_v0, %v257_v56  ;;  %v280_v10 = vadd.f32 %v273_v0, %v258_v57  ;;  %v281_v11 = vadd.f32 %v273_v0, %v259_v58  ;;  %v282_v12 = vadd.f32 %v273_v0, %v260_v59 }
  0x8d   : > { %v283_v13 = vadd.f32 %v273_v0, %v261_v60  ;;  %v284_v14 = vadd.f32 %v273_v0, %v262_v61  ;;  %v285_v15 = vadd.f32 %v273_v0, %v263_v62  ;;  %v286_v16 = vadd.f32 %v273_v0, %v264_v63 }
  0x8e   : > { %v287_v17 = vadd.f32 %v273_v0, %v265_v1  ;;  %v288_v18 = vadd.f32 %v273_v0, %v266_v2  ;;  %v289_v21 = vadd.f32 %v273_v0, %v267_v3  ;;  %v290_v22 = vadd.f32 %v273_v0, %v268_v4 }
  0x8f   : > { %v291_v23 = vmax.f32 %v275_v5, 0.0  ;;  %v292_v24 = vmax.f32 %v276_v6, 0.0  ;;  %v293_v27 = vmax.f32 %v277_v7, 0.0  ;;  %v294_v28 = vmax.f32 %v278_v8, 0.0 }
  0x90   : > { %v295_v29 = vmax.f32 %v279_v9, 0.0  ;;  %v296_v30 = vmax.f32 %v280_v10, 0.0  ;;  %v297_v47 = vmax.f32 %v281_v11, 0.0  ;;  %v298_v52 = vmax.f32 %v282_v12, 0.0 }
  0x91   : > { %v299_v53 = vmax.f32 %v283_v13, 0.0  ;;  %v300_v54 = vmax.f32 %v284_v14, 0.0  ;;  %v301_v55 = vmax.f32 %v285_v15, 0.0  ;;  %v302_v56 = vmax.f32 %v286_v16, 0.0 }
  0x92   : > { %v303_v57 = vmax.f32 %v287_v17, 0.0  ;;  %v304_v58 = vmax.f32 %v288_v18, 0.0  ;;  %v305_v59 = vmax.f32 %v289_v21, 0.0  ;;  %v306_v60 = vmax.f32 %v290_v22, 0.0 }
  0x93   : > { %v331_v61 = vadd.f32 %v315_v35, %v291_v23  ;;  %v332_v62 = vadd.f32 %v316_v36, %v292_v24  ;;  %v333_v63 = vadd.f32 %v317_v37, %v293_v27  ;;  %v334_v0 = vadd.f32 %v318_v38, %v294_v28 }
  0x94   : > { %v335_v1 = vadd.f32 %v319_v39, %v295_v29  ;;  %v336_v2 = vadd.f32 %v320_v40, %v296_v30  ;;  %v337_v3 = vadd.f32 %v321_v41, %v297_v47  ;;  %v338_v35 = vadd.f32 %v322_v42, %v298_v52 }
  0x95   : > { %v339_v19 = vadd.f32 %v323_v43, %v299_v53  ;;  %v340_v36 = vadd.f32 %v324_v44, %v300_v54  ;;  %v341_v20 = vadd.f32 %v325_v45, %v301_v55  ;;  %v342_v37 = vadd.f32 %v326_v46, %v302_v56 }
  0x96   : > { %v343_v25 = vadd.f32 %v327_v48, %v303_v57  ;;  %v344_v26 = vadd.f32 %v328_v49, %v304_v58  ;;  %v345_v31 = vadd.f32 %v329_v50, %v305_v59  ;;  %v346_v38 = vadd.f32 %v330_v51, %v306_v60 }
  0x97   : > { %v508_v39 = vpack.c.bf16 %v332_v62, %v331_v61  ;;  %v509_v40 = vpack.c.bf16 %v334_v0, %v333_v63  ;;  %v510_v32 = vpack.c.bf16 %v336_v2, %v335_v1  ;;  %v511_v41 = vpack.c.bf16 %v338_v35, %v337_v3 }
  0x98   : > { %v512_v42 = vpack.c.bf16 %v340_v36, %v339_v19  ;;  %v513_v43 = vpack.c.bf16 %v342_v37, %v341_v20  ;;  %v514_v44 = vpack.c.bf16 %v344_v26, %v343_v25  ;;  %v515_v45 = vpack.c.bf16 %v346_v38, %v345_v31 }
  0x99   : > { %411 = vst [vmem:[%s221_s5] sm:$0xff] %v508_v39  ;;  %412 = vst [vmem:[%s221_s5 + $0x8] sm:$0xff] %v509_v40 }
  0x9a   : > { %413 = vst [vmem:[%s221_s5 + $0x10] sm:$0xff] %v510_v32  ;;  %414 = vst [vmem:[%s221_s5 + $0x18] sm:$0xff] %v511_v41 }
  0x9b   : > { %415 = vst [vmem:[%s221_s5 + $0x20] sm:$0xff] %v512_v42  ;;  %416 = vst [vmem:[%s221_s5 + $0x28] sm:$0xff] %v513_v43 }
  0x9c   : > { %417 = vst [vmem:[%s221_s5 + $0x30] sm:$0xff] %v514_v44  ;;  %418 = vst [vmem:[%s221_s5 + $0x38] sm:$0xff] %v515_v45 }
  0x9d PF: > { %s14_s15 = sadd.s32 1, %s532_s15  }
  0x9e   : > { %p11_p4 = scmp.ge.s32.totalorder %s14_s15, 4  }
  0xa0   :  { %13 = sbr.rel (!%p11_p4) target bundleno = 1 (0x1), region = 69 }

// kernel: costregnet_small_forward.61
= control target key start
LH: loop header
LB: loop body
LE: loop exit
PB: predicated region body
PF: predicated region fallthrough
CT: control target
= control target key end

     0   :  { %s2696_s9 = smov 0   ;;  %s2698_s10 = smov 0   ;;  %s3473_s0 = inlined_call_operand.vmem [shape: bf16[8,216], index: 0, kind: input, shape index: {}]   ;;  %s3474_s1 = inlined_call_operand.vmem [shape: bf16[216,4096], index: 1, kind: input, shape index: {}]   ;;  %s3475_s2 = inlined_call_operand.vmem [shape: f32[8,4096], index: 2, kind: output, shape index: {}]  }
   0x1   :  { %s2700_s11 = smov 0  }
   0x2 LB: > { %s2359_s12 = sadd.s32 4294967295, %s2679_s11   ;;  %s2713_s13 = sadd.s32 1, %s2679_s11   ;;  %s2679_s11 = sphi %s2700_s11, %s3478_s11   ;;  %s2675_s10 = sphi %s2698_s10, %s3477_s10   ;;  %s2671_s9 = sphi %s2696_s9, %s3476_s9  }
   0x3   : > { %s37_s14 = ssub.s32 %s2679_s11, %s2713_s13  ;;  %s40_s15 = sadd.s32 1, %s2675_s10 }
   0x4   : > { %p38_p0 = scmp.eq.s32.totalorder %s37_s14, 0  ;;  %p47_p1 = scmp.ne.s32.totalorder %s2675_s10, %s2671_s9 }
   0x5   : > { %p48_p2 = scmp.eq.s32.totalorder %s2679_s11, 0  ;;  %p2362_p4 = scmp.ge.s32.totalorder %s2679_s11, 2 }
   0x6   : > { %s2722_s16 = scalar_select %p38_p0, %s2675_s10, %s40_s15  }
   0x7   : > { %p49_p3 = por %p48_p2, %p47_p1  ;;  %102 = sbr.rel (%p2362_p4) target bundleno = 127 (0x7f), region = 20 }
   0xe   : > { %105 = sbr.rel (!%p49_p3) target bundleno = 127 (0x7f), region = 24  ;;  %s107_s17 = sand.u32 (%p49_p3), 1, %s2675_s10  }
   0xf   : > { %s2612_s18 = sshll.u32 (%p49_p3), %s2679_s11, 6  ;;  %s2613_s19 = smul.u32 (%p49_p3), 1728, %s107_s17 }
  0x10   : > { %s2730_s22 = scalar_lea.vmem (%p49_p3), %s3474_s1, %s2612_s18 }
  0x11   : > { %v125_v0 = vld [vmem:[%s2730_s22] sm:$0xff] (%p49_p3)  ;;  %v127_v1 = vld [vmem:[%s2730_s22 + $0x8] sm:$0xff] (%p49_p3)  ;;  %v129_v2 = vld [vmem:[%s2730_s22 + $0x10] sm:$0xff] (%p49_p3)  ;;  %s2738_s23 = scalar_lea.vmem (%p49_p3), [#allocation2], %s2613_s19 }
  0x12   : > { %v131_v3 = vld [vmem:[%s2730_s22 + $0x18] sm:$0xff] (%p49_p3)  ;;  %v133_v4 = vld [vmem:[%s2730_s22 + $0x20] sm:$0xff] (%p49_p3)  ;;  %v135_v5 = vld [vmem:[%s2730_s22 + $0x28] sm:$0xff] (%p49_p3)  ;;  %126 = vst [vmem:[%s2738_s23] sm:$0xff] (%p49_p3), %v125_v0 }
  0x13   : > { %128 = vst [vmem:[%s2738_s23 + $0x8] sm:$0xff] (%p49_p3), %v127_v1  ;;  %130 = vst [vmem:[%s2738_s23 + $0x10] sm:$0xff] (%p49_p3), %v129_v2  ;;  %v137_v6 = vld [vmem:[%s2730_s22 + $0x30] sm:$0xff] (%p49_p3)  ;;  %v139_v7 = vld [vmem:[%s2730_s22 + $0x38] sm:$0xff] (%p49_p3) }
  0x14   : > { %132 = vst [vmem:[%s2738_s23 + $0x18] sm:$0xff] (%p49_p3), %v131_v3  ;;  %134 = vst [vmem:[%s2738_s23 + $0x20] sm:$0xff] (%p49_p3), %v133_v4  ;;  %v141_v8 = vld [vmem:[%s2730_s22 + $0x80] sm:$0xff] (%p49_p3)  ;;  %v143_v9 = vld [vmem:[%s2730_s22 + $0x88] sm:$0xff] (%p49_p3) }
  0x15   : > { %136 = vst [vmem:[%s2738_s23 + $0x28] sm:$0xff] %v135_v5  ;;  %138 = vst [vmem:[%s2738_s23 + $0x30] sm:$0xff] %v137_v6  ;;  %v145_v10 = vld [vmem:[%s2730_s22 + $0x90] sm:$0xff]  ;;  %v147_v11 = vld [vmem:[%s2730_s22 + $0x98] sm:$0xff] }
  0x16   : > { %140 = vst [vmem:[%s2738_s23 + $0x38] sm:$0xff] %v139_v7  ;;  %142 = vst [vmem:[%s2738_s23 + $0x40] sm:$0xff] %v141_v8  ;;  %v149_v12 = vld [vmem:[%s2730_s22 + $0xa0] sm:$0xff]  ;;  %v151_v13 = vld [vmem:[%s2730_s22 + $0xa8] sm:$0xff] }
  0x17   : > { %144 = vst [vmem:[%s2738_s23 + $0x48] sm:$0xff] %v143_v9  ;;  %146 = vst [vmem:[%s2738_s23 + $0x50] sm:$0xff] %v145_v10  ;;  %v153_v14 = vld [vmem:[%s2730_s22 + $0xb0] sm:$0xff]  ;;  %v155_v15 = vld [vmem:[%s2730_s22 + $0xb8] sm:$0xff] }
  0x18   : > { %148 = vst [vmem:[%s2738_s23 + $0x58] sm:$0xff] %v147_v11  ;;  %150 = vst [vmem:[%s2738_s23 + $0x60] sm:$0xff] %v149_v12  ;;  %v157_v16 = vld [vmem:[%s2730_s22 + $0x100] sm:$0xff]  ;;  %v159_v17 = vld [vmem:[%s2730_s22 + $0x108] sm:$0xff] }
  0x19   : > { %152 = vst [vmem:[%s2738_s23 + $0x68] sm:$0xff] %v151_v13  ;;  %154 = vst [vmem:[%s2738_s23 + $0x70] sm:$0xff] %v153_v14  ;;  %v161_v18 = vld [vmem:[%s2730_s22 + $0x110] sm:$0xff]  ;;  %v163_v19 = vld [vmem:[%s2730_s22 + $0x118] sm:$0xff] }
  0x1a   : > { %156 = vst [vmem:[%s2738_s23 + $0x78] sm:$0xff] %v155_v15  ;;  %158 = vst [vmem:[%s2738_s23 + $0x80] sm:$0xff] %v157_v16  ;;  %v165_v20 = vld [vmem:[%s2730_s22 + $0x120] sm:$0xff]  ;;  %v167_v21 = vld [vmem:[%s2730_s22 + $0x128] sm:$0xff] }
  0x1b   : > { %160 = vst [vmem:[%s2738_s23 + $0x88] sm:$0xff] %v159_v17  ;;  %162 = vst [vmem:[%s2738_s23 + $0x90] sm:$0xff] %v161_v18  ;;  %v169_v22 = vld [vmem:[%s2730_s22 + $0x130] sm:$0xff]  ;;  %v171_v23 = vld [vmem:[%s2730_s22 + $0x138] sm:$0xff] }
  0x1c   : > { %164 = vst [vmem:[%s2738_s23 + $0x98] sm:$0xff] %v163_v19  ;;  %166 = vst [vmem:[%s2738_s23 + $0xa0] sm:$0xff] %v165_v20  ;;  %v173_v24 = vld [vmem:[%s2730_s22 + $0x180] sm:$0xff]  ;;  %v175_v25 = vld [vmem:[%s2730_s22 + $0x188] sm:$0xff] }
  0x1d   : > { %168 = vst [vmem:[%s2738_s23 + $0xa8] sm:$0xff] %v167_v21  ;;  %170 = vst [vmem:[%s2738_s23 + $0xb0] sm:$0xff] %v169_v22  ;;  %v177_v26 = vld [vmem:[%s2730_s22 + $0x190] sm:$0xff]  ;;  %v179_v27 = vld [vmem:[%s2730_s22 + $0x198] sm:$0xff] }
  0x1e   : > { %172 = vst [vmem:[%s2738_s23 + $0xb8] sm:$0xff] %v171_v23  ;;  %174 = vst [vmem:[%s2738_s23 + $0xc0] sm:$0xff] %v173_v24  ;;  %v181_v28 = vld [vmem:[%s2730_s22 + $0x1a0] sm:$0xff]  ;;  %v183_v29 = vld [vmem:[%s2730_s22 + $0x1a8] sm:$0xff] }
  0x1f   : > { %176 = vst [vmem:[%s2738_s23 + $0xc8] sm:$0xff] %v175_v25  ;;  %178 = vst [vmem:[%s2738_s23 + $0xd0] sm:$0xff] %v177_v26  ;;  %v185_v30 = vld [vmem:[%s2730_s22 + $0x1b0] sm:$0xff]  ;;  %v187_v31 = vld [vmem:[%s2730_s22 + $0x1b8] sm:$0xff] }
  0x20   : > { %180 = vst [vmem:[%s2738_s23 + $0xd8] sm:$0xff] %v179_v27  ;;  %182 = vst [vmem:[%s2738_s23 + $0xe0] sm:$0xff] %v181_v28  ;;  %v189_v32 = vld [vmem:[%s2730_s22 + $0x200] sm:$0xff]  ;;  %v191_v33 = vld [vmem:[%s2730_s22 + $0x208] sm:$0xff] }
  0x21   : > { %184 = vst [vmem:[%s2738_s23 + $0xe8] sm:$0xff] %v183_v29  ;;  %186 = vst [vmem:[%s2738_s23 + $0xf0] sm:$0xff] %v185_v30  ;;  %v193_v34 = vld [vmem:[%s2730_s22 + $0x210] sm:$0xff]  ;;  %v195_v35 = vld [vmem:[%s2730_s22 + $0x218] sm:$0xff] }
  0x22   : > { %188 = vst [vmem:[%s2738_s23 + $0xf8] sm:$0xff] %v187_v31  ;;  %190 = vst [vmem:[%s2738_s23 + $0x100] sm:$0xff] %v189_v32  ;;  %v197_v36 = vld [vmem:[%s2730_s22 + $0x220] sm:$0xff]  ;;  %v199_v37 = vld [vmem:[%s2730_s22 + $0x228] sm:$0xff] }
  0x23   : > { %192 = vst [vmem:[%s2738_s23 + $0x108] sm:$0xff] %v191_v33  ;;  %194 = vst [vmem:[%s2738_s23 + $0x110] sm:$0xff] %v193_v34  ;;  %v201_v38 = vld [vmem:[%s2730_s22 + $0x230] sm:$0xff]  ;;  %v203_v39 = vld [vmem:[%s2730_s22 + $0x238] sm:$0xff] }
  0x24   : > { %196 = vst [vmem:[%s2738_s23 + $0x118] sm:$0xff] %v195_v35  ;;  %198 = vst [vmem:[%s2738_s23 + $0x120] sm:$0xff] %v197_v36  ;;  %v205_v40 = vld [vmem:[%s2730_s22 + $0x280] sm:$0xff]  ;;  %v207_v41 = vld [vmem:[%s2730_s22 + $0x288] sm:$0xff] }
  0x25   : > { %200 = vst [vmem:[%s2738_s23 + $0x128] sm:$0xff] %v199_v37  ;;  %202 = vst [vmem:[%s2738_s23 + $0x130] sm:$0xff] %v201_v38  ;;  %v209_v42 = vld [vmem:[%s2730_s22 + $0x290] sm:$0xff]  ;;  %v211_v43 = vld [vmem:[%s2730_s22 + $0x298] sm:$0xff] }
  0x26   : > { %204 = vst [vmem:[%s2738_s23 + $0x138] sm:$0xff] %v203_v39  ;;  %206 = vst [vmem:[%s2738_s23 + $0x140] sm:$0xff] %v205_v40  ;;  %v213_v44 = vld [vmem:[%s2730_s22 + $0x2a0] sm:$0xff]  ;;  %v215_v45 = vld [vmem:[%s2730_s22 + $0x2a8] sm:$0xff] }
  0x27   : > { %208 = vst [vmem:[%s2738_s23 + $0x148] sm:$0xff] %v207_v41  ;;  %210 = vst [vmem:[%s2738_s23 + $0x150] sm:$0xff] %v209_v42  ;;  %v217_v46 = vld [vmem:[%s2730_s22 + $0x2b0] sm:$0xff]  ;;  %v219_v47 = vld [vmem:[%s2730_s22 + $0x2b8] sm:$0xff] }
  0x28   : > { %212 = vst [vmem:[%s2738_s23 + $0x158] sm:$0xff] %v211_v43  ;;  %214 = vst [vmem:[%s2738_s23 + $0x160] sm:$0xff] %v213_v44  ;;  %v221_v48 = vld [vmem:[%s2730_s22 + $0x300] sm:$0xff]  ;;  %v223_v49 = vld [vmem:[%s2730_s22 + $0x308] sm:$0xff] }
  0x29   : > { %216 = vst [vmem:[%s2738_s23 + $0x168] sm:$0xff] %v215_v45  ;;  %218 = vst [vmem:[%s2738_s23 + $0x170] sm:$0xff] %v217_v46  ;;  %v225_v50 = vld [vmem:[%s2730_s22 + $0x310] sm:$0xff]  ;;  %v227_v51 = vld [vmem:[%s2730_s22 + $0x318] sm:$0xff] }
  0x2a   : > { %220 = vst [vmem:[%s2738_s23 + $0x178] sm:$0xff] %v219_v47  ;;  %222 = vst [vmem:[%s2738_s23 + $0x180] sm:$0xff] %v221_v48  ;;  %v229_v52 = vld [vmem:[%s2730_s22 + $0x320] sm:$0xff]  ;;  %v231_v53 = vld [vmem:[%s2730_s22 + $0x328] sm:$0xff] }
  0x2b   : > { %224 = vst [vmem:[%s2738_s23 + $0x188] sm:$0xff] %v223_v49  ;;  %226 = vst [vmem:[%s2738_s23 + $0x190] sm:$0xff] %v225_v50  ;;  %v233_v54 = vld [vmem:[%s2730_s22 + $0x330] sm:$0xff]  ;;  %v235_v55 = vld [vmem:[%s2730_s22 + $0x338] sm:$0xff] }
  0x2c   : > { %228 = vst [vmem:[%s2738_s23 + $0x198] sm:$0xff] %v227_v51  ;;  %230 = vst [vmem:[%s2738_s23 + $0x1a0] sm:$0xff] %v229_v52  ;;  %v237_v56 = vld [vmem:[%s2730_s22 + $0x380] sm:$0xff]  ;;  %v239_v57 = vld [vmem:[%s2730_s22 + $0x388] sm:$0xff] }
  0x2d   : > { %232 = vst [vmem:[%s2738_s23 + $0x1a8] sm:$0xff] %v231_v53  ;;  %234 = vst [vmem:[%s2738_s23 + $0x1b0] sm:$0xff] %v233_v54  ;;  %v241_v58 = vld [vmem:[%s2730_s22 + $0x390] sm:$0xff]  ;;  %v243_v59 = vld [vmem:[%s2730_s22 + $0x398] sm:$0xff] }
  0x2e   : > { %236 = vst [vmem:[%s2738_s23 + $0x1b8] sm:$0xff] %v235_v55  ;;  %238 = vst [vmem:[%s2738_s23 + $0x1c0] sm:$0xff] %v237_v56  ;;  %v245_v60 = vld [vmem:[%s2730_s22 + $0x3a0] sm:$0xff]  ;;  %v247_v61 = vld [vmem:[%s2730_s22 + $0x3a8] sm:$0xff] }
  0x2f   : > { %240 = vst [vmem:[%s2738_s23 + $0x1c8] sm:$0xff] %v239_v57  ;;  %242 = vst [vmem:[%s2738_s23 + $0x1d0] sm:$0xff] %v241_v58  ;;  %v249_v62 = vld [vmem:[%s2730_s22 + $0x3b0] sm:$0xff]  ;;  %v251_v63 = vld [vmem:[%s2730_s22 + $0x3b8] sm:$0xff] }
  0x30   : > { %244 = vst [vmem:[%s2738_s23 + $0x1d8] sm:$0xff] %v243_v59  ;;  %246 = vst [vmem:[%s2738_s23 + $0x1e0] sm:$0xff] %v245_v60  ;;  %v253_v0 = vld [vmem:[%s2730_s22 + $0x400] sm:$0xff]  ;;  %v255_v1 = vld [vmem:[%s2730_s22 + $0x408] sm:$0xff] }
  0x31   : > { %248 = vst [vmem:[%s2738_s23 + $0x1e8] sm:$0xff] %v247_v61  ;;  %250 = vst [vmem:[%s2738_s23 + $0x1f0] sm:$0xff] %v249_v62  ;;  %v257_v2 = vld [vmem:[%s2730_s22 + $0x410] sm:$0xff]  ;;  %v259_v3 = vld [vmem:[%s2730_s22 + $0x418] sm:$0xff] }
  0x32   : > { %252 = vst [vmem:[%s2738_s23 + $0x1f8] sm:$0xff] %v251_v63  ;;  %254 = vst [vmem:[%s2738_s23 + $0x200] sm:$0xff] %v253_v0  ;;  %v261_v4 = vld [vmem:[%s2730_s22 + $0x420] sm:$0xff]  ;;  %v263_v5 = vld [vmem:[%s2730_s22 + $0x428] sm:$0xff] }
  0x33   : > { %256 = vst [vmem:[%s2738_s23 + $0x208] sm:$0xff] %v255_v1  ;;  %258 = vst [vmem:[%s2738_s23 + $0x210] sm:$0xff] %v257_v2  ;;  %v265_v6 = vld [vmem:[%s2730_s22 + $0x430] sm:$0xff]  ;;  %v267_v7 = vld [vmem:[%s2730_s22 + $0x438] sm:$0xff] }
  0x34   : > { %260 = vst [vmem:[%s2738_s23 + $0x218] sm:$0xff] %v259_v3  ;;  %262 = vst [vmem:[%s2738_s23 + $0x220] sm:$0xff] %v261_v4  ;;  %v269_v8 = vld [vmem:[%s2730_s22 + $0x480] sm:$0xff]  ;;  %v271_v9 = vld [vmem:[%s2730_s22 + $0x488] sm:$0xff] }
  0x35   : > { %264 = vst [vmem:[%s2738_s23 + $0x228] sm:$0xff] %v263_v5  ;;  %266 = vst [vmem:[%s2738_s23 + $0x230] sm:$0xff] %v265_v6  ;;  %v273_v10 = vld [vmem:[%s2730_s22 + $0x490] sm:$0xff]  ;;  %v275_v11 = vld [vmem:[%s2730_s22 + $0x498] sm:$0xff] }
  0x36   : > { %268 = vst [vmem:[%s2738_s23 + $0x238] sm:$0xff] %v267_v7  ;;  %270 = vst [vmem:[%s2738_s23 + $0x240] sm:$0xff] %v269_v8  ;;  %v277_v12 = vld [vmem:[%s2730_s22 + $0x4a0] sm:$0xff]  ;;  %v279_v13 = vld [vmem:[%s2730_s22 + $0x4a8] sm:$0xff] }
  0x37   : > { %272 = vst [vmem:[%s2738_s23 + $0x248] sm:$0xff] %v271_v9  ;;  %274 = vst [vmem:[%s2738_s23 + $0x250] sm:$0xff] %v273_v10  ;;  %v281_v14 = vld [vmem:[%s2730_s22 + $0x4b0] sm:$0xff]  ;;  %v283_v15 = vld [vmem:[%s2730_s22 + $0x4b8] sm:$0xff] }
  0x38   : > { %276 = vst [vmem:[%s2738_s23 + $0x258] sm:$0xff] %v275_v11  ;;  %278 = vst [vmem:[%s2738_s23 + $0x260] sm:$0xff] %v277_v12  ;;  %v285_v16 = vld [vmem:[%s2730_s22 + $0x500] sm:$0xff]  ;;  %v287_v17 = vld [vmem:[%s2730_s22 + $0x508] sm:$0xff] }
  0x39   : > { %280 = vst [vmem:[%s2738_s23 + $0x268] sm:$0xff] %v279_v13  ;;  %282 = vst [vmem:[%s2738_s23 + $0x270] sm:$0xff] %v281_v14  ;;  %v289_v18 = vld [vmem:[%s2730_s22 + $0x510] sm:$0xff]  ;;  %v291_v19 = vld [vmem:[%s2730_s22 + $0x518] sm:$0xff] }
  0x3a   : > { %284 = vst [vmem:[%s2738_s23 + $0x278] sm:$0xff] %v283_v15  ;;  %286 = vst [vmem:[%s2738_s23 + $0x280] sm:$0xff] %v285_v16  ;;  %v293_v20 = vld [vmem:[%s2730_s22 + $0x520] sm:$0xff]  ;;  %v295_v21 = vld [vmem:[%s2730_s22 + $0x528] sm:$0xff] }
  0x3b   : > { %288 = vst [vmem:[%s2738_s23 + $0x288] sm:$0xff] %v287_v17  ;;  %290 = vst [vmem:[%s2738_s23 + $0x290] sm:$0xff] %v289_v18  ;;  %v297_v22 = vld [vmem:[%s2730_s22 + $0x530] sm:$0xff]  ;;  %v299_v23 = vld [vmem:[%s2730_s22 + $0x538] sm:$0xff] }
  0x3c   : > { %292 = vst [vmem:[%s2738_s23 + $0x298] sm:$0xff] %v291_v19  ;;  %294 = vst [vmem:[%s2738_s23 + $0x2a0] sm:$0xff] %v293_v20  ;;  %v301_v24 = vld [vmem:[%s2730_s22 + $0x580] sm:$0xff]  ;;  %v303_v25 = vld [vmem:[%s2730_s22 + $0x588] sm:$0xff] }
  0x3d   : > { %296 = vst [vmem:[%s2738_s23 + $0x2a8] sm:$0xff] %v295_v21  ;;  %298 = vst [vmem:[%s2738_s23 + $0x2b0] sm:$0xff] %v297_v22  ;;  %v305_v26 = vld [vmem:[%s2730_s22 + $0x590] sm:$0xff]  ;;  %v307_v27 = vld [vmem:[%s2730_s22 + $0x598] sm:$0xff] }
  0x3e   : > { %300 = vst [vmem:[%s2738_s23 + $0x2b8] sm:$0xff] %v299_v23  ;;  %302 = vst [vmem:[%s2738_s23 + $0x2c0] sm:$0xff] %v301_v24  ;;  %v309_v28 = vld [vmem:[%s2730_s22 + $0x5a0] sm:$0xff]  ;;  %v311_v29 = vld [vmem:[%s2730_s22 + $0x5a8] sm:$0xff] }
  0x3f   : > { %304 = vst [vmem:[%s2738_s23 + $0x2c8] sm:$0xff] %v303_v25  ;;  %306 = vst [vmem:[%s2738_s23 + $0x2d0] sm:$0xff] %v305_v26  ;;  %v313_v30 = vld [vmem:[%s2730_s22 + $0x5b0] sm:$0xff]  ;;  %v315_v31 = vld [vmem:[%s2730_s22 + $0x5b8] sm:$0xff] }
  0x40   : > { %308 = vst [vmem:[%s2738_s23 + $0x2d8] sm:$0xff] %v307_v27  ;;  %310 = vst [vmem:[%s2738_s23 + $0x2e0] sm:$0xff] %v309_v28  ;;  %v317_v32 = vld [vmem:[%s2730_s22 + $0x600] sm:$0xff]  ;;  %v319_v33 = vld [vmem:[%s2730_s22 + $0x608] sm:$0xff] }
  0x41   : > { %312 = vst [vmem:[%s2738_s23 + $0x2e8] sm:$0xff] %v311_v29  ;;  %314 = vst [vmem:[%s2738_s23 + $0x2f0] sm:$0xff] %v313_v30  ;;  %v321_v34 = vld [vmem:[%s2730_s22 + $0x610] sm:$0xff]  ;;  %v323_v35 = vld [vmem:[%s2730_s22 + $0x618] sm:$0xff] }
  0x42   : > { %316 = vst [vmem:[%s2738_s23 + $0x2f8] sm:$0xff] %v315_v31  ;;  %318 = vst [vmem:[%s2738_s23 + $0x300] sm:$0xff] %v317_v32  ;;  %v325_v36 = vld [vmem:[%s2730_s22 + $0x620] sm:$0xff]  ;;  %v327_v37 = vld [vmem:[%s2730_s22 + $0x628] sm:$0xff] }
  0x43   : > { %320 = vst [vmem:[%s2738_s23 + $0x308] sm:$0xff] %v319_v33  ;;  %322 = vst [vmem:[%s2738_s23 + $0x310] sm:$0xff] %v321_v34  ;;  %v329_v38 = vld [vmem:[%s2730_s22 + $0x630] sm:$0xff]  ;;  %v331_v39 = vld [vmem:[%s2730_s22 + $0x638] sm:$0xff] }
  0x44   : > { %324 = vst [vmem:[%s2738_s23 + $0x318] sm:$0xff] %v323_v35  ;;  %326 = vst [vmem:[%s2738_s23 + $0x320] sm:$0xff] %v325_v36  ;;  %v333_v40 = vld [vmem:[%s2730_s22 + $0x680] sm:$0xff]  ;;  %v335_v41 = vld [vmem:[%s2730_s22 + $0x688] sm:$0xff] }
  0x45   : > { %328 = vst [vmem:[%s2738_s23 + $0x328] sm:$0xff] %v327_v37  ;;  %330 = vst [vmem:[%s2738_s23 + $0x330] sm:$0xff] %v329_v38  ;;  %v337_v42 = vld [vmem:[%s2730_s22 + $0x690] sm:$0xff]  ;;  %v339_v43 = vld [vmem:[%s2730_s22 + $0x698] sm:$0xff] }
  0x46   : > { %332 = vst [vmem:[%s2738_s23 + $0x338] sm:$0xff] %v331_v39  ;;  %334 = vst [vmem:[%s2738_s23 + $0x340] sm:$0xff] %v333_v40  ;;  %v341_v44 = vld [vmem:[%s2730_s22 + $0x6a0] sm:$0xff]  ;;  %v343_v45 = vld [vmem:[%s2730_s22 + $0x6a8] sm:$0xff] }
  0x47   : > { %336 = vst [vmem:[%s2738_s23 + $0x348] sm:$0xff] %v335_v41  ;;  %338 = vst [vmem:[%s2738_s23 + $0x350] sm:$0xff] %v337_v42  ;;  %v345_v46 = vld [vmem:[%s2730_s22 + $0x6b0] sm:$0xff]  ;;  %v347_v47 = vld [vmem:[%s2730_s22 + $0x6b8] sm:$0xff] }
  0x48   : > { %340 = vst [vmem:[%s2738_s23 + $0x358] sm:$0xff] %v339_v43  ;;  %342 = vst [vmem:[%s2738_s23 + $0x360] sm:$0xff] %v341_v44  ;;  %v349_v48 = vld [vmem:[%s2730_s22 + $0x700] sm:$0xff]  ;;  %v351_v49 = vld [vmem:[%s2730_s22 + $0x708] sm:$0xff] }
  0x49   : > { %344 = vst [vmem:[%s2738_s23 + $0x368] sm:$0xff] %v343_v45  ;;  %346 = vst [vmem:[%s2738_s23 + $0x370] sm:$0xff] %v345_v46  ;;  %v353_v50 = vld [vmem:[%s2730_s22 + $0x710] sm:$0xff]  ;;  %v355_v51 = vld [vmem:[%s2730_s22 + $0x718] sm:$0xff] }
  0x4a   : > { %348 = vst [vmem:[%s2738_s23 + $0x378] sm:$0xff] %v347_v47  ;;  %350 = vst [vmem:[%s2738_s23 + $0x380] sm:$0xff] %v349_v48  ;;  %v357_v52 = vld [vmem:[%s2730_s22 + $0x720] sm:$0xff]  ;;  %v359_v53 = vld [vmem:[%s2730_s22 + $0x728] sm:$0xff] }
  0x4b   : > { %352 = vst [vmem:[%s2738_s23 + $0x388] sm:$0xff] %v351_v49  ;;  %354 = vst [vmem:[%s2738_s23 + $0x390] sm:$0xff] %v353_v50  ;;  %v361_v54 = vld [vmem:[%s2730_s22 + $0x730] sm:$0xff]  ;;  %v363_v55 = vld [vmem:[%s2730_s22 + $0x738] sm:$0xff] }
  0x4c   : > { %356 = vst [vmem:[%s2738_s23 + $0x398] sm:$0xff] %v355_v51  ;;  %358 = vst [vmem:[%s2738_s23 + $0x3a0] sm:$0xff] %v357_v52  ;;  %v365_v56 = vld [vmem:[%s2730_s22 + $0x780] sm:$0xff]  ;;  %v367_v57 = vld [vmem:[%s2730_s22 + $0x788] sm:$0xff] }
  0x4d   : > { %360 = vst [vmem:[%s2738_s23 + $0x3a8] sm:$0xff] %v359_v53  ;;  %362 = vst [vmem:[%s2738_s23 + $0x3b0] sm:$0xff] %v361_v54  ;;  %v369_v58 = vld [vmem:[%s2730_s22 + $0x790] sm:$0xff]  ;;  %v371_v59 = vld [vmem:[%s2730_s22 + $0x798] sm:$0xff] }
  0x4e   : > { %364 = vst [vmem:[%s2738_s23 + $0x3b8] sm:$0xff] %v363_v55  ;;  %366 = vst [vmem:[%s2738_s23 + $0x3c0] sm:$0xff] %v365_v56  ;;  %v373_v60 = vld [vmem:[%s2730_s22 + $0x7a0] sm:$0xff]  ;;  %v375_v61 = vld [vmem:[%s2730_s22 + $0x7a8] sm:$0xff] }
  0x4f   : > { %368 = vst [vmem:[%s2738_s23 + $0x3c8] sm:$0xff] %v367_v57  ;;  %370 = vst [vmem:[%s2738_s23 + $0x3d0] sm:$0xff] %v369_v58  ;;  %v377_v62 = vld [vmem:[%s2730_s22 + $0x7b0] sm:$0xff]  ;;  %v379_v63 = vld [vmem:[%s2730_s22 + $0x7b8] sm:$0xff] }
  0x50   : > { %372 = vst [vmem:[%s2738_s23 + $0x3d8] sm:$0xff] %v371_v59  ;;  %374 = vst [vmem:[%s2738_s23 + $0x3e0] sm:$0xff] %v373_v60  ;;  %v381_v0 = vld [vmem:[%s2730_s22 + $0x800] sm:$0xff]  ;;  %v383_v1 = vld [vmem:[%s2730_s22 + $0x808] sm:$0xff] }
  0x51   : > { %376 = vst [vmem:[%s2738_s23 + $0x3e8] sm:$0xff] %v375_v61  ;;  %378 = vst [vmem:[%s2738_s23 + $0x3f0] sm:$0xff] %v377_v62  ;;  %v385_v2 = vld [vmem:[%s2730_s22 + $0x810] sm:$0xff]  ;;  %v387_v3 = vld [vmem:[%s2730_s22 + $0x818] sm:$0xff] }
  0x52   : > { %380 = vst [vmem:[%s2738_s23 + $0x3f8] sm:$0xff] %v379_v63  ;;  %382 = vst [vmem:[%s2738_s23 + $0x400] sm:$0xff] %v381_v0  ;;  %v389_v4 = vld [vmem:[%s2730_s22 + $0x820] sm:$0xff]  ;;  %v391_v5 = vld [vmem:[%s2730_s22 + $0x828] sm:$0xff] }
  0x53   : > { %384 = vst [vmem:[%s2738_s23 + $0x408] sm:$0xff] %v383_v1  ;;  %386 = vst [vmem:[%s2738_s23 + $0x410] sm:$0xff] %v385_v2  ;;  %v393_v6 = vld [vmem:[%s2730_s22 + $0x830] sm:$0xff]  ;;  %v395_v7 = vld [vmem:[%s2730_s22 + $0x838] sm:$0xff] }
  0x54   : > { %388 = vst [vmem:[%s2738_s23 + $0x418] sm:$0xff] %v387_v3  ;;  %390 = vst [vmem:[%s2738_s23 + $0x420] sm:$0xff] %v389_v4  ;;  %v397_v8 = vld [vmem:[%s2730_s22 + $0x880] sm:$0xff]  ;;  %v399_v9 = vld [vmem:[%s2730_s22 + $0x888] sm:$0xff] }
  0x55   : > { %392 = vst [vmem:[%s2738_s23 + $0x428] sm:$0xff] %v391_v5  ;;  %394 = vst [vmem:[%s2738_s23 + $0x430] sm:$0xff] %v393_v6  ;;  %v401_v10 = vld [vmem:[%s2730_s22 + $0x890] sm:$0xff]  ;;  %v403_v11 = vld [vmem:[%s2730_s22 + $0x898] sm:$0xff] }
  0x56   : > { %396 = vst [vmem:[%s2738_s23 + $0x438] sm:$0xff] %v395_v7  ;;  %398 = vst [vmem:[%s2738_s23 + $0x440] sm:$0xff] %v397_v8  ;;  %v405_v12 = vld [vmem:[%s2730_s22 + $0x8a0] sm:$0xff]  ;;  %v407_v13 = vld [vmem:[%s2730_s22 + $0x8a8] sm:$0xff] }
  0x57   : > { %400 = vst [vmem:[%s2738_s23 + $0x448] sm:$0xff] %v399_v9  ;;  %402 = vst [vmem:[%s2738_s23 + $0x450] sm:$0xff] %v401_v10  ;;  %v409_v14 = vld [vmem:[%s2730_s22 + $0x8b0] sm:$0xff]  ;;  %v411_v15 = vld [vmem:[%s2730_s22 + $0x8b8] sm:$0xff] }
  0x58   : > { %404 = vst [vmem:[%s2738_s23 + $0x458] sm:$0xff] %v403_v11  ;;  %406 = vst [vmem:[%s2738_s23 + $0x460] sm:$0xff] %v405_v12  ;;  %v413_v16 = vld [vmem:[%s2730_s22 + $0x900] sm:$0xff]  ;;  %v415_v17 = vld [vmem:[%s2730_s22 + $0x908] sm:$0xff] }
  0x59   : > { %408 = vst [vmem:[%s2738_s23 + $0x468] sm:$0xff] %v407_v13  ;;  %410 = vst [vmem:[%s2738_s23 + $0x470] sm:$0xff] %v409_v14  ;;  %v417_v18 = vld [vmem:[%s2730_s22 + $0x910] sm:$0xff]  ;;  %v419_v19 = vld [vmem:[%s2730_s22 + $0x918] sm:$0xff] }
  0x5a   : > { %412 = vst [vmem:[%s2738_s23 + $0x478] sm:$0xff] %v411_v15  ;;  %414 = vst [vmem:[%s2738_s23 + $0x480] sm:$0xff] %v413_v16  ;;  %v421_v20 = vld [vmem:[%s2730_s22 + $0x920] sm:$0xff]  ;;  %v423_v21 = vld [vmem:[%s2730_s22 + $0x928] sm:$0xff] }
  0x5b   : > { %416 = vst [vmem:[%s2738_s23 + $0x488] sm:$0xff] %v415_v17  ;;  %418 = vst [vmem:[%s2738_s23 + $0x490] sm:$0xff] %v417_v18  ;;  %v425_v22 = vld [vmem:[%s2730_s22 + $0x930] sm:$0xff]  ;;  %v427_v23 = vld [vmem:[%s2730_s22 + $0x938] sm:$0xff] }
  0x5c   : > { %420 = vst [vmem:[%s2738_s23 + $0x498] sm:$0xff] %v419_v19  ;;  %422 = vst [vmem:[%s2738_s23 + $0x4a0] sm:$0xff] %v421_v20  ;;  %v429_v24 = vld [vmem:[%s2730_s22 + $0x980] sm:$0xff]  ;;  %v431_v25 = vld [vmem:[%s2730_s22 + $0x988] sm:$0xff] }
  0x5d   : > { %424 = vst [vmem:[%s2738_s23 + $0x4a8] sm:$0xff] %v423_v21  ;;  %426 = vst [vmem:[%s2738_s23 + $0x4b0] sm:$0xff] %v425_v22  ;;  %v433_v26 = vld [vmem:[%s2730_s22 + $0x990] sm:$0xff]  ;;  %v435_v27 = vld [vmem:[%s2730_s22 + $0x998] sm:$0xff] }
  0x5e   : > { %428 = vst [vmem:[%s2738_s23 + $0x4b8] sm:$0xff] %v427_v23  ;;  %430 = vst [vmem:[%s2738_s23 + $0x4c0] sm:$0xff] %v429_v24  ;;  %v437_v28 = vld [vmem:[%s2730_s22 + $0x9a0] sm:$0xff]  ;;  %v439_v29 = vld [vmem:[%s2730_s22 + $0x9a8] sm:$0xff] }
  0x5f   : > { %432 = vst [vmem:[%s2738_s23 + $0x4c8] sm:$0xff] %v431_v25  ;;  %434 = vst [vmem:[%s2738_s23 + $0x4d0] sm:$0xff] %v433_v26  ;;  %v441_v30 = vld [vmem:[%s2730_s22 + $0x9b0] sm:$0xff]  ;;  %v443_v31 = vld [vmem:[%s2730_s22 + $0x9b8] sm:$0xff] }
  0x60   : > { %436 = vst [vmem:[%s2738_s23 + $0x4d8] sm:$0xff] %v435_v27  ;;  %438 = vst [vmem:[%s2738_s23 + $0x4e0] sm:$0xff] %v437_v28  ;;  %v445_v32 = vld [vmem:[%s2730_s22 + $0xa00] sm:$0xff]  ;;  %v447_v33 = vld [vmem:[%s2730_s22 + $0xa08] sm:$0xff] }
  0x61   : > { %440 = vst [vmem:[%s2738_s23 + $0x4e8] sm:$0xff] %v439_v29  ;;  %442 = vst [vmem:[%s2738_s23 + $0x4f0] sm:$0xff] %v441_v30  ;;  %v449_v34 = vld [vmem:[%s2730_s22 + $0xa10] sm:$0xff]  ;;  %v451_v35 = vld [vmem:[%s2730_s22 + $0xa18] sm:$0xff] }
  0x62   : > { %444 = vst [vmem:[%s2738_s23 + $0x4f8] sm:$0xff] %v443_v31  ;;  %446 = vst [vmem:[%s2738_s23 + $0x500] sm:$0xff] %v445_v32  ;;  %v453_v36 = vld [vmem:[%s2730_s22 + $0xa20] sm:$0xff]  ;;  %v455_v37 = vld [vmem:[%s2730_s22 + $0xa28] sm:$0xff] }
  0x63   : > { %448 = vst [vmem:[%s2738_s23 + $0x508] sm:$0xff] %v447_v33  ;;  %450 = vst [vmem:[%s2738_s23 + $0x510] sm:$0xff] %v449_v34  ;;  %v457_v38 = vld [vmem:[%s2730_s22 + $0xa30] sm:$0xff]  ;;  %v459_v39 = vld [vmem:[%s2730_s22 + $0xa38] sm:$0xff] }
  0x64   : > { %452 = vst [vmem:[%s2738_s23 + $0x518] sm:$0xff] %v451_v35  ;;  %454 = vst [vmem:[%s2738_s23 + $0x520] sm:$0xff] %v453_v36  ;;  %v461_v40 = vld [vmem:[%s2730_s22 + $0xa80] sm:$0xff]  ;;  %v463_v41 = vld [vmem:[%s2730_s22 + $0xa88] sm:$0xff] }
  0x65   : > { %456 = vst [vmem:[%s2738_s23 + $0x528] sm:$0xff] %v455_v37  ;;  %458 = vst [vmem:[%s2738_s23 + $0x530] sm:$0xff] %v457_v38  ;;  %v465_v42 = vld [vmem:[%s2730_s22 + $0xa90] sm:$0xff]  ;;  %v467_v43 = vld [vmem:[%s2730_s22 + $0xa98] sm:$0xff] }
  0x66   : > { %460 = vst [vmem:[%s2738_s23 + $0x538] sm:$0xff] %v459_v39  ;;  %462 = vst [vmem:[%s2738_s23 + $0x540] sm:$0xff] %v461_v40  ;;  %v469_v44 = vld [vmem:[%s2730_s22 + $0xaa0] sm:$0xff]  ;;  %v471_v45 = vld [vmem:[%s2730_s22 + $0xaa8] sm:$0xff] }
  0x67   : > { %464 = vst [vmem:[%s2738_s23 + $0x548] sm:$0xff] %v463_v41  ;;  %466 = vst [vmem:[%s2738_s23 + $0x550] sm:$0xff] %v465_v42  ;;  %v473_v46 = vld [vmem:[%s2730_s22 + $0xab0] sm:$0xff]  ;;  %v475_v47 = vld [vmem:[%s2730_s22 + $0xab8] sm:$0xff] }
  0x68   : > { %468 = vst [vmem:[%s2738_s23 + $0x558] sm:$0xff] %v467_v43  ;;  %470 = vst [vmem:[%s2738_s23 + $0x560] sm:$0xff] %v469_v44  ;;  %v477_v48 = vld [vmem:[%s2730_s22 + $0xb00] sm:$0xff]  ;;  %v479_v49 = vld [vmem:[%s2730_s22 + $0xb08] sm:$0xff] }
  0x69   : > { %472 = vst [vmem:[%s2738_s23 + $0x568] sm:$0xff] %v471_v45  ;;  %474 = vst [vmem:[%s2738_s23 + $0x570] sm:$0xff] %v473_v46  ;;  %v481_v50 = vld [vmem:[%s2730_s22 + $0xb10] sm:$0xff]  ;;  %v483_v51 = vld [vmem:[%s2730_s22 + $0xb18] sm:$0xff] }
  0x6a   : > { %476 = vst [vmem:[%s2738_s23 + $0x578] sm:$0xff] %v475_v47  ;;  %478 = vst [vmem:[%s2738_s23 + $0x580] sm:$0xff] %v477_v48  ;;  %v485_v52 = vld [vmem:[%s2730_s22 + $0xb20] sm:$0xff]  ;;  %v487_v53 = vld [vmem:[%s2730_s22 + $0xb28] sm:$0xff] }
  0x6b   : > { %480 = vst [vmem:[%s2738_s23 + $0x588] sm:$0xff] %v479_v49  ;;  %482 = vst [vmem:[%s2738_s23 + $0x590] sm:$0xff] %v481_v50  ;;  %v489_v54 = vld [vmem:[%s2730_s22 + $0xb30] sm:$0xff]  ;;  %v491_v55 = vld [vmem:[%s2730_s22 + $0xb38] sm:$0xff] }
  0x6c   : > { %484 = vst [vmem:[%s2738_s23 + $0x598] sm:$0xff] %v483_v51  ;;  %486 = vst [vmem:[%s2738_s23 + $0x5a0] sm:$0xff] %v485_v52  ;;  %v493_v56 = vld [vmem:[%s2730_s22 + $0xb80] sm:$0xff]  ;;  %v495_v57 = vld [vmem:[%s2730_s22 + $0xb88] sm:$0xff] }
  0x6d   : > { %488 = vst [vmem:[%s2738_s23 + $0x5a8] sm:$0xff] %v487_v53  ;;  %490 = vst [vmem:[%s2738_s23 + $0x5b0] sm:$0xff] %v489_v54  ;;  %v497_v58 = vld [vmem:[%s2730_s22 + $0xb90] sm:$0xff]  ;;  %v499_v59 = vld [vmem:[%s2730_s22 + $0xb98] sm:$0xff] }
  0x6e   : > { %492 = vst [vmem:[%s2738_s23 + $0x5b8] sm:$0xff] %v491_v55  ;;  %494 = vst [vmem:[%s2738_s23 + $0x5c0] sm:$0xff] %v493_v56  ;;  %v501_v60 = vld [vmem:[%s2730_s22 + $0xba0] sm:$0xff]  ;;  %v503_v61 = vld [vmem:[%s2730_s22 + $0xba8] sm:$0xff] }
  0x6f   : > { %496 = vst [vmem:[%s2738_s23 + $0x5c8] sm:$0xff] %v495_v57  ;;  %498 = vst [vmem:[%s2738_s23 + $0x5d0] sm:$0xff] %v497_v58  ;;  %v505_v62 = vld [vmem:[%s2730_s22 + $0xbb0] sm:$0xff]  ;;  %v507_v63 = vld [vmem:[%s2730_s22 + $0xbb8] sm:$0xff] }
  0x70   : > { %500 = vst [vmem:[%s2738_s23 + $0x5d8] sm:$0xff] %v499_v59  ;;  %502 = vst [vmem:[%s2738_s23 + $0x5e0] sm:$0xff] %v501_v60  ;;  %v509_v0 = vld [vmem:[%s2730_s22 + $0xc00] sm:$0xff]  ;;  %v511_v1 = vld [vmem:[%s2730_s22 + $0xc08] sm:$0xff] }
  0x71   : > { %504 = vst [vmem:[%s2738_s23 + $0x5e8] sm:$0xff] %v503_v61  ;;  %506 = vst [vmem:[%s2738_s23 + $0x5f0] sm:$0xff] %v505_v62  ;;  %v513_v2 = vld [vmem:[%s2730_s22 + $0xc10] sm:$0xff]  ;;  %v515_v3 = vld [vmem:[%s2730_s22 + $0xc18] sm:$0xff] }
  0x72   : > { %508 = vst [vmem:[%s2738_s23 + $0x5f8] sm:$0xff] %v507_v63  ;;  %510 = vst [vmem:[%s2738_s23 + $0x600] sm:$0xff] %v509_v0  ;;  %v517_v4 = vld [vmem:[%s2730_s22 + $0xc20] sm:$0xff]  ;;  %v519_v5 = vld [vmem:[%s2730_s22 + $0xc28] sm:$0xff] }
  0x73   : > { %512 = vst [vmem:[%s2738_s23 + $0x608] sm:$0xff] %v511_v1  ;;  %514 = vst [vmem:[%s2738_s23 + $0x610] sm:$0xff] %v513_v2  ;;  %v521_v6 = vld [vmem:[%s2730_s22 + $0xc30] sm:$0xff]  ;;  %v523_v7 = vld [vmem:[%s2730_s22 + $0xc38] sm:$0xff] }
  0x74   : > { %516 = vst [vmem:[%s2738_s23 + $0x618] sm:$0xff] %v515_v3  ;;  %518 = vst [vmem:[%s2738_s23 + $0x620] sm:$0xff] %v517_v4  ;;  %v525_v8 = vld [vmem:[%s2730_s22 + $0xc80] sm:$0xff]  ;;  %v527_v9 = vld [vmem:[%s2730_s22 + $0xc88] sm:$0xff] }
  0x75   : > { %520 = vst [vmem:[%s2738_s23 + $0x628] sm:$0xff] %v519_v5  ;;  %522 = vst [vmem:[%s2738_s23 + $0x630] sm:$0xff] %v521_v6  ;;  %v529_v10 = vld [vmem:[%s2730_s22 + $0xc90] sm:$0xff]  ;;  %v531_v11 = vld [vmem:[%s2730_s22 + $0xc98] sm:$0xff] }
  0x76   : > { %524 = vst [vmem:[%s2738_s23 + $0x638] sm:$0xff] %v523_v7  ;;  %526 = vst [vmem:[%s2738_s23 + $0x640] sm:$0xff] %v525_v8  ;;  %v533_v12 = vld [vmem:[%s2730_s22 + $0xca0] sm:$0xff]  ;;  %v535_v13 = vld [vmem:[%s2730_s22 + $0xca8] sm:$0xff] }
  0x77   : > { %528 = vst [vmem:[%s2738_s23 + $0x648] sm:$0xff] %v527_v9  ;;  %530 = vst [vmem:[%s2738_s23 + $0x650] sm:$0xff] %v529_v10  ;;  %v537_v14 = vld [vmem:[%s2730_s22 + $0xcb0] sm:$0xff]  ;;  %v539_v15 = vld [vmem:[%s2730_s22 + $0xcb8] sm:$0xff] }
  0x78   : > { %532 = vst [vmem:[%s2738_s23 + $0x658] sm:$0xff] %v531_v11  ;;  %534 = vst [vmem:[%s2738_s23 + $0x660] sm:$0xff] %v533_v12  ;;  %v541_v16 = vld [vmem:[%s2730_s22 + $0xd00] sm:$0xff]  ;;  %v543_v17 = vld [vmem:[%s2730_s22 + $0xd08] sm:$0xff] }
  0x79   : > { %536 = vst [vmem:[%s2738_s23 + $0x668] sm:$0xff] %v535_v13  ;;  %538 = vst [vmem:[%s2738_s23 + $0x670] sm:$0xff] %v537_v14  ;;  %v545_v18 = vld [vmem:[%s2730_s22 + $0xd10] sm:$0xff]  ;;  %v547_v19 = vld [vmem:[%s2730_s22 + $0xd18] sm:$0xff] }
  0x7a   : > { %540 = vst [vmem:[%s2738_s23 + $0x678] sm:$0xff] %v539_v15  ;;  %542 = vst [vmem:[%s2738_s23 + $0x680] sm:$0xff] %v541_v16  ;;  %v549_v20 = vld [vmem:[%s2730_s22 + $0xd20] sm:$0xff]  ;;  %v551_v21 = vld [vmem:[%s2730_s22 + $0xd28] sm:$0xff] }
  0x7b   : > { %544 = vst [vmem:[%s2738_s23 + $0x688] sm:$0xff] %v543_v17  ;;  %546 = vst [vmem:[%s2738_s23 + $0x690] sm:$0xff] %v545_v18  ;;  %v553_v22 = vld [vmem:[%s2730_s22 + $0xd30] sm:$0xff]  ;;  %v555_v23 = vld [vmem:[%s2730_s22 + $0xd38] sm:$0xff] }
  0x7c   : > { %548 = vst [vmem:[%s2738_s23 + $0x698] sm:$0xff] %v547_v19  ;;  %550 = vst [vmem:[%s2738_s23 + $0x6a0] sm:$0xff] %v549_v20 }
  0x7d   : > { %552 = vst [vmem:[%s2738_s23 + $0x6a8] sm:$0xff] %v551_v21  ;;  %554 = vst [vmem:[%s2738_s23 + $0x6b0] sm:$0xff] %v553_v22 }
  0x7e   : > { %556 = vst [vmem:[%s2738_s23 + $0x6b8] sm:$0xff] %v555_v23 }
  0x7f PF: > { %p2365_p5 = scmp.ge.s32.totalorder %s2679_s11, 1  ;;  %p561_p6 = scmp.lt.s32.totalorder %s2679_s11, 3 }
  0x81   : > { %p562_p7 = pnand %p2365_p5, %p561_p6 }
  0x82   : > { %s568_s24 = sand.u32 (!%p562_p7), 1, %s2671_s9   ;;  %v3172_v24 = vld [vmem:[%s3473_s0] sm:$0xff] (!%p562_p7)  ;;  %vm1900_vm0 = vcmask (!%p562_p7), 719872   ;;  %vm1904_vm1 = vcmask (!%p562_p7), 1043456   ;;  %s2366_s29 = sshll.u32 (!%p562_p7), %s2359_s12, 4 }
  0x83   : > { %565 = sbr.rel (%p562_p7) target bundleno = 578 (0x242), region = 47  ;;  %v3176_v25 = vcombine.high (!%p562_p7), %v3172_v24, %v3172_v24  ;;  %p591_p8 = scmp.lt.s32.totalorder (!%p562_p7), %s2366_s29, 31 }
  0x84   : > { %s2614_s27 = smul.u32 (!%p562_p7), 1728, %s568_s24 }
  0x85   : > { %2595 = vmatprep.mubr.msk.bf16.mxu0 (!%p562_p7), %vm1900_vm0, %v3176_v25  ;;  %2597 = vmatprep.mubr.msk.bf16.mxu1 (!%p562_p7), %vm1900_vm0, %v3176_v25 }
  0x86   : > { %s3182_s28 = scalar_lea.vmem (!%p562_p7), [#allocation2], %s2614_s27 }
  0x87   : > { %v598_v26 = vld [vmem:[%s3182_s28] sm:$0xff] (!%p562_p7)  ;;  %v599_v28 = vld [vmem:[%s3182_s28 + $0x8] sm:$0xff] (!%p562_p7) }
  0x88   : > { %v606_v27 = vld [vmem:[%s3182_s28 + $0x40] sm:$0xff] (!%p562_p7)  ;;  %v607_v30 = vld [vmem:[%s3182_s28 + $0x48] sm:$0xff] (!%p562_p7) }
  0x89   : > { %v2371_v29 = vcombine.high (!%p562_p7), %v598_v26, %v606_v27  ;;  %v2370_v31 = vcombine.low (!%p562_p7), %v598_v26, %v606_v27  ;;  %v614_v32 = vld [vmem:[%s3182_s28 + $0x80] sm:$0xff] (!%p562_p7)  ;;  %v2373_v34 = vcombine.high (!%p562_p7), %v599_v28, %v607_v30  ;;  %v2372_v35 = vcombine.low (!%p562_p7), %v599_v28, %v607_v30  ;;  %v615_v37 = vld [vmem:[%s3182_s28 + $0x88] sm:$0xff] (!%p562_p7) }
  0x8a   : > { %v622_v33 = vld [vmem:[%s3182_s28 + $0xc0] sm:$0xff]  ;;  %v623_v38 = vld [vmem:[%s3182_s28 + $0xc8] sm:$0xff]  ;;  %s3480_s29 = smov (!%p591_p8, %s2366_s29), 31 }
  0x8b   : > { %v2387_v36 = vcombine.high %v614_v32, %v622_v33  ;;  %v630_v39 = vld [vmem:[%s3182_s28 + $0x100] sm:$0xff]  ;;  %1953 = vmatprep.subr.bf16.mxu0 %v2371_v29  ;;  %v2389_v40 = vcombine.high %v615_v37, %v623_v38  ;;  %v631_v42 = vld [vmem:[%s3182_s28 + $0x108] sm:$0xff]  ;;  %1994 = vmatprep.subr.bf16.mxu1 %v2373_v34  ;;  %v2386_v44 = vcombine.low %v614_v32, %v622_v33  ;;  %s2367_s30 = sshll.u32 %s3480_s29, 3 }
  0x8c   : > { %v638_v41 = vld [vmem:[%s3182_s28 + $0x140] sm:$0xff]  ;;  %v639_v43 = vld [vmem:[%s3182_s28 + $0x148] sm:$0xff]  ;;  %1954 = vmatpush1.bf16.msra.mxu0 %v2370_v31  ;;  %1995 = vmatpush1.bf16.msra.mxu1 %v2372_v35  ;;  %v2388_v45 = vcombine.low %v615_v37, %v623_v38  ;;  %s3445_s5 = scalar_lea.vmem %s3475_s2, %s2367_s30 }
  0x8d   : > { %1955 = vmatprep.subr.bf16.mxu0 %v2387_v36  ;;  %v2403_v46 = vcombine.high %v630_v39, %v638_v41  ;;  %1996 = vmatprep.subr.bf16.mxu1 %v2389_v40  ;;  %v2405_v47 = vcombine.high %v631_v42, %v639_v43  ;;  %v646_v48 = vld [vmem:[%s3182_s28 + $0x180] sm:$0xff]  ;;  %v647_v50 = vld [vmem:[%s3182_s28 + $0x188] sm:$0xff]  ;;  %v2402_v52 = vcombine.low %v630_v39, %v638_v41 }
  0x8e   : > { %v654_v49 = vld [vmem:[%s3182_s28 + $0x1c0] sm:$0xff]  ;;  %v655_v51 = vld [vmem:[%s3182_s28 + $0x1c8] sm:$0xff]  ;;  %v2404_v53 = vcombine.low %v631_v42, %v639_v43 }
  0x8f   : > { %v2419_v54 = vcombine.high %v646_v48, %v654_v49  ;;  %v2421_v55 = vcombine.high %v647_v50, %v655_v51  ;;  %v662_v56 = vld [vmem:[%s3182_s28 + $0x200] sm:$0xff]  ;;  %v663_v58 = vld [vmem:[%s3182_s28 + $0x208] sm:$0xff]  ;;  %v2418_v60 = vcombine.low %v646_v48, %v654_v49  ;;  %v2420_v61 = vcombine.low %v647_v50, %v655_v51 }
  0x90   : > { %1956 = vmatpush1.bf16.msra.mxu0 %v2386_v44  ;;  %1997 = vmatpush1.bf16.msra.mxu1 %v2388_v45  ;;  %v670_v57 = vld [vmem:[%s3182_s28 + $0x240] sm:$0xff]  ;;  %v671_v59 = vld [vmem:[%s3182_s28 + $0x248] sm:$0xff] }
  0x91   : > { %1957 = vmatprep.subr.bf16.mxu0 %v2403_v46  ;;  %1998 = vmatprep.subr.bf16.mxu1 %v2405_v47  ;;  %v2435_v62 = vcombine.high %v662_v56, %v670_v57  ;;  %v2437_v63 = vcombine.high %v663_v58, %v671_v59  ;;  %v678_v0 = vld [vmem:[%s3182_s28 + $0x280] sm:$0xff]  ;;  %v679_v2 = vld [vmem:[%s3182_s28 + $0x288] sm:$0xff]  ;;  %v2434_v4 = vcombine.low %v662_v56, %v670_v57 }
  0x92   : > { %v686_v1 = vld [vmem:[%s3182_s28 + $0x2c0] sm:$0xff]  ;;  %v687_v3 = vld [vmem:[%s3182_s28 + $0x2c8] sm:$0xff]  ;;  %v2436_v5 = vcombine.low %v663_v58, %v671_v59 }
  0x93   : > { %v2451_v6 = vcombine.high %v678_v0, %v686_v1  ;;  %v2453_v7 = vcombine.high %v679_v2, %v687_v3  ;;  %v694_v8 = vld [vmem:[%s3182_s28 + $0x300] sm:$0xff]  ;;  %v695_v10 = vld [vmem:[%s3182_s28 + $0x308] sm:$0xff]  ;;  %v2450_v12 = vcombine.low %v678_v0, %v686_v1  ;;  %v2452_v13 = vcombine.low %v679_v2, %v687_v3 }
  0x94   : > { %1958 = vmatpush1.bf16.msra.mxu0 %v2402_v52  ;;  %1999 = vmatpush1.bf16.msra.mxu1 %v2404_v53  ;;  %v702_v9 = vld [vmem:[%s3182_s28 + $0x340] sm:$0xff]  ;;  %v703_v11 = vld [vmem:[%s3182_s28 + $0x348] sm:$0xff] }
  0x95   : > { %1959 = vmatprep.subr.bf16.mxu0 %v2419_v54  ;;  %2000 = vmatprep.subr.bf16.mxu1 %v2421_v55  ;;  %v2467_v14 = vcombine.high %v694_v8, %v702_v9  ;;  %v2469_v15 = vcombine.high %v695_v10, %v703_v11  ;;  %v710_v16 = vld [vmem:[%s3182_s28 + $0x380] sm:$0xff]  ;;  %v711_v18 = vld [vmem:[%s3182_s28 + $0x388] sm:$0xff]  ;;  %v2466_v20 = vcombine.low %v694_v8, %v702_v9 }
  0x96   : > { %v718_v17 = vld [vmem:[%s3182_s28 + $0x3c0] sm:$0xff]  ;;  %v719_v19 = vld [vmem:[%s3182_s28 + $0x3c8] sm:$0xff]  ;;  %v2468_v21 = vcombine.low %v695_v10, %v703_v11  ;;  %v600_v10 = vld [vmem:[%s3182_s28 + $0x10] sm:$0xff] }
  0x97   : > { %v2483_v22 = vcombine.high %v710_v16, %v718_v17  ;;  %v2485_v23 = vcombine.high %v711_v18, %v719_v19  ;;  %v726_v26 = vld [vmem:[%s3182_s28 + $0x400] sm:$0xff]  ;;  %v727_v28 = vld [vmem:[%s3182_s28 + $0x408] sm:$0xff]  ;;  %v2482_v30 = vcombine.low %v710_v16, %v718_v17  ;;  %v2484_v31 = vcombine.low %v711_v18, %v719_v19  ;;  %v608_v11 = vld [vmem:[%s3182_s28 + $0x50] sm:$0xff] }
  0x98   : > { %1960 = vmatpush1.bf16.msra.mxu0 %v2418_v60  ;;  %2001 = vmatpush1.bf16.msra.mxu1 %v2420_v61  ;;  %v734_v27 = vld [vmem:[%s3182_s28 + $0x440] sm:$0xff]  ;;  %v735_v29 = vld [vmem:[%s3182_s28 + $0x448] sm:$0xff]  ;;  %v616_v18 = vld [vmem:[%s3182_s28 + $0x90] sm:$0xff] }
  0x99   : > { %1961 = vmatprep.subr.bf16.mxu0 %v2435_v62  ;;  %2002 = vmatprep.subr.bf16.mxu1 %v2437_v63  ;;  %v2499_v32 = vcombine.high %v726_v26, %v734_v27  ;;  %v2501_v33 = vcombine.high %v727_v28, %v735_v29  ;;  %v742_v34 = vld [vmem:[%s3182_s28 + $0x480] sm:$0xff]  ;;  %v743_v36 = vld [vmem:[%s3182_s28 + $0x488] sm:$0xff]  ;;  %v2498_v38 = vcombine.low %v726_v26, %v734_v27  ;;  %v624_v19 = vld [vmem:[%s3182_s28 + $0xd0] sm:$0xff] }
  0x9a   : > { %v750_v35 = vld [vmem:[%s3182_s28 + $0x4c0] sm:$0xff]  ;;  %v751_v37 = vld [vmem:[%s3182_s28 + $0x4c8] sm:$0xff]  ;;  %v2500_v39 = vcombine.low %v727_v28, %v735_v29  ;;  %v2391_v27 = vcombine.high %v616_v18, %v624_v19  ;;  %v632_v29 = vld [vmem:[%s3182_s28 + $0x110] sm:$0xff] }
  0x9b   : > { %v2515_v40 = vcombine.high %v742_v34, %v750_v35  ;;  %v2517_v41 = vcombine.high %v743_v36, %v751_v37  ;;  %v758_v42 = vld [vmem:[%s3182_s28 + $0x500] sm:$0xff]  ;;  %v759_v44 = vld [vmem:[%s3182_s28 + $0x508] sm:$0xff]  ;;  %v2514_v46 = vcombine.low %v742_v34, %v750_v35  ;;  %v2516_v47 = vcombine.low %v743_v36, %v751_v37  ;;  %v648_v36 = vld [vmem:[%s3182_s28 + $0x190] sm:$0xff] }
  0x9c   : > { %1962 = vmatpush1.bf16.msra.mxu0 %v2434_v4  ;;  %2003 = vmatpush1.bf16.msra.mxu1 %v2436_v5  ;;  %v766_v43 = vld [vmem:[%s3182_s28 + $0x540] sm:$0xff]  ;;  %v767_v45 = vld [vmem:[%s3182_s28 + $0x548] sm:$0xff]  ;;  %v656_v37 = vld [vmem:[%s3182_s28 + $0x1d0] sm:$0xff] }
  0x9d   : > { %1963 = vmatprep.subr.bf16.mxu0 %v2451_v6  ;;  %2004 = vmatprep.subr.bf16.mxu1 %v2453_v7  ;;  %v2531_v48 = vcombine.high %v758_v42, %v766_v43  ;;  %v2533_v49 = vcombine.high %v759_v44, %v767_v45  ;;  %v774_v50 = vld [vmem:[%s3182_s28 + $0x580] sm:$0xff]  ;;  %v775_v52 = vld [vmem:[%s3182_s28 + $0x588] sm:$0xff]  ;;  %v2530_v54 = vcombine.low %v758_v42, %v766_v43 }
  0x9e   : > { %v782_v51 = vld [vmem:[%s3182_s28 + $0x5c0] sm:$0xff]  ;;  %v783_v53 = vld [vmem:[%s3182_s28 + $0x5c8] sm:$0xff]  ;;  %v2532_v55 = vcombine.low %v759_v44, %v767_v45  ;;  %v2423_v42 = vcombine.high %v648_v36, %v656_v37  ;;  %v664_v44 = vld [vmem:[%s3182_s28 + $0x210] sm:$0xff] }
  0x9f   : > { %v2547_v56 = vcombine.high %v774_v50, %v782_v51  ;;  %v2549_v57 = vcombine.high %v775_v52, %v783_v53  ;;  %v790_v58 = vld [vmem:[%s3182_s28 + $0x600] sm:$0xff]  ;;  %v791_v60 = vld [vmem:[%s3182_s28 + $0x608] sm:$0xff]  ;;  %v2546_v62 = vcombine.low %v774_v50, %v782_v51  ;;  %v2548_v63 = vcombine.low %v775_v52, %v783_v53  ;;  %v672_v45 = vld [vmem:[%s3182_s28 + $0x250] sm:$0xff] }
  0xa0   : > { %1964 = vmatpush1.bf16.msra.mxu0 %v2450_v12  ;;  %2005 = vmatpush1.bf16.msra.mxu1 %v2452_v13  ;;  %v798_v59 = vld [vmem:[%s3182_s28 + $0x640] sm:$0xff]  ;;  %v799_v61 = vld [vmem:[%s3182_s28 + $0x648] sm:$0xff]  ;;  %v601_v12 = vld [vmem:[%s3182_s28 + $0x18] sm:$0xff]  ;;  %v2439_v50 = vcombine.high %v664_v44, %v672_v45 }
  0xa1   : > { %1965 = vmatprep.subr.bf16.mxu0 %v2467_v14  ;;  %2006 = vmatprep.subr.bf16.mxu1 %v2469_v15  ;;  %v2563_v0 = vcombine.high %v790_v58, %v798_v59  ;;  %v2565_v1 = vcombine.high %v791_v60, %v799_v61  ;;  %v806_v2 = vld [vmem:[%s3182_s28 + $0x680] sm:$0xff]  ;;  %v807_v3 = vld [vmem:[%s3182_s28 + $0x688] sm:$0xff]  ;;  %v2562_v4 = vcombine.low %v790_v58, %v798_v59  ;;  %v609_v13 = vld [vmem:[%s3182_s28 + $0x58] sm:$0xff] }
  0xa2   : > { %v2564_v5 = vcombine.low %v791_v60, %v799_v61  ;;  %v2579_v6 = vcombine.high %v806_v2, %v806_v2  ;;  %v2578_v7 = vcombine.low %v806_v2, %v806_v2  ;;  %v2581_v8 = vcombine.high %v807_v3, %v807_v3  ;;  %v680_v52 = vld [vmem:[%s3182_s28 + $0x290] sm:$0xff] }
  0xa3   : > { %v2580_v9 = vcombine.low %v807_v3, %v807_v3  ;;  %v2375_v15 = vcombine.high %v600_v10, %v608_v11  ;;  %v2377_v17 = vcombine.high %v601_v12, %v609_v13  ;;  %v2376_v26 = vcombine.low %v601_v12, %v609_v13  ;;  %v688_v53 = vld [vmem:[%s3182_s28 + $0x2d0] sm:$0xff] }
  0xa4   : > { %1966 = vmatpush1.bf16.msra.mxu0 %v2466_v20  ;;  %2007 = vmatpush1.bf16.msra.mxu1 %v2468_v21  ;;  %v1906_v14 = vsel %vm1904_vm1, %v2578_v7, 0  ;;  %v3250_v20 = vcombine.low %v3172_v24, %v3172_v24  ;;  %v617_v21 = vld [vmem:[%s3182_s28 + $0x98] sm:$0xff]  ;;  %v2455_v58 = vcombine.high %v680_v52, %v688_v53  ;;  %v696_v60 = vld [vmem:[%s3182_s28 + $0x310] sm:$0xff] }
  0xa5   : > { %1967 = vmatprep.subr.bf16.mxu0 %v2483_v22  ;;  %2008 = vmatprep.subr.bf16.mxu1 %v2485_v23  ;;  %v1912_v16 = vsel %vm1904_vm1, %v2580_v9, 0  ;;  %v625_v22 = vld [vmem:[%s3182_s28 + $0xd8] sm:$0xff]  ;;  %v2374_v23 = vcombine.low %v600_v10, %v608_v11  ;;  %v704_v61 = vld [vmem:[%s3182_s28 + $0x350] sm:$0xff] }
  0xa6   : > { %v2393_v28 = vcombine.high %v617_v21, %v625_v22  ;;  %v633_v24 = vld [vmem:[%s3182_s28 + $0x118] sm:$0xff]  ;;  %v2471_v2 = vcombine.high %v696_v60, %v704_v61  ;;  %v728_v12 = vld [vmem:[%s3182_s28 + $0x410] sm:$0xff] }
  0xa7   : > { %v721_v7 = vld [vmem:[%s3182_s28 + $0x3d8] sm:$0xff]  ;;  %v736_v13 = vld [vmem:[%s3182_s28 + $0x450] sm:$0xff] }
  0xa8   : > { %1968 = vmatpush1.bf16.msra.mxu0 %v2482_v30  ;;  %2009 = vmatpush1.bf16.msra.mxu1 %v2484_v31  ;;  %v640_v30 = vld [vmem:[%s3182_s28 + $0x150] sm:$0xff]  ;;  %v641_v31 = vld [vmem:[%s3182_s28 + $0x158] sm:$0xff] }
  0xa9   : > { %1969 = vmatprep.subr.bf16.mxu0 %v2499_v32  ;;  %2010 = vmatprep.subr.bf16.mxu1 %v2501_v33  ;;  %v2390_v32 = vcombine.low %v616_v18, %v624_v19  ;;  %v2392_v33 = vcombine.low %v617_v21, %v625_v22  ;;  %v2407_v34 = vcombine.high %v632_v29, %v640_v30  ;;  %v744_v21 = vld [vmem:[%s3182_s28 + $0x490] sm:$0xff] }
  0xaa   : > { %v2409_v35 = vcombine.high %v633_v24, %v641_v31  ;;  %v2503_v18 = vcombine.high %v728_v12, %v736_v13  ;;  %v752_v22 = vld [vmem:[%s3182_s28 + $0x4d0] sm:$0xff] }
  0xac   : > { %1970 = vmatpush1.bf16.msra.mxu0 %v2498_v38  ;;  %2011 = vmatpush1.bf16.msra.mxu1 %v2500_v39  ;;  %v649_v38 = vld [vmem:[%s3182_s28 + $0x198] sm:$0xff] }
  0xad   : > { %1971 = vmatprep.subr.bf16.mxu0 %v2515_v40  ;;  %2012 = vmatprep.subr.bf16.mxu1 %v2517_v41  ;;  %v657_v39 = vld [vmem:[%s3182_s28 + $0x1d8] sm:$0xff]  ;;  %v2406_v40 = vcombine.low %v632_v29, %v640_v30  ;;  %v2408_v41 = vcombine.low %v633_v24, %v641_v31  ;;  %v2519_v29 = vcombine.high %v744_v21, %v752_v22  ;;  %v760_v24 = vld [vmem:[%s3182_s28 + $0x510] sm:$0xff] }
  0xae   : > { %v2425_v43 = vcombine.high %v649_v38, %v657_v39  ;;  %v768_v31 = vld [vmem:[%s3182_s28 + $0x550] sm:$0xff] }
  0xb0   : > { %1972 = vmatpush1.bf16.msra.mxu0 %v2514_v46  ;;  %2013 = vmatpush1.bf16.msra.mxu1 %v2516_v47  ;;  %v665_v46 = vld [vmem:[%s3182_s28 + $0x218] sm:$0xff] }
  0xb1   : > { %1973 = vmatprep.subr.bf16.mxu0 %v2531_v48  ;;  %2014 = vmatprep.subr.bf16.mxu1 %v2533_v49  ;;  %v673_v47 = vld [vmem:[%s3182_s28 + $0x258] sm:$0xff]  ;;  %v2422_v48 = vcombine.low %v648_v36, %v656_v37  ;;  %v2424_v49 = vcombine.low %v649_v38, %v657_v39  ;;  %v2535_v36 = vcombine.high %v760_v24, %v768_v31  ;;  %v776_v38 = vld [vmem:[%s3182_s28 + $0x590] sm:$0xff] }
  0xb2   : > { %v2441_v51 = vcombine.high %v665_v46, %v673_v47  ;;  %v784_v39 = vld [vmem:[%s3182_s28 + $0x5d0] sm:$0xff] }
  0xb4   : > { %1974 = vmatpush1.bf16.msra.mxu0 %v2530_v54  ;;  %2015 = vmatpush1.bf16.msra.mxu1 %v2532_v55  ;;  %v681_v54 = vld [vmem:[%s3182_s28 + $0x298] sm:$0xff] }
  0xb5   : > { %1975 = vmatprep.subr.bf16.mxu0 %v2547_v56  ;;  %2016 = vmatprep.subr.bf16.mxu1 %v2549_v57  ;;  %v689_v55 = vld [vmem:[%s3182_s28 + $0x2d8] sm:$0xff]  ;;  %v2438_v56 = vcombine.low %v664_v44, %v672_v45  ;;  %v2440_v57 = vcombine.low %v665_v46, %v673_v47  ;;  %v2551_v44 = vcombine.high %v776_v38, %v784_v39  ;;  %v792_v46 = vld [vmem:[%s3182_s28 + $0x610] sm:$0xff] }
  0xb6   : > { %v2457_v59 = vcombine.high %v681_v54, %v689_v55  ;;  %v800_v47 = vld [vmem:[%s3182_s28 + $0x650] sm:$0xff] }
  0xb8   : > { %1976 = vmatpush1.bf16.msra.mxu0 %v2546_v62  ;;  %2017 = vmatpush1.bf16.msra.mxu1 %v2548_v63  ;;  %v697_v62 = vld [vmem:[%s3182_s28 + $0x318] sm:$0xff] }
  0xb9   : > { %1977 = vmatprep.subr.bf16.mxu0 %v2563_v0  ;;  %2018 = vmatprep.subr.bf16.mxu1 %v2565_v1  ;;  %v705_v63 = vld [vmem:[%s3182_s28 + $0x358] sm:$0xff]  ;;  %v2454_v0 = vcombine.low %v680_v52, %v688_v53  ;;  %v2456_v1 = vcombine.low %v681_v54, %v689_v55  ;;  %v2567_v52 = vcombine.high %v792_v46, %v800_v47  ;;  %v808_v54 = vld [vmem:[%s3182_s28 + $0x690] sm:$0xff] }
  0xba   : > { %v2473_v3 = vcombine.high %v697_v62, %v705_v63  ;;  %v2472_v9 = vcombine.low %v697_v62, %v705_v63  ;;  %v809_v55 = vld [vmem:[%s3182_s28 + $0x698] sm:$0xff]  ;;  %v602_v62 = vld [vmem:[%s3182_s28 + $0x20] sm:$0xff] }
  0xbb   : > { %v610_v63 = vld [vmem:[%s3182_s28 + $0x60] sm:$0xff] }
  0xbc   : > { %1978 = vmatpush1.bf16.msra.mxu0 %v2562_v4  ;;  %2019 = vmatpush1.bf16.msra.mxu1 %v2564_v5  ;;  %v712_v4 = vld [vmem:[%s3182_s28 + $0x390] sm:$0xff] }
  0xbd   : > { %2594 = vmatprep.subr.msk.bf16.mxu0 %vm1904_vm1, %v2579_v6  ;;  %2596 = vmatprep.subr.msk.bf16.mxu1 %vm1904_vm1, %v2581_v8  ;;  %v720_v5 = vld [vmem:[%s3182_s28 + $0x3d0] sm:$0xff]  ;;  %v713_v6 = vld [vmem:[%s3182_s28 + $0x398] sm:$0xff]  ;;  %v2470_v8 = vcombine.low %v696_v60, %v704_v61  ;;  %v2585_v60 = vcombine.high %v809_v55, %v809_v55  ;;  %v2584_v61 = vcombine.low %v809_v55, %v809_v55 }
  0xbe   : > { %v2487_v10 = vcombine.high %v712_v4, %v720_v5  ;;  %v2489_v11 = vcombine.high %v713_v6, %v721_v7 }
  0xc0   : > { %1980 = vmatpush1.bf16.msra.mxu0 %v1906_v14  ;;  %2021 = vmatpush1.bf16.msra.mxu1 %v1912_v16  ;;  %v729_v14 = vld [vmem:[%s3182_s28 + $0x418] sm:$0xff]  ;;  %v2486_v16 = vcombine.low %v712_v4, %v720_v5  ;;  %v1924_v4 = vsel %vm1904_vm1, %v2584_v61, 0 }
  0xc1   : > { %2035 = vmatprep.subr.bf16.mxu0 %v2375_v15  ;;  %2076 = vmatprep.subr.bf16.mxu1 %v2377_v17  ;;  %v737_v15 = vld [vmem:[%s3182_s28 + $0x458] sm:$0xff]  ;;  %v2488_v17 = vcombine.low %v713_v6, %v721_v7  ;;  %v618_v6 = vld [vmem:[%s3182_s28 + $0xa0] sm:$0xff] }
  0xc2   : > { %v2505_v19 = vcombine.high %v729_v14, %v737_v15  ;;  %v626_v7 = vld [vmem:[%s3182_s28 + $0xe0] sm:$0xff] }
  0xc3   : > { %1986 = vmatmul.mubr.bf16.vlgmr.msra.gmra.mrb[0].mxu0 %v3250_v20  ;;  %2027 = vmatmul.mubr.bf16.vlgmr.msra.gmra.mrb[0].mxu1 %v3250_v20 }
  0xc4   : > { %2036 = vmatpush1.bf16.msra.mxu0 %v2374_v23  ;;  %2077 = vmatpush1.bf16.msra.mxu1 %v2376_v26  ;;  %v745_v23 = vld [vmem:[%s3182_s28 + $0x498] sm:$0xff] }
  0xc5   : > { %2037 = vmatprep.subr.bf16.mxu0 %v2391_v27  ;;  %2078 = vmatprep.subr.bf16.mxu1 %v2393_v28  ;;  %v753_v26 = vld [vmem:[%s3182_s28 + $0x4d8] sm:$0xff]  ;;  %v2502_v27 = vcombine.low %v728_v12, %v736_v13  ;;  %v2504_v28 = vcombine.low %v729_v14, %v737_v15  ;;  %v2395_v12 = vcombine.high %v618_v6, %v626_v7  ;;  %v634_v14 = vld [vmem:[%s3182_s28 + $0x120] sm:$0xff] }
  0xc6   : > { %2599 = vmatprep.mubr.msk.bf16.mxu0 %vm1900_vm0, %v3176_v25  ;;  %2601 = vmatprep.mubr.msk.bf16.mxu1 %vm1900_vm0, %v3176_v25  ;;  %v2521_v30 = vcombine.high %v745_v23, %v753_v26  ;;  %v642_v15 = vld [vmem:[%s3182_s28 + $0x160] sm:$0xff] }
  0xc8   : > { %2038 = vmatpush1.bf16.msra.mxu0 %v2390_v32  ;;  %2079 = vmatpush1.bf16.msra.mxu1 %v2392_v33  ;;  %v761_v32 = vld [vmem:[%s3182_s28 + $0x518] sm:$0xff] }
  0xc9   : > { %2039 = vmatprep.subr.bf16.mxu0 %v2407_v34  ;;  %2080 = vmatprep.subr.bf16.mxu1 %v2409_v35  ;;  %v769_v33 = vld [vmem:[%s3182_s28 + $0x558] sm:$0xff]  ;;  %v2518_v34 = vcombine.low %v744_v21, %v752_v22  ;;  %v2520_v35 = vcombine.low %v745_v23, %v753_v26  ;;  %v2411_v21 = vcombine.high %v634_v14, %v642_v15  ;;  %v650_v23 = vld [vmem:[%s3182_s28 + $0x1a0] sm:$0xff] }
  0xca   : > { %v2537_v37 = vcombine.high %v761_v32, %v769_v33  ;;  %v658_v26 = vld [vmem:[%s3182_s28 + $0x1e0] sm:$0xff] }
  0xcc   : > { %2040 = vmatpush1.bf16.msra.mxu0 %v2406_v40  ;;  %2081 = vmatpush1.bf16.msra.mxu1 %v2408_v41  ;;  %v777_v40 = vld [vmem:[%s3182_s28 + $0x598] sm:$0xff] }
  0xcd   : > { %2041 = vmatprep.subr.bf16.mxu0 %v2423_v42  ;;  %2082 = vmatprep.subr.bf16.mxu1 %v2425_v43  ;;  %v785_v41 = vld [vmem:[%s3182_s28 + $0x5d8] sm:$0xff]  ;;  %v2534_v42 = vcombine.low %v760_v24, %v768_v31  ;;  %v2536_v43 = vcombine.low %v761_v32, %v769_v33  ;;  %v2427_v24 = vcombine.high %v650_v23, %v658_v26  ;;  %v666_v32 = vld [vmem:[%s3182_s28 + $0x220] sm:$0xff] }
  0xce   : > { %v2553_v45 = vcombine.high %v777_v40, %v785_v41  ;;  %v674_v33 = vld [vmem:[%s3182_s28 + $0x260] sm:$0xff] }
  0xd0   : > { %2042 = vmatpush1.bf16.msra.mxu0 %v2422_v48  ;;  %2083 = vmatpush1.bf16.msra.mxu1 %v2424_v49  ;;  %v793_v48 = vld [vmem:[%s3182_s28 + $0x618] sm:$0xff] }
  0xd1   : > { %2043 = vmatprep.subr.bf16.mxu0 %v2439_v50  ;;  %2084 = vmatprep.subr.bf16.mxu1 %v2441_v51  ;;  %v801_v49 = vld [vmem:[%s3182_s28 + $0x658] sm:$0xff]  ;;  %v2550_v50 = vcombine.low %v776_v38, %v784_v39  ;;  %v2552_v51 = vcombine.low %v777_v40, %v785_v41  ;;  %v2443_v38 = vcombine.high %v666_v32, %v674_v33  ;;  %v682_v40 = vld [vmem:[%s3182_s28 + $0x2a0] sm:$0xff] }
  0xd2   : > { %v2569_v53 = vcombine.high %v793_v48, %v801_v49  ;;  %v690_v41 = vld [vmem:[%s3182_s28 + $0x2e0] sm:$0xff] }
  0xd4   : > { %2044 = vmatpush1.bf16.msra.mxu0 %v2438_v56  ;;  %2085 = vmatpush1.bf16.msra.mxu1 %v2440_v57  ;;  %v2566_v56 = vcombine.low %v792_v46, %v800_v47  ;;  %v2568_v57 = vcombine.low %v793_v48, %v801_v49  ;;  %v2459_v46 = vcombine.high %v682_v40, %v690_v41  ;;  %v698_v48 = vld [vmem:[%s3182_s28 + $0x320] sm:$0xff] }
  0xd5   : > { %2045 = vmatprep.subr.bf16.mxu0 %v2455_v58  ;;  %2086 = vmatprep.subr.bf16.mxu1 %v2457_v59  ;;  %v2583_v58 = vcombine.high %v808_v54, %v808_v54  ;;  %v2582_v59 = vcombine.low %v808_v54, %v808_v54  ;;  %v706_v49 = vld [vmem:[%s3182_s28 + $0x360] sm:$0xff] }
  0xd6   : > { %v2475_v54 = vcombine.high %v698_v48, %v706_v49 }
  0xd8   : > { %2046 = vmatpush1.bf16.msra.mxu0 %v2454_v0  ;;  %2087 = vmatpush1.bf16.msra.mxu1 %v2456_v1  ;;  %v603_v0 = vld [vmem:[%s3182_s28 + $0x28] sm:$0xff] }
  0xd9   : > { %2047 = vmatprep.subr.bf16.mxu0 %v2471_v2  ;;  %2088 = vmatprep.subr.bf16.mxu1 %v2473_v3  ;;  %v611_v1 = vld [vmem:[%s3182_s28 + $0x68] sm:$0xff]  ;;  %v1918_v2 = vsel %vm1904_vm1, %v2582_v59, 0  ;;  %v2379_v3 = vcombine.high %v602_v62, %v610_v63 }
  0xda   : > { %v2381_v5 = vcombine.high %v603_v0, %v611_v1  ;;  %v723_v59 = vld [vmem:[%s3182_s28 + $0x3e8] sm:$0xff] }
  0xdc   : > { %2048 = vmatpush1.bf16.msra.mxu0 %v2470_v8  ;;  %2089 = vmatpush1.bf16.msra.mxu1 %v2472_v9  ;;  %v619_v8 = vld [vmem:[%s3182_s28 + $0xa8] sm:$0xff] }
  0xdd   : > { %2049 = vmatprep.subr.bf16.mxu0 %v2487_v10  ;;  %2090 = vmatprep.subr.bf16.mxu1 %v2489_v11  ;;  %v627_v9 = vld [vmem:[%s3182_s28 + $0xe8] sm:$0xff]  ;;  %v2378_v10 = vcombine.low %v602_v62, %v610_v63  ;;  %v2380_v11 = vcombine.low %v603_v0, %v611_v1  ;;  %v730_v0 = vld [vmem:[%s3182_s28 + $0x420] sm:$0xff] }
  0xde   : > { %v2397_v13 = vcombine.high %v619_v8, %v627_v9  ;;  %v738_v1 = vld [vmem:[%s3182_s28 + $0x460] sm:$0xff] }
  0xe0   : > { %2050 = vmatpush1.bf16.msra.mxu0 %v2486_v16  ;;  %2091 = vmatpush1.bf16.msra.mxu1 %v2488_v17  ;;  %v635_v16 = vld [vmem:[%s3182_s28 + $0x128] sm:$0xff] }
  0xe1   : > { %2051 = vmatprep.subr.bf16.mxu0 %v2503_v18  ;;  %2092 = vmatprep.subr.bf16.mxu1 %v2505_v19  ;;  %v643_v17 = vld [vmem:[%s3182_s28 + $0x168] sm:$0xff]  ;;  %v2394_v18 = vcombine.low %v618_v6, %v626_v7  ;;  %v2396_v19 = vcombine.low %v619_v8, %v627_v9  ;;  %v2507_v6 = vcombine.high %v730_v0, %v738_v1  ;;  %v746_v8 = vld [vmem:[%s3182_s28 + $0x4a0] sm:$0xff] }
  0xe2   : > { %v2413_v22 = vcombine.high %v635_v16, %v643_v17  ;;  %v754_v9 = vld [vmem:[%s3182_s28 + $0x4e0] sm:$0xff] }
  0xe4   : > { %2052 = vmatpush1.bf16.msra.mxu0 %v2502_v27  ;;  %2093 = vmatpush1.bf16.msra.mxu1 %v2504_v28  ;;  %v651_v27 = vld [vmem:[%s3182_s28 + $0x1a8] sm:$0xff] }
  0xe5   : > { %2053 = vmatprep.subr.bf16.mxu0 %v2519_v29  ;;  %2094 = vmatprep.subr.bf16.mxu1 %v2521_v30  ;;  %v659_v28 = vld [vmem:[%s3182_s28 + $0x1e8] sm:$0xff]  ;;  %v2410_v29 = vcombine.low %v634_v14, %v642_v15  ;;  %v2412_v30 = vcombine.low %v635_v16, %v643_v17  ;;  %v2523_v14 = vcombine.high %v746_v8, %v754_v9  ;;  %v762_v16 = vld [vmem:[%s3182_s28 + $0x520] sm:$0xff] }
  0xe6   : > { %v2429_v31 = vcombine.high %v651_v27, %v659_v28  ;;  %v770_v17 = vld [vmem:[%s3182_s28 + $0x560] sm:$0xff] }
  0xe8   : > { %2054 = vmatpush1.bf16.msra.mxu0 %v2518_v34  ;;  %2095 = vmatpush1.bf16.msra.mxu1 %v2520_v35  ;;  %v667_v34 = vld [vmem:[%s3182_s28 + $0x228] sm:$0xff] }
  0xe9   : > { %2055 = vmatprep.subr.bf16.mxu0 %v2535_v36  ;;  %2096 = vmatprep.subr.bf16.mxu1 %v2537_v37  ;;  %v675_v35 = vld [vmem:[%s3182_s28 + $0x268] sm:$0xff]  ;;  %v2426_v36 = vcombine.low %v650_v23, %v658_v26  ;;  %v2428_v37 = vcombine.low %v651_v27, %v659_v28  ;;  %v2539_v23 = vcombine.high %v762_v16, %v770_v17  ;;  %v778_v27 = vld [vmem:[%s3182_s28 + $0x5a0] sm:$0xff] }
  0xea   : > { %v2445_v39 = vcombine.high %v667_v34, %v675_v35  ;;  %v786_v28 = vld [vmem:[%s3182_s28 + $0x5e0] sm:$0xff] }
  0xec   : > { %2056 = vmatpush1.bf16.msra.mxu0 %v2534_v42  ;;  %2097 = vmatpush1.bf16.msra.mxu1 %v2536_v43  ;;  %v683_v42 = vld [vmem:[%s3182_s28 + $0x2a8] sm:$0xff] }
  0xed   : > { %2057 = vmatprep.subr.bf16.mxu0 %v2551_v44  ;;  %2098 = vmatprep.subr.bf16.mxu1 %v2553_v45  ;;  %v691_v43 = vld [vmem:[%s3182_s28 + $0x2e8] sm:$0xff]  ;;  %v2442_v44 = vcombine.low %v666_v32, %v674_v33  ;;  %v2444_v45 = vcombine.low %v667_v34, %v675_v35  ;;  %v2555_v32 = vcombine.high %v778_v27, %v786_v28  ;;  %v794_v34 = vld [vmem:[%s3182_s28 + $0x620] sm:$0xff] }
  0xee   : > { %v2461_v47 = vcombine.high %v683_v42, %v691_v43  ;;  %v802_v35 = vld [vmem:[%s3182_s28 + $0x660] sm:$0xff] }
  0xf0   : > { %2058 = vmatpush1.bf16.msra.mxu0 %v2550_v50  ;;  %2099 = vmatpush1.bf16.msra.mxu1 %v2552_v51  ;;  %v699_v50 = vld [vmem:[%s3182_s28 + $0x328] sm:$0xff] }
  0xf1   : > { %2059 = vmatprep.subr.bf16.mxu0 %v2567_v52  ;;  %2100 = vmatprep.subr.bf16.mxu1 %v2569_v53  ;;  %v707_v51 = vld [vmem:[%s3182_s28 + $0x368] sm:$0xff]  ;;  %v2458_v52 = vcombine.low %v682_v40, %v690_v41  ;;  %v2460_v53 = vcombine.low %v683_v42, %v691_v43  ;;  %v2571_v40 = vcombine.high %v794_v34, %v802_v35  ;;  %v810_v42 = vld [vmem:[%s3182_s28 + $0x6a0] sm:$0xff] }
  0xf2   : > { %v2477_v55 = vcombine.high %v699_v50, %v707_v51  ;;  %v2476_v61 = vcombine.low %v699_v50, %v707_v51  ;;  %v811_v43 = vld [vmem:[%s3182_s28 + $0x6a8] sm:$0xff]  ;;  %v604_v50 = vld [vmem:[%s3182_s28 + $0x30] sm:$0xff] }
  0xf3   : > { %v612_v51 = vld [vmem:[%s3182_s28 + $0x70] sm:$0xff] }
  0xf4   : > { %2060 = vmatpush1.bf16.msra.mxu0 %v2566_v56  ;;  %2101 = vmatpush1.bf16.msra.mxu1 %v2568_v57  ;;  %v714_v56 = vld [vmem:[%s3182_s28 + $0x3a0] sm:$0xff] }
  0xf5   : > { %2598 = vmatprep.subr.msk.bf16.mxu0 %vm1904_vm1, %v2583_v58  ;;  %2600 = vmatprep.subr.msk.bf16.mxu1 %vm1904_vm1, %v2585_v60  ;;  %v722_v57 = vld [vmem:[%s3182_s28 + $0x3e0] sm:$0xff]  ;;  %v715_v58 = vld [vmem:[%s3182_s28 + $0x3a8] sm:$0xff]  ;;  %v2474_v60 = vcombine.low %v698_v48, %v706_v49  ;;  %v2589_v48 = vcombine.high %v811_v43, %v811_v43  ;;  %v2588_v49 = vcombine.low %v811_v43, %v811_v43  ;;  %v716_v43 = vld [vmem:[%s3182_s28 + $0x3b0] sm:$0xff] }
  0xf6   : > { %v2491_v62 = vcombine.high %v714_v56, %v722_v57  ;;  %v2493_v63 = vcombine.high %v715_v58, %v723_v59 }
  0xf8   : > { %2062 = vmatpush1.bf16.msra.mxu0 %v1918_v2  ;;  %2103 = vmatpush1.bf16.msra.mxu1 %v1924_v4  ;;  %v731_v2 = vld [vmem:[%s3182_s28 + $0x428] sm:$0xff]  ;;  %v2490_v4 = vcombine.low %v714_v56, %v722_v57  ;;  %v1936_v56 = vsel %vm1904_vm1, %v2588_v49, 0 }
  0xf9   : > { %2117 = vmatprep.subr.bf16.mxu0 %v2379_v3  ;;  %2158 = vmatprep.subr.bf16.mxu1 %v2381_v5  ;;  %v739_v3 = vld [vmem:[%s3182_s28 + $0x468] sm:$0xff]  ;;  %v2492_v5 = vcombine.low %v715_v58, %v723_v59  ;;  %v620_v58 = vld [vmem:[%s3182_s28 + $0xb0] sm:$0xff] }
  0xfa   : > { %v2509_v7 = vcombine.high %v731_v2, %v739_v3  ;;  %v628_v59 = vld [vmem:[%s3182_s28 + $0xf0] sm:$0xff] }
  0xfb   : > { %2068 = vmatmul.mubr.bf16.vlgmr.msra.gmra.mrb[4].mxu0 %v3250_v20  ;;  %2109 = vmatmul.mubr.bf16.vlgmr.msra.gmra.mrb[4].mxu1 %v3250_v20 }
  0xfc   : > { %2118 = vmatpush1.bf16.msra.mxu0 %v2378_v10  ;;  %2159 = vmatpush1.bf16.msra.mxu1 %v2380_v11  ;;  %v747_v10 = vld [vmem:[%s3182_s28 + $0x4a8] sm:$0xff] }
  0xfd   : > { %2119 = vmatprep.subr.bf16.mxu0 %v2395_v12  ;;  %2160 = vmatprep.subr.bf16.mxu1 %v2397_v13  ;;  %v755_v11 = vld [vmem:[%s3182_s28 + $0x4e8] sm:$0xff]  ;;  %v2506_v12 = vcombine.low %v730_v0, %v738_v1  ;;  %v2508_v13 = vcombine.low %v731_v2, %v739_v3  ;;  %v2399_v0 = vcombine.high %v620_v58, %v628_v59  ;;  %v636_v2 = vld [vmem:[%s3182_s28 + $0x130] sm:$0xff] }
  0xfe   : > { %2603 = vmatprep.mubr.msk.bf16.mxu0 %vm1900_vm0, %v3176_v25  ;;  %2605 = vmatprep.mubr.msk.bf16.mxu1 %vm1900_vm0, %v3176_v25  ;;  %v2525_v15 = vcombine.high %v747_v10, %v755_v11  ;;  %v644_v3 = vld [vmem:[%s3182_s28 + $0x170] sm:$0xff] }
 0x100   : > { %2120 = vmatpush1.bf16.msra.mxu0 %v2394_v18  ;;  %2161 = vmatpush1.bf16.msra.mxu1 %v2396_v19  ;;  %v763_v18 = vld [vmem:[%s3182_s28 + $0x528] sm:$0xff] }
 0x101   : > { %2121 = vmatprep.subr.bf16.mxu0 %v2411_v21  ;;  %2162 = vmatprep.subr.bf16.mxu1 %v2413_v22  ;;  %v771_v19 = vld [vmem:[%s3182_s28 + $0x568] sm:$0xff]  ;;  %v2522_v21 = vcombine.low %v746_v8, %v754_v9  ;;  %v2524_v22 = vcombine.low %v747_v10, %v755_v11  ;;  %v2415_v8 = vcombine.high %v636_v2, %v644_v3  ;;  %v652_v10 = vld [vmem:[%s3182_s28 + $0x1b0] sm:$0xff] }
 0x102   : > { %v2541_v26 = vcombine.high %v763_v18, %v771_v19  ;;  %v660_v11 = vld [vmem:[%s3182_s28 + $0x1f0] sm:$0xff] }
 0x104   : > { %2122 = vmatpush1.bf16.msra.mxu0 %v2410_v29  ;;  %2163 = vmatpush1.bf16.msra.mxu1 %v2412_v30  ;;  %v779_v29 = vld [vmem:[%s3182_s28 + $0x5a8] sm:$0xff] }
 0x105   : > { %2123 = vmatprep.subr.bf16.mxu0 %v2427_v24  ;;  %2164 = vmatprep.subr.bf16.mxu1 %v2429_v31  ;;  %v787_v30 = vld [vmem:[%s3182_s28 + $0x5e8] sm:$0xff]  ;;  %v2538_v24 = vcombine.low %v762_v16, %v770_v17  ;;  %v2540_v31 = vcombine.low %v763_v18, %v771_v19  ;;  %v2431_v16 = vcombine.high %v652_v10, %v660_v11  ;;  %v668_v18 = vld [vmem:[%s3182_s28 + $0x230] sm:$0xff] }
 0x106   : > { %v2557_v33 = vcombine.high %v779_v29, %v787_v30  ;;  %v676_v19 = vld [vmem:[%s3182_s28 + $0x270] sm:$0xff] }
 0x108   : > { %2124 = vmatpush1.bf16.msra.mxu0 %v2426_v36  ;;  %2165 = vmatpush1.bf16.msra.mxu1 %v2428_v37  ;;  %v795_v36 = vld [vmem:[%s3182_s28 + $0x628] sm:$0xff] }
 0x109   : > { %2125 = vmatprep.subr.bf16.mxu0 %v2443_v38  ;;  %2166 = vmatprep.subr.bf16.mxu1 %v2445_v39  ;;  %v803_v37 = vld [vmem:[%s3182_s28 + $0x668] sm:$0xff]  ;;  %v2554_v38 = vcombine.low %v778_v27, %v786_v28  ;;  %v2556_v39 = vcombine.low %v779_v29, %v787_v30  ;;  %v684_v28 = vld [vmem:[%s3182_s28 + $0x2b0] sm:$0xff]  ;;  %v685_v30 = vld [vmem:[%s3182_s28 + $0x2b8] sm:$0xff] }
 0x10a   : > { %v2573_v41 = vcombine.high %v795_v36, %v803_v37  ;;  %v692_v29 = vld [vmem:[%s3182_s28 + $0x2f0] sm:$0xff] }
 0x10c   : > { %2126 = vmatpush1.bf16.msra.mxu0 %v2442_v44  ;;  %2167 = vmatpush1.bf16.msra.mxu1 %v2444_v45  ;;  %v2570_v44 = vcombine.low %v794_v34, %v802_v35  ;;  %v2572_v45 = vcombine.low %v795_v36, %v803_v37  ;;  %v700_v35 = vld [vmem:[%s3182_s28 + $0x330] sm:$0xff]  ;;  %v701_v37 = vld [vmem:[%s3182_s28 + $0x338] sm:$0xff] }
 0x10d   : > { %2127 = vmatprep.subr.bf16.mxu0 %v2459_v46  ;;  %2168 = vmatprep.subr.bf16.mxu1 %v2461_v47  ;;  %v2587_v46 = vcombine.high %v810_v42, %v810_v42  ;;  %v2586_v47 = vcombine.low %v810_v42, %v810_v42  ;;  %v708_v36 = vld [vmem:[%s3182_s28 + $0x370] sm:$0xff] }
 0x110   : > { %2128 = vmatpush1.bf16.msra.mxu0 %v2458_v52  ;;  %2169 = vmatpush1.bf16.msra.mxu1 %v2460_v53  ;;  %v605_v52 = vld [vmem:[%s3182_s28 + $0x38] sm:$0xff] }
 0x111   : > { %2129 = vmatprep.subr.bf16.mxu0 %v2475_v54  ;;  %2170 = vmatprep.subr.bf16.mxu1 %v2477_v55  ;;  %v613_v53 = vld [vmem:[%s3182_s28 + $0x78] sm:$0xff]  ;;  %v1930_v54 = vsel %vm1904_vm1, %v2586_v47, 0  ;;  %v2383_v55 = vcombine.high %v604_v50, %v612_v51  ;;  %v2478_v47 = vcombine.low %v700_v35, %v708_v36 }
 0x112   : > { %v2385_v57 = vcombine.high %v605_v52, %v613_v53 }
 0x114   : > { %2130 = vmatpush1.bf16.msra.mxu0 %v2474_v60  ;;  %2171 = vmatpush1.bf16.msra.mxu1 %v2476_v61  ;;  %v621_v60 = vld [vmem:[%s3182_s28 + $0xb8] sm:$0xff] }
 0x115   : > { %2131 = vmatprep.subr.bf16.mxu0 %v2491_v62  ;;  %2172 = vmatprep.subr.bf16.mxu1 %v2493_v63  ;;  %v629_v61 = vld [vmem:[%s3182_s28 + $0xf8] sm:$0xff]  ;;  %v2382_v62 = vcombine.low %v604_v50, %v612_v51  ;;  %v2384_v63 = vcombine.low %v605_v52, %v613_v53  ;;  %v732_v51 = vld [vmem:[%s3182_s28 + $0x430] sm:$0xff] }
 0x116   : > { %v2401_v1 = vcombine.high %v621_v60, %v629_v61  ;;  %v740_v52 = vld [vmem:[%s3182_s28 + $0x470] sm:$0xff]  ;;  %v733_v53 = vld [vmem:[%s3182_s28 + $0x438] sm:$0xff] }
 0x118   : > { %2132 = vmatpush1.bf16.msra.mxu0 %v2490_v4  ;;  %2173 = vmatpush1.bf16.msra.mxu1 %v2492_v5  ;;  %v637_v4 = vld [vmem:[%s3182_s28 + $0x138] sm:$0xff] }
 0x119   : > { %2133 = vmatprep.subr.bf16.mxu0 %v2507_v6  ;;  %2174 = vmatprep.subr.bf16.mxu1 %v2509_v7  ;;  %v645_v5 = vld [vmem:[%s3182_s28 + $0x178] sm:$0xff]  ;;  %v2398_v6 = vcombine.low %v620_v58, %v628_v59  ;;  %v2400_v7 = vcombine.low %v621_v60, %v629_v61  ;;  %v748_v59 = vld [vmem:[%s3182_s28 + $0x4b0] sm:$0xff] }
 0x11a   : > { %v2417_v9 = vcombine.high %v637_v4, %v645_v5  ;;  %v756_v60 = vld [vmem:[%s3182_s28 + $0x4f0] sm:$0xff]  ;;  %v749_v61 = vld [vmem:[%s3182_s28 + $0x4b8] sm:$0xff] }
 0x11c   : > { %2134 = vmatpush1.bf16.msra.mxu0 %v2506_v12  ;;  %2175 = vmatpush1.bf16.msra.mxu1 %v2508_v13  ;;  %v653_v12 = vld [vmem:[%s3182_s28 + $0x1b8] sm:$0xff] }
 0x11d   : > { %2135 = vmatprep.subr.bf16.mxu0 %v2523_v14  ;;  %2176 = vmatprep.subr.bf16.mxu1 %v2525_v15  ;;  %v661_v13 = vld [vmem:[%s3182_s28 + $0x1f8] sm:$0xff]  ;;  %v2414_v14 = vcombine.low %v636_v2, %v644_v3  ;;  %v2416_v15 = vcombine.low %v637_v4, %v645_v5  ;;  %v764_v3 = vld [vmem:[%s3182_s28 + $0x530] sm:$0xff] }
 0x11e   : > { %v2433_v17 = vcombine.high %v653_v12, %v661_v13  ;;  %v772_v4 = vld [vmem:[%s3182_s28 + $0x570] sm:$0xff]  ;;  %v765_v5 = vld [vmem:[%s3182_s28 + $0x538] sm:$0xff] }
 0x120   : > { %2136 = vmatpush1.bf16.msra.mxu0 %v2522_v21  ;;  %2177 = vmatpush1.bf16.msra.mxu1 %v2524_v22  ;;  %v669_v21 = vld [vmem:[%s3182_s28 + $0x238] sm:$0xff] }
 0x121   : > { %2137 = vmatprep.subr.bf16.mxu0 %v2539_v23  ;;  %2178 = vmatprep.subr.bf16.mxu1 %v2541_v26  ;;  %v677_v22 = vld [vmem:[%s3182_s28 + $0x278] sm:$0xff]  ;;  %v2430_v23 = vcombine.low %v652_v10, %v660_v11  ;;  %v2447_v26 = vcombine.high %v668_v18, %v676_v19  ;;  %v780_v11 = vld [vmem:[%s3182_s28 + $0x5b0] sm:$0xff] }
 0x122   : > { %v2449_v27 = vcombine.high %v669_v21, %v677_v22 }
 0x124   : > { %2138 = vmatpush1.bf16.msra.mxu0 %v2538_v24  ;;  %2179 = vmatpush1.bf16.msra.mxu1 %v2540_v31  ;;  %v693_v24 = vld [vmem:[%s3182_s28 + $0x2f8] sm:$0xff]  ;;  %v2446_v31 = vcombine.low %v668_v18, %v676_v19  ;;  %v796_v19 = vld [vmem:[%s3182_s28 + $0x630] sm:$0xff] }
 0x125   : > { %2139 = vmatprep.subr.bf16.mxu0 %v2555_v32  ;;  %2180 = vmatprep.subr.bf16.mxu1 %v2557_v33  ;;  %v2448_v32 = vcombine.low %v669_v21, %v677_v22  ;;  %v2463_v33 = vcombine.high %v684_v28, %v692_v29  ;;  %v2465_v34 = vcombine.high %v685_v30, %v693_v24  ;;  %v804_v21 = vld [vmem:[%s3182_s28 + $0x670] sm:$0xff]  ;;  %v797_v22 = vld [vmem:[%s3182_s28 + $0x638] sm:$0xff] }
 0x128   : > { %2140 = vmatpush1.bf16.msra.mxu0 %v2554_v38  ;;  %2181 = vmatpush1.bf16.msra.mxu1 %v2556_v39  ;;  %v709_v38 = vld [vmem:[%s3182_s28 + $0x378] sm:$0xff]  ;;  %v2462_v39 = vcombine.low %v684_v28, %v692_v29  ;;  %v812_v29 = vld [vmem:[%s3182_s28 + $0x6b0] sm:$0xff] }
 0x129   : > { %2141 = vmatprep.subr.bf16.mxu0 %v2571_v40  ;;  %2182 = vmatprep.subr.bf16.mxu1 %v2573_v41  ;;  %v2464_v40 = vcombine.low %v685_v30, %v693_v24  ;;  %v2479_v41 = vcombine.high %v700_v35, %v708_v36  ;;  %v2481_v42 = vcombine.high %v701_v37, %v709_v38  ;;  %v813_v30 = vld [vmem:[%s3182_s28 + $0x6b8] sm:$0xff] }
 0x12a   : > { %v2574_v24 = vcombine.low %v796_v19, %v804_v21  ;;  %v2592_v35 = vcombine.low %v813_v30, %v813_v30 }
 0x12c   : > { %2142 = vmatpush1.bf16.msra.mxu0 %v2570_v44  ;;  %2183 = vmatpush1.bf16.msra.mxu1 %v2572_v45  ;;  %v724_v44 = vld [vmem:[%s3182_s28 + $0x3f0] sm:$0xff]  ;;  %v717_v45 = vld [vmem:[%s3182_s28 + $0x3b8] sm:$0xff] }
 0x12d   : > { %2602 = vmatprep.subr.msk.bf16.mxu0 %vm1904_vm1, %v2587_v46  ;;  %2604 = vmatprep.subr.msk.bf16.mxu1 %vm1904_vm1, %v2589_v48  ;;  %v725_v46 = vld [vmem:[%s3182_s28 + $0x3f8] sm:$0xff]  ;;  %v2480_v48 = vcombine.low %v701_v37, %v709_v38  ;;  %v2495_v49 = vcombine.high %v716_v43, %v724_v44  ;;  %v1948_v37 = vsel %vm1904_vm1, %v2592_v35, 0 }
 0x12e   : > { %v2497_v50 = vcombine.high %v717_v45, %v725_v46 }
 0x130   : > { %2144 = vmatpush1.bf16.msra.mxu0 %v1930_v54  ;;  %2185 = vmatpush1.bf16.msra.mxu1 %v1936_v56  ;;  %v741_v54 = vld [vmem:[%s3182_s28 + $0x478] sm:$0xff]  ;;  %v2496_v56 = vcombine.low %v717_v45, %v725_v46 }
 0x131   : > { %2199 = vmatprep.subr.bf16.mxu0 %v2383_v55  ;;  %2240 = vmatprep.subr.bf16.mxu1 %v2385_v57  ;;  %v2494_v55 = vcombine.low %v716_v43, %v724_v44  ;;  %v2511_v57 = vcombine.high %v732_v51, %v740_v52  ;;  %v2513_v58 = vcombine.high %v733_v53, %v741_v54 }
 0x133   : > { %2150 = vmatmul.mubr.bf16.vlgmr.msra.gmra.mrb[8].mxu0 %v3250_v20  ;;  %2191 = vmatmul.mubr.bf16.vlgmr.msra.gmra.mrb[8].mxu1 %v3250_v20 }
 0x134   : > { %2200 = vmatpush1.bf16.msra.mxu0 %v2382_v62  ;;  %2241 = vmatpush1.bf16.msra.mxu1 %v2384_v63  ;;  %v757_v62 = vld [vmem:[%s3182_s28 + $0x4f8] sm:$0xff]  ;;  %v2510_v63 = vcombine.low %v732_v51, %v740_v52 }
 0x135   : > { %2201 = vmatprep.subr.bf16.mxu0 %v2399_v0  ;;  %2242 = vmatprep.subr.bf16.mxu1 %v2401_v1  ;;  %v2512_v0 = vcombine.low %v733_v53, %v741_v54  ;;  %v2527_v1 = vcombine.high %v748_v59, %v756_v60  ;;  %v2529_v2 = vcombine.high %v749_v61, %v757_v62 }
 0x136   : > { %2607 = vmatprep.mubr.msk.bf16.mxu0 %vm1900_vm0, %v3176_v25  ;;  %2609 = vmatprep.mubr.msk.bf16.mxu1 %vm1900_vm0, %v3176_v25  ;;  %v2432_v25 = vcombine.low %v653_v12, %v661_v13  ;;  %v788_v12 = vld [vmem:[%s3182_s28 + $0x5f0] sm:$0xff]  ;;  %v781_v13 = vld [vmem:[%s3182_s28 + $0x5b8] sm:$0xff] }
 0x138   : > { %2202 = vmatpush1.bf16.msra.mxu0 %v2398_v6  ;;  %2243 = vmatpush1.bf16.msra.mxu1 %v2400_v7  ;;  %v773_v6 = vld [vmem:[%s3182_s28 + $0x578] sm:$0xff]  ;;  %v2526_v7 = vcombine.low %v748_v59, %v756_v60 }
 0x139   : > { %2203 = vmatprep.subr.bf16.mxu0 %v2415_v8  ;;  %2244 = vmatprep.subr.bf16.mxu1 %v2417_v9  ;;  %v2528_v8 = vcombine.low %v749_v61, %v757_v62  ;;  %v2543_v9 = vcombine.high %v764_v3, %v772_v4  ;;  %v2545_v10 = vcombine.high %v765_v5, %v773_v6 }
 0x13c   : > { %2204 = vmatpush1.bf16.msra.mxu0 %v2414_v14  ;;  %2245 = vmatpush1.bf16.msra.mxu1 %v2416_v15  ;;  %v789_v14 = vld [vmem:[%s3182_s28 + $0x5f8] sm:$0xff]  ;;  %v2542_v15 = vcombine.low %v764_v3, %v772_v4 }
 0x13d   : > { %2205 = vmatprep.subr.bf16.mxu0 %v2431_v16  ;;  %2246 = vmatprep.subr.bf16.mxu1 %v2433_v17  ;;  %v2544_v16 = vcombine.low %v765_v5, %v773_v6  ;;  %v2559_v17 = vcombine.high %v780_v11, %v788_v12  ;;  %v2561_v18 = vcombine.high %v781_v13, %v789_v14 }
 0x140   : > { %2206 = vmatpush1.bf16.msra.mxu0 %v2430_v23  ;;  %2247 = vmatpush1.bf16.msra.mxu1 %v2432_v25  ;;  %v805_v23 = vld [vmem:[%s3182_s28 + $0x678] sm:$0xff]  ;;  %v2558_v25 = vcombine.low %v780_v11, %v788_v12 }
 0x141   : > { %2207 = vmatprep.subr.bf16.mxu0 %v2447_v26  ;;  %2248 = vmatprep.subr.bf16.mxu1 %v2449_v27  ;;  %v2560_v26 = vcombine.low %v781_v13, %v789_v14  ;;  %v2575_v27 = vcombine.high %v796_v19, %v804_v21  ;;  %v2577_v28 = vcombine.high %v797_v22, %v805_v23 }
 0x144   : > { %2208 = vmatpush1.bf16.msra.mxu0 %v2446_v31  ;;  %2249 = vmatpush1.bf16.msra.mxu1 %v2448_v32  ;;  %v2576_v31 = vcombine.low %v797_v22, %v805_v23  ;;  %v2591_v32 = vcombine.high %v812_v29, %v812_v29 }
 0x145   : > { %2209 = vmatprep.subr.bf16.mxu0 %v2463_v33  ;;  %2250 = vmatprep.subr.bf16.mxu1 %v2465_v34  ;;  %v2590_v33 = vcombine.low %v812_v29, %v812_v29  ;;  %v2593_v34 = vcombine.high %v813_v30, %v813_v30 }
 0x147   : > { %v1942_v36 = vsel %vm1904_vm1, %v2590_v33, 0 }
 0x148   : > { %2210 = vmatpush1.bf16.msra.mxu0 %v2462_v39  ;;  %2251 = vmatpush1.bf16.msra.mxu1 %v2464_v40 }
 0x149   : > { %2211 = vmatprep.subr.bf16.mxu0 %v2479_v41  ;;  %2252 = vmatprep.subr.bf16.mxu1 %v2481_v42 }
 0x14c   : > { %2212 = vmatpush1.bf16.msra.mxu0 %v2478_v47  ;;  %2253 = vmatpush1.bf16.msra.mxu1 %v2480_v48 }
 0x14d   : > { %2213 = vmatprep.subr.bf16.mxu0 %v2495_v49  ;;  %2254 = vmatprep.subr.bf16.mxu1 %v2497_v50 }
 0x150   : > { %2214 = vmatpush1.bf16.msra.mxu0 %v2494_v55  ;;  %2255 = vmatpush1.bf16.msra.mxu1 %v2496_v56 }
 0x151   : > { %2215 = vmatprep.subr.bf16.mxu0 %v2511_v57  ;;  %2256 = vmatprep.subr.bf16.mxu1 %v2513_v58 }
 0x154   : > { %2216 = vmatpush1.bf16.msra.mxu0 %v2510_v63  ;;  %2257 = vmatpush1.bf16.msra.mxu1 %v2512_v0 }
 0x155   : > { %2217 = vmatprep.subr.bf16.mxu0 %v2527_v1  ;;  %2258 = vmatprep.subr.bf16.mxu1 %v2529_v2 }
 0x158   : > { %2218 = vmatpush1.bf16.msra.mxu0 %v2526_v7  ;;  %2259 = vmatpush1.bf16.msra.mxu1 %v2528_v8 }
 0x159   : > { %2219 = vmatprep.subr.bf16.mxu0 %v2543_v9  ;;  %2260 = vmatprep.subr.bf16.mxu1 %v2545_v10 }
 0x15c   : > { %2220 = vmatpush1.bf16.msra.mxu0 %v2542_v15  ;;  %2261 = vmatpush1.bf16.msra.mxu1 %v2544_v16 }
 0x15d   : > { %2221 = vmatprep.subr.bf16.mxu0 %v2559_v17  ;;  %2262 = vmatprep.subr.bf16.mxu1 %v2561_v18 }
 0x160   : > { %2222 = vmatpush1.bf16.msra.mxu0 %v2558_v25  ;;  %2263 = vmatpush1.bf16.msra.mxu1 %v2560_v26 }
 0x161   : > { %2223 = vmatprep.subr.bf16.mxu0 %v2575_v27  ;;  %2264 = vmatprep.subr.bf16.mxu1 %v2577_v28 }
 0x164   : > { %2224 = vmatpush1.bf16.msra.mxu0 %v2574_v24  ;;  %2265 = vmatpush1.bf16.msra.mxu1 %v2576_v31 }
 0x165   : > { %2606 = vmatprep.subr.msk.bf16.mxu0 %vm1904_vm1, %v2591_v32  ;;  %2608 = vmatprep.subr.msk.bf16.mxu1 %vm1904_vm1, %v2593_v34 }
 0x168   : > { %2226 = vmatpush1.bf16.msra.mxu0 %v1942_v36  ;;  %2267 = vmatpush1.bf16.msra.mxu1 %v1948_v37 }
 0x16b   : > { %2232 = vmatmul.mubr.bf16.vlgmr.msra.gmra.mrb[12].mxu0 %v3250_v20  ;;  %2273 = vmatmul.mubr.bf16.vlgmr.msra.gmra.mrb[12].mxu1 %v3250_v20 }
 0x196   : > { %v1987_v38 = vpop.f32.mrb[0].mxu0  ;;  %v2028_v20 = vpop.f32.mrb[0].mxu1 }
 0x197   : > { %2281 = vst [vmem:[%s3445_s5] sm:$0xff] %v1987_v38  ;;  %v1989_v39 = vpop.f32.mrb[1].mxu0  ;;  %2283 = vst [vmem:[%s3445_s5 + $0x10] sm:$0xff] %v2028_v20  ;;  %v2030_v40 = vpop.f32.mrb[1].mxu1 }
 0x198   : > { %2282 = vst [vmem:[%s3445_s5 + $0x8] sm:$0xff] %v1989_v39  ;;  %v1991_v41 = vpop.f32.mrb[2].mxu0  ;;  %2284 = vst [vmem:[%s3445_s5 + $0x18] sm:$0xff] %v2030_v40  ;;  %v2032_v42 = vpop.f32.mrb[2].mxu1 }
 0x199   : > { %v1992_v43 = vpop.f32.mrb[3].mxu0  ;;  %v2033_v44 = vpop.f32.mrb[3].mxu1 }
 0x1ce   : > { %v2069_v45 = vpop.f32.mrb[4].mxu0  ;;  %v2110_v46 = vpop.f32.mrb[4].mxu1 }
 0x1cf   : > { %2285 = vst [vmem:[%s3445_s5 + $0x20] sm:$0xff] %v2069_v45  ;;  %v2071_v47 = vpop.f32.mrb[5].mxu0  ;;  %2287 = vst [vmem:[%s3445_s5 + $0x30] sm:$0xff] %v2110_v46  ;;  %v2112_v48 = vpop.f32.mrb[5].mxu1 }
 0x1d0   : > { %2286 = vst [vmem:[%s3445_s5 + $0x28] sm:$0xff] %v2071_v47  ;;  %v2073_v49 = vpop.f32.mrb[6].mxu0  ;;  %2288 = vst [vmem:[%s3445_s5 + $0x38] sm:$0xff] %v2112_v48  ;;  %v2114_v50 = vpop.f32.mrb[6].mxu1 }
 0x1d1   : > { %v2074_v51 = vpop.f32.mrb[7].mxu0  ;;  %v2115_v52 = vpop.f32.mrb[7].mxu1 }
 0x206   : > { %v2151_v53 = vpop.f32.mrb[8].mxu0  ;;  %v2192_v54 = vpop.f32.mrb[8].mxu1 }
 0x207   : > { %2289 = vst [vmem:[%s3445_s5 + $0x40] sm:$0xff] %v2151_v53  ;;  %v2153_v55 = vpop.f32.mrb[9].mxu0  ;;  %2291 = vst [vmem:[%s3445_s5 + $0x50] sm:$0xff] %v2192_v54  ;;  %v2194_v56 = vpop.f32.mrb[9].mxu1 }
 0x208   : > { %2290 = vst [vmem:[%s3445_s5 + $0x48] sm:$0xff] %v2153_v55  ;;  %v2155_v57 = vpop.f32.mrb[10].mxu0  ;;  %2292 = vst [vmem:[%s3445_s5 + $0x58] sm:$0xff] %v2194_v56  ;;  %v2196_v58 = vpop.f32.mrb[10].mxu1 }
 0x209   : > { %v2156_v59 = vpop.f32.mrb[11].mxu0  ;;  %v2197_v60 = vpop.f32.mrb[11].mxu1 }
 0x23e   : > { %v2233_v61 = vpop.f32.mrb[12].mxu0  ;;  %v2274_v62 = vpop.f32.mrb[12].mxu1 }
 0x23f   : > { %2293 = vst [vmem:[%s3445_s5 + $0x60] sm:$0xff] %v2233_v61  ;;  %v2235_v63 = vpop.f32.mrb[13].mxu0  ;;  %2295 = vst [vmem:[%s3445_s5 + $0x70] sm:$0xff] %v2274_v62  ;;  %v2276_v0 = vpop.f32.mrb[13].mxu1 }
 0x240   : > { %2294 = vst [vmem:[%s3445_s5 + $0x68] sm:$0xff] %v2235_v63  ;;  %v2237_v1 = vpop.f32.mrb[14].mxu0  ;;  %2296 = vst [vmem:[%s3445_s5 + $0x78] sm:$0xff] %v2276_v0  ;;  %v2278_v2 = vpop.f32.mrb[14].mxu1 }
 0x241   : > { %v2238_v3 = vpop.f32.mrb[15].mxu0  ;;  %v2279_v4 = vpop.f32.mrb[15].mxu1 }
 0x242 PF: > { %p9_p9 = scmp.ge.s32.totalorder %s2713_s13, 4   ;;  %s3476_s9 = smov %s2675_s10 }
 0x243   : > { %s3477_s10 = smov %s2722_s16  ;;  %s3478_s11 = smov %s2713_s13 }
 0x244   :  { %11 = sbr.rel (!%p9_p9) target bundleno = 2 (0x2), region = 86 }

</bundles_post_ra>
